<compile_context>
chip_gen: v7x
topology: tpu7x:2x2x1
jax: 0.10.0
libtpu: 0.0.40
codegen_flags: <defaults>
</compile_context>

<pallas_src>
import math
import functools

import jax
import jax.numpy as jnp
from jax.experimental import pallas as pl
from jax.experimental.pallas import tpu as pltpu


# ----------------------------------------------------------------------------
# VMEM budgeting (generation aware)
# ----------------------------------------------------------------------------
def _detect_vmem_bytes():
    try:
        cap = int(pltpu.get_tpu_info().vmem_capacity_bytes)
        if cap > 0:
            return cap
    except Exception:
        pass
    return 64 * 1024 * 1024  # conservative: v7x physical VMEM


_VMEM_CAP = _detect_vmem_bytes()
VMEM_LIMIT = int(min(_VMEM_CAP * 3 // 4, 100 * 1024 * 1024))   # passed to Mosaic
TILE_BUDGET = int(VMEM_LIMIT * 3 // 4)                          # what our tiles may use


def _round_up(x, m):
    return ((x + m - 1) // m) * m


def _largest_divisor_leq(n, cap):
    cap = max(1, min(n, cap))
    for d in range(cap, 0, -1):
        if n % d == 0:
            return d
    return 1


# ----------------------------------------------------------------------------
# Linear (matmul + bias [+ GELU] [+ fused residual])
# ----------------------------------------------------------------------------
def _linear_kernel(x_ref, w_ref, b_ref, *rest, activation, has_residual):
    if has_residual:
        r_ref, o_ref = rest
    else:
        (o_ref,) = rest
    acc = jnp.dot(x_ref[...], w_ref[...], preferred_element_type=jnp.float32)
    acc = acc + b_ref[...]
    if activation == "gelu":
        # TODO(synk): PyTorch nn.GELU() is erf-based; tanh approximation used here
        # (no guaranteed erf lowering in Mosaic; ~1e-3 relative error).
        acc = jax.nn.gelu(acc, approximate=True)
    if has_residual:
        acc = acc + r_ref[...].astype(jnp.float32)
    o_ref[...] = acc.astype(o_ref.dtype)


def _linear_tiles(M, K, N, has_residual):
    """Full-K, full-N blocks when the weight slab fits VMEM (it does for ViT-base);
    otherwise split N by a divisor that is a multiple of 128.  M tile as large as the
    remaining VMEM budget allows (weight stays resident, streamed M tiles past it)."""
    tn = N
    if 2 * K * N > TILE_BUDGET // 2:
        for cand in range(1024, 127, -128):
            if N % cand == 0 and 2 * K * cand <= TILE_BUDGET // 2:
                tn = cand
                break
    denom = 4 * K + (8 if has_residual else 4) * tn
    tm_cap = (TILE_BUDGET - 2 * K * tn) // max(denom, 1)
    tm_cap = max(16, min(1024, tm_cap))
    if M <= tm_cap:
        tm = M                       # full dim -> always layout-legal
    else:
        tm = max(16, (tm_cap // 16) * 16)
    return tm, tn


def linear(x, w, b, activation=None, residual=None, out_dtype=jnp.bfloat16):
    """y = act(x @ w + b) (+ residual).  x: (..., K), w: (K, N) bf16, b: (N,) f32."""
    orig_shape = x.shape
    K = orig_shape[-1]
    M = math.prod(orig_shape[:-1])
    N = w.shape[1]

    x2 = x.reshape(M, K).astype(jnp.bfloat16)
    w_bf = w.astype(jnp.bfloat16)
    b2 = b.reshape(1, N).astype(jnp.float32)

    has_res = residual is not None
    tm, tn = _linear_tiles(M, K, N, has_res)
    grid = (pl.cdiv(M, tm), N // tn)

    in_specs = [
        pl.BlockSpec((tm, K), lambda i, j: (i, 0)),
        pl.BlockSpec((K, tn), lambda i, j: (0, j)),   # index constant across i -> resident
        pl.BlockSpec((1, tn), lambda i, j: (0, j)),
    ]
    operands = [x2, w_bf, b2]
    if has_res:
        in_specs.append(pl.BlockSpec((tm, tn), lambda i, j: (i, j)))
        operands.append(residual.reshape(M, N).astype(jnp.bfloat16))

    out = pl.pallas_call(
        functools.partial(_linear_kernel, activation=activation, has_residual=has_res),
        out_shape=jax.ShapeDtypeStruct((M, N), out_dtype),
        grid=grid,
        in_specs=in_specs,
        out_specs=pl.BlockSpec((tm, tn), lambda i, j: (i, j)),
        compiler_params=pltpu.CompilerParams(
            dimension_semantics=("parallel", "parallel"),
            vmem_limit_bytes=VMEM_LIMIT),
        cost_estimate=pl.CostEstimate(
            flops=int(2 * M * K * N),
            transcendentals=int(M * N if activation == "gelu" else 0),
            bytes_accessed=int(2 * M * K + 2 * K * N + 2 * M * N
                               + (2 * M * N if has_res else 0))),
    )(*operands)
    return out.reshape(*orig_shape[:-1], N)


# ----------------------------------------------------------------------------
# LayerNorm (row-tiled, f32 statistics, bf16 output)
# ----------------------------------------------------------------------------
def _layernorm_kernel(x_ref, g_ref, b_ref, o_ref, *, eps):
    x = x_ref[...].astype(jnp.float32)
    mean = jnp.mean(x, axis=-1, keepdims=True)
    xc = x - mean
    var = jnp.mean(xc * xc, axis=-1, keepdims=True)
    y = xc * jax.lax.rsqrt(var + eps)
    o_ref[...] = (y * g_ref[...] + b_ref[...]).astype(o_ref.dtype)


def layernorm(x, g, b, eps=1e-6, out_dtype=jnp.bfloat16):
    shape = x.shape
    D = shape[-1]
    M = math.prod(shape[:-1])
    x2 = x.reshape(M, D)
    tm = M if M <= 1024 else 1024

    out = pl.pallas_call(
        functools.partial(_layernorm_kernel, eps=eps),
        out_shape=jax.ShapeDtypeStruct((M, D), out_dtype),
        grid=(pl.cdiv(M, tm),),
        in_specs=[
            pl.BlockSpec((tm, D), lambda i: (i, 0)),
            pl.BlockSpec((1, D), lambda i: (0, 0)),
            pl.BlockSpec((1, D), lambda i: (0, 0)),
        ],
        out_specs=pl.BlockSpec((tm, D), lambda i: (i, 0)),
        compiler_params=pltpu.CompilerParams(
            dimension_semantics=("parallel",),
            vmem_limit_bytes=VMEM_LIMIT),
    )(x2, g.reshape(1, D), b.reshape(1, D))
    return out.reshape(shape)


# ----------------------------------------------------------------------------
# Multi-head attention core, reading q/k/v straight out of the fused qkv tensor
# ----------------------------------------------------------------------------
def _attn_kernel(qkv_ref, o_ref, *, num_heads, scale):
    D = o_ref.shape[-1]
    hd = D // num_heads
    for h in range(num_heads):                                   # static unroll
        q = qkv_ref[:, :, h * hd:(h + 1) * hd] * scale           # (gb, N, hd) bf16
        k = qkv_ref[:, :, D + h * hd:D + (h + 1) * hd]
        v = qkv_ref[:, :, 2 * D + h * hd:2 * D + (h + 1) * hd]
        s = jnp.einsum("gqd,gkd->gqk", q, k,
                       preferred_element_type=jnp.float32)        # (gb, N, N)
        s = s - jnp.max(s, axis=-1, keepdims=True)
        p = jnp.exp(s)
        p = p * pl.reciprocal(jnp.sum(p, axis=-1, keepdims=True), approx=True)
        o = jnp.einsum("gqk,gkd->gqd", p.astype(jnp.bfloat16), v,
                       preferred_element_type=jnp.float32)        # (gb, N, hd)
        o_ref[:, :, h * hd:(h + 1) * hd] = o.astype(o_ref.dtype)


def attention_core(qkv, num_heads):
    """softmax(q k^T / sqrt(hd)) v per head; no head split/merge transposes in HBM."""
    Bx, N, D3 = qkv.shape
    D = D3 // 3
    hd = D // num_heads
    scale = hd ** -0.5

    # TODO(synk): N (e.g. 197) is left unpadded; full-dim blocks keep the grid legal and
    # avoid an extra HBM pad pass, at the cost of lane-masked softmax tails.
    per_item = 4 * N * D3 + 4 * N * D + 8 * N * _round_up(N, 128)
    gb_cap = max(1, min(256, TILE_BUDGET // max(per_item, 1)))
    gb = _largest_divisor_leq(Bx, gb_cap)

    return pl.pallas_call(
        functools.partial(_attn_kernel, num_heads=num_heads, scale=scale),
        out_shape=jax.ShapeDtypeStruct((Bx, N, D), jnp.bfloat16),
        grid=(Bx // gb,),
        in_specs=[pl.BlockSpec((gb, N, D3), lambda i: (i, 0, 0))],
        out_specs=pl.BlockSpec((gb, N, D), lambda i: (i, 0, 0)),
        compiler_params=pltpu.CompilerParams(
            dimension_semantics=("parallel",),
            vmem_limit_bytes=VMEM_LIMIT),
        cost_estimate=pl.CostEstimate(
            flops=int(4 * Bx * num_heads * N * N * hd),
            transcendentals=int(Bx * num_heads * N * N),
            bytes_accessed=int(2 * Bx * N * (D3 + D))),
    )(qkv)


# ----------------------------------------------------------------------------
# Model composition (plain-JAX glue around Pallas kernels)
# ----------------------------------------------------------------------------
def attention(x, p, num_heads):
    qkv = linear(x, p["qkv_w"], p["qkv_b"])           # (Bx, N, 3D) bf16
    o = attention_core(qkv, num_heads)                # (Bx, N, D)  bf16
    return linear(o, p["proj_w"], p["proj_b"])


def mlp(x, p, residual):
    h = linear(x, p["fc1_w"], p["fc1_b"], activation="gelu")
    return linear(h, p["fc2_w"], p["fc2_b"], residual=residual)


def block_forward(x, p, B, T, W, num_heads):
    """divided_space_time Block (inference: DropPath/Dropout = identity)."""
    num_spatial = (x.shape[1] - 1) // T
    H = num_spatial // W
    D = x.shape[2]

    # ---- temporal attention ----
    xt0 = x[:, 1:, :]                                                 # (B, HWT, D)
    xt_t = xt0.reshape(B, H, W, T, D).reshape(B * H * W, T, D)
    res_t = attention(layernorm(xt_t, p["tnorm_g"], p["tnorm_b"]),
                      p["tattn"], num_heads)
    res_t = res_t.reshape(B, H, W, T, D).reshape(B, H * W * T, D)
    # temporal_fc with the residual add fused into the matmul epilogue
    xt = linear(res_t, p["tfc_w"], p["tfc_b"], residual=xt0)          # (B, HWT, D)

    # ---- spatial attention ----
    init_cls = x[:, 0:1, :]                                           # (B, 1, D)
    cls_rep = jnp.repeat(init_cls, T, axis=1).reshape(B * T, 1, D)
    xs = xt.reshape(B, H, W, T, D).transpose(0, 3, 1, 2, 4).reshape(B * T, H * W, D)
    xs = jnp.concatenate([cls_rep, xs], axis=1)                       # (B*T, 1+HW, D)
    res_s = attention(layernorm(xs, p["norm1_g"], p["norm1_b"]),
                      p["attn"], num_heads)
    cls_tok = res_s[:, 0, :].reshape(B, T, D).mean(axis=1, keepdims=True)
    res_s = res_s[:, 1:, :].reshape(B, T, H, W, D)
    res_s = res_s.transpose(0, 2, 3, 1, 4).reshape(B, H * W * T, D)

    x = jnp.concatenate([init_cls, xt], axis=1) + jnp.concatenate([cls_tok, res_s], axis=1)
    # ---- MLP, residual fused into fc2 epilogue ----
    x = mlp(layernorm(x, p["norm2_g"], p["norm2_b"]), p["mlp"], residual=x)
    return x


def patch_embed(x, w, b, patch):
    """Conv2d(k=p, s=p) as im2col + Pallas matmul.  x: (B, C, T, H, W) f32."""
    B, C, T, H, W = x.shape
    nh, nw = H // patch, W // patch
    x = x.transpose(0, 2, 1, 3, 4).reshape(B * T, C, H, W)            # (b t) c h w
    x = x.reshape(B * T, C, nh, patch, nw, patch)
    x = x.transpose(0, 2, 4, 1, 3, 5).reshape(B * T * nh * nw, C * patch * patch)
    out = linear(x, w, b)                                             # bf16
    D = w.shape[1]
    return out.reshape(B * T, nh * nw, D), T, nw


def model_forward(x, kpt_masks, params, cfg):
    """Returns (predictions, pose_block_attentions, gt_mask)."""
    kpt_masks = kpt_masks.astype(jnp.float32)
    gt_mask = kpt_masks

    B = x.shape[0]
    xp, T, W = patch_embed(x, params["patch_w"], params["patch_b"], cfg["patch"])
    BT, Np, D = xp.shape

    cls = jnp.broadcast_to(params["cls_token"].astype(jnp.bfloat16), (BT, 1, D))
    xp = jnp.concatenate([cls, xp], axis=1)                           # (BT, Np+1, D)
    xp = xp + params["pos_embed"].astype(jnp.bfloat16)

    # time embedding (attention_type != 'space_only')
    cls_tokens = xp[:B, 0, :][:, None, :]                             # (B, 1, D)
    xe = xp[:, 1:]                                                    # (BT, Np, D)
    xe = xe.reshape(B, T, Np, D).transpose(0, 2, 1, 3).reshape(B * Np, T, D)
    xe = xe + params["time_embed"].astype(jnp.bfloat16)               # (1, T, D)
    xe = xe.reshape(B, Np, T, D).reshape(B, Np * T, D)
    h = jnp.concatenate([cls_tokens, xe], axis=1)                     # (B, 1+Np*T, D)

    pose_block_attentions = []
    # TODO(synk): PAAT ('spatial_auxtaskonly') pose-block source unavailable; config
    # places no pose blocks, so pose_block_attentions stays empty.
    for blk in params["blocks"]:
        h = block_forward(h, blk, B, T, W, cfg["num_heads"])

    h = layernorm(h, params["norm_g"], params["norm_b"])
    cls_out = h[:, 0]                                                 # (B, D)
    preds = linear(cls_out, params["head_w"], params["head_b"],
                   out_dtype=jnp.float32)                             # (B, num_classes)
    return preds, pose_block_attentions, gt_mask


# ----------------------------------------------------------------------------
# Deterministic parameter initialization (weights stored bf16, biases/LN f32)
# ----------------------------------------------------------------------------
def _lin(key, fan_in, fan_out, zero=False):
    if zero:
        w = jnp.zeros((fan_in, fan_out), jnp.bfloat16)
    else:
        w = (0.02 * jax.random.normal(key, (fan_in, fan_out), jnp.float32)).astype(jnp.bfloat16)
    return w, jnp.zeros((fan_out,), jnp.float32)


def init_params(key, cfg):
    D, heads = cfg["embed_dim"], cfg["num_heads"]
    C, p = cfg["in_chans"], cfg["patch"]
    Np = (cfg["img_size"] // p) ** 2
    hidden = int(D * cfg["mlp_ratio"])
    keys = iter(jax.random.split(key, 64 + 16 * cfg["depth"]))

    params = {}
    params["patch_w"], params["patch_b"] = _lin(next(keys), C * p * p, D)
    params["cls_token"] = 0.02 * jax.random.normal(next(keys), (1, 1, D), jnp.float32)
    params["pos_embed"] = 0.02 * jax.random.normal(next(keys), (1, Np + 1, D), jnp.float32)
    params["time_embed"] = 0.02 * jax.random.normal(next(keys), (1, cfg["num_frames"], D), jnp.float32)
    params["norm_g"] = jnp.ones((D,), jnp.float32)
    params["norm_b"] = jnp.zeros((D,), jnp.float32)
    params["head_w"], params["head_b"] = _lin(next(keys), D, cfg["num_classes"])

    blocks = []
    for i in range(cfg["depth"]):
        blk = {}
        blk["norm1_g"] = jnp.ones((D,), jnp.float32)
        blk["norm1_b"] = jnp.zeros((D,), jnp.float32)
        blk["norm2_g"] = jnp.ones((D,), jnp.float32)
        blk["norm2_b"] = jnp.zeros((D,), jnp.float32)
        blk["tnorm_g"] = jnp.ones((D,), jnp.float32)
        blk["tnorm_b"] = jnp.zeros((D,), jnp.float32)
        qkv_w, qkv_b = _lin(next(keys), D, 3 * D)
        proj_w, proj_b = _lin(next(keys), D, D)
        blk["attn"] = {"qkv_w": qkv_w, "qkv_b": qkv_b, "proj_w": proj_w, "proj_b": proj_b}
        tqkv_w, tqkv_b = _lin(next(keys), D, 3 * D)
        tproj_w, tproj_b = _lin(next(keys), D, D)
        blk["tattn"] = {"qkv_w": tqkv_w, "qkv_b": tqkv_b, "proj_w": tproj_w, "proj_b": tproj_b}
        # faithful to VisionTransformer init: temporal_fc zeroed for all but the first block
        blk["tfc_w"], blk["tfc_b"] = _lin(next(keys), D, D, zero=(i > 0))
        fc1_w, fc1_b = _lin(next(keys), D, hidden)
        fc2_w, fc2_b = _lin(next(keys), hidden, D)
        blk["mlp"] = {"fc1_w": fc1_w, "fc1_b": fc1_b, "fc2_w": fc2_w, "fc2_b": fc2_b}
        blocks.append(blk)
    params["blocks"] = blocks
    return params


# ----------------------------------------------------------------------------
if __name__ == "__main__":
    # Small config consistent with the module (patch16; everything else scaled down).
    cfg = {
        "img_size": 32,        # -> 2x2 = 4 spatial patches
        "patch": 16,
        "in_chans": 3,
        "num_frames": 2,       # T
        "embed_dim": 64,
        "num_heads": 4,
        "depth": 2,
        "mlp_ratio": 4.0,
        "num_classes": 10,
        "num_joints": 13,
    }

    key = jax.random.PRNGKey(0)
    k_param, k_x, k_m = jax.random.split(key, 3)

    params = init_params(k_param, cfg)

    B = 2
    # layout: x is (B, C, T, H, W) float32, same axis convention as the PyTorch module.
    x = jax.random.normal(k_x, (B, cfg["in_chans"], cfg["num_frames"],
                                cfg["img_size"], cfg["img_size"]), jnp.float32)
    kpt_masks = jax.random.bernoulli(
        k_m, 0.5, (B, cfg["num_frames"], cfg["num_joints"])).astype(jnp.int32)

    fwd = jax.jit(functools.partial(model_forward, params=params, cfg=cfg))
    preds, pose_attns, gt_mask = fwd(x, kpt_masks)
    jax.block_until_ready(preds)
    jax.block_until_ready(gt_mask)

    assert preds.shape == (B, cfg["num_classes"])
    assert preds.dtype == jnp.float32
    assert bool(jnp.all(jnp.isfinite(preds)))
    assert gt_mask.dtype == jnp.float32
    assert pose_attns == []
    print("KERNEL_OK")
</pallas_src>

<mosaic_0001>
module attributes {stable_mosaic.version = 11 : i64} {
  func.func @_linear_kernel(%arg0: i32, %arg1: i32, %arg2: memref<16x768xbf16, #tpu.memory_space<vmem>>, %arg3: memref<768x64xbf16, #tpu.memory_space<vmem>>, %arg4: memref<1x64xf32, #tpu.memory_space<vmem>>, %arg5: memref<16x64xbf16, #tpu.memory_space<vmem>>) attributes {dimension_semantics = [#tpu.dimension_semantics<parallel>, #tpu.dimension_semantics<parallel>], iteration_bounds = array<i64: 1, 1>, scalar_prefetch = 0 : i64, scratch_operands = 0 : i64, tpu.core_type = #tpu.core_type<tc>, window_params = [{transform_indices = @transform_0, window_bounds = array<i64: 16, 768>}, {transform_indices = @transform_1, window_bounds = array<i64: 768, 64>}, {transform_indices = @transform_2, window_bounds = array<i64: 1, 64>}, {transform_indices = @transform_3, window_bounds = array<i64: 16, 64>}]} {
    %c0 = arith.constant 0 : index
    %c0_0 = arith.constant 0 : index
    %0 = vector.load %arg2[%c0, %c0_0] : memref<16x768xbf16, #tpu.memory_space<vmem>>, vector<16x768xbf16>
    %c0_1 = arith.constant 0 : index
    %c0_2 = arith.constant 0 : index
    %1 = vector.load %arg3[%c0_1, %c0_2] : memref<768x64xbf16, #tpu.memory_space<vmem>>, vector<768x64xbf16>
    %cst = arith.constant dense<0.000000e+00> : vector<16x64xf32>
    %2 = tpu.matmul %0, %1, %cst {dimension_numbers = #tpu.dot_dimension_numbers<[1], [0], [0], [1], [0, 0, 1, 1], [], []>} : vector<16x768xbf16>, vector<768x64xbf16>, vector<16x64xf32> -> vector<16x64xf32>
    %c0_3 = arith.constant 0 : index
    %c0_4 = arith.constant 0 : index
    %3 = vector.load %arg4[%c0_3, %c0_4] : memref<1x64xf32, #tpu.memory_space<vmem>>, vector<1x64xf32>
    %4 = vector.broadcast %3 : vector<1x64xf32> to vector<16x64xf32>
    %5 = arith.addf %2, %4 : vector<16x64xf32>
    %6 = arith.truncf %5 : vector<16x64xf32> to vector<16x64xbf16>
    %c0_5 = arith.constant 0 : index
    %c0_6 = arith.constant 0 : index
    %7 = vector.load %arg5[%c0_5, %c0_6] : memref<16x64xbf16, #tpu.memory_space<vmem>>, vector<16x64xbf16>
    tpu.vector_store %arg5[%c0_5, %c0_6], %6 {strides = array<i32>} : memref<16x64xbf16, #tpu.memory_space<vmem>>, vector<16x64xbf16>,
    return
  }
  func.func @transform_0(%arg0: i32, %arg1: i32) -> (i32, i32) {
    %c0_i32 = arith.constant 0 : i32
    %c0_i32_0 = arith.constant 0 : i32
    return %arg0, %c0_i32 : i32, i32
  }
  func.func @transform_1(%arg0: i32, %arg1: i32) -> (i32, i32) {
    %c0_i32 = arith.constant 0 : i32
    %c0_i32_0 = arith.constant 0 : i32
    return %c0_i32, %arg1 : i32, i32
  }
  func.func @transform_2(%arg0: i32, %arg1: i32) -> (i32, i32) {
    %c0_i32 = arith.constant 0 : i32
    %c0_i32_0 = arith.constant 0 : i32
    return %c0_i32, %arg1 : i32, i32
  }
  func.func @transform_3(%arg0: i32, %arg1: i32) -> (i32, i32) {
    %c0_i32 = arith.constant 0 : i32
    return %arg0, %arg1 : i32, i32
  }
}

module attributes {stable_mosaic.version = 11 : i64} {
  func.func @_layernorm_kernel(%arg0: i32, %arg1: memref<16x64xbf16, #tpu.memory_space<vmem>>, %arg2: memref<1x64xf32, #tpu.memory_space<vmem>>, %arg3: memref<1x64xf32, #tpu.memory_space<vmem>>, %arg4: memref<16x64xbf16, #tpu.memory_space<vmem>>) attributes {dimension_semantics = [#tpu.dimension_semantics<parallel>], iteration_bounds = array<i64: 1>, scalar_prefetch = 0 : i64, scratch_operands = 0 : i64, tpu.core_type = #tpu.core_type<tc>, window_params = [{transform_indices = @transform_0, window_bounds = array<i64: 16, 64>}, {pipeline_mode = #tpu.pipeline_mode<synchronous>, transform_indices = @transform_1, window_bounds = array<i64: 1, 64>}, {pipeline_mode = #tpu.pipeline_mode<synchronous>, transform_indices = @transform_2, window_bounds = array<i64: 1, 64>}, {transform_indices = @transform_3, window_bounds = array<i64: 16, 64>}]} {
    %c0 = arith.constant 0 : index
    %c0_0 = arith.constant 0 : index
    %0 = vector.load %arg1[%c0, %c0_0] : memref<16x64xbf16, #tpu.memory_space<vmem>>, vector<16x64xbf16>
    %1 = arith.extf %0 : vector<16x64xbf16> to vector<16x64xf32>
    %cst = arith.constant dense<0.000000e+00> : vector<16xf32>
    %2 = vector.multi_reduction <add>, %1, %cst [1] : vector<16x64xf32> to vector<16xf32>
    %3 = vector.shape_cast %2 : vector<16xf32> to vector<16x1xf32>
    %cst_1 = arith.constant 6.400000e+01 : f32
    %4 = vector.broadcast %cst_1 : f32 to vector<16x1xf32>
    %5 = arith.divf %3, %4 : vector<16x1xf32>
    %6 = vector.broadcast %5 : vector<16x1xf32> to vector<16x64xf32>
    %7 = arith.subf %1, %6 : vector<16x64xf32>
    %8 = arith.mulf %7, %7 : vector<16x64xf32>
    %cst_2 = arith.constant dense<0.000000e+00> : vector<16xf32>
    %9 = vector.multi_reduction <add>, %8, %cst_2 [1] : vector<16x64xf32> to vector<16xf32>
    %10 = vector.shape_cast %9 : vector<16xf32> to vector<16x1xf32>
    %cst_3 = arith.constant 6.400000e+01 : f32
    %11 = vector.broadcast %cst_3 : f32 to vector<16x1xf32>
    %12 = arith.divf %10, %11 : vector<16x1xf32>
    %cst_4 = arith.constant 9.99999997E-7 : f32
    %13 = vector.broadcast %cst_4 : f32 to vector<16x1xf32>
    %14 = arith.addf %12, %13 : vector<16x1xf32>
    %15 = math.rsqrt %14 : vector<16x1xf32>
    %16 = vector.broadcast %15 : vector<16x1xf32> to vector<16x64xf32>
    %17 = arith.mulf %7, %16 : vector<16x64xf32>
    %c0_5 = arith.constant 0 : index
    %c0_6 = arith.constant 0 : index
    %18 = vector.load %arg2[%c0_5, %c0_6] : memref<1x64xf32, #tpu.memory_space<vmem>>, vector<1x64xf32>
    %19 = vector.broadcast %18 : vector<1x64xf32> to vector<16x64xf32>
    %20 = arith.mulf %17, %19 : vector<16x64xf32>
    %c0_7 = arith.constant 0 : index
    %c0_8 = arith.constant 0 : index
    %21 = vector.load %arg3[%c0_7, %c0_8] : memref<1x64xf32, #tpu.memory_space<vmem>>, vector<1x64xf32>
    %22 = vector.broadcast %21 : vector<1x64xf32> to vector<16x64xf32>
    %23 = arith.addf %20, %22 : vector<16x64xf32>
    %24 = arith.truncf %23 : vector<16x64xf32> to vector<16x64xbf16>
    %c0_9 = arith.constant 0 : index
    %c0_10 = arith.constant 0 : index
    %25 = vector.load %arg4[%c0_9, %c0_10] : memref<16x64xbf16, #tpu.memory_space<vmem>>, vector<16x64xbf16>
    tpu.vector_store %arg4[%c0_9, %c0_10], %24 {strides = array<i32>} : memref<16x64xbf16, #tpu.memory_space<vmem>>, vector<16x64xbf16>,
    return
  }
  func.func @transform_0(%arg0: i32) -> (i32, i32) {
    %c0_i32 = arith.constant 0 : i32
    %c0_i32_0 = arith.constant 0 : i32
    return %arg0, %c0_i32 : i32, i32
  }
  func.func @transform_1(%arg0: i32) -> (i32, i32) {
    %c0_i32 = arith.constant 0 : i32
    %c0_i32_0 = arith.constant 0 : i32
    %c0_i32_1 = arith.constant 0 : i32
    return %c0_i32, %c0_i32_0 : i32, i32
  }
  func.func @transform_2(%arg0: i32) -> (i32, i32) {
    %c0_i32 = arith.constant 0 : i32
    %c0_i32_0 = arith.constant 0 : i32
    %c0_i32_1 = arith.constant 0 : i32
    return %c0_i32, %c0_i32_0 : i32, i32
  }
  func.func @transform_3(%arg0: i32) -> (i32, i32) {
    %c0_i32 = arith.constant 0 : i32
    %c0_i32_0 = arith.constant 0 : i32
    return %arg0, %c0_i32 : i32, i32
  }
}

module attributes {stable_mosaic.version = 11 : i64} {
  func.func @_linear_kernel(%arg0: i32, %arg1: i32, %arg2: memref<16x64xbf16, #tpu.memory_space<vmem>>, %arg3: memref<64x192xbf16, #tpu.memory_space<vmem>>, %arg4: memref<1x192xf32, #tpu.memory_space<vmem>>, %arg5: memref<16x192xbf16, #tpu.memory_space<vmem>>) attributes {dimension_semantics = [#tpu.dimension_semantics<parallel>, #tpu.dimension_semantics<parallel>], iteration_bounds = array<i64: 1, 1>, scalar_prefetch = 0 : i64, scratch_operands = 0 : i64, tpu.core_type = #tpu.core_type<tc>, window_params = [{transform_indices = @transform_0, window_bounds = array<i64: 16, 64>}, {transform_indices = @transform_1, window_bounds = array<i64: 64, 192>}, {transform_indices = @transform_2, window_bounds = array<i64: 1, 192>}, {transform_indices = @transform_3, window_bounds = array<i64: 16, 192>}]} {
    %c0 = arith.constant 0 : index
    %c0_0 = arith.constant 0 : index
    %0 = vector.load %arg2[%c0, %c0_0] : memref<16x64xbf16, #tpu.memory_space<vmem>>, vector<16x64xbf16>
    %c0_1 = arith.constant 0 : index
    %c0_2 = arith.constant 0 : index
    %1 = vector.load %arg3[%c0_1, %c0_2] : memref<64x192xbf16, #tpu.memory_space<vmem>>, vector<64x192xbf16>
    %cst = arith.constant dense<0.000000e+00> : vector<16x192xf32>
    %2 = tpu.matmul %0, %1, %cst {dimension_numbers = #tpu.dot_dimension_numbers<[1], [0], [0], [1], [0, 0, 1, 1], [], []>} : vector<16x64xbf16>, vector<64x192xbf16>, vector<16x192xf32> -> vector<16x192xf32>
    %c0_3 = arith.constant 0 : index
    %c0_4 = arith.constant 0 : index
    %3 = vector.load %arg4[%c0_3, %c0_4] : memref<1x192xf32, #tpu.memory_space<vmem>>, vector<1x192xf32>
    %4 = vector.broadcast %3 : vector<1x192xf32> to vector<16x192xf32>
    %5 = arith.addf %2, %4 : vector<16x192xf32>
    %6 = arith.truncf %5 : vector<16x192xf32> to vector<16x192xbf16>
    %c0_5 = arith.constant 0 : index
    %c0_6 = arith.constant 0 : index
    %7 = vector.load %arg5[%c0_5, %c0_6] : memref<16x192xbf16, #tpu.memory_space<vmem>>, vector<16x192xbf16>
    tpu.vector_store %arg5[%c0_5, %c0_6], %6 {strides = array<i32>} : memref<16x192xbf16, #tpu.memory_space<vmem>>, vector<16x192xbf16>,
    return
  }
  func.func @transform_0(%arg0: i32, %arg1: i32) -> (i32, i32) {
    %c0_i32 = arith.constant 0 : i32
    %c0_i32_0 = arith.constant 0 : i32
    return %arg0, %c0_i32 : i32, i32
  }
  func.func @transform_1(%arg0: i32, %arg1: i32) -> (i32, i32) {
    %c0_i32 = arith.constant 0 : i32
    %c0_i32_0 = arith.constant 0 : i32
    return %c0_i32, %arg1 : i32, i32
  }
  func.func @transform_2(%arg0: i32, %arg1: i32) -> (i32, i32) {
    %c0_i32 = arith.constant 0 : i32
    %c0_i32_0 = arith.constant 0 : i32
    return %c0_i32, %arg1 : i32, i32
  }
  func.func @transform_3(%arg0: i32, %arg1: i32) -> (i32, i32) {
    %c0_i32 = arith.constant 0 : i32
    return %arg0, %arg1 : i32, i32
  }
}

module attributes {stable_mosaic.version = 11 : i64} {
  func.func @_attn_kernel(%arg0: i32, %arg1: memref<8x2x192xbf16, #tpu.memory_space<vmem>>, %arg2: memref<8x2x64xbf16, #tpu.memory_space<vmem>>) attributes {dimension_semantics = [#tpu.dimension_semantics<parallel>], iteration_bounds = array<i64: 1>, scalar_prefetch = 0 : i64, scratch_operands = 0 : i64, tpu.core_type = #tpu.core_type<tc>, window_params = [{transform_indices = @transform_0, window_bounds = array<i64: 8, 2, 192>}, {transform_indices = @transform_1, window_bounds = array<i64: 8, 2, 64>}]} {
    %c0 = arith.constant 0 : index
    %c0_0 = arith.constant 0 : index
    %c0_1 = arith.constant 0 : index
    %0 = vector.load %arg1[%c0, %c0_0, %c0_1] : memref<8x2x192xbf16, #tpu.memory_space<vmem>>, vector<8x2x16xbf16>
    %cst = arith.constant 2.500000e-01 : bf16
    %1 = vector.broadcast %cst : bf16 to vector<8x2x16xbf16>
    %2 = arith.mulf %0, %1 : vector<8x2x16xbf16>
    %c0_2 = arith.constant 0 : index
    %c0_3 = arith.constant 0 : index
    %c64 = arith.constant 64 : index
    %3 = vector.load %arg1[%c0_2, %c0_3, %c64] : memref<8x2x192xbf16, #tpu.memory_space<vmem>>, vector<8x2x16xbf16>
    %c0_4 = arith.constant 0 : index
    %c0_5 = arith.constant 0 : index
    %c128 = arith.constant 128 : index
    %4 = vector.load %arg1[%c0_4, %c0_5, %c128] : memref<8x2x192xbf16, #tpu.memory_space<vmem>>, vector<8x2x16xbf16>
    "tpu.trace_start"() <{level = 10 : i32, message = "gqd,gkd->gqk"}> : () -> ()
    %cst_6 = arith.constant dense<0.000000e+00> : vector<8x2x2xf32>
    %5 = tpu.matmul %2, %3, %cst_6 {dimension_numbers = #tpu.dot_dimension_numbers<[2], [2], [1], [1], [0, 0, 0, 1, 1, 1], [0], [0]>} : vector<8x2x16xbf16>, vector<8x2x16xbf16>, vector<8x2x2xf32> -> vector<8x2x2xf32>
    "tpu.trace_stop"() : () -> ()
    %cst_7 = arith.constant dense<0xFF800000> : vector<8x2xf32>
    %6 = vector.multi_reduction <maximumf>, %5, %cst_7 [2] : vector<8x2x2xf32> to vector<8x2xf32>
    %7 = vector.shape_cast %6 : vector<8x2xf32> to vector<8x2x1xf32>
    %8 = vector.broadcast %7 : vector<8x2x1xf32> to vector<8x2x2xf32>
    %9 = arith.subf %5, %8 : vector<8x2x2xf32>
    %10 = math.exp %9 : vector<8x2x2xf32>
    %cst_8 = arith.constant dense<0.000000e+00> : vector<8x2xf32>
    %11 = vector.multi_reduction <add>, %10, %cst_8 [2] : vector<8x2x2xf32> to vector<8x2xf32>
    %12 = vector.shape_cast %11 : vector<8x2xf32> to vector<8x2x1xf32>
    %13 = tpu.reciprocal %12 {approx = true} : vector<8x2x1xf32> -> vector<8x2x1xf32>
    %14 = vector.broadcast %13 : vector<8x2x1xf32> to vector<8x2x2xf32>
    %15 = arith.mulf %10, %14 : vector<8x2x2xf32>
    %16 = arith.truncf %15 : vector<8x2x2xf32> to vector<8x2x2xbf16>
    "tpu.trace_start"() <{level = 10 : i32, message = "gqk,gkd->gqd"}> : () -> ()
    %cst_9 = arith.constant dense<0.000000e+00> : vector<8x2x16xf32>
    %17 = tpu.matmul %16, %4, %cst_9 {dimension_numbers = #tpu.dot_dimension_numbers<[2], [1], [1], [2], [0, 0, 0, 1, 1, 2], [0], [0]>} : vector<8x2x2xbf16>, vector<8x2x16xbf16>, vector<8x2x16xf32> -> vector<8x2x16xf32>
    "tpu.trace_stop"() : () -> ()
    %18 = arith.truncf %17 : vector<8x2x16xf32> to vector<8x2x16xbf16>
    %c0_10 = arith.constant 0 : index
    %c0_11 = arith.constant 0 : index
    %c0_12 = arith.constant 0 : index
    %19 = vector.load %arg2[%c0_10, %c0_11, %c0_12] : memref<8x2x64xbf16, #tpu.memory_space<vmem>>, vector<8x2x16xbf16>
    tpu.vector_store %arg2[%c0_10, %c0_11, %c0_12], %18 {strides = array<i32>} : memref<8x2x64xbf16, #tpu.memory_space<vmem>>, vector<8x2x16xbf16>,
    %c0_13 = arith.constant 0 : index
    %c0_14 = arith.constant 0 : index
    %c16 = arith.constant 16 : index
    %20 = vector.load %arg1[%c0_13, %c0_14, %c16] : memref<8x2x192xbf16, #tpu.memory_space<vmem>>, vector<8x2x16xbf16>
    %cst_15 = arith.constant 2.500000e-01 : bf16
    %21 = vector.broadcast %cst_15 : bf16 to vector<8x2x16xbf16>
    %22 = arith.mulf %20, %21 : vector<8x2x16xbf16>
    %c0_16 = arith.constant 0 : index
    %c0_17 = arith.constant 0 : index
    %c80 = arith.constant 80 : index
    %23 = vector.load %arg1[%c0_16, %c0_17, %c80] : memref<8x2x192xbf16, #tpu.memory_space<vmem>>, vector<8x2x16xbf16>
    %c0_18 = arith.constant 0 : index
    %c0_19 = arith.constant 0 : index
    %c144 = arith.constant 144 : index
    %24 = vector.load %arg1[%c0_18, %c0_19, %c144] : memref<8x2x192xbf16, #tpu.memory_space<vmem>>, vector<8x2x16xbf16>
    "tpu.trace_start"() <{level = 10 : i32, message = "gqd,gkd->gqk"}> : () -> ()
    %cst_20 = arith.constant dense<0.000000e+00> : vector<8x2x2xf32>
    %25 = tpu.matmul %22, %23, %cst_20 {dimension_numbers = #tpu.dot_dimension_numbers<[2], [2], [1], [1], [0, 0, 0, 1, 1, 1], [0], [0]>} : vector<8x2x16xbf16>, vector<8x2x16xbf16>, vector<8x2x2xf32> -> vector<8x2x2xf32>
    "tpu.trace_stop"() : () -> ()
    %cst_21 = arith.constant dense<0xFF800000> : vector<8x2xf32>
    %26 = vector.multi_reduction <maximumf>, %25, %cst_21 [2] : vector<8x2x2xf32> to vector<8x2xf32>
    %27 = vector.shape_cast %26 : vector<8x2xf32> to vector<8x2x1xf32>
    %28 = vector.broadcast %27 : vector<8x2x1xf32> to vector<8x2x2xf32>
    %29 = arith.subf %25, %28 : vector<8x2x2xf32>
    %30 = math.exp %29 : vector<8x2x2xf32>
    %cst_22 = arith.constant dense<0.000000e+00> : vector<8x2xf32>
    %31 = vector.multi_reduction <add>, %30, %cst_22 [2] : vector<8x2x2xf32> to vector<8x2xf32>
    %32 = vector.shape_cast %31 : vector<8x2xf32> to vector<8x2x1xf32>
    %33 = tpu.reciprocal %32 {approx = true} : vector<8x2x1xf32> -> vector<8x2x1xf32>
    %34 = vector.broadcast %33 : vector<8x2x1xf32> to vector<8x2x2xf32>
    %35 = arith.mulf %30, %34 : vector<8x2x2xf32>
    %36 = arith.truncf %35 : vector<8x2x2xf32> to vector<8x2x2xbf16>
    "tpu.trace_start"() <{level = 10 : i32, message = "gqk,gkd->gqd"}> : () -> ()
    %cst_23 = arith.constant dense<0.000000e+00> : vector<8x2x16xf32>
    %37 = tpu.matmul %36, %24, %cst_23 {dimension_numbers = #tpu.dot_dimension_numbers<[2], [1], [1], [2], [0, 0, 0, 1, 1, 2], [0], [0]>} : vector<8x2x2xbf16>, vector<8x2x16xbf16>, vector<8x2x16xf32> -> vector<8x2x16xf32>
    "tpu.trace_stop"() : () -> ()
    %38 = arith.truncf %37 : vector<8x2x16xf32> to vector<8x2x16xbf16>
    %c0_24 = arith.constant 0 : index
    %c0_25 = arith.constant 0 : index
    %c16_26 = arith.constant 16 : index
    %39 = vector.load %arg2[%c0_24, %c0_25, %c16_26] : memref<8x2x64xbf16, #tpu.memory_space<vmem>>, vector<8x2x16xbf16>
    tpu.vector_store %arg2[%c0_24, %c0_25, %c16_26], %38 {strides = array<i32>} : memref<8x2x64xbf16, #tpu.memory_space<vmem>>, vector<8x2x16xbf16>,
    %c0_27 = arith.constant 0 : index
    %c0_28 = arith.constant 0 : index
    %c32 = arith.constant 32 : index
    %40 = vector.load %arg1[%c0_27, %c0_28, %c32] : memref<8x2x192xbf16, #tpu.memory_space<vmem>>, vector<8x2x16xbf16>
    %cst_29 = arith.constant 2.500000e-01 : bf16
    %41 = vector.broadcast %cst_29 : bf16 to vector<8x2x16xbf16>
    %42 = arith.mulf %40, %41 : vector<8x2x16xbf16>
    %c0_30 = arith.constant 0 : index
    %c0_31 = arith.constant 0 : index
    %c96 = arith.constant 96 : index
    %43 = vector.load %arg1[%c0_30, %c0_31, %c96] : memref<8x2x192xbf16, #tpu.memory_space<vmem>>, vector<8x2x16xbf16>
    %c0_32 = arith.constant 0 : index
    %c0_33 = arith.constant 0 : index
    %c160 = arith.constant 160 : index
    %44 = vector.load %arg1[%c0_32, %c0_33, %c160] : memref<8x2x192xbf16, #tpu.memory_space<vmem>>, vector<8x2x16xbf16>
    "tpu.trace_start"() <{level = 10 : i32, message = "gqd,gkd->gqk"}> : () -> ()
    %cst_34 = arith.constant dense<0.000000e+00> : vector<8x2x2xf32>
    %45 = tpu.matmul %42, %43, %cst_34 {dimension_numbers = #tpu.dot_dimension_numbers<[2], [2], [1], [1], [0, 0, 0, 1, 1, 1], [0], [0]>} : vector<8x2x16xbf16>, vector<8x2x16xbf16>, vector<8x2x2xf32> -> vector<8x2x2xf32>
    "tpu.trace_stop"() : () -> ()
    %cst_35 = arith.constant dense<0xFF800000> : vector<8x2xf32>
    %46 = vector.multi_reduction <maximumf>, %45, %cst_35 [2] : vector<8x2x2xf32> to vector<8x2xf32>
    %47 = vector.shape_cast %46 : vector<8x2xf32> to vector<8x2x1xf32>
    %48 = vector.broadcast %47 : vector<8x2x1xf32> to vector<8x2x2xf32>
    %49 = arith.subf %45, %48 : vector<8x2x2xf32>
    %50 = math.exp %49 : vector<8x2x2xf32>
    %cst_36 = arith.constant dense<0.000000e+00> : vector<8x2xf32>
    %51 = vector.multi_reduction <add>, %50, %cst_36 [2] : vector<8x2x2xf32> to vector<8x2xf32>
    %52 = vector.shape_cast %51 : vector<8x2xf32> to vector<8x2x1xf32>
    %53 = tpu.reciprocal %52 {approx = true} : vector<8x2x1xf32> -> vector<8x2x1xf32>
    %54 = vector.broadcast %53 : vector<8x2x1xf32> to vector<8x2x2xf32>
    %55 = arith.mulf %50, %54 : vector<8x2x2xf32>
    %56 = arith.truncf %55 : vector<8x2x2xf32> to vector<8x2x2xbf16>
    "tpu.trace_start"() <{level = 10 : i32, message = "gqk,gkd->gqd"}> : () -> ()
    %cst_37 = arith.constant dense<0.000000e+00> : vector<8x2x16xf32>
    %57 = tpu.matmul %56, %44, %cst_37 {dimension_numbers = #tpu.dot_dimension_numbers<[2], [1], [1], [2], [0, 0, 0, 1, 1, 2], [0], [0]>} : vector<8x2x2xbf16>, vector<8x2x16xbf16>, vector<8x2x16xf32> -> vector<8x2x16xf32>
    "tpu.trace_stop"() : () -> ()
    %58 = arith.truncf %57 : vector<8x2x16xf32> to vector<8x2x16xbf16>
    %c0_38 = arith.constant 0 : index
    %c0_39 = arith.constant 0 : index
    %c32_40 = arith.constant 32 : index
    %59 = vector.load %arg2[%c0_38, %c0_39, %c32_40] : memref<8x2x64xbf16, #tpu.memory_space<vmem>>, vector<8x2x16xbf16>
    tpu.vector_store %arg2[%c0_38, %c0_39, %c32_40], %58 {strides = array<i32>} : memref<8x2x64xbf16, #tpu.memory_space<vmem>>, vector<8x2x16xbf16>,
    %c0_41 = arith.constant 0 : index
    %c0_42 = arith.constant 0 : index
    %c48 = arith.constant 48 : index
    %60 = vector.load %arg1[%c0_41, %c0_42, %c48] : memref<8x2x192xbf16, #tpu.memory_space<vmem>>, vector<8x2x16xbf16>
    %cst_43 = arith.constant 2.500000e-01 : bf16
    %61 = vector.broadcast %cst_43 : bf16 to vector<8x2x16xbf16>
    %62 = arith.mulf %60, %61 : vector<8x2x16xbf16>
    %c0_44 = arith.constant 0 : index
    %c0_45 = arith.constant 0 : index
    %c112 = arith.constant 112 : index
    %63 = vector.load %arg1[%c0_44, %c0_45, %c112] : memref<8x2x192xbf16, #tpu.memory_space<vmem>>, vector<8x2x16xbf16>
    %c0_46 = arith.constant 0 : index
    %c0_47 = arith.constant 0 : index
    %c176 = arith.constant 176 : index
    %64 = vector.load %arg1[%c0_46, %c0_47, %c176] : memref<8x2x192xbf16, #tpu.memory_space<vmem>>, vector<8x2x16xbf16>
    "tpu.trace_start"() <{level = 10 : i32, message = "gqd,gkd->gqk"}> : () -> ()
    %cst_48 = arith.constant dense<0.000000e+00> : vector<8x2x2xf32>
    %65 = tpu.matmul %62, %63, %cst_48 {dimension_numbers = #tpu.dot_dimension_numbers<[2], [2], [1], [1], [0, 0, 0, 1, 1, 1], [0], [0]>} : vector<8x2x16xbf16>, vector<8x2x16xbf16>, vector<8x2x2xf32> -> vector<8x2x2xf32>
    "tpu.trace_stop"() : () -> ()
    %cst_49 = arith.constant dense<0xFF800000> : vector<8x2xf32>
    %66 = vector.multi_reduction <maximumf>, %65, %cst_49 [2] : vector<8x2x2xf32> to vector<8x2xf32>
    %67 = vector.shape_cast %66 : vector<8x2xf32> to vector<8x2x1xf32>
    %68 = vector.broadcast %67 : vector<8x2x1xf32> to vector<8x2x2xf32>
    %69 = arith.subf %65, %68 : vector<8x2x2xf32>
    %70 = math.exp %69 : vector<8x2x2xf32>
    %cst_50 = arith.constant dense<0.000000e+00> : vector<8x2xf32>
    %71 = vector.multi_reduction <add>, %70, %cst_50 [2] : vector<8x2x2xf32> to vector<8x2xf32>
    %72 = vector.shape_cast %71 : vector<8x2xf32> to vector<8x2x1xf32>
    %73 = tpu.reciprocal %72 {approx = true} : vector<8x2x1xf32> -> vector<8x2x1xf32>
    %74 = vector.broadcast %73 : vector<8x2x1xf32> to vector<8x2x2xf32>
    %75 = arith.mulf %70, %74 : vector<8x2x2xf32>
    %76 = arith.truncf %75 : vector<8x2x2xf32> to vector<8x2x2xbf16>
    "tpu.trace_start"() <{level = 10 : i32, message = "gqk,gkd->gqd"}> : () -> ()
    %cst_51 = arith.constant dense<0.000000e+00> : vector<8x2x16xf32>
    %77 = tpu.matmul %76, %64, %cst_51 {dimension_numbers = #tpu.dot_dimension_numbers<[2], [1], [1], [2], [0, 0, 0, 1, 1, 2], [0], [0]>} : vector<8x2x2xbf16>, vector<8x2x16xbf16>, vector<8x2x16xf32> -> vector<8x2x16xf32>
    "tpu.trace_stop"() : () -> ()
    %78 = arith.truncf %77 : vector<8x2x16xf32> to vector<8x2x16xbf16>
    %c0_52 = arith.constant 0 : index
    %c0_53 = arith.constant 0 : index
    %c48_54 = arith.constant 48 : index
    %79 = vector.load %arg2[%c0_52, %c0_53, %c48_54] : memref<8x2x64xbf16, #tpu.memory_space<vmem>>, vector<8x2x16xbf16>
    tpu.vector_store %arg2[%c0_52, %c0_53, %c48_54], %78 {strides = array<i32>} : memref<8x2x64xbf16, #tpu.memory_space<vmem>>, vector<8x2x16xbf16>,
    return
  }
  func.func @transform_0(%arg0: i32) -> (i32, i32, i32) {
    %c0_i32 = arith.constant 0 : i32
    %c0_i32_0 = arith.constant 0 : i32
    %c0_i32_1 = arith.constant 0 : i32
    return %arg0, %c0_i32, %c0_i32_0 : i32, i32, i32
  }
  func.func @transform_1(%arg0: i32) -> (i32, i32, i32) {
    %c0_i32 = arith.constant 0 : i32
    %c0_i32_0 = arith.constant 0 : i32
    %c0_i32_1 = arith.constant 0 : i32
    return %arg0, %c0_i32, %c0_i32_0 : i32, i32, i32
  }
}

module attributes {stable_mosaic.version = 11 : i64} {
  func.func @_linear_kernel(%arg0: i32, %arg1: i32, %arg2: memref<16x64xbf16, #tpu.memory_space<vmem>>, %arg3: memref<64x64xbf16, #tpu.memory_space<vmem>>, %arg4: memref<1x64xf32, #tpu.memory_space<vmem>>, %arg5: memref<16x64xbf16, #tpu.memory_space<vmem>>) attributes {dimension_semantics = [#tpu.dimension_semantics<parallel>, #tpu.dimension_semantics<parallel>], iteration_bounds = array<i64: 1, 1>, scalar_prefetch = 0 : i64, scratch_operands = 0 : i64, tpu.core_type = #tpu.core_type<tc>, window_params = [{transform_indices = @transform_0, window_bounds = array<i64: 16, 64>}, {transform_indices = @transform_1, window_bounds = array<i64: 64, 64>}, {transform_indices = @transform_2, window_bounds = array<i64: 1, 64>}, {transform_indices = @transform_3, window_bounds = array<i64: 16, 64>}]} {
    %c0 = arith.constant 0 : index
    %c0_0 = arith.constant 0 : index
    %0 = vector.load %arg2[%c0, %c0_0] : memref<16x64xbf16, #tpu.memory_space<vmem>>, vector<16x64xbf16>
    %c0_1 = arith.constant 0 : index
    %c0_2 = arith.constant 0 : index
    %1 = vector.load %arg3[%c0_1, %c0_2] : memref<64x64xbf16, #tpu.memory_space<vmem>>, vector<64x64xbf16>
    %cst = arith.constant dense<0.000000e+00> : vector<16x64xf32>
    %2 = tpu.matmul %0, %1, %cst {dimension_numbers = #tpu.dot_dimension_numbers<[1], [0], [0], [1], [0, 0, 1, 1], [], []>} : vector<16x64xbf16>, vector<64x64xbf16>, vector<16x64xf32> -> vector<16x64xf32>
    %c0_3 = arith.constant 0 : index
    %c0_4 = arith.constant 0 : index
    %3 = vector.load %arg4[%c0_3, %c0_4] : memref<1x64xf32, #tpu.memory_space<vmem>>, vector<1x64xf32>
    %4 = vector.broadcast %3 : vector<1x64xf32> to vector<16x64xf32>
    %5 = arith.addf %2, %4 : vector<16x64xf32>
    %6 = arith.truncf %5 : vector<16x64xf32> to vector<16x64xbf16>
    %c0_5 = arith.constant 0 : index
    %c0_6 = arith.constant 0 : index
    %7 = vector.load %arg5[%c0_5, %c0_6] : memref<16x64xbf16, #tpu.memory_space<vmem>>, vector<16x64xbf16>
    tpu.vector_store %arg5[%c0_5, %c0_6], %6 {strides = array<i32>} : memref<16x64xbf16, #tpu.memory_space<vmem>>, vector<16x64xbf16>,
    return
  }
  func.func @transform_0(%arg0: i32, %arg1: i32) -> (i32, i32) {
    %c0_i32 = arith.constant 0 : i32
    %c0_i32_0 = arith.constant 0 : i32
    return %arg0, %c0_i32 : i32, i32
  }
  func.func @transform_1(%arg0: i32, %arg1: i32) -> (i32, i32) {
    %c0_i32 = arith.constant 0 : i32
    %c0_i32_0 = arith.constant 0 : i32
    return %c0_i32, %arg1 : i32, i32
  }
  func.func @transform_2(%arg0: i32, %arg1: i32) -> (i32, i32) {
    %c0_i32 = arith.constant 0 : i32
    %c0_i32_0 = arith.constant 0 : i32
    return %c0_i32, %arg1 : i32, i32
  }
  func.func @transform_3(%arg0: i32, %arg1: i32) -> (i32, i32) {
    %c0_i32 = arith.constant 0 : i32
    return %arg0, %arg1 : i32, i32
  }
}

module attributes {stable_mosaic.version = 11 : i64} {
  func.func @_linear_kernel(%arg0: i32, %arg1: i32, %arg2: memref<16x64xbf16, #tpu.memory_space<vmem>>, %arg3: memref<64x64xbf16, #tpu.memory_space<vmem>>, %arg4: memref<1x64xf32, #tpu.memory_space<vmem>>, %arg5: memref<16x64xbf16, #tpu.memory_space<vmem>>, %arg6: memref<16x64xbf16, #tpu.memory_space<vmem>>) attributes {dimension_semantics = [#tpu.dimension_semantics<parallel>, #tpu.dimension_semantics<parallel>], iteration_bounds = array<i64: 1, 1>, scalar_prefetch = 0 : i64, scratch_operands = 0 : i64, tpu.core_type = #tpu.core_type<tc>, window_params = [{transform_indices = @transform_0, window_bounds = array<i64: 16, 64>}, {transform_indices = @transform_1, window_bounds = array<i64: 64, 64>}, {transform_indices = @transform_2, window_bounds = array<i64: 1, 64>}, {transform_indices = @transform_3, window_bounds = array<i64: 16, 64>}, {transform_indices = @transform_4, window_bounds = array<i64: 16, 64>}]} {
    %c0 = arith.constant 0 : index
    %c0_0 = arith.constant 0 : index
    %0 = vector.load %arg2[%c0, %c0_0] : memref<16x64xbf16, #tpu.memory_space<vmem>>, vector<16x64xbf16>
    %c0_1 = arith.constant 0 : index
    %c0_2 = arith.constant 0 : index
    %1 = vector.load %arg3[%c0_1, %c0_2] : memref<64x64xbf16, #tpu.memory_space<vmem>>, vector<64x64xbf16>
    %cst = arith.constant dense<0.000000e+00> : vector<16x64xf32>
    %2 = tpu.matmul %0, %1, %cst {dimension_numbers = #tpu.dot_dimension_numbers<[1], [0], [0], [1], [0, 0, 1, 1], [], []>} : vector<16x64xbf16>, vector<64x64xbf16>, vector<16x64xf32> -> vector<16x64xf32>
    %c0_3 = arith.constant 0 : index
    %c0_4 = arith.constant 0 : index
    %3 = vector.load %arg4[%c0_3, %c0_4] : memref<1x64xf32, #tpu.memory_space<vmem>>, vector<1x64xf32>
    %4 = vector.broadcast %3 : vector<1x64xf32> to vector<16x64xf32>
    %5 = arith.addf %2, %4 : vector<16x64xf32>
    %c0_5 = arith.constant 0 : index
    %c0_6 = arith.constant 0 : index
    %6 = vector.load %arg5[%c0_5, %c0_6] : memref<16x64xbf16, #tpu.memory_space<vmem>>, vector<16x64xbf16>
    %7 = arith.extf %6 : vector<16x64xbf16> to vector<16x64xf32>
    %8 = arith.addf %5, %7 : vector<16x64xf32>
    %9 = arith.truncf %8 : vector<16x64xf32> to vector<16x64xbf16>
    %c0_7 = arith.constant 0 : index
    %c0_8 = arith.constant 0 : index
    %10 = vector.load %arg6[%c0_7, %c0_8] : memref<16x64xbf16, #tpu.memory_space<vmem>>, vector<16x64xbf16>
    tpu.vector_store %arg6[%c0_7, %c0_8], %9 {strides = array<i32>} : memref<16x64xbf16, #tpu.memory_space<vmem>>, vector<16x64xbf16>,
    return
  }
  func.func @transform_0(%arg0: i32, %arg1: i32) -> (i32, i32) {
    %c0_i32 = arith.constant 0 : i32
    %c0_i32_0 = arith.constant 0 : i32
    return %arg0, %c0_i32 : i32, i32
  }
  func.func @transform_1(%arg0: i32, %arg1: i32) -> (i32, i32) {
    %c0_i32 = arith.constant 0 : i32
    %c0_i32_0 = arith.constant 0 : i32
    return %c0_i32, %arg1 : i32, i32
  }
  func.func @transform_2(%arg0: i32, %arg1: i32) -> (i32, i32) {
    %c0_i32 = arith.constant 0 : i32
    %c0_i32_0 = arith.constant 0 : i32
    return %c0_i32, %arg1 : i32, i32
  }
  func.func @transform_3(%arg0: i32, %arg1: i32) -> (i32, i32) {
    %c0_i32 = arith.constant 0 : i32
    return %arg0, %arg1 : i32, i32
  }
  func.func @transform_4(%arg0: i32, %arg1: i32) -> (i32, i32) {
    %c0_i32 = arith.constant 0 : i32
    return %arg0, %arg1 : i32, i32
  }
}

module attributes {stable_mosaic.version = 11 : i64} {
  func.func @_layernorm_kernel(%arg0: i32, %arg1: memref<20x64xbf16, #tpu.memory_space<vmem>>, %arg2: memref<1x64xf32, #tpu.memory_space<vmem>>, %arg3: memref<1x64xf32, #tpu.memory_space<vmem>>, %arg4: memref<20x64xbf16, #tpu.memory_space<vmem>>) attributes {dimension_semantics = [#tpu.dimension_semantics<parallel>], iteration_bounds = array<i64: 1>, scalar_prefetch = 0 : i64, scratch_operands = 0 : i64, tpu.core_type = #tpu.core_type<tc>, window_params = [{transform_indices = @transform_0, window_bounds = array<i64: 20, 64>}, {pipeline_mode = #tpu.pipeline_mode<synchronous>, transform_indices = @transform_1, window_bounds = array<i64: 1, 64>}, {pipeline_mode = #tpu.pipeline_mode<synchronous>, transform_indices = @transform_2, window_bounds = array<i64: 1, 64>}, {transform_indices = @transform_3, window_bounds = array<i64: 20, 64>}]} {
    %c0 = arith.constant 0 : index
    %c0_0 = arith.constant 0 : index
    %0 = vector.load %arg1[%c0, %c0_0] : memref<20x64xbf16, #tpu.memory_space<vmem>>, vector<20x64xbf16>
    %1 = arith.extf %0 : vector<20x64xbf16> to vector<20x64xf32>
    %cst = arith.constant dense<0.000000e+00> : vector<20xf32>
    %2 = vector.multi_reduction <add>, %1, %cst [1] : vector<20x64xf32> to vector<20xf32>
    %3 = vector.shape_cast %2 : vector<20xf32> to vector<20x1xf32>
    %cst_1 = arith.constant 6.400000e+01 : f32
    %4 = vector.broadcast %cst_1 : f32 to vector<20x1xf32>
    %5 = arith.divf %3, %4 : vector<20x1xf32>
    %6 = vector.broadcast %5 : vector<20x1xf32> to vector<20x64xf32>
    %7 = arith.subf %1, %6 : vector<20x64xf32>
    %8 = arith.mulf %7, %7 : vector<20x64xf32>
    %cst_2 = arith.constant dense<0.000000e+00> : vector<20xf32>
    %9 = vector.multi_reduction <add>, %8, %cst_2 [1] : vector<20x64xf32> to vector<20xf32>
    %10 = vector.shape_cast %9 : vector<20xf32> to vector<20x1xf32>
    %cst_3 = arith.constant 6.400000e+01 : f32
    %11 = vector.broadcast %cst_3 : f32 to vector<20x1xf32>
    %12 = arith.divf %10, %11 : vector<20x1xf32>
    %cst_4 = arith.constant 9.99999997E-7 : f32
    %13 = vector.broadcast %cst_4 : f32 to vector<20x1xf32>
    %14 = arith.addf %12, %13 : vector<20x1xf32>
    %15 = math.rsqrt %14 : vector<20x1xf32>
    %16 = vector.broadcast %15 : vector<20x1xf32> to vector<20x64xf32>
    %17 = arith.mulf %7, %16 : vector<20x64xf32>
    %c0_5 = arith.constant 0 : index
    %c0_6 = arith.constant 0 : index
    %18 = vector.load %arg2[%c0_5, %c0_6] : memref<1x64xf32, #tpu.memory_space<vmem>>, vector<1x64xf32>
    %19 = vector.broadcast %18 : vector<1x64xf32> to vector<20x64xf32>
    %20 = arith.mulf %17, %19 : vector<20x64xf32>
    %c0_7 = arith.constant 0 : index
    %c0_8 = arith.constant 0 : index
    %21 = vector.load %arg3[%c0_7, %c0_8] : memref<1x64xf32, #tpu.memory_space<vmem>>, vector<1x64xf32>
    %22 = vector.broadcast %21 : vector<1x64xf32> to vector<20x64xf32>
    %23 = arith.addf %20, %22 : vector<20x64xf32>
    %24 = arith.truncf %23 : vector<20x64xf32> to vector<20x64xbf16>
    %c0_9 = arith.constant 0 : index
    %c0_10 = arith.constant 0 : index
    %25 = vector.load %arg4[%c0_9, %c0_10] : memref<20x64xbf16, #tpu.memory_space<vmem>>, vector<20x64xbf16>
    tpu.vector_store %arg4[%c0_9, %c0_10], %24 {strides = array<i32>} : memref<20x64xbf16, #tpu.memory_space<vmem>>, vector<20x64xbf16>,
    return
  }
  func.func @transform_0(%arg0: i32) -> (i32, i32) {
    %c0_i32 = arith.constant 0 : i32
    %c0_i32_0 = arith.constant 0 : i32
    return %arg0, %c0_i32 : i32, i32
  }
  func.func @transform_1(%arg0: i32) -> (i32, i32) {
    %c0_i32 = arith.constant 0 : i32
    %c0_i32_0 = arith.constant 0 : i32
    %c0_i32_1 = arith.constant 0 : i32
    return %c0_i32, %c0_i32_0 : i32, i32
  }
  func.func @transform_2(%arg0: i32) -> (i32, i32) {
    %c0_i32 = arith.constant 0 : i32
    %c0_i32_0 = arith.constant 0 : i32
    %c0_i32_1 = arith.constant 0 : i32
    return %c0_i32, %c0_i32_0 : i32, i32
  }
  func.func @transform_3(%arg0: i32) -> (i32, i32) {
    %c0_i32 = arith.constant 0 : i32
    %c0_i32_0 = arith.constant 0 : i32
    return %arg0, %c0_i32 : i32, i32
  }
}

module attributes {stable_mosaic.version = 11 : i64} {
  func.func @_linear_kernel(%arg0: i32, %arg1: i32, %arg2: memref<20x64xbf16, #tpu.memory_space<vmem>>, %arg3: memref<64x192xbf16, #tpu.memory_space<vmem>>, %arg4: memref<1x192xf32, #tpu.memory_space<vmem>>, %arg5: memref<20x192xbf16, #tpu.memory_space<vmem>>) attributes {dimension_semantics = [#tpu.dimension_semantics<parallel>, #tpu.dimension_semantics<parallel>], iteration_bounds = array<i64: 1, 1>, scalar_prefetch = 0 : i64, scratch_operands = 0 : i64, tpu.core_type = #tpu.core_type<tc>, window_params = [{transform_indices = @transform_0, window_bounds = array<i64: 20, 64>}, {transform_indices = @transform_1, window_bounds = array<i64: 64, 192>}, {transform_indices = @transform_2, window_bounds = array<i64: 1, 192>}, {transform_indices = @transform_3, window_bounds = array<i64: 20, 192>}]} {
    %c0 = arith.constant 0 : index
    %c0_0 = arith.constant 0 : index
    %0 = vector.load %arg2[%c0, %c0_0] : memref<20x64xbf16, #tpu.memory_space<vmem>>, vector<20x64xbf16>
    %c0_1 = arith.constant 0 : index
    %c0_2 = arith.constant 0 : index
    %1 = vector.load %arg3[%c0_1, %c0_2] : memref<64x192xbf16, #tpu.memory_space<vmem>>, vector<64x192xbf16>
    %cst = arith.constant dense<0.000000e+00> : vector<20x192xf32>
    %2 = tpu.matmul %0, %1, %cst {dimension_numbers = #tpu.dot_dimension_numbers<[1], [0], [0], [1], [0, 0, 1, 1], [], []>} : vector<20x64xbf16>, vector<64x192xbf16>, vector<20x192xf32> -> vector<20x192xf32>
    %c0_3 = arith.constant 0 : index
    %c0_4 = arith.constant 0 : index
    %3 = vector.load %arg4[%c0_3, %c0_4] : memref<1x192xf32, #tpu.memory_space<vmem>>, vector<1x192xf32>
    %4 = vector.broadcast %3 : vector<1x192xf32> to vector<20x192xf32>
    %5 = arith.addf %2, %4 : vector<20x192xf32>
    %6 = arith.truncf %5 : vector<20x192xf32> to vector<20x192xbf16>
    %c0_5 = arith.constant 0 : index
    %c0_6 = arith.constant 0 : index
    %7 = vector.load %arg5[%c0_5, %c0_6] : memref<20x192xbf16, #tpu.memory_space<vmem>>, vector<20x192xbf16>
    tpu.vector_store %arg5[%c0_5, %c0_6], %6 {strides = array<i32>} : memref<20x192xbf16, #tpu.memory_space<vmem>>, vector<20x192xbf16>,
    return
  }
  func.func @transform_0(%arg0: i32, %arg1: i32) -> (i32, i32) {
    %c0_i32 = arith.constant 0 : i32
    %c0_i32_0 = arith.constant 0 : i32
    return %arg0, %c0_i32 : i32, i32
  }
  func.func @transform_1(%arg0: i32, %arg1: i32) -> (i32, i32) {
    %c0_i32 = arith.constant 0 : i32
    %c0_i32_0 = arith.constant 0 : i32
    return %c0_i32, %arg1 : i32, i32
  }
  func.func @transform_2(%arg0: i32, %arg1: i32) -> (i32, i32) {
    %c0_i32 = arith.constant 0 : i32
    %c0_i32_0 = arith.constant 0 : i32
    return %c0_i32, %arg1 : i32, i32
  }
  func.func @transform_3(%arg0: i32, %arg1: i32) -> (i32, i32) {
    %c0_i32 = arith.constant 0 : i32
    return %arg0, %arg1 : i32, i32
  }
}

module attributes {stable_mosaic.version = 11 : i64} {
  func.func @_attn_kernel(%arg0: i32, %arg1: memref<4x5x192xbf16, #tpu.memory_space<vmem>>, %arg2: memref<4x5x64xbf16, #tpu.memory_space<vmem>>) attributes {dimension_semantics = [#tpu.dimension_semantics<parallel>], iteration_bounds = array<i64: 1>, scalar_prefetch = 0 : i64, scratch_operands = 0 : i64, tpu.core_type = #tpu.core_type<tc>, window_params = [{transform_indices = @transform_0, window_bounds = array<i64: 4, 5, 192>}, {transform_indices = @transform_1, window_bounds = array<i64: 4, 5, 64>}]} {
    %c0 = arith.constant 0 : index
    %c0_0 = arith.constant 0 : index
    %c0_1 = arith.constant 0 : index
    %0 = vector.load %arg1[%c0, %c0_0, %c0_1] : memref<4x5x192xbf16, #tpu.memory_space<vmem>>, vector<4x5x16xbf16>
    %cst = arith.constant 2.500000e-01 : bf16
    %1 = vector.broadcast %cst : bf16 to vector<4x5x16xbf16>
    %2 = arith.mulf %0, %1 : vector<4x5x16xbf16>
    %c0_2 = arith.constant 0 : index
    %c0_3 = arith.constant 0 : index
    %c64 = arith.constant 64 : index
    %3 = vector.load %arg1[%c0_2, %c0_3, %c64] : memref<4x5x192xbf16, #tpu.memory_space<vmem>>, vector<4x5x16xbf16>
    %c0_4 = arith.constant 0 : index
    %c0_5 = arith.constant 0 : index
    %c128 = arith.constant 128 : index
    %4 = vector.load %arg1[%c0_4, %c0_5, %c128] : memref<4x5x192xbf16, #tpu.memory_space<vmem>>, vector<4x5x16xbf16>
    "tpu.trace_start"() <{level = 10 : i32, message = "gqd,gkd->gqk"}> : () -> ()
    %cst_6 = arith.constant dense<0.000000e+00> : vector<4x5x5xf32>
    %5 = tpu.matmul %2, %3, %cst_6 {dimension_numbers = #tpu.dot_dimension_numbers<[2], [2], [1], [1], [0, 0, 0, 1, 1, 1], [0], [0]>} : vector<4x5x16xbf16>, vector<4x5x16xbf16>, vector<4x5x5xf32> -> vector<4x5x5xf32>
    "tpu.trace_stop"() : () -> ()
    %cst_7 = arith.constant dense<0xFF800000> : vector<4x5xf32>
    %6 = vector.multi_reduction <maximumf>, %5, %cst_7 [2] : vector<4x5x5xf32> to vector<4x5xf32>
    %7 = vector.shape_cast %6 : vector<4x5xf32> to vector<4x5x1xf32>
    %8 = vector.broadcast %7 : vector<4x5x1xf32> to vector<4x5x5xf32>
    %9 = arith.subf %5, %8 : vector<4x5x5xf32>
    %10 = math.exp %9 : vector<4x5x5xf32>
    %cst_8 = arith.constant dense<0.000000e+00> : vector<4x5xf32>
    %11 = vector.multi_reduction <add>, %10, %cst_8 [2] : vector<4x5x5xf32> to vector<4x5xf32>
    %12 = vector.shape_cast %11 : vector<4x5xf32> to vector<4x5x1xf32>
    %13 = tpu.reciprocal %12 {approx = true} : vector<4x5x1xf32> -> vector<4x5x1xf32>
    %14 = vector.broadcast %13 : vector<4x5x1xf32> to vector<4x5x5xf32>
    %15 = arith.mulf %10, %14 : vector<4x5x5xf32>
    %16 = arith.truncf %15 : vector<4x5x5xf32> to vector<4x5x5xbf16>
    "tpu.trace_start"() <{level = 10 : i32, message = "gqk,gkd->gqd"}> : () -> ()
    %cst_9 = arith.constant dense<0.000000e+00> : vector<4x5x16xf32>
    %17 = tpu.matmul %16, %4, %cst_9 {dimension_numbers = #tpu.dot_dimension_numbers<[2], [1], [1], [2], [0, 0, 0, 1, 1, 2], [0], [0]>} : vector<4x5x5xbf16>, vector<4x5x16xbf16>, vector<4x5x16xf32> -> vector<4x5x16xf32>
    "tpu.trace_stop"() : () -> ()
    %18 = arith.truncf %17 : vector<4x5x16xf32> to vector<4x5x16xbf16>
    %c0_10 = arith.constant 0 : index
    %c0_11 = arith.constant 0 : index
    %c0_12 = arith.constant 0 : index
    %19 = vector.load %arg2[%c0_10, %c0_11, %c0_12] : memref<4x5x64xbf16, #tpu.memory_space<vmem>>, vector<4x5x16xbf16>
    tpu.vector_store %arg2[%c0_10, %c0_11, %c0_12], %18 {strides = array<i32>} : memref<4x5x64xbf16, #tpu.memory_space<vmem>>, vector<4x5x16xbf16>,
    %c0_13 = arith.constant 0 : index
    %c0_14 = arith.constant 0 : index
    %c16 = arith.constant 16 : index
    %20 = vector.load %arg1[%c0_13, %c0_14, %c16] : memref<4x5x192xbf16, #tpu.memory_space<vmem>>, vector<4x5x16xbf16>
    %cst_15 = arith.constant 2.500000e-01 : bf16
    %21 = vector.broadcast %cst_15 : bf16 to vector<4x5x16xbf16>
    %22 = arith.mulf %20, %21 : vector<4x5x16xbf16>
    %c0_16 = arith.constant 0 : index
    %c0_17 = arith.constant 0 : index
    %c80 = arith.constant 80 : index
    %23 = vector.load %arg1[%c0_16, %c0_17, %c80] : memref<4x5x192xbf16, #tpu.memory_space<vmem>>, vector<4x5x16xbf16>
    %c0_18 = arith.constant 0 : index
    %c0_19 = arith.constant 0 : index
    %c144 = arith.constant 144 : index
    %24 = vector.load %arg1[%c0_18, %c0_19, %c144] : memref<4x5x192xbf16, #tpu.memory_space<vmem>>, vector<4x5x16xbf16>
    "tpu.trace_start"() <{level = 10 : i32, message = "gqd,gkd->gqk"}> : () -> ()
    %cst_20 = arith.constant dense<0.000000e+00> : vector<4x5x5xf32>
    %25 = tpu.matmul %22, %23, %cst_20 {dimension_numbers = #tpu.dot_dimension_numbers<[2], [2], [1], [1], [0, 0, 0, 1, 1, 1], [0], [0]>} : vector<4x5x16xbf16>, vector<4x5x16xbf16>, vector<4x5x5xf32> -> vector<4x5x5xf32>
    "tpu.trace_stop"() : () -> ()
    %cst_21 = arith.constant dense<0xFF800000> : vector<4x5xf32>
    %26 = vector.multi_reduction <maximumf>, %25, %cst_21 [2] : vector<4x5x5xf32> to vector<4x5xf32>
    %27 = vector.shape_cast %26 : vector<4x5xf32> to vector<4x5x1xf32>
    %28 = vector.broadcast %27 : vector<4x5x1xf32> to vector<4x5x5xf32>
    %29 = arith.subf %25, %28 : vector<4x5x5xf32>
    %30 = math.exp %29 : vector<4x5x5xf32>
    %cst_22 = arith.constant dense<0.000000e+00> : vector<4x5xf32>
    %31 = vector.multi_reduction <add>, %30, %cst_22 [2] : vector<4x5x5xf32> to vector<4x5xf32>
    %32 = vector.shape_cast %31 : vector<4x5xf32> to vector<4x5x1xf32>
    %33 = tpu.reciprocal %32 {approx = true} : vector<4x5x1xf32> -> vector<4x5x1xf32>
    %34 = vector.broadcast %33 : vector<4x5x1xf32> to vector<4x5x5xf32>
    %35 = arith.mulf %30, %34 : vector<4x5x5xf32>
    %36 = arith.truncf %35 : vector<4x5x5xf32> to vector<4x5x5xbf16>
    "tpu.trace_start"() <{level = 10 : i32, message = "gqk,gkd->gqd"}> : () -> ()
    %cst_23 = arith.constant dense<0.000000e+00> : vector<4x5x16xf32>
    %37 = tpu.matmul %36, %24, %cst_23 {dimension_numbers = #tpu.dot_dimension_numbers<[2], [1], [1], [2], [0, 0, 0, 1, 1, 2], [0], [0]>} : vector<4x5x5xbf16>, vector<4x5x16xbf16>, vector<4x5x16xf32> -> vector<4x5x16xf32>
    "tpu.trace_stop"() : () -> ()
    %38 = arith.truncf %37 : vector<4x5x16xf32> to vector<4x5x16xbf16>
    %c0_24 = arith.constant 0 : index
    %c0_25 = arith.constant 0 : index
    %c16_26 = arith.constant 16 : index
    %39 = vector.load %arg2[%c0_24, %c0_25, %c16_26] : memref<4x5x64xbf16, #tpu.memory_space<vmem>>, vector<4x5x16xbf16>
    tpu.vector_store %arg2[%c0_24, %c0_25, %c16_26], %38 {strides = array<i32>} : memref<4x5x64xbf16, #tpu.memory_space<vmem>>, vector<4x5x16xbf16>,
    %c0_27 = arith.constant 0 : index
    %c0_28 = arith.constant 0 : index
    %c32 = arith.constant 32 : index
    %40 = vector.load %arg1[%c0_27, %c0_28, %c32] : memref<4x5x192xbf16, #tpu.memory_space<vmem>>, vector<4x5x16xbf16>
    %cst_29 = arith.constant 2.500000e-01 : bf16
    %41 = vector.broadcast %cst_29 : bf16 to vector<4x5x16xbf16>
    %42 = arith.mulf %40, %41 : vector<4x5x16xbf16>
    %c0_30 = arith.constant 0 : index
    %c0_31 = arith.constant 0 : index
    %c96 = arith.constant 96 : index
    %43 = vector.load %arg1[%c0_30, %c0_31, %c96] : memref<4x5x192xbf16, #tpu.memory_space<vmem>>, vector<4x5x16xbf16>
    %c0_32 = arith.constant 0 : index
    %c0_33 = arith.constant 0 : index
    %c160 = arith.constant 160 : index
    %44 = vector.load %arg1[%c0_32, %c0_33, %c160] : memref<4x5x192xbf16, #tpu.memory_space<vmem>>, vector<4x5x16xbf16>
    "tpu.trace_start"() <{level = 10 : i32, message = "gqd,gkd->gqk"}> : () -> ()
    %cst_34 = arith.constant dense<0.000000e+00> : vector<4x5x5xf32>
    %45 = tpu.matmul %42, %43, %cst_34 {dimension_numbers = #tpu.dot_dimension_numbers<[2], [2], [1], [1], [0, 0, 0, 1, 1, 1], [0], [0]>} : vector<4x5x16xbf16>, vector<4x5x16xbf16>, vector<4x5x5xf32> -> vector<4x5x5xf32>
    "tpu.trace_stop"() : () -> ()
    %cst_35 = arith.constant dense<0xFF800000> : vector<4x5xf32>
    %46 = vector.multi_reduction <maximumf>, %45, %cst_35 [2] : vector<4x5x5xf32> to vector<4x5xf32>
    %47 = vector.shape_cast %46 : vector<4x5xf32> to vector<4x5x1xf32>
    %48 = vector.broadcast %47 : vector<4x5x1xf32> to vector<4x5x5xf32>
    %49 = arith.subf %45, %48 : vector<4x5x5xf32>
    %50 = math.exp %49 : vector<4x5x5xf32>
    %cst_36 = arith.constant dense<0.000000e+00> : vector<4x5xf32>
    %51 = vector.multi_reduction <add>, %50, %cst_36 [2] : vector<4x5x5xf32> to vector<4x5xf32>
    %52 = vector.shape_cast %51 : vector<4x5xf32> to vector<4x5x1xf32>
    %53 = tpu.reciprocal %52 {approx = true} : vector<4x5x1xf32> -> vector<4x5x1xf32>
    %54 = vector.broadcast %53 : vector<4x5x1xf32> to vector<4x5x5xf32>
    %55 = arith.mulf %50, %54 : vector<4x5x5xf32>
    %56 = arith.truncf %55 : vector<4x5x5xf32> to vector<4x5x5xbf16>
    "tpu.trace_start"() <{level = 10 : i32, message = "gqk,gkd->gqd"}> : () -> ()
    %cst_37 = arith.constant dense<0.000000e+00> : vector<4x5x16xf32>
    %57 = tpu.matmul %56, %44, %cst_37 {dimension_numbers = #tpu.dot_dimension_numbers<[2], [1], [1], [2], [0, 0, 0, 1, 1, 2], [0], [0]>} : vector<4x5x5xbf16>, vector<4x5x16xbf16>, vector<4x5x16xf32> -> vector<4x5x16xf32>
    "tpu.trace_stop"() : () -> ()
    %58 = arith.truncf %57 : vector<4x5x16xf32> to vector<4x5x16xbf16>
    %c0_38 = arith.constant 0 : index
    %c0_39 = arith.constant 0 : index
    %c32_40 = arith.constant 32 : index
    %59 = vector.load %arg2[%c0_38, %c0_39, %c32_40] : memref<4x5x64xbf16, #tpu.memory_space<vmem>>, vector<4x5x16xbf16>
    tpu.vector_store %arg2[%c0_38, %c0_39, %c32_40], %58 {strides = array<i32>} : memref<4x5x64xbf16, #tpu.memory_space<vmem>>, vector<4x5x16xbf16>,
    %c0_41 = arith.constant 0 : index
    %c0_42 = arith.constant 0 : index
    %c48 = arith.constant 48 : index
    %60 = vector.load %arg1[%c0_41, %c0_42, %c48] : memref<4x5x192xbf16, #tpu.memory_space<vmem>>, vector<4x5x16xbf16>
    %cst_43 = arith.constant 2.500000e-01 : bf16
    %61 = vector.broadcast %cst_43 : bf16 to vector<4x5x16xbf16>
    %62 = arith.mulf %60, %61 : vector<4x5x16xbf16>
    %c0_44 = arith.constant 0 : index
    %c0_45 = arith.constant 0 : index
    %c112 = arith.constant 112 : index
    %63 = vector.load %arg1[%c0_44, %c0_45, %c112] : memref<4x5x192xbf16, #tpu.memory_space<vmem>>, vector<4x5x16xbf16>
    %c0_46 = arith.constant 0 : index
    %c0_47 = arith.constant 0 : index
    %c176 = arith.constant 176 : index
    %64 = vector.load %arg1[%c0_46, %c0_47, %c176] : memref<4x5x192xbf16, #tpu.memory_space<vmem>>, vector<4x5x16xbf16>
    "tpu.trace_start"() <{level = 10 : i32, message = "gqd,gkd->gqk"}> : () -> ()
    %cst_48 = arith.constant dense<0.000000e+00> : vector<4x5x5xf32>
    %65 = tpu.matmul %62, %63, %cst_48 {dimension_numbers = #tpu.dot_dimension_numbers<[2], [2], [1], [1], [0, 0, 0, 1, 1, 1], [0], [0]>} : vector<4x5x16xbf16>, vector<4x5x16xbf16>, vector<4x5x5xf32> -> vector<4x5x5xf32>
    "tpu.trace_stop"() : () -> ()
    %cst_49 = arith.constant dense<0xFF800000> : vector<4x5xf32>
    %66 = vector.multi_reduction <maximumf>, %65, %cst_49 [2] : vector<4x5x5xf32> to vector<4x5xf32>
    %67 = vector.shape_cast %66 : vector<4x5xf32> to vector<4x5x1xf32>
    %68 = vector.broadcast %67 : vector<4x5x1xf32> to vector<4x5x5xf32>
    %69 = arith.subf %65, %68 : vector<4x5x5xf32>
    %70 = math.exp %69 : vector<4x5x5xf32>
    %cst_50 = arith.constant dense<0.000000e+00> : vector<4x5xf32>
    %71 = vector.multi_reduction <add>, %70, %cst_50 [2] : vector<4x5x5xf32> to vector<4x5xf32>
    %72 = vector.shape_cast %71 : vector<4x5xf32> to vector<4x5x1xf32>
    %73 = tpu.reciprocal %72 {approx = true} : vector<4x5x1xf32> -> vector<4x5x1xf32>
    %74 = vector.broadcast %73 : vector<4x5x1xf32> to vector<4x5x5xf32>
    %75 = arith.mulf %70, %74 : vector<4x5x5xf32>
    %76 = arith.truncf %75 : vector<4x5x5xf32> to vector<4x5x5xbf16>
    "tpu.trace_start"() <{level = 10 : i32, message = "gqk,gkd->gqd"}> : () -> ()
    %cst_51 = arith.constant dense<0.000000e+00> : vector<4x5x16xf32>
    %77 = tpu.matmul %76, %64, %cst_51 {dimension_numbers = #tpu.dot_dimension_numbers<[2], [1], [1], [2], [0, 0, 0, 1, 1, 2], [0], [0]>} : vector<4x5x5xbf16>, vector<4x5x16xbf16>, vector<4x5x16xf32> -> vector<4x5x16xf32>
    "tpu.trace_stop"() : () -> ()
    %78 = arith.truncf %77 : vector<4x5x16xf32> to vector<4x5x16xbf16>
    %c0_52 = arith.constant 0 : index
    %c0_53 = arith.constant 0 : index
    %c48_54 = arith.constant 48 : index
    %79 = vector.load %arg2[%c0_52, %c0_53, %c48_54] : memref<4x5x64xbf16, #tpu.memory_space<vmem>>, vector<4x5x16xbf16>
    tpu.vector_store %arg2[%c0_52, %c0_53, %c48_54], %78 {strides = array<i32>} : memref<4x5x64xbf16, #tpu.memory_space<vmem>>, vector<4x5x16xbf16>,
    return
  }
  func.func @transform_0(%arg0: i32) -> (i32, i32, i32) {
    %c0_i32 = arith.constant 0 : i32
    %c0_i32_0 = arith.constant 0 : i32
    %c0_i32_1 = arith.constant 0 : i32
    return %arg0, %c0_i32, %c0_i32_0 : i32, i32, i32
  }
  func.func @transform_1(%arg0: i32) -> (i32, i32, i32) {
    %c0_i32 = arith.constant 0 : i32
    %c0_i32_0 = arith.constant 0 : i32
    %c0_i32_1 = arith.constant 0 : i32
    return %arg0, %c0_i32, %c0_i32_0 : i32, i32, i32
  }
}

module attributes {stable_mosaic.version = 11 : i64} {
  func.func @_linear_kernel(%arg0: i32, %arg1: i32, %arg2: memref<20x64xbf16, #tpu.memory_space<vmem>>, %arg3: memref<64x64xbf16, #tpu.memory_space<vmem>>, %arg4: memref<1x64xf32, #tpu.memory_space<vmem>>, %arg5: memref<20x64xbf16, #tpu.memory_space<vmem>>) attributes {dimension_semantics = [#tpu.dimension_semantics<parallel>, #tpu.dimension_semantics<parallel>], iteration_bounds = array<i64: 1, 1>, scalar_prefetch = 0 : i64, scratch_operands = 0 : i64, tpu.core_type = #tpu.core_type<tc>, window_params = [{transform_indices = @transform_0, window_bounds = array<i64: 20, 64>}, {transform_indices = @transform_1, window_bounds = array<i64: 64, 64>}, {transform_indices = @transform_2, window_bounds = array<i64: 1, 64>}, {transform_indices = @transform_3, window_bounds = array<i64: 20, 64>}]} {
    %c0 = arith.constant 0 : index
    %c0_0 = arith.constant 0 : index
    %0 = vector.load %arg2[%c0, %c0_0] : memref<20x64xbf16, #tpu.memory_space<vmem>>, vector<20x64xbf16>
    %c0_1 = arith.constant 0 : index
    %c0_2 = arith.constant 0 : index
    %1 = vector.load %arg3[%c0_1, %c0_2] : memref<64x64xbf16, #tpu.memory_space<vmem>>, vector<64x64xbf16>
    %cst = arith.constant dense<0.000000e+00> : vector<20x64xf32>
    %2 = tpu.matmul %0, %1, %cst {dimension_numbers = #tpu.dot_dimension_numbers<[1], [0], [0], [1], [0, 0, 1, 1], [], []>} : vector<20x64xbf16>, vector<64x64xbf16>, vector<20x64xf32> -> vector<20x64xf32>
    %c0_3 = arith.constant 0 : index
    %c0_4 = arith.constant 0 : index
    %3 = vector.load %arg4[%c0_3, %c0_4] : memref<1x64xf32, #tpu.memory_space<vmem>>, vector<1x64xf32>
    %4 = vector.broadcast %3 : vector<1x64xf32> to vector<20x64xf32>
    %5 = arith.addf %2, %4 : vector<20x64xf32>
    %6 = arith.truncf %5 : vector<20x64xf32> to vector<20x64xbf16>
    %c0_5 = arith.constant 0 : index
    %c0_6 = arith.constant 0 : index
    %7 = vector.load %arg5[%c0_5, %c0_6] : memref<20x64xbf16, #tpu.memory_space<vmem>>, vector<20x64xbf16>
    tpu.vector_store %arg5[%c0_5, %c0_6], %6 {strides = array<i32>} : memref<20x64xbf16, #tpu.memory_space<vmem>>, vector<20x64xbf16>,
    return
  }
  func.func @transform_0(%arg0: i32, %arg1: i32) -> (i32, i32) {
    %c0_i32 = arith.constant 0 : i32
    %c0_i32_0 = arith.constant 0 : i32
    return %arg0, %c0_i32 : i32, i32
  }
  func.func @transform_1(%arg0: i32, %arg1: i32) -> (i32, i32) {
    %c0_i32 = arith.constant 0 : i32
    %c0_i32_0 = arith.constant 0 : i32
    return %c0_i32, %arg1 : i32, i32
  }
  func.func @transform_2(%arg0: i32, %arg1: i32) -> (i32, i32) {
    %c0_i32 = arith.constant 0 : i32
    %c0_i32_0 = arith.constant 0 : i32
    return %c0_i32, %arg1 : i32, i32
  }
  func.func @transform_3(%arg0: i32, %arg1: i32) -> (i32, i32) {
    %c0_i32 = arith.constant 0 : i32
    return %arg0, %arg1 : i32, i32
  }
}

module attributes {stable_mosaic.version = 11 : i64} {
  func.func @_layernorm_kernel(%arg0: i32, %arg1: memref<18x64xbf16, #tpu.memory_space<vmem>>, %arg2: memref<1x64xf32, #tpu.memory_space<vmem>>, %arg3: memref<1x64xf32, #tpu.memory_space<vmem>>, %arg4: memref<18x64xbf16, #tpu.memory_space<vmem>>) attributes {dimension_semantics = [#tpu.dimension_semantics<parallel>], iteration_bounds = array<i64: 1>, scalar_prefetch = 0 : i64, scratch_operands = 0 : i64, tpu.core_type = #tpu.core_type<tc>, window_params = [{transform_indices = @transform_0, window_bounds = array<i64: 18, 64>}, {pipeline_mode = #tpu.pipeline_mode<synchronous>, transform_indices = @transform_1, window_bounds = array<i64: 1, 64>}, {pipeline_mode = #tpu.pipeline_mode<synchronous>, transform_indices = @transform_2, window_bounds = array<i64: 1, 64>}, {transform_indices = @transform_3, window_bounds = array<i64: 18, 64>}]} {
    %c0 = arith.constant 0 : index
    %c0_0 = arith.constant 0 : index
    %0 = vector.load %arg1[%c0, %c0_0] : memref<18x64xbf16, #tpu.memory_space<vmem>>, vector<18x64xbf16>
    %1 = arith.extf %0 : vector<18x64xbf16> to vector<18x64xf32>
    %cst = arith.constant dense<0.000000e+00> : vector<18xf32>
    %2 = vector.multi_reduction <add>, %1, %cst [1] : vector<18x64xf32> to vector<18xf32>
    %3 = vector.shape_cast %2 : vector<18xf32> to vector<18x1xf32>
    %cst_1 = arith.constant 6.400000e+01 : f32
    %4 = vector.broadcast %cst_1 : f32 to vector<18x1xf32>
    %5 = arith.divf %3, %4 : vector<18x1xf32>
    %6 = vector.broadcast %5 : vector<18x1xf32> to vector<18x64xf32>
    %7 = arith.subf %1, %6 : vector<18x64xf32>
    %8 = arith.mulf %7, %7 : vector<18x64xf32>
    %cst_2 = arith.constant dense<0.000000e+00> : vector<18xf32>
    %9 = vector.multi_reduction <add>, %8, %cst_2 [1] : vector<18x64xf32> to vector<18xf32>
    %10 = vector.shape_cast %9 : vector<18xf32> to vector<18x1xf32>
    %cst_3 = arith.constant 6.400000e+01 : f32
    %11 = vector.broadcast %cst_3 : f32 to vector<18x1xf32>
    %12 = arith.divf %10, %11 : vector<18x1xf32>
    %cst_4 = arith.constant 9.99999997E-7 : f32
    %13 = vector.broadcast %cst_4 : f32 to vector<18x1xf32>
    %14 = arith.addf %12, %13 : vector<18x1xf32>
    %15 = math.rsqrt %14 : vector<18x1xf32>
    %16 = vector.broadcast %15 : vector<18x1xf32> to vector<18x64xf32>
    %17 = arith.mulf %7, %16 : vector<18x64xf32>
    %c0_5 = arith.constant 0 : index
    %c0_6 = arith.constant 0 : index
    %18 = vector.load %arg2[%c0_5, %c0_6] : memref<1x64xf32, #tpu.memory_space<vmem>>, vector<1x64xf32>
    %19 = vector.broadcast %18 : vector<1x64xf32> to vector<18x64xf32>
    %20 = arith.mulf %17, %19 : vector<18x64xf32>
    %c0_7 = arith.constant 0 : index
    %c0_8 = arith.constant 0 : index
    %21 = vector.load %arg3[%c0_7, %c0_8] : memref<1x64xf32, #tpu.memory_space<vmem>>, vector<1x64xf32>
    %22 = vector.broadcast %21 : vector<1x64xf32> to vector<18x64xf32>
    %23 = arith.addf %20, %22 : vector<18x64xf32>
    %24 = arith.truncf %23 : vector<18x64xf32> to vector<18x64xbf16>
    %c0_9 = arith.constant 0 : index
    %c0_10 = arith.constant 0 : index
    %25 = vector.load %arg4[%c0_9, %c0_10] : memref<18x64xbf16, #tpu.memory_space<vmem>>, vector<18x64xbf16>
    tpu.vector_store %arg4[%c0_9, %c0_10], %24 {strides = array<i32>} : memref<18x64xbf16, #tpu.memory_space<vmem>>, vector<18x64xbf16>,
    return
  }
  func.func @transform_0(%arg0: i32) -> (i32, i32) {
    %c0_i32 = arith.constant 0 : i32
    %c0_i32_0 = arith.constant 0 : i32
    return %arg0, %c0_i32 : i32, i32
  }
  func.func @transform_1(%arg0: i32) -> (i32, i32) {
    %c0_i32 = arith.constant 0 : i32
    %c0_i32_0 = arith.constant 0 : i32
    %c0_i32_1 = arith.constant 0 : i32
    return %c0_i32, %c0_i32_0 : i32, i32
  }
  func.func @transform_2(%arg0: i32) -> (i32, i32) {
    %c0_i32 = arith.constant 0 : i32
    %c0_i32_0 = arith.constant 0 : i32
    %c0_i32_1 = arith.constant 0 : i32
    return %c0_i32, %c0_i32_0 : i32, i32
  }
  func.func @transform_3(%arg0: i32) -> (i32, i32) {
    %c0_i32 = arith.constant 0 : i32
    %c0_i32_0 = arith.constant 0 : i32
    return %arg0, %c0_i32 : i32, i32
  }
}

module attributes {stable_mosaic.version = 11 : i64} {
  func.func @_linear_kernel(%arg0: i32, %arg1: i32, %arg2: memref<18x64xbf16, #tpu.memory_space<vmem>>, %arg3: memref<64x256xbf16, #tpu.memory_space<vmem>>, %arg4: memref<1x256xf32, #tpu.memory_space<vmem>>, %arg5: memref<18x256xbf16, #tpu.memory_space<vmem>>) attributes {dimension_semantics = [#tpu.dimension_semantics<parallel>, #tpu.dimension_semantics<parallel>], iteration_bounds = array<i64: 1, 1>, scalar_prefetch = 0 : i64, scratch_operands = 0 : i64, tpu.core_type = #tpu.core_type<tc>, window_params = [{transform_indices = @transform_0, window_bounds = array<i64: 18, 64>}, {transform_indices = @transform_1, window_bounds = array<i64: 64, 256>}, {transform_indices = @transform_2, window_bounds = array<i64: 1, 256>}, {transform_indices = @transform_3, window_bounds = array<i64: 18, 256>}]} {
    %c0 = arith.constant 0 : index
    %c0_0 = arith.constant 0 : index
    %0 = vector.load %arg2[%c0, %c0_0] : memref<18x64xbf16, #tpu.memory_space<vmem>>, vector<18x64xbf16>
    %c0_1 = arith.constant 0 : index
    %c0_2 = arith.constant 0 : index
    %1 = vector.load %arg3[%c0_1, %c0_2] : memref<64x256xbf16, #tpu.memory_space<vmem>>, vector<64x256xbf16>
    %cst = arith.constant dense<0.000000e+00> : vector<18x256xf32>
    %2 = tpu.matmul %0, %1, %cst {dimension_numbers = #tpu.dot_dimension_numbers<[1], [0], [0], [1], [0, 0, 1, 1], [], []>} : vector<18x64xbf16>, vector<64x256xbf16>, vector<18x256xf32> -> vector<18x256xf32>
    %c0_3 = arith.constant 0 : index
    %c0_4 = arith.constant 0 : index
    %3 = vector.load %arg4[%c0_3, %c0_4] : memref<1x256xf32, #tpu.memory_space<vmem>>, vector<1x256xf32>
    %4 = vector.broadcast %3 : vector<1x256xf32> to vector<18x256xf32>
    %5 = arith.addf %2, %4 : vector<18x256xf32>
    %6 = arith.mulf %5, %5 : vector<18x256xf32>
    %7 = arith.mulf %5, %6 : vector<18x256xf32>
    %cst_5 = arith.constant 4.471500e-02 : f32
    %8 = vector.broadcast %cst_5 : f32 to vector<18x256xf32>
    %9 = arith.mulf %8, %7 : vector<18x256xf32>
    %10 = arith.addf %5, %9 : vector<18x256xf32>
    %cst_6 = arith.constant 0.797884583 : f32
    %11 = vector.broadcast %cst_6 : f32 to vector<18x256xf32>
    %12 = arith.mulf %11, %10 : vector<18x256xf32>
    %13 = math.tanh %12 : vector<18x256xf32>
    %cst_7 = arith.constant 1.000000e+00 : f32
    %14 = vector.broadcast %cst_7 : f32 to vector<18x256xf32>
    %15 = arith.addf %14, %13 : vector<18x256xf32>
    %cst_8 = arith.constant 5.000000e-01 : f32
    %16 = vector.broadcast %cst_8 : f32 to vector<18x256xf32>
    %17 = arith.mulf %16, %15 : vector<18x256xf32>
    %18 = arith.mulf %5, %17 : vector<18x256xf32>
    %19 = arith.truncf %18 : vector<18x256xf32> to vector<18x256xbf16>
    %c0_9 = arith.constant 0 : index
    %c0_10 = arith.constant 0 : index
    %20 = vector.load %arg5[%c0_9, %c0_10] : memref<18x256xbf16, #tpu.memory_space<vmem>>, vector<18x256xbf16>
    tpu.vector_store %arg5[%c0_9, %c0_10], %19 {strides = array<i32>} : memref<18x256xbf16, #tpu.memory_space<vmem>>, vector<18x256xbf16>,
    return
  }
  func.func @transform_0(%arg0: i32, %arg1: i32) -> (i32, i32) {
    %c0_i32 = arith.constant 0 : i32
    %c0_i32_0 = arith.constant 0 : i32
    return %arg0, %c0_i32 : i32, i32
  }
  func.func @transform_1(%arg0: i32, %arg1: i32) -> (i32, i32) {
    %c0_i32 = arith.constant 0 : i32
    %c0_i32_0 = arith.constant 0 : i32
    return %c0_i32, %arg1 : i32, i32
  }
  func.func @transform_2(%arg0: i32, %arg1: i32) -> (i32, i32) {
    %c0_i32 = arith.constant 0 : i32
    %c0_i32_0 = arith.constant 0 : i32
    return %c0_i32, %arg1 : i32, i32
  }
  func.func @transform_3(%arg0: i32, %arg1: i32) -> (i32, i32) {
    %c0_i32 = arith.constant 0 : i32
    return %arg0, %arg1 : i32, i32
  }
}

module attributes {stable_mosaic.version = 11 : i64} {
  func.func @_linear_kernel(%arg0: i32, %arg1: i32, %arg2: memref<18x256xbf16, #tpu.memory_space<vmem>>, %arg3: memref<256x64xbf16, #tpu.memory_space<vmem>>, %arg4: memref<1x64xf32, #tpu.memory_space<vmem>>, %arg5: memref<18x64xbf16, #tpu.memory_space<vmem>>, %arg6: memref<18x64xbf16, #tpu.memory_space<vmem>>) attributes {dimension_semantics = [#tpu.dimension_semantics<parallel>, #tpu.dimension_semantics<parallel>], iteration_bounds = array<i64: 1, 1>, scalar_prefetch = 0 : i64, scratch_operands = 0 : i64, tpu.core_type = #tpu.core_type<tc>, window_params = [{transform_indices = @transform_0, window_bounds = array<i64: 18, 256>}, {transform_indices = @transform_1, window_bounds = array<i64: 256, 64>}, {transform_indices = @transform_2, window_bounds = array<i64: 1, 64>}, {transform_indices = @transform_3, window_bounds = array<i64: 18, 64>}, {transform_indices = @transform_4, window_bounds = array<i64: 18, 64>}]} {
    %c0 = arith.constant 0 : index
    %c0_0 = arith.constant 0 : index
    %0 = vector.load %arg2[%c0, %c0_0] : memref<18x256xbf16, #tpu.memory_space<vmem>>, vector<18x256xbf16>
    %c0_1 = arith.constant 0 : index
    %c0_2 = arith.constant 0 : index
    %1 = vector.load %arg3[%c0_1, %c0_2] : memref<256x64xbf16, #tpu.memory_space<vmem>>, vector<256x64xbf16>
    %cst = arith.constant dense<0.000000e+00> : vector<18x64xf32>
    %2 = tpu.matmul %0, %1, %cst {dimension_numbers = #tpu.dot_dimension_numbers<[1], [0], [0], [1], [0, 0, 1, 1], [], []>} : vector<18x256xbf16>, vector<256x64xbf16>, vector<18x64xf32> -> vector<18x64xf32>
    %c0_3 = arith.constant 0 : index
    %c0_4 = arith.constant 0 : index
    %3 = vector.load %arg4[%c0_3, %c0_4] : memref<1x64xf32, #tpu.memory_space<vmem>>, vector<1x64xf32>
    %4 = vector.broadcast %3 : vector<1x64xf32> to vector<18x64xf32>
    %5 = arith.addf %2, %4 : vector<18x64xf32>
    %c0_5 = arith.constant 0 : index
    %c0_6 = arith.constant 0 : index
    %6 = vector.load %arg5[%c0_5, %c0_6] : memref<18x64xbf16, #tpu.memory_space<vmem>>, vector<18x64xbf16>
    %7 = arith.extf %6 : vector<18x64xbf16> to vector<18x64xf32>
    %8 = arith.addf %5, %7 : vector<18x64xf32>
    %9 = arith.truncf %8 : vector<18x64xf32> to vector<18x64xbf16>
    %c0_7 = arith.constant 0 : index
    %c0_8 = arith.constant 0 : index
    %10 = vector.load %arg6[%c0_7, %c0_8] : memref<18x64xbf16, #tpu.memory_space<vmem>>, vector<18x64xbf16>
    tpu.vector_store %arg6[%c0_7, %c0_8], %9 {strides = array<i32>} : memref<18x64xbf16, #tpu.memory_space<vmem>>, vector<18x64xbf16>,
    return
  }
  func.func @transform_0(%arg0: i32, %arg1: i32) -> (i32, i32) {
    %c0_i32 = arith.constant 0 : i32
    %c0_i32_0 = arith.constant 0 : i32
    return %arg0, %c0_i32 : i32, i32
  }
  func.func @transform_1(%arg0: i32, %arg1: i32) -> (i32, i32) {
    %c0_i32 = arith.constant 0 : i32
    %c0_i32_0 = arith.constant 0 : i32
    return %c0_i32, %arg1 : i32, i32
  }
  func.func @transform_2(%arg0: i32, %arg1: i32) -> (i32, i32) {
    %c0_i32 = arith.constant 0 : i32
    %c0_i32_0 = arith.constant 0 : i32
    return %c0_i32, %arg1 : i32, i32
  }
  func.func @transform_3(%arg0: i32, %arg1: i32) -> (i32, i32) {
    %c0_i32 = arith.constant 0 : i32
    return %arg0, %arg1 : i32, i32
  }
  func.func @transform_4(%arg0: i32, %arg1: i32) -> (i32, i32) {
    %c0_i32 = arith.constant 0 : i32
    return %arg0, %arg1 : i32, i32
  }
}

module attributes {stable_mosaic.version = 11 : i64} {
  func.func @_linear_kernel(%arg0: i32, %arg1: i32, %arg2: memref<2x64xbf16, #tpu.memory_space<vmem>>, %arg3: memref<64x10xbf16, #tpu.memory_space<vmem>>, %arg4: memref<1x10xf32, #tpu.memory_space<vmem>>, %arg5: memref<2x10xf32, #tpu.memory_space<vmem>>) attributes {dimension_semantics = [#tpu.dimension_semantics<parallel>, #tpu.dimension_semantics<parallel>], iteration_bounds = array<i64: 1, 1>, scalar_prefetch = 0 : i64, scratch_operands = 0 : i64, tpu.core_type = #tpu.core_type<tc>, window_params = [{transform_indices = @transform_0, window_bounds = array<i64: 2, 64>}, {transform_indices = @transform_1, window_bounds = array<i64: 64, 10>}, {transform_indices = @transform_2, window_bounds = array<i64: 1, 10>}, {transform_indices = @transform_3, window_bounds = array<i64: 2, 10>}]} {
    %c0 = arith.constant 0 : index
    %c0_0 = arith.constant 0 : index
    %0 = vector.load %arg2[%c0, %c0_0] : memref<2x64xbf16, #tpu.memory_space<vmem>>, vector<2x64xbf16>
    %c0_1 = arith.constant 0 : index
    %c0_2 = arith.constant 0 : index
    %1 = vector.load %arg3[%c0_1, %c0_2] : memref<64x10xbf16, #tpu.memory_space<vmem>>, vector<64x10xbf16>
    %cst = arith.constant dense<0.000000e+00> : vector<2x10xf32>
    %2 = tpu.matmul %0, %1, %cst {dimension_numbers = #tpu.dot_dimension_numbers<[1], [0], [0], [1], [0, 0, 1, 1], [], []>} : vector<2x64xbf16>, vector<64x10xbf16>, vector<2x10xf32> -> vector<2x10xf32>
    %c0_3 = arith.constant 0 : index
    %c0_4 = arith.constant 0 : index
    %3 = vector.load %arg4[%c0_3, %c0_4] : memref<1x10xf32, #tpu.memory_space<vmem>>, vector<1x10xf32>
    %4 = vector.broadcast %3 : vector<1x10xf32> to vector<2x10xf32>
    %5 = arith.addf %2, %4 : vector<2x10xf32>
    %c0_5 = arith.constant 0 : index
    %c0_6 = arith.constant 0 : index
    %6 = vector.load %arg5[%c0_5, %c0_6] : memref<2x10xf32, #tpu.memory_space<vmem>>, vector<2x10xf32>
    tpu.vector_store %arg5[%c0_5, %c0_6], %5 {strides = array<i32>} : memref<2x10xf32, #tpu.memory_space<vmem>>, vector<2x10xf32>,
    return
  }
  func.func @transform_0(%arg0: i32, %arg1: i32) -> (i32, i32) {
    %c0_i32 = arith.constant 0 : i32
    %c0_i32_0 = arith.constant 0 : i32
    return %arg0, %c0_i32 : i32, i32
  }
  func.func @transform_1(%arg0: i32, %arg1: i32) -> (i32, i32) {
    %c0_i32 = arith.constant 0 : i32
    %c0_i32_0 = arith.constant 0 : i32
    return %c0_i32, %arg1 : i32, i32
  }
  func.func @transform_2(%arg0: i32, %arg1: i32) -> (i32, i32) {
    %c0_i32 = arith.constant 0 : i32
    %c0_i32_0 = arith.constant 0 : i32
    return %c0_i32, %arg1 : i32, i32
  }
  func.func @transform_3(%arg0: i32, %arg1: i32) -> (i32, i32) {
    %c0_i32 = arith.constant 0 : i32
    return %arg0, %arg1 : i32, i32
  }
}

</mosaic_0001>

<bundles_post_ra>
// kernel: model_forward.28
= control target key start
LH: loop header
LB: loop body
LE: loop exit
PB: predicated region body
PF: predicated region fallthrough
CT: control target
= control target key end

     0   :  { %vm18_vm0 = vcmask 523264   ;;  %vm72_vm1 = vcmask 519168   ;;  %s132_s0 = inlined_call_operand.vmem [shape: bf16[16,64], index: 0, kind: input, shape index: {}]   ;;  %s133_s1 = inlined_call_operand.vmem [shape: f32[1,64], index: 1, kind: input, shape index: {}]   ;;  %s134_s2 = inlined_call_operand.vmem [shape: f32[1,64], index: 2, kind: input, shape index: {}]   ;;  %s135_s3 = inlined_call_operand.vmem [shape: bf16[16,64], index: 3, kind: output, shape index: {}]  }
   0x1   :  { %v86_v0 = vld [vmem:[%s132_s0] sm:$0xff]  }
   0x2   :  { %v87_v1 = vunpack.c.l.bf16 %v86_v0  ;;  %v88_v2 = vunpack.c.h.bf16 %v86_v0  ;;  %v79_v22 = vld [vmem:[%s133_s1] ss:$0 sm:$0xff] }
   0x3   :  { %v80_v24 = vld [vmem:[%s134_s2] ss:$0 sm:$0xff] }
   0x4   :  { %v19_v3 = vsel %vm18_vm0, %v87_v1, 0.0  ;;  %v22_v4 = vsel %vm18_vm0, %v88_v2, 0.0 }
   0x5   :  { %20 = vadd.xlane.f32.xlu0 %v19_v3 }
   0x9   :  { %23 = vadd.xlane.f32.xlu0 %v22_v4 }
  0x92   :  { %v21_v5 = vpop.xlane.xlu0 %20 }
  0x93   :  { %v26_v6 = vmul.f32 0.015625, %v21_v5 }
  0x95   :  { %v28_v7 = vsub.f32 %v87_v1, %v26_v6 }
  0x96   :  { %v24_v8 = vpop.xlane.xlu0 %23 }
  0x97   :  { %v27_v9 = vmul.f32 0.015625, %v24_v8  ;;  %v30_v10 = vmul.f32 %v28_v7, %v28_v7 }
  0x99   :  { %v29_v11 = vsub.f32 %v88_v2, %v27_v9  ;;  %v32_v12 = vsel %vm18_vm0, %v30_v10, 0.0 }
  0x9a   :  { %33 = vadd.xlane.f32.xlu1 %v32_v12 }
  0x9b   :  { %v31_v13 = vmul.f32 %v29_v11, %v29_v11 }
  0x9d   :  { %v35_v14 = vsel %vm18_vm0, %v31_v13, 0.0 }
  0x9e   :  { %36 = vadd.xlane.f32.xlu1 %v35_v14 }
 0x127   :  { %v34_v15 = vpop.xlane.xlu1 %33 }
 0x128   :  { %v38_v16 = vmul.f32 0.015625, %v34_v15 }
 0x12a   :  { %v40_v17 = vadd.f32 1e-06, %v38_v16 }
 0x12b   :  { %v37_v18 = vpop.xlane.xlu1 %36 }
 0x12c   :  { %89 = vrsqrt.f32 %v40_v17  ;;  %v39_v19 = vmul.f32 0.015625, %v37_v18 }
 0x12e   :  { %v41_v20 = vadd.f32 1e-06, %v39_v19 }
 0x130   :  { %91 = vrsqrt.f32 %v41_v20 }
 0x136   :  { %v90_v21 = vpop.eup %89 }
 0x137   :  { %v44_v23 = vmul.f32 %v90_v21, %v28_v7 }
 0x139   :  { %v53_v25 = vmul.f32 %v79_v22, %v44_v23 }
 0x13a   :  { %v92_v26 = vpop.eup %91 }
 0x13b   :  { %v62_v27 = vadd.f32 %v80_v24, %v53_v25  ;;  %v45_v28 = vmul.f32 %v92_v26, %v29_v11 }
 0x13d   :  { %v83_v29 = vpack.c.bf16 %v62_v27, %v62_v27  ;;  %v54_v30 = vmul.f32 %v79_v22, %v45_v28 }
 0x13f   :  { %73 = vst.msk [vmem:[%s135_s3] sm:$0xf] %vm72_vm1, %v83_v29  ;;  %v63_v31 = vadd.f32 %v80_v24, %v54_v30 }
 0x141   :  { %v84_v32 = vpack.c.bf16 %v63_v31, %v63_v31 }
 0x143   :  { %74 = vst.msk [vmem:[%s135_s3 + $0x4] sm:$0xf] %vm72_vm1, %v84_v32 }

// kernel: model_forward.27
= control target key start
LH: loop header
LB: loop body
LE: loop exit
PB: predicated region body
PF: predicated region fallthrough
CT: control target
= control target key end

     0   :  { %vm573_vm0 = vcmask 519168   ;;  %s953_s1 = inlined_call_operand.vmem [shape: bf16[768,64], index: 1, kind: input, shape index: {}]   ;;  %s954_s0 = inlined_call_operand.vmem [shape: bf16[16,768], index: 0, kind: input, shape index: {}]   ;;  %s955_s2 = inlined_call_operand.vmem [shape: f32[1,64], index: 2, kind: input, shape index: {}]   ;;  %s956_s3 = inlined_call_operand.vmem [shape: bf16[16,64], index: 3, kind: output, shape index: {}]  }
   0x1   :  { %v705_v0 = vld [vmem:[%s953_s1 + $0x40] sm:$0xff]   ;;  %v709_v4 = vld [vmem:[%s953_s1 + $0x48] sm:$0xff]   ;;  %v713_v8 = vld [vmem:[%s953_s1 + $0x50] sm:$0xff]  }
   0x2   :  { %v706_v1 = vld [vmem:[%s953_s1] sm:$0xff]   ;;  %639 = vmatprep.subr.bf16.mxu0 %v705_v0  ;;  %v710_v5 = vld [vmem:[%s953_s1 + $0x8] sm:$0xff]   ;;  %v714_v9 = vld [vmem:[%s953_s1 + $0x10] sm:$0xff]  }
   0x3   :  { %v707_v2 = vld [vmem:[%s953_s1 + $0xc0] sm:$0xff]   ;;  %640 = vmatpush3.bf16.msra.mxu0 %v706_v1  ;;  %v711_v6 = vld [vmem:[%s953_s1 + $0xc8] sm:$0xff]   ;;  %v715_v10 = vld [vmem:[%s953_s1 + $0xd0] sm:$0xff]  }
   0x4   :  { %v708_v3 = vld [vmem:[%s953_s1 + $0x80] sm:$0xff]   ;;  %661 = vmatprep.subr.bf16.mxu1 %v707_v2  ;;  %641 = vmatprep.subr.bf16.mxu0 %v709_v4  ;;  %v712_v7 = vld [vmem:[%s953_s1 + $0x88] sm:$0xff]   ;;  %v716_v11 = vld [vmem:[%s953_s1 + $0x90] sm:$0xff]  }
   0x5   :  { %662 = vmatpush3.bf16.msra.mxu1 %v708_v3  ;;  %v717_v12 = vld [vmem:[%s953_s1 + $0x58] sm:$0xff]   ;;  %v721_v16 = vld [vmem:[%s953_s1 + $0x60] sm:$0xff]   ;;  %v725_v20 = vld [vmem:[%s953_s1 + $0x68] sm:$0xff]  }
   0x6   :  { %663 = vmatprep.subr.bf16.mxu1 %v711_v6  ;;  %v718_v13 = vld [vmem:[%s953_s1 + $0x18] sm:$0xff]   ;;  %v722_v17 = vld [vmem:[%s953_s1 + $0x20] sm:$0xff]   ;;  %v726_v21 = vld [vmem:[%s953_s1 + $0x28] sm:$0xff]  }
   0x7   :  { %642 = vmatpush3.bf16.msra.mxu0 %v710_v5  ;;  %v719_v14 = vld [vmem:[%s953_s1 + $0xd8] sm:$0xff]   ;;  %v723_v18 = vld [vmem:[%s953_s1 + $0xe0] sm:$0xff]   ;;  %v727_v22 = vld [vmem:[%s953_s1 + $0xe8] sm:$0xff]  }
   0x8   :  { %643 = vmatprep.subr.bf16.mxu0 %v713_v8  ;;  %v720_v15 = vld [vmem:[%s953_s1 + $0x98] sm:$0xff]   ;;  %v724_v19 = vld [vmem:[%s953_s1 + $0xa0] sm:$0xff]   ;;  %v728_v23 = vld [vmem:[%s953_s1 + $0xa8] sm:$0xff]  }
   0x9   :  { %664 = vmatpush3.bf16.msra.mxu1 %v712_v7  ;;  %v729_v24 = vld [vmem:[%s953_s1 + $0x70] sm:$0xff]   ;;  %v733_v28 = vld [vmem:[%s953_s1 + $0x78] sm:$0xff]   ;;  %v740_v34 = vld [vmem:[%s953_s1 + $0x140] sm:$0xff]  }
   0xa   :  { %665 = vmatprep.subr.bf16.mxu1 %v715_v10  ;;  %v730_v25 = vld [vmem:[%s953_s1 + $0x30] sm:$0xff]   ;;  %v734_v29 = vld [vmem:[%s953_s1 + $0x38] sm:$0xff]   ;;  %v741_v35 = vld [vmem:[%s954_s0 + $0x8] ss:$24 sps:$4 sm:$0xff]  }
   0xb   :  { %644 = vmatpush3.bf16.msra.mxu0 %v714_v9  ;;  %v731_v26 = vld [vmem:[%s953_s1 + $0xf0] sm:$0xff]   ;;  %v735_v30 = vld [vmem:[%s953_s1 + $0xf8] sm:$0xff]   ;;  %v743_v36 = vld [vmem:[%s954_s0 + $0xc] ss:$24 sps:$4 sm:$0xff]  }
   0xc   :  { %645 = vmatprep.subr.bf16.mxu0 %v717_v12  ;;  %v732_v27 = vld [vmem:[%s953_s1 + $0xb0] sm:$0xff]   ;;  %v736_v31 = vld [vmem:[%s954_s0] ss:$24 sps:$4 sm:$0xff]   ;;  %v738_v32 = vld [vmem:[%s954_s0 + $0x4] ss:$24 sps:$4 sm:$0xff]   ;;  %515 = vmatprep.mubr.bf16.mxu1 %v743_v36 }
   0xd   :  { %666 = vmatpush3.bf16.msra.mxu1 %v716_v11  ;;  %v739_v33 = vld [vmem:[%s953_s1 + $0xb8] sm:$0xff]   ;;  %474 = vmatprep.mubr.bf16.mxu0 %v738_v32  ;;  %v744_v37 = vld [vmem:[%s953_s1 + $0x100] sm:$0xff]   ;;  %v745_v38 = vld [vmem:[%s953_s1 + $0x148] sm:$0xff]  }
   0xe   :  { %667 = vmatprep.subr.bf16.mxu1 %v719_v14  ;;  %v746_v39 = vld [vmem:[%s953_s1 + $0x108] sm:$0xff]   ;;  %v747_v40 = vld [vmem:[%s953_s1 + $0x150] sm:$0xff]   ;;  %v749_v42 = vld [vmem:[%s953_s1 + $0x158] sm:$0xff]  }
   0xf   :  { %646 = vmatpush3.bf16.msra.mxu0 %v718_v13  ;;  %v748_v41 = vld [vmem:[%s953_s1 + $0x110] sm:$0xff]   ;;  %v750_v43 = vld [vmem:[%s953_s1 + $0x118] sm:$0xff]   ;;  %v751_v44 = vld [vmem:[%s953_s1 + $0x160] sm:$0xff]  }
  0x10   :  { %647 = vmatprep.subr.bf16.mxu0 %v721_v16  ;;  %v752_v45 = vld [vmem:[%s953_s1 + $0x120] sm:$0xff]   ;;  %v753_v46 = vld [vmem:[%s953_s1 + $0x168] sm:$0xff]   ;;  %v755_v49 = vld [vmem:[%s953_s1 + $0x170] sm:$0xff]  }
  0x11   :  { %668 = vmatpush3.bf16.msra.mxu1 %v720_v15  ;;  %v761_v47 = vld [vmem:[%s954_s0 + $0x14] ss:$24 sps:$4 sm:$0xff]   ;;  %v757_v51 = vld [vmem:[%s953_s1 + $0x178] sm:$0xff]   ;;  %v759_v53 = vld [vmem:[%s954_s0 + $0x10] ss:$24 sps:$4 sm:$0xff]  }
  0x12   :  { %669 = vmatprep.subr.bf16.mxu1 %v723_v18  ;;  %v754_v48 = vld [vmem:[%s953_s1 + $0x128] sm:$0xff]   ;;  %v756_v50 = vld [vmem:[%s953_s1 + $0x130] sm:$0xff]   ;;  %v758_v52 = vld [vmem:[%s953_s1 + $0x138] sm:$0xff]  }
  0x13   :  { %648 = vmatpush3.bf16.msra.mxu0 %v722_v17  ;;  %v580_v55 = vld [vmem:[%s955_s2] ss:$0 sm:$0xff] }
  0x14   :  { %649 = vmatprep.subr.bf16.mxu0 %v725_v20 }
  0x15   :  { %670 = vmatpush3.bf16.msra.mxu1 %v724_v19 }
  0x16   :  { %671 = vmatprep.subr.bf16.mxu1 %v727_v22 }
  0x17   :  { %650 = vmatpush3.bf16.msra.mxu0 %v726_v21 }
  0x18   :  { %651 = vmatprep.subr.bf16.mxu0 %v729_v24 }
  0x19   :  { %672 = vmatpush3.bf16.msra.mxu1 %v728_v23 }
  0x1a   :  { %673 = vmatprep.subr.bf16.mxu1 %v731_v26 }
  0x1b   :  { %652 = vmatpush3.bf16.msra.mxu0 %v730_v25 }
  0x1c   :  { %653 = vmatprep.subr.bf16.mxu0 %v733_v28 }
  0x1d   :  { %674 = vmatpush3.bf16.msra.mxu1 %v732_v27 }
  0x1e   :  { %675 = vmatprep.subr.bf16.mxu1 %v735_v30 }
  0x1f   :  { %654 = vmatpush3.bf16.msra.mxu0 %v734_v29 }
  0x20   :  { %683 = vmatprep.subr.bf16.mxu0 %v740_v34 }
  0x21   :  { %676 = vmatpush3.bf16.msra.mxu1 %v739_v33 }
  0x22   :  { %475 = vmatmul.mubr.bf16.vlgmr.msra.gmra.mrb[0].mxu0 %v736_v31 }
  0x23   :  { %684 = vmatpush3.bf16.msra.mxu0 %v744_v37  ;;  %556 = vmatprep.mubr.bf16.mxu0 %v761_v47 }
  0x24   :  { %516 = vmatmul.mubr.bf16.vlgmr.msra.gmra.mrb[0].mxu1 %v741_v35  ;;  %685 = vmatprep.subr.bf16.mxu0 %v745_v38 }
  0x27   :  { %686 = vmatpush3.bf16.msra.mxu0 %v746_v39 }
  0x28   :  { %687 = vmatprep.subr.bf16.mxu0 %v747_v40 }
  0x2b   :  { %688 = vmatpush3.bf16.msra.mxu0 %v748_v41 }
  0x2c   :  { %689 = vmatprep.subr.bf16.mxu0 %v749_v42 }
  0x2f   :  { %690 = vmatpush3.bf16.msra.mxu0 %v750_v43 }
  0x30   :  { %691 = vmatprep.subr.bf16.mxu0 %v751_v44 }
  0x33   :  { %692 = vmatpush3.bf16.msra.mxu0 %v752_v45 }
  0x34   :  { %693 = vmatprep.subr.bf16.mxu0 %v753_v46 }
  0x37   :  { %694 = vmatpush3.bf16.msra.mxu0 %v754_v48 }
  0x38   :  { %695 = vmatprep.subr.bf16.mxu0 %v755_v49 }
  0x3b   :  { %696 = vmatpush3.bf16.msra.mxu0 %v756_v50 }
  0x3c   :  { %697 = vmatprep.subr.bf16.mxu0 %v757_v51 }
  0x3f   :  { %698 = vmatpush3.bf16.msra.mxu0 %v758_v52 }
  0x42   :  { %557 = vmatmul.mubr.bf16.vlgmr.msra.gmra.mrb[4].mxu0 %v759_v53 }
  0xf5   :  { %v655_v54 = vpop.f32.mrb[0].mxu0 }
  0xf6   :  { %v656_v56 = vpop.f32.mrb[1].mxu0 }
  0xf7   :  { %v657_v57 = vadd.f32 %v656_v56, %v655_v54  ;;  %v658_v58 = vpop.f32.mrb[2].mxu0  ;;  %v677_v59 = vpop.f32.mrb[0].mxu1 }
  0xf8   :  { %v659_v60 = vpop.f32.mrb[3].mxu0  ;;  %v678_v63 = vpop.f32.mrb[1].mxu1 }
  0xf9   :  { %v477_v61 = vadd.f32 %v657_v57, %v580_v55  ;;  %v660_v62 = vadd.f32 %v659_v60, %v658_v58  ;;  %v679_v0 = vadd.f32 %v678_v63, %v677_v59  ;;  %v680_v1 = vpop.f32.mrb[2].mxu1 }
  0xfa   :  { %v681_v3 = vpop.f32.mrb[3].mxu1 }
  0xfb   :  { %v480_v2 = vadd.f32 %v660_v62, %v580_v55  ;;  %v518_v4 = vadd.f32 %v679_v0, %v477_v61  ;;  %v682_v5 = vadd.f32 %v681_v3, %v680_v1 }
  0xfd   :  { %v521_v6 = vadd.f32 %v682_v5, %v480_v2 }
 0x115   :  { %v699_v7 = vpop.f32.mrb[4].mxu0 }
 0x116   :  { %v700_v8 = vpop.f32.mrb[5].mxu0 }
 0x117   :  { %v701_v9 = vadd.f32 %v700_v8, %v699_v7  ;;  %v702_v10 = vpop.f32.mrb[6].mxu0 }
 0x118   :  { %v703_v11 = vpop.f32.mrb[7].mxu0 }
 0x119   :  { %v559_v12 = vadd.f32 %v701_v9, %v518_v4  ;;  %v704_v13 = vadd.f32 %v703_v11, %v702_v10 }
 0x11b   :  { %v637_v14 = vpack.c.bf16 %v559_v12, %v559_v12  ;;  %v562_v15 = vadd.f32 %v704_v13, %v521_v6 }
 0x11d   :  { %574 = vst.msk [vmem:[%s956_s3] sm:$0xf] %vm573_vm0, %v637_v14  ;;  %v638_v16 = vpack.c.bf16 %v562_v15, %v562_v15 }
 0x11f   :  { %575 = vst.msk [vmem:[%s956_s3 + $0x4] sm:$0xf] %vm573_vm0, %v638_v16 }

// kernel: model_forward.29
= control target key start
LH: loop header
LB: loop body
LE: loop exit
PB: predicated region body
PF: predicated region fallthrough
CT: control target
= control target key end

     0   :  { %v178_v1 = vmov 0   ;;  %vm82_vm0 = vcmask 523264   ;;  %v27_v10 = vlaneseq  ;;  %vm141_vm1 = vcmask 1043456   ;;  %s235_s1 = inlined_call_operand.vmem [shape: bf16[64,192], index: 1, kind: input, shape index: {}]   ;;  %s236_s0 = inlined_call_operand.vmem [shape: bf16[16,64], index: 0, kind: input, shape index: {}]   ;;  %s237_s2 = inlined_call_operand.vmem [shape: f32[1,192], index: 2, kind: input, shape index: {}]   ;;  %s238_s3 = inlined_call_operand.vmem [shape: bf16[16,192], index: 3, kind: output, shape index: {}]  }
   0x1   :  { %v165_v0 = vld [vmem:[%s235_s1 + $0x4] ss:$8 sps:$4 sm:$0xff]   ;;  %118 = vmatprep.mubr.bf16.mxu0 %v178_v1  ;;  %v167_v2 = vld [vmem:[%s235_s1] ss:$8 sps:$4 sm:$0xff]   ;;  %v168_v3 = vld [vmem:[%s235_s1 + $0x14] ss:$8 sps:$4 sm:$0xff]  }
   0x2   :  { %86 = vmatprep.subr.bf16.mxu0 %v165_v0  ;;  %v170_v4 = vld [vmem:[%s235_s1 + $0x10] ss:$8 sps:$4 sm:$0xff]   ;;  %v171_v5 = vld [vmem:[%s235_s1 + $0x24] ss:$8 sps:$4 sm:$0xff]   ;;  %v173_v6 = vld [vmem:[%s235_s1 + $0x20] ss:$8 sps:$4 sm:$0xff]  }
   0x3   :  { %87 = vmatpush1.bf16.msra.mxu0 %v167_v2  ;;  %v174_v7 = vld [vmem:[%s235_s1 + $0x34] ss:$8 sps:$4 sm:$0xff]   ;;  %v176_v8 = vld [vmem:[%s235_s1 + $0x30] ss:$8 sps:$4 sm:$0xff]   ;;  %v177_v9 = vld [vmem:[%s236_s0] sm:$0xff]   ;;  %v28_v11 = vshrl.u32 %v27_v10, 7 }
   0x4   :  { %88 = vmatprep.subr.bf16.mxu0 %v168_v3  ;;  %v25_v13 = vld [vmem:[%s237_s2] sm:$0x3]  ;;  %vm142_vm2 = vcmask 523268  }
   0x5   :  { %v29_v12 = vsub.s32 0, %v28_v11  ;;  %v33_v14 = vsub.s32 1, %v28_v11  ;;  %vm143_vm3 = vmor %vm142_vm2, %vm141_vm1 }
   0x7   :  { %89 = vmatpush1.bf16.msra.mxu0 %v170_v4  ;;  %v30_v15 = vrot.slane %v25_v13, %v29_v12  ;;  %v34_v16 = vrot.slane %v25_v13, %v33_v14 }
   0x8   :  { %90 = vmatprep.subr.bf16.mxu0 %v171_v5 }
   0xb   :  { %91 = vmatpush1.bf16.msra.mxu0 %v173_v6 }
   0xc   :  { %92 = vmatprep.subr.bf16.mxu0 %v174_v7 }
   0xf   :  { %93 = vmatpush1.bf16.msra.mxu0 %v176_v8 }
  0x12   :  { %159 = vmatmul.mubr.msk.bf16.vlgmr.msra.gmra.mrb[0].mxu0 %vm82_vm0, %v177_v9 }
  0xe5   :  { %v120_v17 = vpop.f32.mrb[0].mxu0 }
  0xe6   :  { %v121_v18 = vadd.f32 %v120_v17, %v30_v15  ;;  %v122_v19 = vpop.f32.mrb[1].mxu0 }
  0xe7   :  { %v123_v20 = vadd.f32 %v122_v19, %v34_v16  ;;  %v124_v21 = vpop.f32.mrb[2].mxu0 }
  0xe8   :  { %v125_v22 = vadd.f32 %v124_v21, %v30_v15  ;;  %v126_v23 = vpop.f32.mrb[3].mxu0 }
  0xe9   :  { %v162_v24 = vpack.c.bf16 %v123_v20, %v121_v18  ;;  %v127_v25 = vadd.f32 %v126_v23, %v34_v16 }
  0xeb   :  { %144 = vst.msk [vmem:[%s238_s3] sm:$0xff] %vm143_vm3, %v162_v24  ;;  %v163_v26 = vpack.c.bf16 %v127_v25, %v125_v22 }
  0xed   :  { %145 = vst.msk [vmem:[%s238_s3 + $0x8] sm:$0xff] %vm143_vm3, %v163_v26 }

// kernel: model_forward.31
= control target key start
LH: loop header
LB: loop body
LE: loop exit
PB: predicated region body
PF: predicated region fallthrough
CT: control target
= control target key end

     0   :  { %v156_v0 = vmov 0.0   ;;  %vm157_vm0 = vmmov 0   ;;  %vm61_vm1 = vcmask 523264   ;;  %vm114_vm2 = vcmask 519168   ;;  %s202_s1 = inlined_call_operand.vmem [shape: bf16[64,64], index: 1, kind: input, shape index: {}]   ;;  %s203_s0 = inlined_call_operand.vmem [shape: bf16[16,64], index: 0, kind: input, shape index: {}]   ;;  %s204_s2 = inlined_call_operand.vmem [shape: f32[1,64], index: 2, kind: input, shape index: {}]   ;;  %s205_s3 = inlined_call_operand.vmem [shape: bf16[16,64], index: 3, kind: output, shape index: {}]  }
   0x1   :  { %137 = vmatprep.subr.bf16.mxu0 %v156_v0  ;;  %v151_v1 = vld [vmem:[%s202_s1] sm:$0xff]   ;;  %145 = vmatprep.mubr.msk.bf16.mxu0 %vm157_vm0, %v156_v0  ;;  %v152_v2 = vld [vmem:[%s202_s1 + $0x8] sm:$0xff]   ;;  %v153_v3 = vld [vmem:[%s202_s1 + $0x10] sm:$0xff]  }
   0x2   :  { %138 = vmatpush3.bf16.msra.mxu0 %v151_v1  ;;  %v154_v4 = vld [vmem:[%s202_s1 + $0x18] sm:$0xff]   ;;  %v155_v5 = vld [vmem:[%s203_s0] sm:$0xff]  }
   0x3   :  { %139 = vmatprep.subr.bf16.mxu0 %v156_v0  ;;  %v121_v6 = vld [vmem:[%s204_s2] ss:$0 sm:$0xff] }
   0x6   :  { %140 = vmatpush3.bf16.msra.mxu0 %v152_v2 }
   0x7   :  { %141 = vmatprep.subr.bf16.mxu0 %v156_v0 }
   0xa   :  { %142 = vmatpush3.bf16.msra.mxu0 %v153_v3 }
   0xb   :  { %143 = vmatprep.subr.bf16.mxu0 %v156_v0 }
   0xe   :  { %144 = vmatpush3.bf16.msra.mxu0 %v154_v4 }
  0x11   :  { %146 = vmatmul.mubr.msk.bf16.vlgmr.msra.gmra.mrb[0].mxu0 %vm61_vm1, %v155_v5 }
  0xe4   :  { %v99_v7 = vpop.f32.mrb[0].mxu0 }
  0xe5   :  { %v100_v8 = vadd.f32 %v121_v6, %v99_v7  ;;  %v147_v9 = vpop.f32.mrb[1].mxu0 }
  0xe6   :  { %v102_v10 = vpop.f32.mrb[2].mxu0 }
  0xe7   :  { %v130_v11 = vpack.c.bf16 %v100_v8, %v100_v8  ;;  %v103_v12 = vadd.f32 %v121_v6, %v102_v10  ;;  %v148_v13 = vpop.f32.mrb[3].mxu0 }
  0xe9   :  { %115 = vst.msk [vmem:[%s205_s3] sm:$0xf] %vm114_vm2, %v130_v11  ;;  %v131_v14 = vpack.c.bf16 %v103_v12, %v103_v12 }
  0xeb   :  { %116 = vst.msk [vmem:[%s205_s3 + $0x4] sm:$0xf] %vm114_vm2, %v131_v14 }

// kernel: model_forward.32
= control target key start
LH: loop header
LB: loop body
LE: loop exit
PB: predicated region body
PF: predicated region fallthrough
CT: control target
= control target key end

     0   :  { %v169_v0 = vmov 0.0   ;;  %vm170_vm0 = vmmov 0   ;;  %vm64_vm1 = vcmask 523264   ;;  %vm123_vm2 = vcmask 519168   ;;  %s223_s1 = inlined_call_operand.vmem [shape: bf16[64,64], index: 1, kind: input, shape index: {}]   ;;  %s224_s0 = inlined_call_operand.vmem [shape: bf16[16,64], index: 0, kind: input, shape index: {}]   ;;  %s225_s3 = inlined_call_operand.vmem [shape: bf16[16,64], index: 3, kind: input, shape index: {}]   ;;  %s226_s2 = inlined_call_operand.vmem [shape: f32[1,64], index: 2, kind: input, shape index: {}]   ;;  %s227_s4 = inlined_call_operand.vmem [shape: bf16[16,64], index: 4, kind: output, shape index: {}]  }
   0x1   :  { %150 = vmatprep.subr.bf16.mxu0 %v169_v0  ;;  %v164_v1 = vld [vmem:[%s223_s1] sm:$0xff]   ;;  %158 = vmatprep.mubr.msk.bf16.mxu0 %vm170_vm0, %v169_v0  ;;  %v165_v2 = vld [vmem:[%s223_s1 + $0x8] sm:$0xff]   ;;  %v166_v3 = vld [vmem:[%s223_s1 + $0x10] sm:$0xff]  }
   0x2   :  { %151 = vmatpush3.bf16.msra.mxu0 %v164_v1  ;;  %v167_v4 = vld [vmem:[%s223_s1 + $0x18] sm:$0xff]   ;;  %v168_v5 = vld [vmem:[%s224_s0] sm:$0xff]  }
   0x3   :  { %152 = vmatprep.subr.bf16.mxu0 %v169_v0  ;;  %v142_v6 = vld [vmem:[%s225_s3] sm:$0xff]  }
   0x4   :  { %v130_v7 = vld [vmem:[%s226_s2] ss:$0 sm:$0xff]  ;;  %v143_v8 = vunpack.c.l.bf16 %v142_v6  ;;  %v144_v12 = vunpack.c.h.bf16 %v142_v6 }
   0x6   :  { %153 = vmatpush3.bf16.msra.mxu0 %v165_v2 }
   0x7   :  { %154 = vmatprep.subr.bf16.mxu0 %v169_v0 }
   0xa   :  { %155 = vmatpush3.bf16.msra.mxu0 %v166_v3 }
   0xb   :  { %156 = vmatprep.subr.bf16.mxu0 %v169_v0 }
   0xe   :  { %157 = vmatpush3.bf16.msra.mxu0 %v167_v4 }
  0x11   :  { %159 = vmatmul.mubr.msk.bf16.vlgmr.msra.gmra.mrb[0].mxu0 %vm64_vm1, %v168_v5 }
  0xe4   :  { %v102_v9 = vpop.f32.mrb[0].mxu0 }
  0xe5   :  { %v103_v10 = vadd.f32 %v130_v7, %v102_v9  ;;  %v160_v11 = vpop.f32.mrb[1].mxu0 }
  0xe6   :  { %v105_v13 = vpop.f32.mrb[2].mxu0 }
  0xe7   :  { %v113_v14 = vadd.f32 %v143_v8, %v103_v10  ;;  %v106_v15 = vadd.f32 %v130_v7, %v105_v13  ;;  %v161_v16 = vpop.f32.mrb[3].mxu0 }
  0xe9   :  { %v139_v17 = vpack.c.bf16 %v113_v14, %v113_v14  ;;  %v114_v18 = vadd.f32 %v144_v12, %v106_v15 }
  0xeb   :  { %124 = vst.msk [vmem:[%s227_s4] sm:$0xf] %vm123_vm2, %v139_v17  ;;  %v140_v19 = vpack.c.bf16 %v114_v18, %v114_v18 }
  0xed   :  { %125 = vst.msk [vmem:[%s227_s4 + $0x4] sm:$0xf] %vm123_vm2, %v140_v19 }

// kernel: model_forward.33
= control target key start
LH: loop header
LB: loop body
LE: loop exit
PB: predicated region body
PF: predicated region fallthrough
CT: control target
= control target key end

     0   :  { %vm20_vm0 = vcmask 523264   ;;  %vm27_vm1 = vcmask 519168   ;;  %vm97_vm2 = vcmask 517120   ;;  %s170_s0 = inlined_call_operand.vmem [shape: bf16[20,64], index: 0, kind: input, shape index: {}]   ;;  %s171_s1 = inlined_call_operand.vmem [shape: f32[1,64], index: 1, kind: input, shape index: {}]   ;;  %s172_s2 = inlined_call_operand.vmem [shape: f32[1,64], index: 2, kind: input, shape index: {}]   ;;  %s173_s3 = inlined_call_operand.vmem [shape: bf16[20,64], index: 3, kind: output, shape index: {}]  }
   0x1   :  { %v112_v0 = vld [vmem:[%s170_s0] sm:$0xff]   ;;  %v16_v1 = vld [vmem:[%s170_s0 + $0x8] sm:$0x3] }
   0x2   :  { %v113_v2 = vunpack.c.l.bf16 %v112_v0  ;;  %v19_v3 = vunpack.c.l.bf16 %v16_v1  ;;  %v114_v4 = vunpack.c.h.bf16 %v112_v0  ;;  %v103_v33 = vld [vmem:[%s171_s1] ss:$0 sm:$0xff] }
   0x3   :  { %v104_v35 = vld [vmem:[%s172_s2] ss:$0 sm:$0xff] }
   0x4   :  { %v21_v5 = vsel %vm20_vm0, %v113_v2, 0.0  ;;  %v28_v6 = vsel %vm27_vm1, %v19_v3, 0.0  ;;  %v24_v7 = vsel %vm20_vm0, %v114_v4, 0.0 }
   0x5   :  { %22 = vadd.xlane.f32.xlu0 %v21_v5  ;;  %29 = vadd.xlane.f32.xlu1 %v28_v6 }
   0x9   :  { %25 = vadd.xlane.f32.xlu0 %v24_v7 }
  0x92   :  { %v23_v8 = vpop.xlane.xlu0 %22  ;;  %v30_v9 = vpop.xlane.xlu1 %29 }
  0x93   :  { %v32_v10 = vmul.f32 0.015625, %v23_v8  ;;  %v34_v11 = vmul.f32 0.015625, %v30_v9 }
  0x95   :  { %v35_v12 = vsub.f32 %v113_v2, %v32_v10  ;;  %v37_v13 = vsub.f32 %v19_v3, %v34_v11 }
  0x96   :  { %v26_v14 = vpop.xlane.xlu0 %25 }
  0x97   :  { %v33_v15 = vmul.f32 0.015625, %v26_v14  ;;  %v38_v16 = vmul.f32 %v35_v12, %v35_v12  ;;  %v40_v17 = vmul.f32 %v37_v13, %v37_v13 }
  0x99   :  { %v36_v18 = vsub.f32 %v114_v4, %v33_v15  ;;  %v41_v19 = vsel %vm20_vm0, %v38_v16, 0.0  ;;  %v47_v20 = vsel %vm27_vm1, %v40_v17, 0.0 }
  0x9a   :  { %42 = vadd.xlane.f32.xlu1 %v41_v19 }
  0x9b   :  { %v39_v21 = vmul.f32 %v36_v18, %v36_v18 }
  0x9d   :  { %v44_v22 = vsel %vm20_vm0, %v39_v21, 0.0 }
  0x9e   :  { %48 = vadd.xlane.f32.xlu1 %v47_v20  ;;  %45 = vadd.xlane.f32.xlu0 %v44_v22 }
 0x127   :  { %v43_v23 = vpop.xlane.xlu1 %42 }
 0x128   :  { %v50_v24 = vmul.f32 0.015625, %v43_v23 }
 0x12a   :  { %v53_v25 = vadd.f32 1e-06, %v50_v24 }
 0x12b   :  { %v49_v26 = vpop.xlane.xlu1 %48  ;;  %v46_v27 = vpop.xlane.xlu0 %45 }
 0x12c   :  { %115 = vrsqrt.f32 %v53_v25  ;;  %v52_v28 = vmul.f32 0.015625, %v49_v26  ;;  %v51_v29 = vmul.f32 0.015625, %v46_v27 }
 0x12e   :  { %v55_v30 = vadd.f32 1e-06, %v52_v28  ;;  %v54_v31 = vadd.f32 1e-06, %v51_v29 }
 0x130   :  { %117 = vrsqrt.f32 %v55_v30 }
 0x131   :  { %119 = vrsqrt.f32 %v54_v31 }
 0x136   :  { %v116_v32 = vpop.eup %115 }
 0x137   :  { %v59_v34 = vmul.f32 %v116_v32, %v35_v12 }
 0x139   :  { %v69_v36 = vmul.f32 %v103_v33, %v59_v34 }
 0x13a   :  { %v118_v37 = vpop.eup %117 }
 0x13b   :  { %v120_v38 = vpop.eup %119  ;;  %v79_v39 = vadd.f32 %v104_v35, %v69_v36  ;;  %v61_v40 = vmul.f32 %v118_v37, %v37_v13 }
 0x13c   :  { %v60_v41 = vmul.f32 %v120_v38, %v36_v18 }
 0x13d   :  { %v108_v42 = vpack.c.bf16 %v79_v39, %v79_v39  ;;  %v71_v43 = vmul.f32 %v103_v33, %v61_v40 }
 0x13e   :  { %v70_v44 = vmul.f32 %v103_v33, %v60_v41 }
 0x13f   :  { %95 = vst.msk [vmem:[%s173_s3] sm:$0xf] %vm27_vm1, %v108_v42  ;;  %v81_v45 = vadd.f32 %v104_v35, %v71_v43 }
 0x140   :  { %v80_v46 = vadd.f32 %v104_v35, %v70_v44 }
 0x141   :  { %v110_v47 = vpack.c.bf16 %v81_v45, %v81_v45 }
 0x142   :  { %v109_v48 = vpack.c.bf16 %v80_v46, %v80_v46 }
 0x143   :  { %98 = vst.msk [vmem:[%s173_s3 + $0x8] sm:$0x3] %vm97_vm2, %v110_v47 }
 0x144   :  { %96 = vst.msk [vmem:[%s173_s3 + $0x4] sm:$0xf] %vm27_vm1, %v109_v48 }

// kernel: model_forward.34
= control target key start
LH: loop header
LB: loop body
LE: loop exit
PB: predicated region body
PF: predicated region fallthrough
CT: control target
= control target key end

     0   :  { %v218_v1 = vmov 0   ;;  %vm86_vm0 = vcmask 523264   ;;  %v28_v11 = vlaneseq  ;;  %vm164_vm1 = vcmask 1043456   ;;  %s281_s1 = inlined_call_operand.vmem [shape: bf16[64,192], index: 1, kind: input, shape index: {}]   ;;  %s282_s0 = inlined_call_operand.vmem [shape: bf16[20,64], index: 0, kind: input, shape index: {}]   ;;  %s283_s2 = inlined_call_operand.vmem [shape: f32[1,192], index: 2, kind: input, shape index: {}]   ;;  %s284_s3 = inlined_call_operand.vmem [shape: bf16[20,192], index: 3, kind: output, shape index: {}]  }
   0x1   :  { %v204_v0 = vld [vmem:[%s281_s1 + $0x4] ss:$8 sps:$4 sm:$0xff]   ;;  %125 = vmatprep.mubr.bf16.mxu0 %v218_v1  ;;  %135 = vmatprep.mubr.bf16.mxu1 %v218_v1  ;;  %v206_v2 = vld [vmem:[%s281_s1] ss:$8 sps:$4 sm:$0xff]   ;;  %v207_v3 = vld [vmem:[%s281_s1 + $0x14] ss:$8 sps:$4 sm:$0xff]  }
   0x2   :  { %93 = vmatprep.subr.bf16.mxu0 %v204_v0  ;;  %195 = vmatprep.subr.bf16.mxu1 %v204_v0  ;;  %v209_v4 = vld [vmem:[%s281_s1 + $0x10] ss:$8 sps:$4 sm:$0xff]   ;;  %v210_v5 = vld [vmem:[%s281_s1 + $0x24] ss:$8 sps:$4 sm:$0xff]   ;;  %v212_v6 = vld [vmem:[%s281_s1 + $0x20] ss:$8 sps:$4 sm:$0xff]  }
   0x3   :  { %94 = vmatpush1.bf16.msra.mxu0 %v206_v2  ;;  %199 = vmatpush1.bf16.msra.mxu1 %v206_v2  ;;  %v213_v7 = vld [vmem:[%s281_s1 + $0x34] ss:$8 sps:$4 sm:$0xff]   ;;  %v215_v8 = vld [vmem:[%s281_s1 + $0x30] ss:$8 sps:$4 sm:$0xff]   ;;  %v216_v9 = vld [vmem:[%s282_s0] sm:$0xff]   ;;  %v29_v12 = vshrl.u32 %v28_v11, 7 }
   0x4   :  { %95 = vmatprep.subr.bf16.mxu0 %v207_v3  ;;  %196 = vmatprep.subr.bf16.mxu1 %v207_v3  ;;  %v217_v10 = vld [vmem:[%s282_s0 + $0x8] ss:$0 sps:$4 sm:$0x33]   ;;  %v26_v14 = vld [vmem:[%s283_s2] sm:$0x3]  ;;  %vm165_vm2 = vcmask 523268  }
   0x5   :  { %v30_v13 = vsub.s32 0, %v29_v12  ;;  %v34_v15 = vsub.s32 1, %v29_v12  ;;  %vm169_vm3 = vcmask 1041408   ;;  %vm170_vm4 = vcmask 521220   ;;  %vm166_vm5 = vmor %vm165_vm2, %vm164_vm1 }
   0x6   :  { %vm171_vm6 = vmor %vm170_vm4, %vm169_vm3 }
   0x7   :  { %96 = vmatpush1.bf16.msra.mxu0 %v209_v4  ;;  %200 = vmatpush1.bf16.msra.mxu1 %v209_v4  ;;  %v31_v16 = vrot.slane %v26_v14, %v30_v13  ;;  %v35_v17 = vrot.slane %v26_v14, %v34_v15 }
   0x8   :  { %97 = vmatprep.subr.bf16.mxu0 %v210_v5  ;;  %197 = vmatprep.subr.bf16.mxu1 %v210_v5 }
   0xb   :  { %98 = vmatpush1.bf16.msra.mxu0 %v212_v6  ;;  %201 = vmatpush1.bf16.msra.mxu1 %v212_v6 }
   0xc   :  { %99 = vmatprep.subr.bf16.mxu0 %v213_v7  ;;  %198 = vmatprep.subr.bf16.mxu1 %v213_v7 }
   0xf   :  { %100 = vmatpush1.bf16.msra.mxu0 %v215_v8  ;;  %202 = vmatpush1.bf16.msra.mxu1 %v215_v8 }
  0x12   :  { %187 = vmatmul.mubr.msk.bf16.vlgmr.msra.gmra.mrb[0].mxu0 %vm86_vm0, %v216_v9  ;;  %188 = vmatmul.mubr.msk.bf16.vlgmr.msra.gmra.mrb[0].mxu1 %vm86_vm0, %v217_v10 }
  0xe5   :  { %v127_v18 = vpop.f32.mrb[0].mxu0  ;;  %v137_v19 = vpop.f32.mrb[0].mxu1 }
  0xe6   :  { %v128_v20 = vadd.f32 %v127_v18, %v31_v16  ;;  %v138_v21 = vadd.f32 %v137_v19, %v31_v16  ;;  %v129_v22 = vpop.f32.mrb[1].mxu0  ;;  %v139_v23 = vpop.f32.mrb[1].mxu1 }
  0xe7   :  { %v130_v24 = vadd.f32 %v129_v22, %v35_v17  ;;  %v140_v25 = vadd.f32 %v139_v23, %v35_v17  ;;  %v131_v26 = vpop.f32.mrb[2].mxu0  ;;  %v141_v27 = vpop.f32.mrb[2].mxu1 }
  0xe8   :  { %v132_v28 = vadd.f32 %v131_v26, %v31_v16  ;;  %v133_v29 = vpop.f32.mrb[3].mxu0  ;;  %v142_v30 = vpop.f32.mrb[3].mxu1 }
  0xe9   :  { %v192_v31 = vpack.c.bf16 %v130_v24, %v128_v20  ;;  %v194_v32 = vpack.c.bf16 %v140_v25, %v138_v21  ;;  %v134_v33 = vadd.f32 %v133_v29, %v35_v17 }
  0xeb   :  { %167 = vst.msk [vmem:[%s284_s3] sm:$0xff] %vm166_vm5, %v192_v31  ;;  %v193_v34 = vpack.c.bf16 %v134_v33, %v132_v28 }
  0xec   :  { %172 = vst.msk [vmem:[%s284_s3 + $0x10] sm:$0x33] %vm171_vm6, %v194_v32 }
  0xed   :  { %168 = vst.msk [vmem:[%s284_s3 + $0x8] sm:$0xff] %vm166_vm5, %v193_v34 }

// kernel: model_forward.36
= control target key start
LH: loop header
LB: loop body
LE: loop exit
PB: predicated region body
PF: predicated region fallthrough
CT: control target
= control target key end

     0   :  { %vm65_vm0 = vcmask 523264   ;;  %vm136_vm1 = vcmask 517120   ;;  %vm133_vm2 = vcmask 519168   ;;  %s231_s1 = inlined_call_operand.vmem [shape: bf16[64,64], index: 1, kind: input, shape index: {}]   ;;  %s232_s0 = inlined_call_operand.vmem [shape: bf16[20,64], index: 0, kind: input, shape index: {}]   ;;  %s233_s2 = inlined_call_operand.vmem [shape: f32[1,64], index: 2, kind: input, shape index: {}]   ;;  %s234_s3 = inlined_call_operand.vmem [shape: bf16[20,64], index: 3, kind: output, shape index: {}]  }
   0x1   :  { %v175_v0 = vld [vmem:[%s231_s1] sm:$0xff]   ;;  %v176_v1 = vld [vmem:[%s231_s1 + $0x8] sm:$0xff]   ;;  %v177_v2 = vld [vmem:[%s231_s1 + $0x10] sm:$0xff]  }
   0x2   :  { %163 = vmatprep.subr.bf16.mxu0 %v175_v0  ;;  %v179_v3 = vld [vmem:[%s232_s0] sm:$0xff]   ;;  %v178_v4 = vld [vmem:[%s231_s1 + $0x18] sm:$0xff]   ;;  %v180_v5 = vld [vmem:[%s232_s0 + $0x8] ss:$0 sps:$4 sm:$0x33]  }
   0x3   :  { %164 = vmatpush3.bf16.msra.mxu0 %v175_v0  ;;  %171 = vmatprep.mubr.msk.bf16.mxu0 %vm65_vm0, %v179_v3  ;;  %v142_v6 = vld [vmem:[%s233_s2] ss:$0 sm:$0xff] }
   0x4   :  { %165 = vmatprep.subr.bf16.mxu0 %v176_v1 }
   0x7   :  { %166 = vmatpush3.bf16.msra.mxu0 %v176_v1 }
   0x8   :  { %167 = vmatprep.subr.bf16.mxu0 %v177_v2 }
   0xb   :  { %168 = vmatpush3.bf16.msra.mxu0 %v177_v2 }
   0xc   :  { %169 = vmatprep.subr.bf16.mxu0 %v178_v4 }
   0xf   :  { %170 = vmatpush3.bf16.msra.mxu0 %v178_v4 }
  0x12   :  { %172 = vmatmul.mubr.msk.bf16.vlgmr.msra.gmra.mrb[0].mxu0 %vm65_vm0, %v180_v5 }
  0xe5   :  { %v173_v7 = vpop.f32.mrb[0].mxu0 }
  0xe6   :  { %v115_v8 = vadd.f32 %v173_v7, %v142_v6  ;;  %v106_v9 = vpop.f32.mrb[1].mxu0 }
  0xe7   :  { %v107_v10 = vadd.f32 %v142_v6, %v106_v9  ;;  %v174_v11 = vpop.f32.mrb[2].mxu0 }
  0xe8   :  { %v156_v12 = vpack.c.bf16 %v115_v8, %v115_v8  ;;  %v109_v13 = vpop.f32.mrb[3].mxu0 }
  0xe9   :  { %v154_v14 = vpack.c.bf16 %v107_v10, %v107_v10  ;;  %v110_v15 = vadd.f32 %v142_v6, %v109_v13 }
  0xea   :  { %137 = vst.msk [vmem:[%s234_s3 + $0x8] sm:$0x3] %vm136_vm1, %v156_v12 }
  0xeb   :  { %134 = vst.msk [vmem:[%s234_s3] sm:$0xf] %vm133_vm2, %v154_v14  ;;  %v155_v16 = vpack.c.bf16 %v110_v15, %v110_v15 }
  0xed   :  { %135 = vst.msk [vmem:[%s234_s3 + $0x4] sm:$0xf] %vm133_vm2, %v155_v16 }

// kernel: model_forward.37
= control target key start
LH: loop header
LB: loop body
LE: loop exit
PB: predicated region body
PF: predicated region fallthrough
CT: control target
= control target key end

     0   :  { %vm20_vm0 = vcmask 523264   ;;  %vm27_vm1 = vcmask 517120   ;;  %vm95_vm2 = vcmask 519168   ;;  %vm98_vm3 = vcmask 516096   ;;  %s169_s0 = inlined_call_operand.vmem [shape: bf16[18,64], index: 0, kind: input, shape index: {}]   ;;  %s170_s1 = inlined_call_operand.vmem [shape: f32[1,64], index: 1, kind: input, shape index: {}]   ;;  %s171_s2 = inlined_call_operand.vmem [shape: f32[1,64], index: 2, kind: input, shape index: {}]   ;;  %s172_s3 = inlined_call_operand.vmem [shape: bf16[18,64], index: 3, kind: output, shape index: {}]  }
   0x1   :  { %v113_v0 = vld [vmem:[%s169_s0] sm:$0xff]   ;;  %v16_v1 = vld [vmem:[%s169_s0 + $0x8] sm:$0x1] }
   0x2   :  { %v114_v2 = vunpack.c.l.bf16 %v113_v0  ;;  %v19_v3 = vunpack.c.l.bf16 %v16_v1  ;;  %v115_v4 = vunpack.c.h.bf16 %v113_v0  ;;  %v104_v33 = vld [vmem:[%s170_s1] ss:$0 sm:$0xff] }
   0x3   :  { %v105_v35 = vld [vmem:[%s171_s2] ss:$0 sm:$0xff] }
   0x4   :  { %v21_v5 = vsel %vm20_vm0, %v114_v2, 0.0  ;;  %v28_v6 = vsel %vm27_vm1, %v19_v3, 0.0  ;;  %v24_v7 = vsel %vm20_vm0, %v115_v4, 0.0 }
   0x5   :  { %22 = vadd.xlane.f32.xlu0 %v21_v5  ;;  %29 = vadd.xlane.f32.xlu1 %v28_v6 }
   0x9   :  { %25 = vadd.xlane.f32.xlu0 %v24_v7 }
  0x92   :  { %v23_v8 = vpop.xlane.xlu0 %22  ;;  %v30_v9 = vpop.xlane.xlu1 %29 }
  0x93   :  { %v32_v10 = vmul.f32 0.015625, %v23_v8  ;;  %v34_v11 = vmul.f32 0.015625, %v30_v9 }
  0x95   :  { %v35_v12 = vsub.f32 %v114_v2, %v32_v10  ;;  %v37_v13 = vsub.f32 %v19_v3, %v34_v11 }
  0x96   :  { %v26_v14 = vpop.xlane.xlu0 %25 }
  0x97   :  { %v33_v15 = vmul.f32 0.015625, %v26_v14  ;;  %v38_v16 = vmul.f32 %v35_v12, %v35_v12  ;;  %v40_v17 = vmul.f32 %v37_v13, %v37_v13 }
  0x99   :  { %v36_v18 = vsub.f32 %v115_v4, %v33_v15  ;;  %v41_v19 = vsel %vm20_vm0, %v38_v16, 0.0  ;;  %v47_v20 = vsel %vm27_vm1, %v40_v17, 0.0 }
  0x9a   :  { %42 = vadd.xlane.f32.xlu1 %v41_v19 }
  0x9b   :  { %v39_v21 = vmul.f32 %v36_v18, %v36_v18 }
  0x9d   :  { %v44_v22 = vsel %vm20_vm0, %v39_v21, 0.0 }
  0x9e   :  { %48 = vadd.xlane.f32.xlu1 %v47_v20  ;;  %45 = vadd.xlane.f32.xlu0 %v44_v22 }
 0x127   :  { %v43_v23 = vpop.xlane.xlu1 %42 }
 0x128   :  { %v50_v24 = vmul.f32 0.015625, %v43_v23 }
 0x12a   :  { %v53_v25 = vadd.f32 1e-06, %v50_v24 }
 0x12b   :  { %v49_v26 = vpop.xlane.xlu1 %48  ;;  %v46_v27 = vpop.xlane.xlu0 %45 }
 0x12c   :  { %116 = vrsqrt.f32 %v53_v25  ;;  %v52_v28 = vmul.f32 0.015625, %v49_v26  ;;  %v51_v29 = vmul.f32 0.015625, %v46_v27 }
 0x12e   :  { %v55_v30 = vadd.f32 1e-06, %v52_v28  ;;  %v54_v31 = vadd.f32 1e-06, %v51_v29 }
 0x130   :  { %118 = vrsqrt.f32 %v55_v30 }
 0x131   :  { %120 = vrsqrt.f32 %v54_v31 }
 0x136   :  { %v117_v32 = vpop.eup %116 }
 0x137   :  { %v59_v34 = vmul.f32 %v117_v32, %v35_v12 }
 0x139   :  { %v69_v36 = vmul.f32 %v104_v33, %v59_v34 }
 0x13a   :  { %v119_v37 = vpop.eup %118 }
 0x13b   :  { %v121_v38 = vpop.eup %120  ;;  %v79_v39 = vadd.f32 %v105_v35, %v69_v36  ;;  %v61_v40 = vmul.f32 %v119_v37, %v37_v13 }
 0x13c   :  { %v60_v41 = vmul.f32 %v121_v38, %v36_v18 }
 0x13d   :  { %v109_v42 = vpack.c.bf16 %v79_v39, %v79_v39  ;;  %v71_v43 = vmul.f32 %v104_v33, %v61_v40 }
 0x13e   :  { %v70_v44 = vmul.f32 %v104_v33, %v60_v41 }
 0x13f   :  { %96 = vst.msk [vmem:[%s172_s3] sm:$0xf] %vm95_vm2, %v109_v42  ;;  %v81_v45 = vadd.f32 %v105_v35, %v71_v43 }
 0x140   :  { %v80_v46 = vadd.f32 %v105_v35, %v70_v44 }
 0x141   :  { %v111_v47 = vpack.c.bf16 %v81_v45, %v81_v45 }
 0x142   :  { %v110_v48 = vpack.c.bf16 %v80_v46, %v80_v46 }
 0x143   :  { %99 = vst.msk [vmem:[%s172_s3 + $0x8] sm:$0x1] %vm98_vm3, %v111_v47 }
 0x144   :  { %97 = vst.msk [vmem:[%s172_s3 + $0x4] sm:$0xf] %vm95_vm2, %v110_v48 }

// kernel: model_forward.35
= control target key start
LH: loop header
LB: loop body
LE: loop exit
PB: predicated region body
PF: predicated region fallthrough
CT: control target
= control target key end

     0   :  { %v2532_v3 = vmov 0.0   ;;  %vm2533_vm0 = vmmov 0   ;;  %s2534_s14 = smov 64   ;;  %vm27_vm1 = vcmask 130048   ;;  %vm227_vm2 = vcmask 36864   ;;  %s2535_s17 = smov 48   ;;  %s3110_s0 = inlined_call_operand.vmem [shape: bf16[4,5,192], index: 0, kind: input, shape index: {}]   ;;  %s3111_s1 = inlined_call_operand.vmem [shape: bf16[4,5,64], index: 1, kind: output, shape index: {}]  }
   0x1   :  { %v10_v0 = vld [vmem:[%s3110_s0] sm:$0x7]  ;;  %v11_v1 = vld [vmem:[%s3110_s0 + $0x8] sm:$0x7]  ;;  %v12_v2 = vld [vmem:[%s3110_s0 + $0x10] sm:$0x7]  ;;  %2238 = vmatprep.subr.bf16.mxu0 %v2532_v3  ;;  %2244 = vmatprep.subr.bf16.mxu1 %v2532_v3 }
   0x2   :  { %v2078_v4 = vcombine.low %v10_v0, %v10_v0  ;;  %v13_v5 = vld [vmem:[%s3110_s0 + $0x18] sm:$0x7]  ;;  %2240 = vmatprep.mubr.msk.bf16.mxu0 %vm2533_vm0, %v2532_v3  ;;  %2246 = vmatprep.mubr.msk.bf16.mxu1 %vm2533_vm0, %v2532_v3  ;;  %v2082_v6 = vcombine.low %v12_v2, %v12_v2  ;;  %v2080_v7 = vcombine.low %v11_v1, %v11_v1  ;;  %v14_v13 = vmul.bf16 1048592000, %v10_v0  ;;  %v484_v56 = vld [vmem:[%s3110_s0] sm:$0x7] }
   0x3   :  { %v2084_v8 = vcombine.low %v13_v5, %v13_v5  ;;  %v15_v17 = vmul.bf16 1048592000, %v11_v1  ;;  %v16_v19 = vmul.bf16 1048592000, %v12_v2  ;;  %v17_v20 = vmul.bf16 1048592000, %v13_v5 }
   0x4   :  { %25 = vrot.lane.b32.xlu0 %v2078_v4, %s2534_s14  ;;  %128 = vrot.lane.b32.xlu1 %v2082_v6, %s2534_s14  ;;  %v2091_v58 = vcombine.low %v484_v56, %v484_v56  ;;  %vm280_vm3 = vcmask 1041408   ;;  %vm281_vm4 = vcmask 1042432   ;;  %v2536_v59 = vmov 65535   ;;  %v18_v61 = vld [vmem:[%s3110_s0 + $0x4] sm:$0x7]  ;;  %s2537_s26 = smov 112  }
   0x5   :  { %v282_v60 = vsel %vm280_vm3, 4294967295, %v2536_v59  ;;  %v485_v0 = vld [vmem:[%s3110_s0 + $0x8] sm:$0x7]  ;;  %v19_v1 = vld [vmem:[%s3110_s0 + $0xc] sm:$0x7]  ;;  %vm276_vm5 = vcmask 39936  }
   0x6   :  { %v2610_v62 = vsel %vm281_vm4, %v282_v60, 0  ;;  %v2094_v4 = vcombine.low %v485_v0, %v485_v0  ;;  %v486_v6 = vld [vmem:[%s3110_s0 + $0x10] sm:$0x7]  ;;  %vm469_vm6 = vcmask 124928   ;;  %vm470_vm7 = vsmask.f32 2304 }
   0x7   :  { %v285_v63 = vand.u32 %v2610_v62, %v18_v61  ;;  %v331_v2 = vand.u32 %v2610_v62, %v19_v1  ;;  %vm2681_vm8 = vmand %vm469_vm6, %vm470_vm7  ;;  %s2539_s5 = smov 96   ;;  %s2540_s21 = smov 16   ;;  %vm1000_vm9 = vcmask 256128   ;;  %vm1530_vm11 = vcmask 387328  }
   0x8   :  { %77 = vrot.lane.b32.xlu0 %v2080_v7, %s2534_s14  ;;  %179 = vrot.lane.b32.xlu1 %v2084_v8, %s2534_s14  ;;  %v2097_v7 = vcombine.low %v486_v6, %v486_v6  ;;  %v490_v8 = vmul.bf16 1048592000, %v486_v6  ;;  %s2541_s27 = smov 80   ;;  %vm2988_vm10 = vmand %vm1000_vm9, %vm470_vm7  ;;  %vm2060_vm13 = vcmask 518528  }
   0x9   :  { %vm3032_vm12 = vmand %vm1530_vm11, %vm470_vm7 }
   0xa   :  { %vm3074_vm14 = vmand %vm2060_vm13, %vm470_vm7 }
  0x76   :  { %v26_v9 = vpop.permute.xlu0 %25  ;;  %v129_v11 = vpop.permute.xlu1 %128 }
  0x77   :  { %v32_v10 = vsel %vm27_vm1, %v26_v9, 0  ;;  %v134_v15 = vsel %vm27_vm1, %v129_v11, 0 }
  0x78   :  { %2239 = vmatpush3.bf16.xpose.msra.mxu0 %v32_v10  ;;  %v2096_v10 = vcombine.low %v490_v8, %v490_v8 }
  0x79   :  { %2250 = vmatprep.subr.bf16.mxu0 %v2532_v3 }
  0x7a   :  { %v78_v12 = vpop.permute.xlu0 %77  ;;  %v180_v16 = vpop.permute.xlu1 %179 }
  0x7b   :  { %v83_v14 = vsel %vm27_vm1, %v78_v12, 0  ;;  %v185_v18 = vsel %vm27_vm1, %v180_v16, 0 }
  0x7c   :  { %2245 = vmatpush3.bf16.xpose.msra.mxu1 %v83_v14 }
  0x7d   :  { %2256 = vmatprep.subr.bf16.mxu1 %v2532_v3 }
  0x7f   :  { %2241 = vmatmul.mubr.msk.bf16.vlgmr.msra.gmra.mrb[0].mxu0 %vm27_vm1, %v14_v13  ;;  %v488_v13 = vmul.bf16 1048592000, %v484_v56 }
  0x80   :  { %2251 = vmatpush3.bf16.xpose.msra.mxu0 %v134_v15  ;;  %2252 = vmatprep.mubr.msk.bf16.mxu0 %vm2533_vm0, %v2532_v3  ;;  %v489_v15 = vmul.bf16 1048592000, %v485_v0 }
  0x81   :  { %2262 = vmatprep.subr.bf16.mxu0 %v2532_v3  ;;  %v2090_v14 = vcombine.low %v488_v13, %v488_v13 }
  0x82   :  { %v2093_v16 = vcombine.low %v489_v15, %v489_v15 }
  0x83   :  { %2247 = vmatmul.mubr.msk.bf16.vlgmr.msra.gmra.mrb[0].mxu1 %vm27_vm1, %v15_v17  ;;  %v487_v17 = vld [vmem:[%s3110_s0 + $0x18] sm:$0x7] }
  0x84   :  { %2257 = vmatpush3.bf16.xpose.msra.mxu1 %v185_v18  ;;  %2258 = vmatprep.mubr.msk.bf16.mxu1 %vm2533_vm0, %v2532_v3  ;;  %v2100_v18 = vcombine.low %v487_v17, %v487_v17 }
  0x85   :  { %2268 = vmatprep.subr.bf16.mxu1 %v2532_v3 }
  0x87   :  { %2253 = vmatmul.mubr.msk.bf16.vlgmr.msra.gmra.mrb[4].mxu0 %vm27_vm1, %v16_v19  ;;  %v491_v19 = vmul.bf16 1048592000, %v487_v17 }
  0x88   :  { %2264 = vmatprep.mubr.msk.bf16.mxu0 %vm2533_vm0, %v2532_v3  ;;  %2263 = vmatpush3.bf16.msra.mxu0 %v285_v63  ;;  %v475_v63 = vld [vmem:[%s3111_s1 + $0x4] sm:$0x7] }
  0x89   :  { %2274 = vmatprep.subr.bf16.mxu0 %v2532_v3 }
  0x8b   :  { %2259 = vmatmul.mubr.msk.bf16.vlgmr.msra.gmra.mrb[4].mxu1 %vm27_vm1, %v17_v20  ;;  %v2099_v20 = vcombine.low %v491_v19, %v491_v19  ;;  %v478_v19 = vld [vmem:[%s3111_s1 + $0x8] sm:$0x7] }
  0x8c   :  { %2270 = vmatprep.mubr.msk.bf16.mxu1 %vm2533_vm0, %v2532_v3  ;;  %2269 = vmatpush3.bf16.msra.mxu1 %v331_v2 }
  0x8d   :  { %2280 = vmatprep.subr.bf16.mxu1 %v2532_v3 }
 0x152   :  { %v68_v21 = vpop.f32.mrb[0].mxu0 }
 0x153   :  { %v2242_v22 = vpop.f32.mrb[1].mxu0  ;;  %v228_v23 = vsel %vm227_vm2, %v68_v21, -inf }
 0x154   :  { %229 = vmax.xlane.f32.xlu0 %v228_v23  ;;  %v71_v24 = vpop.f32.mrb[2].mxu0  ;;  %v20_v23 = vld [vmem:[%s3110_s0 + $0x14] sm:$0x7] }
 0x155   :  { %v2243_v25 = vpop.f32.mrb[3].mxu0 }
 0x156   :  { %v119_v26 = vpop.f32.mrb[0].mxu1 }
 0x157   :  { %v231_v27 = vsel %vm227_vm2, %v119_v26, -inf  ;;  %v2248_v28 = vpop.f32.mrb[1].mxu1 }
 0x158   :  { %232 = vmax.xlane.f32.xlu1 %v231_v27  ;;  %v122_v29 = vpop.f32.mrb[2].mxu1  ;;  %v377_v27 = vand.u32 %v2610_v62, %v20_v23 }
 0x159   :  { %v2249_v30 = vpop.f32.mrb[3].mxu1  ;;  %v21_v29 = vld [vmem:[%s3110_s0 + $0x1c] sm:$0x7] }
 0x15a   :  { %v170_v31 = vpop.f32.mrb[4].mxu0 }
 0x15b   :  { %v234_v32 = vsel %vm227_vm2, %v170_v31, -inf  ;;  %v2254_v33 = vpop.f32.mrb[5].mxu0 }
 0x15c   :  { %235 = vmax.xlane.f32.xlu0 %v234_v32  ;;  %v173_v34 = vpop.f32.mrb[6].mxu0  ;;  %v423_v32 = vand.u32 %v2610_v62, %v21_v29 }
 0x15d   :  { %v2255_v35 = vpop.f32.mrb[7].mxu0 }
 0x15e   :  { %v221_v36 = vpop.f32.mrb[4].mxu1 }
 0x15f   :  { %v237_v37 = vsel %vm227_vm2, %v221_v36, -inf  ;;  %v2260_v38 = vpop.f32.mrb[5].mxu1 }
 0x160   :  { %238 = vmax.xlane.f32.xlu0 %v237_v37  ;;  %v224_v39 = vpop.f32.mrb[6].mxu1 }
 0x161   :  { %v2261_v40 = vpop.f32.mrb[7].mxu1 }
 0x1e1   :  { %v230_v41 = vpop.xlane.xlu0 %229 }
 0x1e2   :  { %v240_v42 = vsub.f32 %v68_v21, %v230_v41 }
 0x1e4   :  { %v244_v43 = vmul.f32 1.442695, %v240_v42 }
 0x1e5   :  { %v233_v44 = vpop.xlane.xlu1 %232 }
 0x1e6   :  { %2468 = vpow2.f32 %v244_v43  ;;  %v241_v45 = vsub.f32 %v119_v26, %v233_v44 }
 0x1e8   :  { %v246_v46 = vmul.f32 1.442695, %v241_v45 }
 0x1e9   :  { %v236_v47 = vpop.xlane.xlu0 %235 }
 0x1ea   :  { %2470 = vpow2.f32 %v246_v46  ;;  %v242_v5 = vsub.f32 %v170_v31, %v236_v47 }
 0x1ec   :  { %v248_v9 = vmul.f32 1.442695, %v242_v5 }
 0x1ed   :  { %v239_v48 = vpop.xlane.xlu0 %238 }
 0x1ee   :  { %v243_v49 = vsub.f32 %v221_v36, %v239_v48 }
 0x1f0   :  { %v2469_v50 = vpop.eup %2468  ;;  %v250_v51 = vmul.f32 1.442695, %v243_v49 }
 0x1f1   :  { %v252_v52 = vsel %vm227_vm2, %v2469_v50, 0.0 }
 0x1f2   :  { %2472 = vpow2.f32 %v250_v51  ;;  %253 = vadd.xlane.f32.xlu1 %v252_v52 }
 0x1f3   :  { %2474 = vpow2.f32 %v248_v9 }
 0x1f4   :  { %v2595_v53 = vpop.eup %2470 }
 0x1f5   :  { %v255_v54 = vsel %vm227_vm2, %v2595_v53, 0.0 }
 0x1f6   :  { %256 = vadd.xlane.f32.xlu0 %v255_v54 }
 0x1fc   :  { %v2599_v55 = vpop.eup %2472 }
 0x1fd   :  { %v261_v57 = vsel %vm227_vm2, %v2599_v55, 0.0  ;;  %v2475_v11 = vpop.eup %2474 }
 0x1fe   :  { %262 = vadd.xlane.f32.xlu0 %v261_v57  ;;  %v258_v12 = vsel %vm227_vm2, %v2475_v11, 0.0 }
 0x203   :  { %504 = vrot.lane.b32.xlu1 %v2091_v58, %s2535_s17 }
 0x214   :  { %560 = vrot.lane.b32.xlu0 %v2094_v4, %s2535_s17 }
 0x218   :  { %616 = vrot.lane.b32.xlu0 %v2097_v7, %s2535_s17  ;;  %v481_v7 = vld [vmem:[%s3111_s1 + $0xc] sm:$0x7] }
 0x21c   :  { %611 = vrot.lane.b32.xlu0 %v2096_v10, %s2537_s26 }
 0x227   :  { %259 = vadd.xlane.f32.xlu1 %v258_v12 }
 0x238   :  { %499 = vrot.lane.b32.xlu1 %v2090_v14, %s2537_s26 }
 0x23c   :  { %555 = vrot.lane.b32.xlu1 %v2093_v16, %s2537_s26 }
 0x240   :  { %672 = vrot.lane.b32.xlu1 %v2100_v18, %s2535_s17 }
 0x244   :  { %667 = vrot.lane.b32.xlu1 %v2099_v20, %s2537_s26 }
 0x27f   :  { %v254_v21 = vpop.xlane.xlu1 %253 }
 0x280   :  { %2476 = vrcp.f32 %v254_v21 }
 0x283   :  { %v257_v22 = vpop.xlane.xlu0 %256  ;;  %v505_v39 = vpop.permute.xlu1 %504 }
 0x284   :  { %2478 = vrcp.f32 %v257_v22  ;;  %v510_v48 = vsel %vm27_vm1, %v505_v39, 0 }
 0x28a   :  { %v2477_v24 = vpop.eup %2476 }
 0x28b   :  { %v268_v25 = vmul.f32 %v2477_v24, %v2469_v50  ;;  %v263_v26 = vpop.xlane.xlu0 %262 }
 0x28c   :  { %2480 = vrcp.f32 %v263_v26 }
 0x28d   :  { %v272_v28 = vpack.c.bf16 %v268_v25, %v268_v25 }
 0x28e   :  { %v2479_v30 = vpop.eup %2478 }
 0x28f   :  { %v269_v31 = vmul.f32 %v2479_v30, %v2595_v53  ;;  %2265 = vmatmul.mubr.msk.bf16.vlgmr.msra.gmra.mrb[8].mxu0 %vm276_vm5, %v272_v28  ;;  %v561_v36 = vpop.permute.xlu0 %560  ;;  %v2448_v30 = vld [vmem:[%s3110_s0 + $0x4] ss:$0 sps:$4 sm:$0x77]  }
 0x290   :  { %2275 = vmatpush3.bf16.msra.mxu0 %v377_v27  ;;  %2276 = vmatprep.mubr.msk.bf16.mxu0 %vm2533_vm0, %v2532_v3  ;;  %v566_v38 = vsel %vm27_vm1, %v561_v36, 0 }
 0x291   :  { %v273_v33 = vpack.c.bf16 %v269_v31, %v269_v31  ;;  %2286 = vmatprep.subr.bf16.mxu0 %v2532_v3 }
 0x293   :  { %2271 = vmatmul.mubr.msk.bf16.vlgmr.msra.gmra.mrb[8].mxu1 %vm276_vm5, %v273_v33  ;;  %v617_v50 = vpop.permute.xlu0 %616 }
 0x294   :  { %2281 = vmatpush3.bf16.msra.mxu1 %v423_v32  ;;  %2282 = vmatprep.mubr.msk.bf16.mxu1 %vm2533_vm0, %v2532_v3  ;;  %v622_v51 = vsel %vm27_vm1, %v617_v50, 0 }
 0x295   :  { %2292 = vmatprep.subr.bf16.mxu1 %v2532_v3 }
 0x296   :  { %v2481_v34 = vpop.eup %2480 }
 0x297   :  { %v271_v35 = vmul.f32 %v2481_v34, %v2599_v55  ;;  %v612_v52 = vpop.permute.xlu0 %611  ;;  %v472_v55 = vld [vmem:[%s3111_s1] sm:$0x7] }
 0x299   :  { %v275_v37 = vpack.c.bf16 %v271_v35, %v271_v35 }
 0x29b   :  { %2283 = vmatmul.mubr.msk.bf16.vlgmr.msra.gmra.mrb[12].mxu1 %vm276_vm5, %v275_v37 }
 0x29c   :  { %2294 = vmatprep.mubr.msk.bf16.mxu1 %vm2533_vm0, %v2532_v3 }
 0x29d   :  { %2293 = vmatpush3.bf16.xpose.msra.mxu1 %v566_v38 }
 0x29e   :  { %2304 = vmatprep.subr.bf16.mxu1 %v2532_v3 }
 0x2b4   :  { %v260_v40 = vpop.xlane.xlu1 %259 }
 0x2b5   :  { %2482 = vrcp.f32 %v260_v40 }
 0x2b8   :  { %v500_v41 = vpop.permute.xlu1 %499 }
 0x2bc   :  { %v556_v42 = vpop.permute.xlu1 %555 }
 0x2bd   :  { %2295 = vmatmul.mubr.msk.bf16.vlgmr.msra.gmra.mrb[16].mxu1 %vm27_vm1, %v556_v42 }
 0x2be   :  { %2306 = vmatprep.mubr.msk.bf16.mxu1 %vm2533_vm0, %v2532_v3 }
 0x2bf   :  { %v2483_v43 = vpop.eup %2482 }
 0x2c0   :  { %v270_v44 = vmul.f32 %v2483_v43, %v2475_v11  ;;  %v673_v45 = vpop.permute.xlu1 %672 }
 0x2c1   :  { %v678_v46 = vsel %vm27_vm1, %v673_v45, 0 }
 0x2c2   :  { %v274_v47 = vpack.c.bf16 %v270_v44, %v270_v44  ;;  %2305 = vmatpush3.bf16.xpose.msra.mxu1 %v678_v46 }
 0x2c3   :  { %2316 = vmatprep.subr.bf16.mxu1 %v2532_v3 }
 0x2c4   :  { %2277 = vmatmul.mubr.msk.bf16.vlgmr.msra.gmra.mrb[12].mxu0 %vm276_vm5, %v274_v47  ;;  %v668_v49 = vpop.permute.xlu1 %667 }
 0x2c5   :  { %2287 = vmatpush3.bf16.xpose.msra.mxu0 %v510_v48  ;;  %2288 = vmatprep.mubr.msk.bf16.mxu0 %vm2533_vm0, %v2532_v3 }
 0x2c6   :  { %2298 = vmatprep.subr.bf16.mxu0 %v2532_v3 }
 0x2c9   :  { %2307 = vmatmul.mubr.msk.bf16.vlgmr.msra.gmra.mrb[20].mxu1 %vm27_vm1, %v668_v49 }
 0x2ca   :  { %2318 = vmatprep.mubr.msk.bf16.mxu1 %vm2533_vm0, %v2532_v3 }
 0x2cc   :  { %2289 = vmatmul.mubr.msk.bf16.vlgmr.msra.gmra.mrb[16].mxu0 %vm27_vm1, %v500_v41 }
 0x2cd   :  { %2299 = vmatpush3.bf16.xpose.msra.mxu0 %v622_v51  ;;  %2300 = vmatprep.mubr.msk.bf16.mxu0 %vm2533_vm0, %v2532_v3 }
 0x2ce   :  { %2310 = vmatprep.subr.bf16.mxu0 %v2532_v3 }
 0x2d4   :  { %2301 = vmatmul.mubr.msk.bf16.vlgmr.msra.gmra.mrb[20].mxu0 %vm27_vm1, %v612_v52 }
 0x2d5   :  { %2312 = vmatprep.mubr.msk.bf16.mxu0 %vm2533_vm0, %v2532_v3 }
 0x362   :  { %v321_v53 = vpop.f32.mrb[8].mxu0 }
 0x363   :  { %v465_v56 = vpack.c.bf16 %v321_v53, %v321_v53  ;;  %v2266_v57 = vpop.f32.mrb[9].mxu0  ;;  %v2449_v53 = vld [vmem:[%s3110_s0 + $0xc] ss:$0 sps:$4 sm:$0x77]  }
 0x364   :  { %v324_v58 = vpop.f32.mrb[10].mxu0 }
 0x365   :  { %v473_v59 = vsel %vm2681_vm8, %v465_v56, %v472_v55  ;;  %v2267_v60 = vpop.f32.mrb[11].mxu0  ;;  %v2450_v56 = vld [vmem:[%s3110_s0 + $0x14] ss:$0 sps:$4 sm:$0x77]  }
 0x366   :  { %474 = vst [vmem:[%s3111_s1] sm:$0x7] %v473_v59  ;;  %v367_v61 = vpop.f32.mrb[8].mxu1  ;;  %v2451_v58 = vld [vmem:[%s3110_s0 + $0x1c] ss:$0 sps:$4 sm:$0x77]  }
 0x367   :  { %v466_v0 = vpack.c.bf16 %v367_v61, %v367_v61  ;;  %v2272_v1 = vpop.f32.mrb[9].mxu1 }
 0x368   :  { %v370_v2 = vpop.f32.mrb[10].mxu1 }
 0x369   :  { %v476_v4 = vsel %vm2681_vm8, %v466_v0, %v475_v63  ;;  %v2273_v5 = vpop.f32.mrb[11].mxu1  ;;  %v1014_v2 = vld [vmem:[%s3110_s0] sm:$0x7] }
 0x36a   :  { %477 = vst [vmem:[%s3111_s1 + $0x4] sm:$0x7] %v476_v4  ;;  %v2115_v5 = vcombine.low %v1014_v2, %v1014_v2 }
 0x36e   :  { %v459_v6 = vpop.f32.mrb[12].mxu1 }
 0x36f   :  { %v468_v8 = vpack.c.bf16 %v459_v6, %v459_v6  ;;  %v2284_v9 = vpop.f32.mrb[13].mxu1  ;;  %v1018_v6 = vmul.bf16 1048592000, %v1014_v2 }
 0x370   :  { %v462_v10 = vpop.f32.mrb[14].mxu1 }
 0x371   :  { %v482_v11 = vsel %vm2681_vm8, %v468_v8, %v481_v7  ;;  %v2285_v12 = vpop.f32.mrb[15].mxu1  ;;  %v2114_v7 = vcombine.low %v1018_v6, %v1018_v6  ;;  %v1016_v8 = vld [vmem:[%s3110_s0 + $0x10] sm:$0x7] }
 0x372   :  { %483 = vst [vmem:[%s3111_s1 + $0xc] sm:$0x7] %v482_v11  ;;  %v2121_v9 = vcombine.low %v1016_v8, %v1016_v8  ;;  %v1020_v10 = vmul.bf16 1048592000, %v1016_v8  ;;  %v1015_v11 = vld [vmem:[%s3110_s0 + $0x8] sm:$0x7] }
 0x374   :  { %v2120_v12 = vcombine.low %v1020_v10, %v1020_v10 }
 0x390   :  { %v602_v13 = vpop.f32.mrb[16].mxu1 }
 0x391   :  { %v723_v14 = vsel %vm227_vm2, %v602_v13, -inf  ;;  %v2296_v15 = vpop.f32.mrb[17].mxu1 }
 0x392   :  { %724 = vmax.xlane.f32.xlu1 %v723_v14  ;;  %v605_v16 = vpop.f32.mrb[18].mxu1  ;;  %v1019_v14 = vmul.bf16 1048592000, %v1015_v11 }
 0x393   :  { %v2297_v17 = vpop.f32.mrb[19].mxu1  ;;  %v1017_v16 = vld [vmem:[%s3110_s0 + $0x18] sm:$0x7] }
 0x394   :  { %v2117_v15 = vcombine.low %v1019_v14, %v1019_v14  ;;  %v2124_v17 = vcombine.low %v1017_v16, %v1017_v16 }
 0x397   :  { %v413_v18 = vpop.f32.mrb[12].mxu0 }
 0x398   :  { %v467_v20 = vpack.c.bf16 %v413_v18, %v413_v18  ;;  %v2278_v21 = vpop.f32.mrb[13].mxu0  ;;  %v1021_v18 = vmul.bf16 1048592000, %v1017_v16 }
 0x399   :  { %v416_v22 = vpop.f32.mrb[14].mxu0 }
 0x39a   :  { %v479_v23 = vsel %vm2681_vm8, %v467_v20, %v478_v19  ;;  %v2279_v24 = vpop.f32.mrb[15].mxu0  ;;  %v2123_v19 = vcombine.low %v1021_v18, %v1021_v18 }
 0x39b   :  { %480 = vst [vmem:[%s3111_s1 + $0x8] sm:$0x7] %v479_v23 }
 0x39c   :  { %v714_v25 = vpop.f32.mrb[20].mxu1 }
 0x39d   :  { %v2308_v26 = vpop.f32.mrb[21].mxu1  ;;  %v729_v39 = vsel %vm227_vm2, %v714_v25, -inf }
 0x39e   :  { %v717_v27 = vpop.f32.mrb[22].mxu1 }
 0x39f   :  { %v546_v28 = vpop.f32.mrb[16].mxu0  ;;  %v2309_v29 = vpop.f32.mrb[23].mxu1 }
 0x3a0   :  { %v2290_v31 = vpop.f32.mrb[17].mxu0  ;;  %v720_v32 = vsel %vm227_vm2, %v546_v28, -inf }
 0x3a1   :  { %721 = vmax.xlane.f32.xlu0 %v720_v32  ;;  %v549_v33 = vpop.f32.mrb[18].mxu0 }
 0x3a2   :  { %v2291_v34 = vpop.f32.mrb[19].mxu0 }
 0x3a3   :  { %771 = vrot.lane.b32.xlu1 %v2448_v30, %s2537_s26 }
 0x3a7   :  { %v658_v35 = vpop.f32.mrb[20].mxu0 }
 0x3a8   :  { %v726_v36 = vsel %vm227_vm2, %v658_v35, -inf  ;;  %v2302_v37 = vpop.f32.mrb[21].mxu0 }
 0x3a9   :  { %727 = vmax.xlane.f32.xlu0 %v726_v36  ;;  %v661_v38 = vpop.f32.mrb[22].mxu0 }
 0x3aa   :  { %v2303_v40 = vpop.f32.mrb[23].mxu0 }
 0x3ad   :  { %730 = vmax.xlane.f32.xlu0 %v729_v39 }
 0x41f   :  { %v725_v41 = vpop.xlane.xlu1 %724 }
 0x420   :  { %v733_v42 = vsub.f32 %v602_v13, %v725_v41  ;;  %v2118_v13 = vcombine.low %v1015_v11, %v1015_v11 }
 0x422   :  { %v738_v43 = vmul.f32 1.442695, %v733_v42 }
 0x423   :  { %v772_v44 = vpop.permute.xlu1 %771 }
 0x424   :  { %2484 = vpow2.f32 %v738_v43  ;;  %v777_v45 = vand.u32 %v772_v44, %v2610_v62 }
 0x426   :  { %2311 = vmatpush3.bf16.msra.mxu0 %v777_v45 }
 0x427   :  { %2322 = vmatprep.subr.bf16.mxu0 %v2532_v3 }
 0x42e   :  { %v2727_v46 = vpop.eup %2484  ;;  %v722_v47 = vpop.xlane.xlu0 %721 }
 0x42f   :  { %v732_v48 = vsub.f32 %v546_v28, %v722_v47  ;;  %v747_v49 = vsel %vm227_vm2, %v2727_v46, 0.0 }
 0x430   :  { %748 = vadd.xlane.f32.xlu0 %v747_v49 }
 0x431   :  { %v736_v50 = vmul.f32 1.442695, %v732_v48 }
 0x433   :  { %2486 = vpow2.f32 %v736_v50 }
 0x436   :  { %v728_v54 = vpop.xlane.xlu0 %727 }
 0x437   :  { %v734_v61 = vsub.f32 %v658_v35, %v728_v54 }
 0x439   :  { %v740_v0 = vmul.f32 1.442695, %v734_v61 }
 0x43a   :  { %v731_v55 = vpop.xlane.xlu0 %730 }
 0x43b   :  { %v735_v57 = vsub.f32 %v714_v25, %v731_v55 }
 0x43d   :  { %v2731_v51 = vpop.eup %2486  ;;  %v742_v59 = vmul.f32 1.442695, %v735_v57 }
 0x43e   :  { %v744_v52 = vsel %vm227_vm2, %v2731_v51, 0.0 }
 0x43f   :  { %745 = vadd.xlane.f32.xlu1 %v744_v52  ;;  %2488 = vpow2.f32 %v742_v59 }
 0x440   :  { %2490 = vpow2.f32 %v740_v0 }
 0x446   :  { %822 = vrot.lane.b32.xlu0 %v2449_v53, %s2537_s26 }
 0x449   :  { %v2747_v60 = vpop.eup %2488 }
 0x44a   :  { %v753_v63 = vsel %vm227_vm2, %v2747_v60, 0.0  ;;  %v2751_v1 = vpop.eup %2490 }
 0x44b   :  { %v750_v4 = vsel %vm227_vm2, %v2751_v1, 0.0 }
 0x450   :  { %873 = vrot.lane.b32.xlu1 %v2450_v56, %s2537_s26 }
 0x454   :  { %924 = vrot.lane.b32.xlu1 %v2451_v58, %s2537_s26  ;;  %s2538_s26 = smov 32  }
 0x465   :  { %754 = vadd.xlane.f32.xlu0 %v753_v63 }
 0x478   :  { %751 = vadd.xlane.f32.xlu1 %v750_v4 }
 0x47b   :  { %1034 = vrot.lane.b32.xlu0 %v2115_v5, %s2538_s26 }
 0x47f   :  { %1029 = vrot.lane.b32.xlu0 %v2114_v7, %s2539_s5 }
 0x483   :  { %1146 = vrot.lane.b32.xlu0 %v2121_v9, %s2538_s26 }
 0x487   :  { %1141 = vrot.lane.b32.xlu0 %v2120_v12, %s2539_s5 }
 0x489   :  { %1090 = vrot.lane.b32.xlu1 %v2118_v13, %s2538_s26 }
 0x48d   :  { %1085 = vrot.lane.b32.xlu1 %v2117_v15, %s2539_s5 }
 0x491   :  { %1202 = vrot.lane.b32.xlu1 %v2124_v17, %s2538_s26 }
 0x495   :  { %1197 = vrot.lane.b32.xlu1 %v2123_v19, %s2539_s5 }
 0x4bd   :  { %v749_v20 = vpop.xlane.xlu0 %748 }
 0x4be   :  { %2492 = vrcp.f32 %v749_v20 }
 0x4c1   :  { %v823_v21 = vpop.permute.xlu0 %822 }
 0x4c2   :  { %v828_v22 = vand.u32 %v823_v21, %v2610_v62 }
 0x4c4   :  { %2317 = vmatpush3.bf16.msra.mxu1 %v828_v22  ;;  %v2456_v22 = vld [vmem:[%s3110_s0 + $0x4] ss:$0 sps:$4 sm:$0x77]  }
 0x4c5   :  { %2328 = vmatprep.subr.bf16.mxu1 %v2532_v3 }
 0x4c8   :  { %v2493_v23 = vpop.eup %2492 }
 0x4c9   :  { %v761_v24 = vmul.f32 %v2493_v23, %v2727_v46 }
 0x4cb   :  { %v765_v25 = vpack.c.bf16 %v761_v24, %v761_v24 }
 0x4cc   :  { %v746_v26 = vpop.xlane.xlu1 %745 }
 0x4cd   :  { %2494 = vrcp.f32 %v746_v26  ;;  %2319 = vmatmul.mubr.msk.bf16.vlgmr.msra.gmra.mrb[24].mxu1 %vm276_vm5, %v765_v25 }
 0x4ce   :  { %2330 = vmatprep.mubr.msk.bf16.mxu1 %vm2533_vm0, %v2532_v3 }
 0x4d0   :  { %v874_v27 = vpop.permute.xlu1 %873 }
 0x4d1   :  { %v879_v33 = vand.u32 %v874_v27, %v2610_v62 }
 0x4d4   :  { %v925_v28 = vpop.permute.xlu1 %924 }
 0x4d5   :  { %v930_v29 = vand.u32 %v925_v28, %v2610_v62 }
 0x4d7   :  { %v2495_v30 = vpop.eup %2494  ;;  %2329 = vmatpush3.bf16.msra.mxu1 %v930_v29 }
 0x4d8   :  { %v760_v31 = vmul.f32 %v2495_v30, %v2731_v51  ;;  %2340 = vmatprep.subr.bf16.mxu1 %v2532_v3 }
 0x4da   :  { %v764_v32 = vpack.c.bf16 %v760_v31, %v760_v31 }
 0x4dc   :  { %2313 = vmatmul.mubr.msk.bf16.vlgmr.msra.gmra.mrb[24].mxu0 %vm276_vm5, %v764_v32 }
 0x4dd   :  { %2323 = vmatpush3.bf16.msra.mxu0 %v879_v33  ;;  %2324 = vmatprep.mubr.msk.bf16.mxu0 %vm2533_vm0, %v2532_v3 }
 0x4de   :  { %2334 = vmatprep.subr.bf16.mxu0 %v2532_v3 }
 0x4f2   :  { %v755_v34 = vpop.xlane.xlu0 %754 }
 0x4f3   :  { %2496 = vrcp.f32 %v755_v34 }
 0x4f6   :  { %v1035_v41 = vpop.permute.xlu0 %1034 }
 0x4f7   :  { %v1040_v48 = vsel %vm27_vm1, %v1035_v41, 0  ;;  %v2457_v41 = vld [vmem:[%s3110_s0 + $0xc] ss:$0 sps:$4 sm:$0x77]  }
 0x4fa   :  { %v1030_v46 = vpop.permute.xlu0 %1029 }
 0x4fd   :  { %v2497_v35 = vpop.eup %2496 }
 0x4fe   :  { %v763_v36 = vmul.f32 %v2497_v35, %v2747_v60  ;;  %v1147_v51 = vpop.permute.xlu0 %1146 }
 0x4ff   :  { %v1152_v52 = vsel %vm27_vm1, %v1147_v51, 0 }
 0x500   :  { %v767_v37 = vpack.c.bf16 %v763_v36, %v763_v36 }
 0x502   :  { %2331 = vmatmul.mubr.msk.bf16.vlgmr.msra.gmra.mrb[28].mxu1 %vm276_vm5, %v767_v37  ;;  %v1142_v53 = vpop.permute.xlu0 %1141 }
 0x503   :  { %2342 = vmatprep.mubr.msk.bf16.mxu1 %vm2533_vm0, %v2532_v3 }
 0x505   :  { %v752_v38 = vpop.xlane.xlu1 %751 }
 0x506   :  { %2498 = vrcp.f32 %v752_v38 }
 0x509   :  { %v1091_v39 = vpop.permute.xlu1 %1090 }
 0x50a   :  { %v1096_v40 = vsel %vm27_vm1, %v1091_v39, 0 }
 0x50b   :  { %2341 = vmatpush3.bf16.xpose.msra.mxu1 %v1096_v40 }
 0x50c   :  { %2352 = vmatprep.subr.bf16.mxu1 %v2532_v3 }
 0x50d   :  { %v1086_v42 = vpop.permute.xlu1 %1085 }
 0x510   :  { %v2499_v43 = vpop.eup %2498 }
 0x511   :  { %v762_v44 = vmul.f32 %v2499_v43, %v2751_v1  ;;  %v1203_v45 = vpop.permute.xlu1 %1202  ;;  %v2458_v43 = vld [vmem:[%s3110_s0 + $0x14] ss:$0 sps:$4 sm:$0x77]  }
 0x512   :  { %2343 = vmatmul.mubr.msk.bf16.vlgmr.msra.gmra.mrb[32].mxu1 %vm27_vm1, %v1086_v42  ;;  %v1208_v47 = vsel %vm27_vm1, %v1203_v45, 0  ;;  %v2459_v45 = vld [vmem:[%s3110_s0 + $0x1c] ss:$0 sps:$4 sm:$0x77]  }
 0x513   :  { %v766_v49 = vpack.c.bf16 %v762_v44, %v762_v44  ;;  %2353 = vmatpush3.bf16.xpose.msra.mxu1 %v1208_v47  ;;  %2354 = vmatprep.mubr.msk.bf16.mxu1 %vm2533_vm0, %v2532_v3 }
 0x514   :  { %2364 = vmatprep.subr.bf16.mxu1 %v2532_v3 }
 0x515   :  { %2325 = vmatmul.mubr.msk.bf16.vlgmr.msra.gmra.mrb[28].mxu0 %vm276_vm5, %v766_v49  ;;  %v1198_v50 = vpop.permute.xlu1 %1197 }
 0x516   :  { %2335 = vmatpush3.bf16.xpose.msra.mxu0 %v1040_v48  ;;  %2336 = vmatprep.mubr.msk.bf16.mxu0 %vm2533_vm0, %v2532_v3 }
 0x517   :  { %2346 = vmatprep.subr.bf16.mxu0 %v2532_v3 }
 0x51a   :  { %2355 = vmatmul.mubr.msk.bf16.vlgmr.msra.gmra.mrb[36].mxu1 %vm27_vm1, %v1198_v50 }
 0x51b   :  { %2366 = vmatprep.mubr.msk.bf16.mxu1 %vm2533_vm0, %v2532_v3 }
 0x51d   :  { %2337 = vmatmul.mubr.msk.bf16.vlgmr.msra.gmra.mrb[32].mxu0 %vm27_vm1, %v1030_v46 }
 0x51e   :  { %2347 = vmatpush3.bf16.xpose.msra.mxu0 %v1152_v52  ;;  %2348 = vmatprep.mubr.msk.bf16.mxu0 %vm2533_vm0, %v2532_v3 }
 0x51f   :  { %2358 = vmatprep.subr.bf16.mxu0 %v2532_v3 }
 0x525   :  { %2349 = vmatmul.mubr.msk.bf16.vlgmr.msra.gmra.mrb[36].mxu0 %vm27_vm1, %v1142_v53 }
 0x526   :  { %2360 = vmatprep.mubr.msk.bf16.mxu0 %vm2533_vm0, %v2532_v3 }
 0x5a0   :  { %v2817_v54 = vpop.f32.mrb[24].mxu1 }
 0x5a1   :  { %v2320_v55 = vpop.f32.mrb[25].mxu1 }
 0x5a2   :  { %v867_v56 = vpop.f32.mrb[26].mxu1  ;;  %v1544_v55 = vld [vmem:[%s3110_s0] sm:$0x7] }
 0x5a3   :  { %v2321_v57 = vpop.f32.mrb[27].mxu1  ;;  %v2139_v56 = vcombine.low %v1544_v55, %v1544_v55 }
 0x5a4   :  { %v1548_v57 = vmul.bf16 1048592000, %v1544_v55 }
 0x5af   :  { %v2819_v58 = vpop.f32.mrb[24].mxu0 }
 0x5b0   :  { %v2314_v59 = vpop.f32.mrb[25].mxu0 }
 0x5b1   :  { %v816_v60 = vpop.f32.mrb[26].mxu0  ;;  %v2138_v59 = vcombine.low %v1548_v57, %v1548_v57 }
 0x5b2   :  { %v2315_v61 = vpop.f32.mrb[27].mxu0  ;;  %v1546_v60 = vld [vmem:[%s3110_s0 + $0x10] sm:$0x7] }
 0x5b3   :  { %v1545_v61 = vld [vmem:[%s3110_s0 + $0x8] sm:$0x7] }
 0x5d5   :  { %v2821_v63 = vpop.f32.mrb[28].mxu1 }
 0x5d6   :  { %v2332_v0 = vpop.f32.mrb[29].mxu1 }
 0x5d7   :  { %v969_v1 = vpop.f32.mrb[30].mxu1  ;;  %v2145_v0 = vcombine.low %v1546_v60, %v1546_v60 }
 0x5d8   :  { %v2333_v2 = vpop.f32.mrb[31].mxu1  ;;  %v1550_v1 = vmul.bf16 1048592000, %v1546_v60 }
 0x5d9   :  { %v2142_v2 = vcombine.low %v1545_v61, %v1545_v61 }
 0x5e5   :  { %v1132_v4 = vpop.f32.mrb[32].mxu1 }
 0x5e6   :  { %v1253_v5 = vsel %vm227_vm2, %v1132_v4, -inf  ;;  %v2344_v6 = vpop.f32.mrb[33].mxu1 }
 0x5e7   :  { %1254 = vmax.xlane.f32.xlu1 %v1253_v5  ;;  %v1135_v7 = vpop.f32.mrb[34].mxu1  ;;  %v2144_v5 = vcombine.low %v1550_v1, %v1550_v1 }
 0x5e8   :  { %v2824_v8 = vpop.f32.mrb[28].mxu0  ;;  %v2345_v9 = vpop.f32.mrb[35].mxu1  ;;  %v1547_v7 = vld [vmem:[%s3110_s0 + $0x18] sm:$0x7] }
 0x5e9   :  { %v2326_v10 = vpop.f32.mrb[29].mxu0  ;;  %v2148_v9 = vcombine.low %v1547_v7, %v1547_v7 }
 0x5ea   :  { %v918_v11 = vpop.f32.mrb[30].mxu0  ;;  %v1551_v10 = vmul.bf16 1048592000, %v1547_v7 }
 0x5eb   :  { %v2327_v12 = vpop.f32.mrb[31].mxu0 }
 0x5ec   :  { %v2147_v11 = vcombine.low %v1551_v10, %v1551_v10 }
 0x5ed   :  { %v1244_v13 = vpop.f32.mrb[36].mxu1 }
 0x5ee   :  { %v2356_v14 = vpop.f32.mrb[37].mxu1  ;;  %v1259_v27 = vsel %vm227_vm2, %v1244_v13, -inf }
 0x5ef   :  { %v1247_v15 = vpop.f32.mrb[38].mxu1 }
 0x5f0   :  { %v1076_v16 = vpop.f32.mrb[32].mxu0  ;;  %v2357_v17 = vpop.f32.mrb[39].mxu1 }
 0x5f1   :  { %v2338_v18 = vpop.f32.mrb[33].mxu0  ;;  %v1250_v19 = vsel %vm227_vm2, %v1076_v16, -inf }
 0x5f2   :  { %1251 = vmax.xlane.f32.xlu0 %v1250_v19  ;;  %v1079_v20 = vpop.f32.mrb[34].mxu0 }
 0x5f3   :  { %v2339_v21 = vpop.f32.mrb[35].mxu0 }
 0x5f8   :  { %v1188_v23 = vpop.f32.mrb[36].mxu0  ;;  %1301 = vrot.lane.b32.xlu1 %v2456_v22, %s2539_s5 }
 0x5f9   :  { %v1256_v24 = vsel %vm227_vm2, %v1188_v23, -inf  ;;  %v2350_v25 = vpop.f32.mrb[37].mxu0 }
 0x5fa   :  { %1257 = vmax.xlane.f32.xlu0 %v1256_v24  ;;  %v1191_v26 = vpop.f32.mrb[38].mxu0 }
 0x5fb   :  { %v2351_v28 = vpop.f32.mrb[39].mxu0 }
 0x5fe   :  { %1260 = vmax.xlane.f32.xlu0 %v1259_v27 }
 0x674   :  { %v1255_v29 = vpop.xlane.xlu1 %1254 }
 0x675   :  { %v1263_v30 = vsub.f32 %v1132_v4, %v1255_v29  ;;  %v1549_v4 = vmul.bf16 1048592000, %v1545_v61 }
 0x677   :  { %v1268_v31 = vmul.f32 1.442695, %v1263_v30  ;;  %v2141_v6 = vcombine.low %v1549_v4, %v1549_v4 }
 0x678   :  { %v1302_v32 = vpop.permute.xlu1 %1301 }
 0x679   :  { %2500 = vpow2.f32 %v1268_v31  ;;  %v1307_v33 = vand.u32 %v1302_v32, %v2610_v62 }
 0x67b   :  { %2359 = vmatpush3.bf16.msra.mxu0 %v1307_v33 }
 0x67c   :  { %2370 = vmatprep.subr.bf16.mxu0 %v2532_v3 }
 0x67f   :  { %v1252_v34 = vpop.xlane.xlu0 %1251 }
 0x680   :  { %v1262_v35 = vsub.f32 %v1076_v16, %v1252_v34 }
 0x682   :  { %v1266_v36 = vmul.f32 1.442695, %v1262_v35 }
 0x683   :  { %v2501_v37 = vpop.eup %2500 }
 0x684   :  { %2502 = vpow2.f32 %v1266_v36  ;;  %v1277_v38 = vsel %vm227_vm2, %v2501_v37, 0.0 }
 0x685   :  { %1278 = vadd.xlane.f32.xlu0 %v1277_v38 }
 0x687   :  { %v1258_v42 = vpop.xlane.xlu0 %1257 }
 0x688   :  { %v1264_v48 = vsub.f32 %v1188_v23, %v1258_v42 }
 0x68a   :  { %v1270_v50 = vmul.f32 1.442695, %v1264_v48 }
 0x68b   :  { %v1261_v44 = vpop.xlane.xlu0 %1260 }
 0x68c   :  { %v1265_v46 = vsub.f32 %v1244_v13, %v1261_v44 }
 0x68e   :  { %v2836_v39 = vpop.eup %2502  ;;  %v1272_v47 = vmul.f32 1.442695, %v1265_v46 }
 0x68f   :  { %v1274_v40 = vsel %vm227_vm2, %v2836_v39, 0.0 }
 0x690   :  { %1275 = vadd.xlane.f32.xlu1 %v1274_v40  ;;  %2504 = vpow2.f32 %v1272_v47 }
 0x691   :  { %2506 = vpow2.f32 %v1270_v50 }
 0x69a   :  { %v2852_v49 = vpop.eup %2504 }
 0x69b   :  { %1352 = vrot.lane.b32.xlu0 %v2457_v41, %s2539_s5  ;;  %v1283_v51 = vsel %vm227_vm2, %v2852_v49, 0.0  ;;  %v2856_v52 = vpop.eup %2506 }
 0x69c   :  { %v1280_v53 = vsel %vm227_vm2, %v2856_v52, 0.0 }
 0x6a1   :  { %1403 = vrot.lane.b32.xlu1 %v2458_v43, %s2539_s5 }
 0x6a5   :  { %1454 = vrot.lane.b32.xlu1 %v2459_v45, %s2539_s5 }
 0x6ba   :  { %1284 = vadd.xlane.f32.xlu0 %v1283_v51 }
 0x6c9   :  { %1281 = vadd.xlane.f32.xlu1 %v1280_v53 }
 0x6d0   :  { %1564 = vrot.lane.b32.xlu0 %v2139_v56, %s2540_s21 }
 0x6d4   :  { %1559 = vrot.lane.b32.xlu0 %v2138_v59, %s2541_s27 }
 0x6d8   :  { %1676 = vrot.lane.b32.xlu0 %v2145_v0, %s2540_s21 }
 0x6da   :  { %1620 = vrot.lane.b32.xlu1 %v2142_v2, %s2540_s21 }
 0x6dc   :  { %1671 = vrot.lane.b32.xlu0 %v2144_v5, %s2541_s27 }
 0x6de   :  { %1615 = vrot.lane.b32.xlu1 %v2141_v6, %s2541_s27 }
 0x6e2   :  { %1732 = vrot.lane.b32.xlu1 %v2148_v9, %s2540_s21 }
 0x6e6   :  { %1727 = vrot.lane.b32.xlu1 %v2147_v11, %s2541_s27 }
 0x712   :  { %v1279_v12 = vpop.xlane.xlu0 %1278 }
 0x713   :  { %2508 = vrcp.f32 %v1279_v12 }
 0x716   :  { %v1353_v13 = vpop.permute.xlu0 %1352 }
 0x717   :  { %v1358_v14 = vand.u32 %v1353_v13, %v2610_v62 }
 0x719   :  { %2365 = vmatpush3.bf16.msra.mxu1 %v1358_v14 }
 0x71a   :  { %2376 = vmatprep.subr.bf16.mxu1 %v2532_v3 }
 0x71d   :  { %v2509_v15 = vpop.eup %2508  ;;  %v1276_v16 = vpop.xlane.xlu1 %1275 }
 0x71e   :  { %v1291_v17 = vmul.f32 %v2509_v15, %v2501_v37  ;;  %2510 = vrcp.f32 %v1276_v16 }
 0x720   :  { %v1295_v18 = vpack.c.bf16 %v1291_v17, %v1291_v17 }
 0x721   :  { %v1404_v19 = vpop.permute.xlu1 %1403 }
 0x722   :  { %2367 = vmatmul.mubr.msk.bf16.vlgmr.msra.gmra.mrb[40].mxu1 %vm276_vm5, %v1295_v18  ;;  %v1409_v25 = vand.u32 %v1404_v19, %v2610_v62  ;;  %v2464_v18 = vld [vmem:[%s3110_s0 + $0x4] ss:$0 sps:$4 sm:$0x77]  }
 0x723   :  { %2378 = vmatprep.mubr.msk.bf16.mxu1 %vm2533_vm0, %v2532_v3 }
 0x725   :  { %v1455_v20 = vpop.permute.xlu1 %1454 }
 0x726   :  { %v1460_v21 = vand.u32 %v1455_v20, %v2610_v62 }
 0x728   :  { %v2511_v22 = vpop.eup %2510  ;;  %2377 = vmatpush3.bf16.msra.mxu1 %v1460_v21 }
 0x729   :  { %v1290_v23 = vmul.f32 %v2511_v22, %v2836_v39  ;;  %2388 = vmatprep.subr.bf16.mxu1 %v2532_v3 }
 0x72b   :  { %v1294_v24 = vpack.c.bf16 %v1290_v23, %v1290_v23 }
 0x72d   :  { %2361 = vmatmul.mubr.msk.bf16.vlgmr.msra.gmra.mrb[40].mxu0 %vm276_vm5, %v1294_v24 }
 0x72e   :  { %2371 = vmatpush3.bf16.msra.mxu0 %v1409_v25  ;;  %2372 = vmatprep.mubr.msk.bf16.mxu0 %vm2533_vm0, %v2532_v3 }
 0x72f   :  { %2382 = vmatprep.subr.bf16.mxu0 %v2532_v3 }
 0x747   :  { %v1285_v26 = vpop.xlane.xlu0 %1284 }
 0x748   :  { %2512 = vrcp.f32 %v1285_v26 }
 0x74b   :  { %v1565_v33 = vpop.permute.xlu0 %1564 }
 0x74c   :  { %v1570_v40 = vsel %vm27_vm1, %v1565_v33, 0 }
 0x74f   :  { %v1560_v38 = vpop.permute.xlu0 %1559 }
 0x752   :  { %v2513_v27 = vpop.eup %2512 }
 0x753   :  { %v1293_v28 = vmul.f32 %v2513_v27, %v2852_v49  ;;  %v1677_v43 = vpop.permute.xlu0 %1676 }
 0x754   :  { %v1682_v44 = vsel %vm27_vm1, %v1677_v43, 0 }
 0x755   :  { %v1297_v29 = vpack.c.bf16 %v1293_v28, %v1293_v28 }
 0x756   :  { %v1282_v30 = vpop.xlane.xlu1 %1281 }
 0x757   :  { %2514 = vrcp.f32 %v1282_v30  ;;  %2379 = vmatmul.mubr.msk.bf16.vlgmr.msra.gmra.mrb[44].mxu1 %vm276_vm5, %v1297_v29  ;;  %v1672_v45 = vpop.permute.xlu0 %1671 }
 0x758   :  { %2390 = vmatprep.mubr.msk.bf16.mxu1 %vm2533_vm0, %v2532_v3 }
 0x75a   :  { %v1621_v31 = vpop.permute.xlu1 %1620 }
 0x75b   :  { %v1626_v32 = vsel %vm27_vm1, %v1621_v31, 0 }
 0x75c   :  { %2389 = vmatpush3.bf16.xpose.msra.mxu1 %v1626_v32 }
 0x75d   :  { %2400 = vmatprep.subr.bf16.mxu1 %v2532_v3 }
 0x75e   :  { %v1616_v34 = vpop.permute.xlu1 %1615 }
 0x761   :  { %v2515_v35 = vpop.eup %2514 }
 0x762   :  { %v1292_v36 = vmul.f32 %v2515_v35, %v2856_v52  ;;  %v1733_v37 = vpop.permute.xlu1 %1732 }
 0x763   :  { %2391 = vmatmul.mubr.msk.bf16.vlgmr.msra.gmra.mrb[48].mxu1 %vm27_vm1, %v1616_v34  ;;  %v1738_v39 = vsel %vm27_vm1, %v1733_v37, 0 }
 0x764   :  { %v1296_v41 = vpack.c.bf16 %v1292_v36, %v1292_v36  ;;  %2401 = vmatpush3.bf16.xpose.msra.mxu1 %v1738_v39  ;;  %2402 = vmatprep.mubr.msk.bf16.mxu1 %vm2533_vm0, %v2532_v3 }
 0x765   :  { %2412 = vmatprep.subr.bf16.mxu1 %v2532_v3 }
 0x766   :  { %2373 = vmatmul.mubr.msk.bf16.vlgmr.msra.gmra.mrb[44].mxu0 %vm276_vm5, %v1296_v41  ;;  %v1728_v42 = vpop.permute.xlu1 %1727 }
 0x767   :  { %2383 = vmatpush3.bf16.xpose.msra.mxu0 %v1570_v40  ;;  %2384 = vmatprep.mubr.msk.bf16.mxu0 %vm2533_vm0, %v2532_v3 }
 0x768   :  { %2394 = vmatprep.subr.bf16.mxu0 %v2532_v3 }
 0x76b   :  { %2403 = vmatmul.mubr.msk.bf16.vlgmr.msra.gmra.mrb[52].mxu1 %vm27_vm1, %v1728_v42 }
 0x76c   :  { %2414 = vmatprep.mubr.msk.bf16.mxu1 %vm2533_vm0, %v2532_v3 }
 0x76e   :  { %2385 = vmatmul.mubr.msk.bf16.vlgmr.msra.gmra.mrb[48].mxu0 %vm27_vm1, %v1560_v38 }
 0x76f   :  { %2395 = vmatpush3.bf16.xpose.msra.mxu0 %v1682_v44  ;;  %2396 = vmatprep.mubr.msk.bf16.mxu0 %vm2533_vm0, %v2532_v3 }
 0x770   :  { %2406 = vmatprep.subr.bf16.mxu0 %v2532_v3 }
 0x776   :  { %2397 = vmatmul.mubr.msk.bf16.vlgmr.msra.gmra.mrb[52].mxu0 %vm27_vm1, %v1672_v45 }
 0x777   :  { %2408 = vmatprep.mubr.msk.bf16.mxu0 %vm2533_vm0, %v2532_v3 }
 0x7f5   :  { %v2921_v46 = vpop.f32.mrb[40].mxu1 }
 0x7f6   :  { %v2368_v47 = vpop.f32.mrb[41].mxu1 }
 0x7f7   :  { %v1397_v48 = vpop.f32.mrb[42].mxu1 }
 0x7f8   :  { %v2369_v49 = vpop.f32.mrb[43].mxu1  ;;  %v2465_v48 = vld [vmem:[%s3110_s0 + $0x14] ss:$0 sps:$4 sm:$0x77]  }
 0x7f9   :  { %v2466_v49 = vld [vmem:[%s3110_s0 + $0x1c] ss:$0 sps:$4 sm:$0x77]  }
 0x800   :  { %v2923_v50 = vpop.f32.mrb[40].mxu0 }
 0x801   :  { %v2362_v51 = vpop.f32.mrb[41].mxu0 }
 0x802   :  { %v1346_v52 = vpop.f32.mrb[42].mxu0  ;;  %v2467_v51 = vld [vmem:[%s3110_s0 + $0xc] ss:$0 sps:$4 sm:$0x77]  }
 0x803   :  { %v2363_v53 = vpop.f32.mrb[43].mxu0  ;;  %v2163_v52 = vpack.c.bf16 %v2817_v54, %v2817_v54  ;;  %v2164_v54 = vpack.c.bf16 %v2824_v8, %v2824_v8 }
 0x804   :  { %v2165_v53 = vpack.c.bf16 %v2821_v63, %v2821_v63 }
 0x82a   :  { %v2925_v55 = vpop.f32.mrb[44].mxu1 }
 0x82b   :  { %v2380_v56 = vpop.f32.mrb[45].mxu1  ;;  %v2169_v63 = vpack.c.bf16 %v2925_v55, %v2925_v55 }
 0x82c   :  { %v1499_v57 = vpop.f32.mrb[46].mxu1  ;;  %v2162_v56 = vpack.c.bf16 %v2819_v58, %v2819_v58  ;;  %v2166_v58 = vpack.c.bf16 %v2923_v50, %v2923_v50 }
 0x82d   :  { %v2381_v59 = vpop.f32.mrb[47].mxu1  ;;  %v2167_v57 = vpack.c.bf16 %v2921_v46, %v2921_v46 }
 0x836   :  { %v1662_v60 = vpop.f32.mrb[48].mxu1 }
 0x837   :  { %v1783_v61 = vsel %vm227_vm2, %v1662_v60, -inf  ;;  %v2392_v0 = vpop.f32.mrb[49].mxu1 }
 0x838   :  { %1784 = vmax.xlane.f32.xlu1 %v1783_v61  ;;  %v1665_v1 = vpop.f32.mrb[50].mxu1 }
 0x839   :  { %v2928_v2 = vpop.f32.mrb[44].mxu0  ;;  %v2393_v4 = vpop.f32.mrb[51].mxu1 }
 0x83a   :  { %v2374_v5 = vpop.f32.mrb[45].mxu0  ;;  %v2168_v46 = vpack.c.bf16 %v2928_v2, %v2928_v2 }
 0x83b   :  { %v1448_v6 = vpop.f32.mrb[46].mxu0 }
 0x83c   :  { %v2375_v7 = vpop.f32.mrb[47].mxu0 }
 0x83e   :  { %v1774_v9 = vpop.f32.mrb[52].mxu1 }
 0x83f   :  { %v2404_v10 = vpop.f32.mrb[53].mxu1  ;;  %v1789_v24 = vsel %vm227_vm2, %v1774_v9, -inf }
 0x840   :  { %v1777_v11 = vpop.f32.mrb[54].mxu1 }
 0x841   :  { %v1606_v12 = vpop.f32.mrb[48].mxu0  ;;  %v2405_v13 = vpop.f32.mrb[55].mxu1 }
 0x842   :  { %v2386_v14 = vpop.f32.mrb[49].mxu0  ;;  %v1780_v15 = vsel %vm227_vm2, %v1606_v12, -inf }
 0x843   :  { %1781 = vmax.xlane.f32.xlu0 %v1780_v15  ;;  %v1609_v16 = vpop.f32.mrb[50].mxu0  ;;  %v1005_v14 = vld [vmem:[%s3111_s1 + $0x4] sm:$0x7] }
 0x844   :  { %v2387_v17 = vpop.f32.mrb[51].mxu0  ;;  %v1002_v16 = vld [vmem:[%s3111_s1] sm:$0x7] }
 0x849   :  { %v1718_v19 = vpop.f32.mrb[52].mxu0  ;;  %1831 = vrot.lane.b32.xlu1 %v2464_v18, %s2541_s27 }
 0x84a   :  { %v2398_v20 = vpop.f32.mrb[53].mxu0  ;;  %v1786_v21 = vsel %vm227_vm2, %v1718_v19, -inf }
 0x84b   :  { %1787 = vmax.xlane.f32.xlu0 %v1786_v21  ;;  %v1721_v22 = vpop.f32.mrb[54].mxu0 }
 0x84c   :  { %v2399_v23 = vpop.f32.mrb[55].mxu0 }
 0x84d   :  { %v1011_v23 = vld [vmem:[%s3111_s1 + $0xc] sm:$0x7] }
 0x84f   :  { %1790 = vmax.xlane.f32.xlu0 %v1789_v24 }
 0x8c5   :  { %v1785_v25 = vpop.xlane.xlu1 %1784 }
 0x8c6   :  { %v1793_v26 = vsub.f32 %v1662_v60, %v1785_v25  ;;  %v1008_v25 = vld [vmem:[%s3111_s1 + $0x8] sm:$0x7] }
 0x8c8   :  { %v1798_v27 = vmul.f32 1.442695, %v1793_v26 }
 0x8c9   :  { %v1832_v28 = vpop.permute.xlu1 %1831 }
 0x8ca   :  { %2516 = vpow2.f32 %v1798_v27  ;;  %v1837_v29 = vand.u32 %v1832_v28, %v2610_v62 }
 0x8cc   :  { %2407 = vmatpush3.bf16.msra.mxu0 %v1837_v29 }
 0x8cd   :  { %2418 = vmatprep.subr.bf16.mxu0 %v2532_v3 }
 0x8d0   :  { %v1782_v30 = vpop.xlane.xlu0 %1781 }
 0x8d1   :  { %v1792_v31 = vsub.f32 %v1606_v12, %v1782_v30 }
 0x8d3   :  { %v1796_v32 = vmul.f32 1.442695, %v1792_v31 }
 0x8d4   :  { %v2517_v33 = vpop.eup %2516 }
 0x8d5   :  { %2518 = vpow2.f32 %v1796_v32  ;;  %v1807_v34 = vsel %vm227_vm2, %v2517_v33, 0.0 }
 0x8d6   :  { %1808 = vadd.xlane.f32.xlu0 %v1807_v34 }
 0x8d8   :  { %v1788_v35 = vpop.xlane.xlu0 %1787 }
 0x8d9   :  { %v1794_v36 = vsub.f32 %v1718_v19, %v1788_v35 }
 0x8db   :  { %v1800_v37 = vmul.f32 1.442695, %v1794_v36 }
 0x8dc   :  { %v1791_v38 = vpop.xlane.xlu0 %1790 }
 0x8dd   :  { %2520 = vpow2.f32 %v1800_v37  ;;  %v1795_v39 = vsub.f32 %v1774_v9, %v1791_v38 }
 0x8df   :  { %v2519_v40 = vpop.eup %2518  ;;  %v1802_v41 = vmul.f32 1.442695, %v1795_v39 }
 0x8e0   :  { %v1804_v42 = vsel %vm227_vm2, %v2519_v40, 0.0 }
 0x8e1   :  { %2522 = vpow2.f32 %v1802_v41  ;;  %1805 = vadd.xlane.f32.xlu1 %v1804_v42 }
 0x8e7   :  { %v2521_v43 = vpop.eup %2520 }
 0x8e8   :  { %v1810_v44 = vsel %vm227_vm2, %v2521_v43, 0.0 }
 0x8e9   :  { %1811 = vadd.xlane.f32.xlu1 %v1810_v44 }
 0x8eb   :  { %v2942_v45 = vpop.eup %2522 }
 0x8ec   :  { %v1813_v47 = vsel %vm227_vm2, %v2942_v45, 0.0 }
 0x8ed   :  { %1814 = vadd.xlane.f32.xlu0 %v1813_v47 }
 0x8fa   :  { %1933 = vrot.lane.b32.xlu1 %v2465_v48, %s2541_s27 }
 0x8fe   :  { %1984 = vrot.lane.b32.xlu1 %v2466_v49, %s2541_s27 }
 0x902   :  { %990 = vrot.lane.b32.xlu1 %v2163_v52, %s2540_s21 }
 0x903   :  { %1882 = vrot.lane.b32.xlu0 %v2467_v51, %s2541_s27 }
 0x906   :  { %994 = vrot.lane.b32.xlu1 %v2165_v53, %s2540_s21 }
 0x907   :  { %988 = vrot.lane.b32.xlu0 %v2162_v56, %s2540_s21 }
 0x90a   :  { %1520 = vrot.lane.b32.xlu1 %v2167_v57, %s2538_s26 }
 0x90b   :  { %992 = vrot.lane.b32.xlu0 %v2164_v54, %s2540_s21 }
 0x90e   :  { %1524 = vrot.lane.b32.xlu1 %v2169_v63, %s2538_s26 }
 0x90f   :  { %1518 = vrot.lane.b32.xlu0 %v2166_v58, %s2538_s26 }
 0x913   :  { %1522 = vrot.lane.b32.xlu0 %v2168_v46, %s2538_s26 }
 0x963   :  { %v1809_v8 = vpop.xlane.xlu0 %1808 }
 0x96e   :  { %v1806_v59 = vpop.xlane.xlu1 %1805 }
 0x96f   :  { %2524 = vrcp.f32 %v1806_v59 }
 0x970   :  { %2526 = vrcp.f32 %v1809_v8 }
 0x976   :  { %v1812_v60 = vpop.xlane.xlu1 %1811 }
 0x977   :  { %2528 = vrcp.f32 %v1812_v60 }
 0x979   :  { %v2525_v61 = vpop.eup %2524 }
 0x97a   :  { %v1820_v55 = vmul.f32 %v2525_v61, %v2519_v40  ;;  %v1934_v0 = vpop.permute.xlu1 %1933  ;;  %v1815_v1 = vpop.xlane.xlu0 %1814 }
 0x97b   :  { %v2527_v50 = vpop.eup %2526  ;;  %v1939_v4 = vand.u32 %v1934_v0, %v2610_v62  ;;  %2530 = vrcp.f32 %v1815_v1 }
 0x97c   :  { %v1824_v5 = vpack.c.bf16 %v1820_v55, %v1820_v55  ;;  %v1821_v6 = vmul.f32 %v2527_v50, %v2517_v33 }
 0x97e   :  { %2409 = vmatmul.mubr.msk.bf16.vlgmr.msra.gmra.mrb[56].mxu0 %vm276_vm5, %v1824_v5  ;;  %v1985_v2 = vpop.permute.xlu1 %1984  ;;  %v1883_v7 = vpop.permute.xlu0 %1882  ;;  %v1825_v18 = vpack.c.bf16 %v1821_v6, %v1821_v6 }
 0x97f   :  { %v1888_v9 = vand.u32 %v1883_v7, %v2610_v62  ;;  %2419 = vmatpush3.bf16.msra.mxu0 %v1939_v4  ;;  %2420 = vmatprep.mubr.msk.bf16.mxu0 %vm2533_vm0, %v2532_v3  ;;  %v1990_v12 = vand.u32 %v1985_v2, %v2610_v62 }
 0x981   :  { %v2529_v11 = vpop.eup %2528  ;;  %2413 = vmatpush3.bf16.msra.mxu1 %v1888_v9 }
 0x982   :  { %v1822_v13 = vmul.f32 %v2529_v11, %v2521_v43  ;;  %v991_v15 = vpop.permute.xlu1 %990  ;;  %v989_v17 = vpop.permute.xlu0 %988  ;;  %2424 = vmatprep.subr.bf16.mxu1 %v2532_v3 }
 0x983   :  { %v1006_v19 = vsel %vm2988_vm10, %v991_v15, %v1005_v14  ;;  %v1003_v62 = vsel %vm2988_vm10, %v989_v17, %v1002_v16 }
 0x984   :  { %1007 = vst [vmem:[%s3111_s1 + $0x4] sm:$0x7] %v1006_v19  ;;  %1004 = vst [vmem:[%s3111_s1] sm:$0x7] %v1003_v62  ;;  %2415 = vmatmul.mubr.msk.bf16.vlgmr.msra.gmra.mrb[56].mxu1 %vm276_vm5, %v1825_v18  ;;  %v1826_v20 = vpack.c.bf16 %v1822_v13, %v1822_v13 }
 0x985   :  { %v2531_v21 = vpop.eup %2530  ;;  %2425 = vmatpush3.bf16.msra.mxu1 %v1990_v12  ;;  %2426 = vmatprep.mubr.msk.bf16.mxu1 %vm2533_vm0, %v2532_v3 }
 0x986   :  { %v1823_v22 = vmul.f32 %v2531_v21, %v2942_v45  ;;  %2421 = vmatmul.mubr.msk.bf16.vlgmr.msra.gmra.mrb[60].mxu0 %vm276_vm5, %v1826_v20  ;;  %v995_v24 = vpop.permute.xlu1 %994  ;;  %v993_v26 = vpop.permute.xlu0 %992 }
 0x987   :  { %v1012_v27 = vsel %vm2988_vm10, %v995_v24, %v1011_v23  ;;  %v1009_v3 = vsel %vm2988_vm10, %v993_v26, %v1008_v25 }
 0x988   :  { %1013 = vst [vmem:[%s3111_s1 + $0xc] sm:$0x7] %v1012_v27  ;;  %1010 = vst [vmem:[%s3111_s1 + $0x8] sm:$0x7] %v1009_v3  ;;  %v1827_v31 = vpack.c.bf16 %v1823_v22, %v1823_v22 }
 0x98a   :  { %v1521_v29 = vpop.permute.xlu1 %1520  ;;  %v1519_v30 = vpop.permute.xlu0 %1518 }
 0x98b   :  { %v1535_v32 = vld [vmem:[%s3111_s1 + $0x4] sm:$0x7]  ;;  %v1532_v33 = vld [vmem:[%s3111_s1] sm:$0x7] }
 0x98c   :  { %v1536_v34 = vsel %vm3032_vm12, %v1521_v29, %v1535_v32  ;;  %v1533_v35 = vsel %vm3032_vm12, %v1519_v30, %v1532_v33  ;;  %2427 = vmatmul.mubr.msk.bf16.vlgmr.msra.gmra.mrb[60].mxu1 %vm276_vm5, %v1827_v31 }
 0x98d   :  { %1537 = vst [vmem:[%s3111_s1 + $0x4] sm:$0x7] %v1536_v34  ;;  %1534 = vst [vmem:[%s3111_s1] sm:$0x7] %v1533_v35 }
 0x98e   :  { %v1525_v36 = vpop.permute.xlu1 %1524  ;;  %v1523_v37 = vpop.permute.xlu0 %1522 }
 0x98f   :  { %v1541_v38 = vld [vmem:[%s3111_s1 + $0xc] sm:$0x7]  ;;  %v1538_v39 = vld [vmem:[%s3111_s1 + $0x8] sm:$0x7] }
 0x990   :  { %v1542_v40 = vsel %vm3032_vm12, %v1525_v36, %v1541_v38  ;;  %v1539_v41 = vsel %vm3032_vm12, %v1523_v37, %v1538_v39 }
 0x991   :  { %1543 = vst [vmem:[%s3111_s1 + $0xc] sm:$0x7] %v1542_v40  ;;  %1540 = vst [vmem:[%s3111_s1 + $0x8] sm:$0x7] %v1539_v41 }
 0x994   :  { %v2062_v0 = vld [vmem:[%s3111_s1] sm:$0x7]  ;;  %v2065_v4 = vld [vmem:[%s3111_s1 + $0x4] sm:$0x7] }
 0x998   :  { %v2068_v2 = vld [vmem:[%s3111_s1 + $0x8] sm:$0x7]  ;;  %v2071_v10 = vld [vmem:[%s3111_s1 + $0xc] sm:$0x7] }
 0xa51   :  { %v1873_v42 = vpop.f32.mrb[56].mxu0 }
 0xa52   :  { %v2170_v43 = vpack.c.bf16 %v1873_v42, %v1873_v42  ;;  %v2410_v44 = vpop.f32.mrb[57].mxu0 }
 0xa53   :  { %v1876_v45 = vpop.f32.mrb[58].mxu0 }
 0xa54   :  { %2048 = vrot.lane.b32.xlu0 %v2170_v43, %s2535_s17  ;;  %v2411_v47 = vpop.f32.mrb[59].mxu0 }
 0xa57   :  { %v1924_v48 = vpop.f32.mrb[56].mxu1 }
 0xa58   :  { %v2171_v49 = vpack.c.bf16 %v1924_v48, %v1924_v48  ;;  %v2416_v51 = vpop.f32.mrb[57].mxu1 }
 0xa59   :  { %v1927_v52 = vpop.f32.mrb[58].mxu1  ;;  %v1975_v53 = vpop.f32.mrb[60].mxu0 }
 0xa5a   :  { %v2172_v56 = vpack.c.bf16 %v1975_v53, %v1975_v53  ;;  %2050 = vrot.lane.b32.xlu1 %v2171_v49, %s2535_s17  ;;  %v2417_v57 = vpop.f32.mrb[59].mxu1  ;;  %v2422_v54 = vpop.f32.mrb[61].mxu0 }
 0xa5b   :  { %v1978_v63 = vpop.f32.mrb[62].mxu0 }
 0xa5c   :  { %2052 = vrot.lane.b32.xlu0 %v2172_v56, %s2535_s17  ;;  %v2423_v58 = vpop.f32.mrb[63].mxu0 }
 0xa5f   :  { %v2026_v46 = vpop.f32.mrb[60].mxu1 }
 0xa60   :  { %v2173_v8 = vpack.c.bf16 %v2026_v46, %v2026_v46  ;;  %v2428_v59 = vpop.f32.mrb[61].mxu1 }
 0xa61   :  { %v2029_v60 = vpop.f32.mrb[62].mxu1 }
 0xa62   :  { %2054 = vrot.lane.b32.xlu1 %v2173_v8, %s2535_s17  ;;  %v2429_v61 = vpop.f32.mrb[63].mxu1 }
 0xac6   :  { %v2049_v1 = vpop.permute.xlu0 %2048 }
 0xac7   :  { %v2063_v50 = vsel %vm3074_vm14, %v2049_v1, %v2062_v0 }
 0xac8   :  { %2064 = vst [vmem:[%s3111_s1] sm:$0x7] %v2063_v50 }
 0xacc   :  { %v2051_v5 = vpop.permute.xlu1 %2050 }
 0xacd   :  { %v2066_v6 = vsel %vm3074_vm14, %v2051_v5, %v2065_v4 }
 0xace   :  { %2067 = vst [vmem:[%s3111_s1 + $0x4] sm:$0x7] %v2066_v6  ;;  %v2053_v7 = vpop.permute.xlu0 %2052 }
 0xacf   :  { %v2069_v9 = vsel %vm3074_vm14, %v2053_v7, %v2068_v2 }
 0xad0   :  { %2070 = vst [vmem:[%s3111_s1 + $0x8] sm:$0x7] %v2069_v9 }
 0xad4   :  { %v2055_v11 = vpop.permute.xlu1 %2054 }
 0xad5   :  { %v2072_v12 = vsel %vm3074_vm14, %v2055_v11, %v2071_v10 }
 0xad6   :  { %2073 = vst [vmem:[%s3111_s1 + $0xc] sm:$0x7] %v2072_v12 }

// kernel: model_forward.38
= control target key start
LH: loop header
LB: loop body
LE: loop exit
PB: predicated region body
PF: predicated region fallthrough
CT: control target
= control target key end

     0   :  { %v278_v1 = vmov 0   ;;  %vm86_vm0 = vcmask 523264   ;;  %v28_v11 = vlaneseq  ;;  %s348_s1 = inlined_call_operand.vmem [shape: bf16[64,256], index: 1, kind: input, shape index: {}]   ;;  %s349_s0 = inlined_call_operand.vmem [shape: bf16[18,64], index: 0, kind: input, shape index: {}]   ;;  %s350_s2 = inlined_call_operand.vmem [shape: f32[1,256], index: 2, kind: input, shape index: {}]   ;;  %s351_s3 = inlined_call_operand.vmem [shape: bf16[18,256], index: 3, kind: output, shape index: {}]  }
   0x1   :  { %v252_v0 = vld [vmem:[%s348_s1 + $0x4] ss:$8 sps:$4 sm:$0xff]   ;;  %125 = vmatprep.mubr.bf16.mxu0 %v278_v1  ;;  %135 = vmatprep.mubr.bf16.mxu1 %v278_v1  ;;  %v254_v2 = vld [vmem:[%s348_s1] ss:$8 sps:$4 sm:$0xff]   ;;  %v255_v3 = vld [vmem:[%s348_s1 + $0x14] ss:$8 sps:$4 sm:$0xff]  }
   0x2   :  { %93 = vmatprep.subr.bf16.mxu0 %v252_v0  ;;  %243 = vmatprep.subr.bf16.mxu1 %v252_v0  ;;  %v257_v4 = vld [vmem:[%s348_s1 + $0x10] ss:$8 sps:$4 sm:$0xff]   ;;  %v258_v5 = vld [vmem:[%s348_s1 + $0x24] ss:$8 sps:$4 sm:$0xff]   ;;  %v260_v6 = vld [vmem:[%s348_s1 + $0x20] ss:$8 sps:$4 sm:$0xff]  }
   0x3   :  { %94 = vmatpush1.bf16.msra.mxu0 %v254_v2  ;;  %247 = vmatpush1.bf16.msra.mxu1 %v254_v2  ;;  %v261_v7 = vld [vmem:[%s348_s1 + $0x34] ss:$8 sps:$4 sm:$0xff]   ;;  %v263_v8 = vld [vmem:[%s348_s1 + $0x30] ss:$8 sps:$4 sm:$0xff]   ;;  %v264_v9 = vld [vmem:[%s349_s0] sm:$0xff]   ;;  %v29_v12 = vshrl.u32 %v28_v11, 7 }
   0x4   :  { %95 = vmatprep.subr.bf16.mxu0 %v255_v3  ;;  %244 = vmatprep.subr.bf16.mxu1 %v255_v3  ;;  %v265_v10 = vld [vmem:[%s349_s0 + $0x8] ss:$0 sps:$4 sm:$0x11]   ;;  %v26_v14 = vld [vmem:[%s350_s2] sm:$0x3] }
   0x5   :  { %v30_v13 = vsub.s32 0, %v29_v12  ;;  %v34_v15 = vsub.s32 1, %v29_v12 }
   0x7   :  { %96 = vmatpush1.bf16.msra.mxu0 %v257_v4  ;;  %248 = vmatpush1.bf16.msra.mxu1 %v257_v4  ;;  %v31_v16 = vrot.slane %v26_v14, %v30_v13  ;;  %v35_v17 = vrot.slane %v26_v14, %v34_v15 }
   0x8   :  { %97 = vmatprep.subr.bf16.mxu0 %v258_v5  ;;  %245 = vmatprep.subr.bf16.mxu1 %v258_v5 }
   0xb   :  { %98 = vmatpush1.bf16.msra.mxu0 %v260_v6  ;;  %249 = vmatpush1.bf16.msra.mxu1 %v260_v6 }
   0xc   :  { %99 = vmatprep.subr.bf16.mxu0 %v261_v7  ;;  %246 = vmatprep.subr.bf16.mxu1 %v261_v7 }
   0xf   :  { %100 = vmatpush1.bf16.msra.mxu0 %v263_v8  ;;  %250 = vmatpush1.bf16.msra.mxu1 %v263_v8 }
  0x12   :  { %235 = vmatmul.mubr.msk.bf16.vlgmr.msra.gmra.mrb[0].mxu0 %vm86_vm0, %v264_v9  ;;  %236 = vmatmul.mubr.msk.bf16.vlgmr.msra.gmra.mrb[0].mxu1 %vm86_vm0, %v265_v10 }
  0xe5   :  { %v127_v18 = vpop.f32.mrb[0].mxu0  ;;  %v137_v19 = vpop.f32.mrb[0].mxu1 }
  0xe6   :  { %v128_v20 = vadd.f32 %v127_v18, %v31_v16  ;;  %v138_v21 = vadd.f32 %v137_v19, %v31_v16  ;;  %v129_v22 = vpop.f32.mrb[1].mxu0  ;;  %v139_v23 = vpop.f32.mrb[1].mxu1 }
  0xe7   :  { %v130_v24 = vadd.f32 %v129_v22, %v35_v17  ;;  %v332_v25 = vadd.f32 %v139_v23, %v35_v17  ;;  %v131_v26 = vpop.f32.mrb[2].mxu0  ;;  %v141_v27 = vpop.f32.mrb[2].mxu1 }
  0xe8   :  { %v144_v28 = vmul.f32 %v128_v20, %v128_v20  ;;  %v148_v29 = vmul.f32 %v138_v21, %v138_v21  ;;  %v132_v30 = vadd.f32 %v131_v26, %v31_v16  ;;  %v133_v31 = vpop.f32.mrb[3].mxu0  ;;  %v142_v32 = vpop.f32.mrb[3].mxu1 }
  0xe9   :  { %v145_v33 = vmul.f32 %v130_v24, %v130_v24  ;;  %v149_v34 = vmul.f32 %v332_v25, %v332_v25  ;;  %v134_v35 = vadd.f32 %v133_v31, %v35_v17 }
  0xea   :  { %v150_v36 = vmul.f32 %v144_v28, %v128_v20  ;;  %v154_v37 = vmul.f32 %v148_v29, %v138_v21  ;;  %v146_v38 = vmul.f32 %v132_v30, %v132_v30 }
  0xeb   :  { %v151_v39 = vmul.f32 %v145_v33, %v130_v24  ;;  %v155_v40 = vmul.f32 %v149_v34, %v332_v25  ;;  %v147_v41 = vmul.f32 %v134_v35, %v134_v35 }
  0xec   :  { %v156_v42 = vmul.f32 0.044715, %v150_v36  ;;  %v160_v43 = vmul.f32 0.044715, %v154_v37  ;;  %v152_v44 = vmul.f32 %v146_v38, %v132_v30 }
  0xed   :  { %v157_v45 = vmul.f32 0.044715, %v151_v39  ;;  %v161_v46 = vmul.f32 0.044715, %v155_v40  ;;  %v153_v47 = vmul.f32 %v147_v41, %v134_v35 }
  0xee   :  { %v162_v48 = vadd.f32 %v156_v42, %v128_v20  ;;  %v166_v49 = vadd.f32 %v160_v43, %v138_v21  ;;  %v158_v50 = vmul.f32 0.044715, %v152_v44 }
  0xef   :  { %v163_v51 = vadd.f32 %v157_v45, %v130_v24  ;;  %v167_v52 = vadd.f32 %v161_v46, %v332_v25  ;;  %v159_v53 = vmul.f32 0.044715, %v153_v47 }
  0xf0   :  { %v168_v54 = vmul.f32 0.7978846, %v162_v48  ;;  %v172_v55 = vmul.f32 0.7978846, %v166_v49  ;;  %v164_v56 = vadd.f32 %v158_v50, %v132_v30 }
  0xf1   :  { %v169_v57 = vmul.f32 0.7978846, %v163_v51  ;;  %v173_v58 = vmul.f32 0.7978846, %v167_v52  ;;  %v165_v59 = vadd.f32 %v159_v53, %v134_v35 }
  0xf2   :  { %266 = vtanh.f32 %v168_v54  ;;  %v170_v60 = vmul.f32 0.7978846, %v164_v56 }
  0xf3   :  { %268 = vtanh.f32 %v172_v55  ;;  %v171_v61 = vmul.f32 0.7978846, %v165_v59 }
  0xf4   :  { %270 = vtanh.f32 %v169_v57 }
  0xf5   :  { %272 = vtanh.f32 %v173_v58 }
  0xf6   :  { %274 = vtanh.f32 %v170_v60 }
  0xf7   :  { %276 = vtanh.f32 %v171_v61 }
  0xfc   :  { %v267_v62 = vpop.eup %266 }
  0xfd   :  { %v269_v63 = vpop.eup %268  ;;  %v180_v0 = vadd.f32 1.0, %v267_v62 }
  0xfe   :  { %v271_v1 = vpop.eup %270  ;;  %v184_v2 = vadd.f32 1.0, %v269_v63 }
  0xff   :  { %v273_v3 = vpop.eup %272  ;;  %v186_v4 = vmul.f32 0.5, %v180_v0  ;;  %v181_v5 = vadd.f32 1.0, %v271_v1 }
 0x100   :  { %v275_v6 = vpop.eup %274  ;;  %v190_v7 = vmul.f32 0.5, %v184_v2  ;;  %v185_v8 = vadd.f32 1.0, %v273_v3 }
 0x101   :  { %v277_v9 = vpop.eup %276  ;;  %v192_v10 = vmul.f32 %v186_v4, %v128_v20  ;;  %v187_v11 = vmul.f32 0.5, %v181_v5  ;;  %v182_v12 = vadd.f32 1.0, %v275_v6 }
 0x102   :  { %v196_v13 = vmul.f32 %v190_v7, %v138_v21  ;;  %v191_v14 = vmul.f32 0.5, %v185_v8  ;;  %v183_v15 = vadd.f32 1.0, %v277_v9 }
 0x103   :  { %v193_v16 = vmul.f32 %v187_v11, %v130_v24  ;;  %v188_v17 = vmul.f32 0.5, %v182_v12 }
 0x104   :  { %v197_v18 = vmul.f32 %v191_v14, %v332_v25  ;;  %v189_v19 = vmul.f32 0.5, %v183_v15 }
 0x105   :  { %v240_v22 = vpack.c.bf16 %v193_v16, %v192_v10  ;;  %v194_v23 = vmul.f32 %v188_v17, %v132_v30 }
 0x106   :  { %v242_v26 = vpack.c.bf16 %v197_v18, %v196_v13  ;;  %v195_v27 = vmul.f32 %v189_v19, %v134_v35 }
 0x107   :  { %218 = vst [vmem:[%s351_s3] sm:$0xff] %v240_v22 }
 0x108   :  { %220 = vst [vmem:[%s351_s3 + $0x10] sm:$0x11] %v242_v26  ;;  %v241_v20 = vpack.c.bf16 %v195_v27, %v194_v23 }
 0x10a   :  { %219 = vst [vmem:[%s351_s3 + $0x8] sm:$0xff] %v241_v20 }

// kernel: model_forward.30
= control target key start
LH: loop header
LB: loop body
LE: loop exit
PB: predicated region body
PF: predicated region fallthrough
CT: control target
= control target key end

     0   :  { %v38_v0 = vlaneseq  ;;  %v6040_v1 = vmov 1966171168   ;;  %v6041_v3 = vmov 0.0   ;;  %vm6042_vm0 = vmmov 0   ;;  %s6043_s18 = smov 64   ;;  %s6044_s29 = smov 48   ;;  %s7322_s0 = inlined_call_operand.vmem [shape: bf16[8,2,192], index: 0, kind: input, shape index: {}]   ;;  %s7323_s1 = inlined_call_operand.vmem [shape: bf16[8,2,64], index: 1, kind: output, shape index: {}]  }
   0x1   :  { %v36_v2 = vunpack.c.l.s4 %v6040_v1  ;;  %5518 = vmatprep.subr.bf16.mxu0 %v6041_v3  ;;  %5524 = vmatprep.subr.bf16.mxu1 %v6041_v3  ;;  %v10_v5 = vld [vmem:[%s7322_s0] sm:$0x1]  ;;  %v11_v7 = vld [vmem:[%s7322_s0 + $0x2] sm:$0x1]  ;;  %v6071_v8 = vld [vmem:[%s7322_s0 + $0x4] sm:$0x1] }
   0x2   :  { %v39_v4 = vshrl.u32 %v38_v0, 7  ;;  %v6076_v9 = vld [vmem:[%s7322_s0 + $0x6] sm:$0x1]  ;;  %5520 = vmatprep.mubr.msk.bf16.mxu0 %vm6042_vm0, %v6041_v3  ;;  %5526 = vmatprep.mubr.msk.bf16.mxu1 %vm6042_vm0, %v6041_v3  ;;  %v6093_v15 = vld [vmem:[%s7322_s0 + $0x8] sm:$0x1]  ;;  %vm51_vm1 = vcmask 130048  }
   0x3   :  { %v37_v6 = vunpack.c.0.s8 %v36_v2  ;;  %v6098_v16 = vld [vmem:[%s7322_s0 + $0xa] sm:$0x1]  ;;  %v6111_v23 = vld [vmem:[%s7322_s0 + $0xc] sm:$0x1]  ;;  %v6116_v24 = vld [vmem:[%s7322_s0 + $0xe] sm:$0x1] }
   0x4   :  { %v18_v35 = vmul.bf16 1048592000, %v10_v5  ;;  %v19_v39 = vmul.bf16 1048592000, %v11_v7  ;;  %v20_v42 = vmul.bf16 1048592000, %v6071_v8 }
   0x5   :  { %v6078_v10 = vsub.s32 %v37_v6, %v39_v4  ;;  %v21_v45 = vmul.bf16 1048592000, %v6076_v9  ;;  %v22_v48 = vmul.bf16 1048592000, %v6093_v15  ;;  %v23_v51 = vmul.bf16 1048592000, %v6098_v16 }
   0x6   :  { %v24_v53 = vmul.bf16 1048592000, %v6111_v23  ;;  %v25_v54 = vmul.bf16 1048592000, %v6116_v24  ;;  %vm539_vm2 = vcmask 9216   ;;  %vm640_vm3 = vcmask 1040384  }
   0x7   :  { %v41_v11 = vrot.slane %v10_v5, %v6078_v10  ;;  %v105_v12 = vrot.slane %v11_v7, %v6078_v10  ;;  %v168_v13 = vrot.slane %v6071_v8, %v6078_v10  ;;  %v231_v14 = vrot.slane %v6076_v9, %v6078_v10  ;;  %s6045_s7 = smov 112   ;;  %s6046_s11 = smov 32  }
   0x8   :  { %v294_v19 = vrot.slane %v6093_v15, %v6078_v10  ;;  %v357_v22 = vrot.slane %v6098_v16, %v6078_v10  ;;  %v420_v25 = vrot.slane %v6111_v23, %v6078_v10  ;;  %v483_v28 = vrot.slane %v6116_v24, %v6078_v10  ;;  %s6047_s14 = smov 96   ;;  %s6048_s30 = smov 16  }
   0x9   :  { %v48_v17 = vrot.slane %v41_v11, %v6078_v10  ;;  %v175_v18 = vrot.slane %v168_v13, %v6078_v10  ;;  %v112_v20 = vrot.slane %v105_v12, %v6078_v10  ;;  %v238_v21 = vrot.slane %v231_v14, %v6078_v10  ;;  %s6049_s4 = smov 80  }
   0xa   :  { %v301_v26 = vrot.slane %v294_v19, %v6078_v10  ;;  %v364_v27 = vrot.slane %v357_v22, %v6078_v10  ;;  %v427_v29 = vrot.slane %v420_v25, %v6078_v10  ;;  %v490_v30 = vrot.slane %v483_v28, %v6078_v10 }
   0xb   :  { %49 = vrot.lane.b32.xlu0 %v48_v17, %s6043_s18  ;;  %176 = vrot.lane.b32.xlu1 %v175_v18, %s6043_s18  ;;  %vm636_vm4 = vcmask 15360   ;;  %vm1014_vm5 = vcmask 122880   ;;  %vm2439_vm6 = vcmask 254080   ;;  %vm3864_vm7 = vcmask 385280  }
   0xc   :  { %vm5289_vm8 = vcmask 516480  }
   0xf   :  { %113 = vrot.lane.b32.xlu0 %v112_v20, %s6043_s18  ;;  %239 = vrot.lane.b32.xlu1 %v238_v21, %s6043_s18 }
  0x13   :  { %302 = vrot.lane.b32.xlu0 %v301_v26, %s6043_s18  ;;  %365 = vrot.lane.b32.xlu1 %v364_v27, %s6043_s18 }
  0x17   :  { %428 = vrot.lane.b32.xlu0 %v427_v29, %s6043_s18  ;;  %491 = vrot.lane.b32.xlu1 %v490_v30, %s6043_s18 }
  0x7d   :  { %v50_v31 = vpop.permute.xlu0 %49  ;;  %v177_v33 = vpop.permute.xlu1 %176 }
  0x7e   :  { %v56_v32 = vsel %vm51_vm1, %v50_v31, 0  ;;  %v182_v37 = vsel %vm51_vm1, %v177_v33, 0 }
  0x7f   :  { %5519 = vmatpush3.bf16.xpose.msra.mxu0 %v56_v32 }
  0x80   :  { %5530 = vmatprep.subr.bf16.mxu0 %v6041_v3 }
  0x81   :  { %v114_v34 = vpop.permute.xlu0 %113  ;;  %v240_v38 = vpop.permute.xlu1 %239 }
  0x82   :  { %v119_v36 = vsel %vm51_vm1, %v114_v34, 0  ;;  %v245_v40 = vsel %vm51_vm1, %v240_v38, 0 }
  0x83   :  { %5525 = vmatpush3.bf16.xpose.msra.mxu1 %v119_v36 }
  0x84   :  { %5536 = vmatprep.subr.bf16.mxu1 %v6041_v3 }
  0x85   :  { %v303_v41 = vpop.permute.xlu0 %302  ;;  %v366_v44 = vpop.permute.xlu1 %365 }
  0x86   :  { %5521 = vmatmul.mubr.msk.bf16.vlgmr.msra.gmra.mrb[0].mxu0 %vm51_vm1, %v18_v35  ;;  %v308_v43 = vsel %vm51_vm1, %v303_v41, 0  ;;  %v371_v46 = vsel %vm51_vm1, %v366_v44, 0 }
  0x87   :  { %5531 = vmatpush3.bf16.xpose.msra.mxu0 %v182_v37  ;;  %5532 = vmatprep.mubr.msk.bf16.mxu0 %vm6042_vm0, %v6041_v3 }
  0x88   :  { %5542 = vmatprep.subr.bf16.mxu0 %v6041_v3 }
  0x89   :  { %v429_v47 = vpop.permute.xlu0 %428  ;;  %v492_v50 = vpop.permute.xlu1 %491 }
  0x8a   :  { %5527 = vmatmul.mubr.msk.bf16.vlgmr.msra.gmra.mrb[0].mxu1 %vm51_vm1, %v19_v39  ;;  %v434_v49 = vsel %vm51_vm1, %v429_v47, 0  ;;  %v497_v52 = vsel %vm51_vm1, %v492_v50, 0 }
  0x8b   :  { %5537 = vmatpush3.bf16.xpose.msra.mxu1 %v245_v40  ;;  %5538 = vmatprep.mubr.msk.bf16.mxu1 %vm6042_vm0, %v6041_v3 }
  0x8c   :  { %5548 = vmatprep.subr.bf16.mxu1 %v6041_v3 }
  0x8e   :  { %5533 = vmatmul.mubr.msk.bf16.vlgmr.msra.gmra.mrb[4].mxu0 %vm51_vm1, %v20_v42 }
  0x8f   :  { %5543 = vmatpush3.bf16.xpose.msra.mxu0 %v308_v43  ;;  %5544 = vmatprep.mubr.msk.bf16.mxu0 %vm6042_vm0, %v6041_v3 }
  0x90   :  { %5554 = vmatprep.subr.bf16.mxu0 %v6041_v3 }
  0x92   :  { %5539 = vmatmul.mubr.msk.bf16.vlgmr.msra.gmra.mrb[4].mxu1 %vm51_vm1, %v21_v45 }
  0x93   :  { %5549 = vmatpush3.bf16.xpose.msra.mxu1 %v371_v46  ;;  %5550 = vmatprep.mubr.msk.bf16.mxu1 %vm6042_vm0, %v6041_v3 }
  0x94   :  { %5560 = vmatprep.subr.bf16.mxu1 %v6041_v3 }
  0x96   :  { %5545 = vmatmul.mubr.msk.bf16.vlgmr.msra.gmra.mrb[8].mxu0 %vm51_vm1, %v22_v48 }
  0x97   :  { %5555 = vmatpush3.bf16.xpose.msra.mxu0 %v434_v49  ;;  %5556 = vmatprep.mubr.msk.bf16.mxu0 %vm6042_vm0, %v6041_v3 }
  0x98   :  { %5566 = vmatprep.subr.bf16.mxu0 %v6041_v3 }
  0x9a   :  { %5551 = vmatmul.mubr.msk.bf16.vlgmr.msra.gmra.mrb[8].mxu1 %vm51_vm1, %v23_v51 }
  0x9b   :  { %5561 = vmatpush3.bf16.xpose.msra.mxu1 %v497_v52  ;;  %5562 = vmatprep.mubr.msk.bf16.mxu1 %vm6042_vm0, %v6041_v3 }
  0x9c   :  { %5572 = vmatprep.subr.bf16.mxu1 %v6041_v3 }
  0x9e   :  { %5557 = vmatmul.mubr.msk.bf16.vlgmr.msra.gmra.mrb[12].mxu0 %vm51_vm1, %v24_v53 }
  0x9f   :  { %5568 = vmatprep.mubr.msk.bf16.mxu0 %vm6042_vm0, %v6041_v3 }
  0xa2   :  { %5563 = vmatmul.mubr.msk.bf16.vlgmr.msra.gmra.mrb[12].mxu1 %vm51_vm1, %v25_v54 }
  0xa3   :  { %5574 = vmatprep.mubr.msk.bf16.mxu1 %vm6042_vm0, %v6041_v3 }
 0x159   :  { %v92_v55 = vpop.f32.mrb[0].mxu0 }
 0x15a   :  { %v5522_v56 = vpop.f32.mrb[1].mxu0  ;;  %v540_v57 = vsel %vm539_vm2, %v92_v55, -inf }
 0x15b   :  { %541 = vmax.xlane.f32.xlu0 %v540_v57  ;;  %v95_v58 = vpop.f32.mrb[2].mxu0 }
 0x15c   :  { %v5523_v59 = vpop.f32.mrb[3].mxu0 }
 0x15d   :  { %v155_v60 = vpop.f32.mrb[0].mxu1 }
 0x15e   :  { %v543_v61 = vsel %vm539_vm2, %v155_v60, -inf  ;;  %v5528_v62 = vpop.f32.mrb[1].mxu1 }
 0x15f   :  { %544 = vmax.xlane.f32.xlu1 %v543_v61  ;;  %v158_v63 = vpop.f32.mrb[2].mxu1 }
 0x160   :  { %v5529_v0 = vpop.f32.mrb[3].mxu1 }
 0x161   :  { %v218_v1 = vpop.f32.mrb[4].mxu0 }
 0x162   :  { %v5534_v2 = vpop.f32.mrb[5].mxu0  ;;  %v546_v4 = vsel %vm539_vm2, %v218_v1, -inf }
 0x163   :  { %547 = vmax.xlane.f32.xlu0 %v546_v4  ;;  %v221_v5 = vpop.f32.mrb[6].mxu0  ;;  %v1023_v2 = vld [vmem:[%s7322_s0] sm:$0x1]  ;;  %v26_v4 = vld [vmem:[%s7322_s0 + $0x1] sm:$0x1] }
 0x164   :  { %v5535_v6 = vpop.f32.mrb[7].mxu0  ;;  %v1071_v5 = vrot.slane %v1023_v2, %v6078_v10 }
 0x165   :  { %v281_v7 = vpop.f32.mrb[4].mxu1  ;;  %v642_v6 = vsel %vm640_vm3, %v26_v4, 0 }
 0x166   :  { %v549_v8 = vsel %vm539_vm2, %v281_v7, -inf  ;;  %v5540_v9 = vpop.f32.mrb[5].mxu1  ;;  %5567 = vmatpush3.bf16.msra.mxu0 %v642_v6 }
 0x167   :  { %550 = vmax.xlane.f32.xlu0 %v549_v8  ;;  %v284_v11 = vpop.f32.mrb[6].mxu1  ;;  %5578 = vmatprep.subr.bf16.mxu0 %v6041_v3  ;;  %v27_v9 = vld [vmem:[%s7322_s0 + $0x3] sm:$0x1] }
 0x168   :  { %v5541_v12 = vpop.f32.mrb[7].mxu1  ;;  %v1078_v11 = vrot.slane %v1071_v5, %v6078_v10 }
 0x169   :  { %v344_v13 = vpop.f32.mrb[8].mxu0  ;;  %v688_v12 = vsel %vm640_vm3, %v27_v9, 0 }
 0x16a   :  { %v5546_v14 = vpop.f32.mrb[9].mxu0  ;;  %v552_v15 = vsel %vm539_vm2, %v344_v13, -inf  ;;  %5573 = vmatpush3.bf16.msra.mxu1 %v688_v12  ;;  %v28_v12 = vld [vmem:[%s7322_s0 + $0x5] sm:$0x1] }
 0x16b   :  { %553 = vmax.xlane.f32.xlu1 %v552_v15  ;;  %v347_v16 = vpop.f32.mrb[10].mxu0  ;;  %5584 = vmatprep.subr.bf16.mxu1 %v6041_v3  ;;  %v1025_v15 = vld [vmem:[%s7322_s0 + $0x4] sm:$0x1] }
 0x16c   :  { %v5547_v17 = vpop.f32.mrb[11].mxu0 }
 0x16d   :  { %v407_v18 = vpop.f32.mrb[8].mxu1 }
 0x16e   :  { %v555_v19 = vsel %vm539_vm2, %v407_v18, -inf  ;;  %v5552_v20 = vpop.f32.mrb[9].mxu1 }
 0x16f   :  { %556 = vmax.xlane.f32.xlu0 %v555_v19  ;;  %v410_v21 = vpop.f32.mrb[10].mxu1  ;;  %v1033_v19 = vmul.bf16 1048592000, %v1025_v15 }
 0x170   :  { %v5553_v22 = vpop.f32.mrb[11].mxu1 }
 0x171   :  { %v6178_v23 = vpop.f32.mrb[12].mxu0  ;;  %v1214_v22 = vrot.slane %v1033_v19, %v6078_v10 }
 0x172   :  { %v558_v24 = vsel %vm539_vm2, %v6178_v23, -inf  ;;  %v5558_v25 = vpop.f32.mrb[13].mxu0 }
 0x173   :  { %559 = vmax.xlane.f32.xlu1 %v558_v24  ;;  %v473_v26 = vpop.f32.mrb[14].mxu0  ;;  %v1027_v25 = vld [vmem:[%s7322_s0 + $0x8] sm:$0x1] }
 0x174   :  { %v5559_v27 = vpop.f32.mrb[15].mxu0  ;;  %v1221_v26 = vrot.slane %v1214_v22, %v6078_v10 }
 0x175   :  { %v533_v28 = vpop.f32.mrb[12].mxu1  ;;  %v1391_v27 = vrot.slane %v1027_v25, %v6078_v10 }
 0x176   :  { %v561_v29 = vsel %vm539_vm2, %v533_v28, -inf  ;;  %v5564_v30 = vpop.f32.mrb[13].mxu1 }
 0x177   :  { %562 = vmax.xlane.f32.xlu0 %v561_v29  ;;  %v536_v31 = vpop.f32.mrb[14].mxu1  ;;  %v1029_v30 = vld [vmem:[%s7322_s0 + $0xc] sm:$0x1] }
 0x178   :  { %v5565_v32 = vpop.f32.mrb[15].mxu1 }
 0x179   :  { %v1551_v32 = vrot.slane %v1029_v30, %v6078_v10 }
 0x1e8   :  { %v542_v33 = vpop.xlane.xlu0 %541 }
 0x1e9   :  { %v564_v34 = vsub.f32 %v92_v55, %v542_v33  ;;  %v1037_v33 = vmul.bf16 1048592000, %v1029_v30 }
 0x1eb   :  { %v572_v35 = vmul.f32 1.442695, %v564_v34 }
 0x1ec   :  { %v545_v36 = vpop.xlane.xlu1 %544 }
 0x1ed   :  { %5912 = vpow2.f32 %v572_v35  ;;  %v565_v37 = vsub.f32 %v155_v60, %v545_v36  ;;  %v1558_v35 = vrot.slane %v1551_v32, %v6078_v10  ;;  %v1534_v36 = vrot.slane %v1037_v33, %v6078_v10  ;;  %v32_v32 = vld [vmem:[%s7322_s0 + $0xd] sm:$0x1] }
 0x1ef   :  { %v574_v38 = vmul.f32 1.442695, %v565_v37 }
 0x1f0   :  { %v548_v39 = vpop.xlane.xlu0 %547 }
 0x1f1   :  { %5914 = vpow2.f32 %v574_v38  ;;  %v566_v40 = vsub.f32 %v218_v1, %v548_v39  ;;  %v1541_v38 = vrot.slane %v1534_v36, %v6078_v10  ;;  %v1031_v39 = vmul.bf16 1048592000, %v1023_v2 }
 0x1f2   :  { %v918_v36 = vsel %vm640_vm3, %v32_v32, 0 }
 0x1f3   :  { %v576_v41 = vmul.f32 1.442695, %v566_v40  ;;  %v1054_v40 = vrot.slane %v1031_v39, %v6078_v10 }
 0x1f4   :  { %v551_v42 = vpop.xlane.xlu0 %550 }
 0x1f5   :  { %5916 = vpow2.f32 %v576_v41  ;;  %v567_v43 = vsub.f32 %v281_v7, %v551_v42  ;;  %v1061_v42 = vrot.slane %v1054_v40, %v6078_v10 }
 0x1f7   :  { %v6183_v44 = vpop.eup %5912  ;;  %v578_v45 = vmul.f32 1.442695, %v567_v43 }
 0x1f8   :  { %v554_v46 = vpop.xlane.xlu1 %553  ;;  %v588_v47 = vsel %vm539_vm2, %v6183_v44, 0.0 }
 0x1f9   :  { %5918 = vpow2.f32 %v578_v45  ;;  %v568_v48 = vsub.f32 %v344_v13, %v554_v46  ;;  %589 = vadd.xlane.f32.xlu1 %v588_v47  ;;  %v1024_v13 = vld [vmem:[%s7322_s0 + $0x2] sm:$0x1]  ;;  %v1026_v45 = vld [vmem:[%s7322_s0 + $0x6] sm:$0x1] }
 0x1fa   :  { %v1151_v14 = vrot.slane %v1024_v13, %v6078_v10  ;;  %v1032_v41 = vmul.bf16 1048592000, %v1024_v13  ;;  %v1311_v47 = vrot.slane %v1026_v45, %v6078_v10 }
 0x1fb   :  { %v6187_v49 = vpop.eup %5914  ;;  %v580_v50 = vmul.f32 1.442695, %v568_v48  ;;  %v1034_v48 = vmul.bf16 1048592000, %v1026_v45 }
 0x1fc   :  { %v557_v51 = vpop.xlane.xlu0 %556  ;;  %v591_v52 = vsel %vm539_vm2, %v6187_v49, 0.0  ;;  %v1158_v17 = vrot.slane %v1151_v14, %v6078_v10  ;;  %v1134_v43 = vrot.slane %v1032_v41, %v6078_v10 }
 0x1fd   :  { %5920 = vpow2.f32 %v580_v50  ;;  %v569_v53 = vsub.f32 %v407_v18, %v557_v51  ;;  %592 = vadd.xlane.f32.xlu0 %v591_v52  ;;  %v1231_v18 = vrot.slane %v1025_v15, %v6078_v10  ;;  %v1318_v50 = vrot.slane %v1311_v47, %v6078_v10  ;;  %v1028_v52 = vld [vmem:[%s7322_s0 + $0xa] sm:$0x1] }
 0x1fe   :  { %v1141_v46 = vrot.slane %v1134_v43, %v6078_v10  ;;  %v1294_v51 = vrot.slane %v1034_v48, %v6078_v10 }
 0x1ff   :  { %v6191_v54 = vpop.eup %5916  ;;  %v582_v55 = vmul.f32 1.442695, %v569_v53  ;;  %v1238_v21 = vrot.slane %v1231_v18, %v6078_v10  ;;  %v29_v18 = vld [vmem:[%s7322_s0 + $0x7] sm:$0x1] }
 0x200   :  { %v594_v56 = vsel %vm539_vm2, %v6191_v54, 0.0  ;;  %v560_v16 = vpop.xlane.xlu1 %559  ;;  %v1301_v53 = vrot.slane %v1294_v51, %v6078_v10 }
 0x201   :  { %5922 = vpow2.f32 %v582_v55  ;;  %595 = vadd.xlane.f32.xlu1 %v594_v56  ;;  %v570_v20 = vsub.f32 %v6178_v23, %v560_v16  ;;  %v1398_v23 = vrot.slane %v1391_v27, %v6078_v10  ;;  %v1471_v55 = vrot.slane %v1028_v52, %v6078_v10 }
 0x202   :  { %v1036_v56 = vmul.bf16 1048592000, %v1028_v52  ;;  %v734_v16 = vsel %vm640_vm3, %v28_v12, 0 }
 0x203   :  { %v6195_v57 = vpop.eup %5918  ;;  %v584_v24 = vmul.f32 1.442695, %v570_v20 }
 0x204   :  { %v563_v58 = vpop.xlane.xlu0 %562  ;;  %v597_v59 = vsel %vm539_vm2, %v6195_v57, 0.0 }
 0x205   :  { %v571_v60 = vsub.f32 %v533_v28, %v563_v58  ;;  %598 = vadd.xlane.f32.xlu0 %v597_v59  ;;  %v1035_v28 = vmul.bf16 1048592000, %v1027_v25  ;;  %v1478_v58 = vrot.slane %v1471_v55, %v6078_v10  ;;  %v1454_v59 = vrot.slane %v1036_v56, %v6078_v10 }
 0x207   :  { %v6199_v61 = vpop.eup %5920  ;;  %v586_v62 = vmul.f32 1.442695, %v571_v60  ;;  %v1374_v29 = vrot.slane %v1035_v28, %v6078_v10  ;;  %v1030_v60 = vld [vmem:[%s7322_s0 + $0xe] sm:$0x1] }
 0x208   :  { %v600_v63 = vsel %vm539_vm2, %v6199_v61, 0.0 }
 0x209   :  { %5924 = vpow2.f32 %v586_v62  ;;  %601 = vadd.xlane.f32.xlu1 %v600_v63  ;;  %v1381_v31 = vrot.slane %v1374_v29, %v6078_v10  ;;  %v1461_v62 = vrot.slane %v1454_v59, %v6078_v10  ;;  %v1631_v63 = vrot.slane %v1030_v60, %v6078_v10 }
 0x20a   :  { %5926 = vpow2.f32 %v584_v24  ;;  %v30_v24 = vld [vmem:[%s7322_s0 + $0x9] sm:$0x1] }
 0x20b   :  { %v6203_v0 = vpop.eup %5922  ;;  %v1638_v2 = vrot.slane %v1631_v63, %v6078_v10  ;;  %v826_v27 = vsel %vm640_vm3, %v30_v24, 0 }
 0x20c   :  { %v603_v1 = vsel %vm539_vm2, %v6203_v0, 0.0 }
 0x20d   :  { %604 = vadd.xlane.f32.xlu0 %v603_v1  ;;  %v1038_v1 = vmul.bf16 1048592000, %v1030_v60 }
 0x20f   :  { %v1614_v4 = vrot.slane %v1038_v1, %v6078_v10 }
 0x211   :  { %v1621_v5 = vrot.slane %v1614_v4, %v6078_v10 }
 0x213   :  { %v6215_v7 = vpop.eup %5924 }
 0x214   :  { %v609_v8 = vsel %vm539_vm2, %v6215_v7, 0.0  ;;  %v6255_v34 = vpop.eup %5926 }
 0x215   :  { %610 = vadd.xlane.f32.xlu0 %v609_v8  ;;  %v606_v37 = vsel %vm539_vm2, %v6255_v34, 0.0 }
 0x21a   :  { %1079 = vrot.lane.b32.xlu1 %v1078_v11, %s6044_s29 }
 0x22b   :  { %1159 = vrot.lane.b32.xlu0 %v1158_v17, %s6044_s29 }
 0x22f   :  { %1239 = vrot.lane.b32.xlu0 %v1238_v21, %s6044_s29  ;;  %v780_v21 = vsel %vm640_vm3, %v29_v18, 0  ;;  %v5332_v18 = vld.sshfl [vmem:[%s7322_s0 + $0x7] sm:$0x1 pattern:$0x75316420] }
 0x233   :  { %1222 = vrot.lane.b32.xlu0 %v1221_v26, %s6045_s7 }
 0x237   :  { %1399 = vrot.lane.b32.xlu0 %v1398_v23, %s6044_s29  ;;  %v31_v23 = vld [vmem:[%s7322_s0 + $0xb] sm:$0x1] }
 0x238   :  { %v872_v30 = vsel %vm640_vm3, %v31_v23, 0 }
 0x23b   :  { %1382 = vrot.lane.b32.xlu0 %v1381_v31, %s6045_s7 }
 0x23e   :  { %607 = vadd.xlane.f32.xlu1 %v606_v37 }
 0x23f   :  { %1559 = vrot.lane.b32.xlu0 %v1558_v35, %s6044_s29 }
 0x243   :  { %1542 = vrot.lane.b32.xlu0 %v1541_v38, %s6045_s7  ;;  %v33_v38 = vld [vmem:[%s7322_s0 + $0xf] sm:$0x1] }
 0x244   :  { %v964_v40 = vsel %vm640_vm3, %v33_v38, 0 }
 0x24f   :  { %1062 = vrot.lane.b32.xlu1 %v1061_v42, %s6045_s7 }
 0x253   :  { %1142 = vrot.lane.b32.xlu1 %v1141_v46, %s6045_s7 }
 0x257   :  { %1319 = vrot.lane.b32.xlu1 %v1318_v50, %s6044_s29 }
 0x25b   :  { %1302 = vrot.lane.b32.xlu1 %v1301_v53, %s6045_s7 }
 0x25f   :  { %1479 = vrot.lane.b32.xlu1 %v1478_v58, %s6044_s29 }
 0x263   :  { %1462 = vrot.lane.b32.xlu1 %v1461_v62, %s6045_s7 }
 0x267   :  { %1639 = vrot.lane.b32.xlu1 %v1638_v2, %s6044_s29 }
 0x26b   :  { %1622 = vrot.lane.b32.xlu1 %v1621_v5, %s6045_s7 }
 0x286   :  { %v590_v6 = vpop.xlane.xlu1 %589 }
 0x287   :  { %5928 = vrcp.f32 %v590_v6 }
 0x28a   :  { %v593_v8 = vpop.xlane.xlu0 %592 }
 0x28b   :  { %5930 = vrcp.f32 %v593_v8 }
 0x28e   :  { %v596_v9 = vpop.xlane.xlu1 %595 }
 0x28f   :  { %5932 = vrcp.f32 %v596_v9 }
 0x291   :  { %v5929_v11 = vpop.eup %5928 }
 0x292   :  { %v599_v13 = vpop.xlane.xlu0 %598  ;;  %v620_v14 = vmul.f32 %v5929_v11, %v6183_v44 }
 0x293   :  { %5934 = vrcp.f32 %v599_v13 }
 0x294   :  { %v628_v15 = vpack.c.bf16 %v620_v14, %v620_v14  ;;  %v5326_v14 = vld.sshfl [vmem:[%s7322_s0 + $0x1] sm:$0x1 pattern:$0x75316420] }
 0x295   :  { %v5931_v17 = vpop.eup %5930 }
 0x296   :  { %5569 = vmatmul.mubr.msk.bf16.vlgmr.msra.gmra.mrb[16].mxu0 %vm636_vm4, %v628_v15  ;;  %v602_v19 = vpop.xlane.xlu1 %601  ;;  %v621_v20 = vmul.f32 %v5931_v17, %v6187_v49  ;;  %v6402_v15 = vrot.slane %v5326_v14, %v6078_v10 }
 0x297   :  { %5936 = vrcp.f32 %v602_v19  ;;  %5579 = vmatpush3.bf16.msra.mxu0 %v734_v16  ;;  %5580 = vmatprep.mubr.msk.bf16.mxu0 %vm6042_vm0, %v6041_v3  ;;  %v5330_v16 = vld.sshfl [vmem:[%s7322_s0 + $0x5] sm:$0x1 pattern:$0x75316420]  ;;  %v6420_v19 = vrot.slane %v5332_v18, %v6078_v10 }
 0x298   :  { %v629_v44 = vpack.c.bf16 %v621_v20, %v621_v20  ;;  %5590 = vmatprep.subr.bf16.mxu0 %v6041_v3  ;;  %1798 = vrot.lane.b32.xlu1 %v6402_v15, %s6045_s7  ;;  %v6412_v17 = vrot.slane %v5330_v16, %v6078_v10  ;;  %v5328_v20 = vld.sshfl [vmem:[%s7322_s0 + $0x3] sm:$0x1 pattern:$0x75316420] }
 0x299   :  { %v5933_v22 = vpop.eup %5932 }
 0x29a   :  { %5575 = vmatmul.mubr.msk.bf16.vlgmr.msra.gmra.mrb[16].mxu1 %vm636_vm4, %v629_v44  ;;  %v605_v25 = vpop.xlane.xlu0 %604  ;;  %v622_v49 = vmul.f32 %v5933_v22, %v6191_v54  ;;  %v1080_v46 = vpop.permute.xlu1 %1079  ;;  %v6428_v44 = vrot.slane %v5328_v20, %v6078_v10 }
 0x29b   :  { %5938 = vrcp.f32 %v605_v25  ;;  %5585 = vmatpush3.bf16.msra.mxu1 %v780_v21  ;;  %5586 = vmatprep.mubr.msk.bf16.mxu1 %vm6042_vm0, %v6041_v3  ;;  %v1085_v58 = vsel %vm51_vm1, %v1080_v46, 0 }
 0x29c   :  { %v630_v26 = vpack.c.bf16 %v622_v49, %v622_v49  ;;  %5596 = vmatprep.subr.bf16.mxu1 %v6041_v3  ;;  %1924 = vrot.lane.b32.xlu1 %v6412_v17, %s6045_s7 }
 0x29d   :  { %v5935_v28 = vpop.eup %5934  ;;  %1861 = vrot.lane.b32.xlu0 %v6428_v44, %s6045_s7 }
 0x29e   :  { %5581 = vmatmul.mubr.msk.bf16.vlgmr.msra.gmra.mrb[20].mxu0 %vm636_vm4, %v630_v26  ;;  %v623_v29 = vmul.f32 %v5935_v28, %v6195_v57 }
 0x29f   :  { %5591 = vmatpush3.bf16.msra.mxu0 %v826_v27  ;;  %5592 = vmatprep.mubr.msk.bf16.mxu0 %vm6042_vm0, %v6041_v3 }
 0x2a0   :  { %v631_v54 = vpack.c.bf16 %v623_v29, %v623_v29  ;;  %5602 = vmatprep.subr.bf16.mxu0 %v6041_v3  ;;  %1987 = vrot.lane.b32.xlu1 %v6420_v19, %s6045_s7 }
 0x2a1   :  { %v5937_v31 = vpop.eup %5936 }
 0x2a2   :  { %5587 = vmatmul.mubr.msk.bf16.vlgmr.msra.gmra.mrb[20].mxu1 %vm636_vm4, %v631_v54  ;;  %v611_v33 = vpop.xlane.xlu0 %610  ;;  %v624_v35 = vmul.f32 %v5937_v31, %v6199_v61 }
 0x2a3   :  { %5940 = vrcp.f32 %v611_v33  ;;  %5597 = vmatpush3.bf16.msra.mxu1 %v872_v30  ;;  %5598 = vmatprep.mubr.msk.bf16.mxu1 %vm6042_vm0, %v6041_v3 }
 0x2a4   :  { %v632_v57 = vpack.c.bf16 %v624_v35, %v624_v35  ;;  %5608 = vmatprep.subr.bf16.mxu1 %v6041_v3 }
 0x2a5   :  { %v5939_v37 = vpop.eup %5938 }
 0x2a6   :  { %5593 = vmatmul.mubr.msk.bf16.vlgmr.msra.gmra.mrb[24].mxu0 %vm636_vm4, %v632_v57  ;;  %v625_v39 = vmul.f32 %v5939_v37, %v6203_v0  ;;  %v1160_v42 = vpop.permute.xlu0 %1159 }
 0x2a7   :  { %5603 = vmatpush3.bf16.msra.mxu0 %v918_v36  ;;  %5604 = vmatprep.mubr.msk.bf16.mxu0 %vm6042_vm0, %v6041_v3  ;;  %v1165_v45 = vsel %vm51_vm1, %v1160_v42, 0 }
 0x2a8   :  { %v633_v61 = vpack.c.bf16 %v625_v39, %v625_v39  ;;  %5614 = vmatprep.subr.bf16.mxu0 %v6041_v3 }
 0x2aa   :  { %5599 = vmatmul.mubr.msk.bf16.vlgmr.msra.gmra.mrb[24].mxu1 %vm636_vm4, %v633_v61  ;;  %v1240_v51 = vpop.permute.xlu0 %1239 }
 0x2ab   :  { %5609 = vmatpush3.bf16.msra.mxu1 %v964_v40  ;;  %5610 = vmatprep.mubr.msk.bf16.mxu1 %vm6042_vm0, %v6041_v3  ;;  %v1245_v63 = vsel %vm51_vm1, %v1240_v51, 0 }
 0x2ac   :  { %5620 = vmatprep.subr.bf16.mxu1 %v6041_v3 }
 0x2ad   :  { %v5941_v41 = vpop.eup %5940 }
 0x2ae   :  { %v627_v0 = vmul.f32 %v5941_v41, %v6215_v7  ;;  %v1223_v60 = vpop.permute.xlu0 %1222 }
 0x2b0   :  { %v635_v43 = vpack.c.bf16 %v627_v0, %v627_v0 }
 0x2b2   :  { %5611 = vmatmul.mubr.msk.bf16.vlgmr.msra.gmra.mrb[28].mxu1 %vm636_vm4, %v635_v43  ;;  %v1400_v1 = vpop.permute.xlu0 %1399 }
 0x2b3   :  { %5622 = vmatprep.mubr.msk.bf16.mxu1 %vm6042_vm0, %v6041_v3  ;;  %v1405_v8 = vsel %vm51_vm1, %v1400_v1, 0 }
 0x2b4   :  { %5621 = vmatpush3.bf16.xpose.msra.mxu1 %v1165_v45 }
 0x2b5   :  { %5632 = vmatprep.subr.bf16.mxu1 %v6041_v3 }
 0x2b6   :  { %v1383_v5 = vpop.permute.xlu0 %1382 }
 0x2ba   :  { %v1560_v11 = vpop.permute.xlu0 %1559 }
 0x2bb   :  { %v1565_v12 = vsel %vm51_vm1, %v1560_v11, 0 }
 0x2be   :  { %v1543_v13 = vpop.permute.xlu0 %1542 }
 0x2cb   :  { %v608_v47 = vpop.xlane.xlu1 %607 }
 0x2cc   :  { %5942 = vrcp.f32 %v608_v47 }
 0x2cf   :  { %v1063_v48 = vpop.permute.xlu1 %1062 }
 0x2d3   :  { %v1143_v50 = vpop.permute.xlu1 %1142 }
 0x2d4   :  { %5623 = vmatmul.mubr.msk.bf16.vlgmr.msra.gmra.mrb[32].mxu1 %vm51_vm1, %v1143_v50 }
 0x2d5   :  { %5634 = vmatprep.mubr.msk.bf16.mxu1 %vm6042_vm0, %v6041_v3 }
 0x2d6   :  { %v5943_v7 = vpop.eup %5942 }
 0x2d7   :  { %v626_v52 = vmul.f32 %v5943_v7, %v6255_v34  ;;  %v1320_v53 = vpop.permute.xlu1 %1319 }
 0x2d8   :  { %v1325_v55 = vsel %vm51_vm1, %v1320_v53, 0 }
 0x2d9   :  { %v634_v56 = vpack.c.bf16 %v626_v52, %v626_v52  ;;  %5633 = vmatpush3.bf16.xpose.msra.mxu1 %v1325_v55 }
 0x2da   :  { %5644 = vmatprep.subr.bf16.mxu1 %v6041_v3 }
 0x2db   :  { %5605 = vmatmul.mubr.msk.bf16.vlgmr.msra.gmra.mrb[28].mxu0 %vm636_vm4, %v634_v56  ;;  %v1303_v59 = vpop.permute.xlu1 %1302 }
 0x2dc   :  { %5615 = vmatpush3.bf16.xpose.msra.mxu0 %v1085_v58  ;;  %5616 = vmatprep.mubr.msk.bf16.mxu0 %vm6042_vm0, %v6041_v3 }
 0x2dd   :  { %5626 = vmatprep.subr.bf16.mxu0 %v6041_v3 }
 0x2df   :  { %v1480_v34 = vpop.permute.xlu1 %1479 }
 0x2e0   :  { %v1485_v62 = vsel %vm51_vm1, %v1480_v34, 0  ;;  %5635 = vmatmul.mubr.msk.bf16.vlgmr.msra.gmra.mrb[36].mxu1 %vm51_vm1, %v1303_v59 }
 0x2e1   :  { %5645 = vmatpush3.bf16.xpose.msra.mxu1 %v1485_v62  ;;  %5646 = vmatprep.mubr.msk.bf16.mxu1 %vm6042_vm0, %v6041_v3 }
 0x2e2   :  { %5656 = vmatprep.subr.bf16.mxu1 %v6041_v3 }
 0x2e3   :  { %5617 = vmatmul.mubr.msk.bf16.vlgmr.msra.gmra.mrb[32].mxu0 %vm51_vm1, %v1063_v48  ;;  %v1463_v2 = vpop.permute.xlu1 %1462 }
 0x2e4   :  { %5627 = vmatpush3.bf16.xpose.msra.mxu0 %v1245_v63  ;;  %5628 = vmatprep.mubr.msk.bf16.mxu0 %vm6042_vm0, %v6041_v3 }
 0x2e5   :  { %5638 = vmatprep.subr.bf16.mxu0 %v6041_v3 }
 0x2e7   :  { %v1640_v4 = vpop.permute.xlu1 %1639 }
 0x2e8   :  { %v1645_v6 = vsel %vm51_vm1, %v1640_v4, 0  ;;  %5647 = vmatmul.mubr.msk.bf16.vlgmr.msra.gmra.mrb[40].mxu1 %vm51_vm1, %v1463_v2 }
 0x2e9   :  { %5657 = vmatpush3.bf16.xpose.msra.mxu1 %v1645_v6  ;;  %5658 = vmatprep.mubr.msk.bf16.mxu1 %vm6042_vm0, %v6041_v3 }
 0x2ea   :  { %5668 = vmatprep.subr.bf16.mxu1 %v6041_v3 }
 0x2eb   :  { %5629 = vmatmul.mubr.msk.bf16.vlgmr.msra.gmra.mrb[36].mxu0 %vm51_vm1, %v1223_v60  ;;  %v1623_v9 = vpop.permute.xlu1 %1622 }
 0x2ec   :  { %5639 = vmatpush3.bf16.xpose.msra.mxu0 %v1405_v8  ;;  %5640 = vmatprep.mubr.msk.bf16.mxu0 %vm6042_vm0, %v6041_v3 }
 0x2ed   :  { %5650 = vmatprep.subr.bf16.mxu0 %v6041_v3 }
 0x2f0   :  { %5659 = vmatmul.mubr.msk.bf16.vlgmr.msra.gmra.mrb[44].mxu1 %vm51_vm1, %v1623_v9 }
 0x2f1   :  { %5670 = vmatprep.mubr.msk.bf16.mxu1 %vm6042_vm0, %v6041_v3 }
 0x2f3   :  { %5641 = vmatmul.mubr.msk.bf16.vlgmr.msra.gmra.mrb[40].mxu0 %vm51_vm1, %v1383_v5 }
 0x2f4   :  { %5651 = vmatpush3.bf16.xpose.msra.mxu0 %v1565_v12  ;;  %5652 = vmatprep.mubr.msk.bf16.mxu0 %vm6042_vm0, %v6041_v3 }
 0x2f5   :  { %5662 = vmatprep.subr.bf16.mxu0 %v6041_v3 }
 0x2fb   :  { %5653 = vmatmul.mubr.msk.bf16.vlgmr.msra.gmra.mrb[44].mxu0 %vm51_vm1, %v1543_v13 }
 0x2fc   :  { %5664 = vmatprep.mubr.msk.bf16.mxu0 %vm6042_vm0, %v6041_v3 }
 0x30a   :  { %v1799_v54 = vpop.permute.xlu1 %1798 }
 0x30b   :  { %v1804_v31 = vsel %vm640_vm3, %v1799_v54, 0 }
 0x30c   :  { %5663 = vmatpush3.bf16.msra.mxu0 %v1804_v31 }
 0x30d   :  { %5674 = vmatprep.subr.bf16.mxu0 %v6041_v3 }
 0x30f   :  { %v1862_v46 = vpop.permute.xlu0 %1861 }
 0x310   :  { %v1867_v50 = vsel %vm640_vm3, %v1862_v46, 0 }
 0x311   :  { %5669 = vmatpush3.bf16.msra.mxu1 %v1867_v50 }
 0x312   :  { %5680 = vmatprep.subr.bf16.mxu1 %v6041_v3 }
 0x369   :  { %v678_v21 = vpop.f32.mrb[16].mxu0 }
 0x36a   :  { %v1006_v22 = vpack.c.bf16 %v678_v21, %v678_v21  ;;  %v5570_v24 = vpop.f32.mrb[17].mxu0 }
 0x36b   :  { %v681_v25 = vpop.f32.mrb[18].mxu0 }
 0x36c   :  { %1015 = vst.msk [vmem:[%s7323_s1] sm:$0x1] %vm1014_vm5, %v1006_v22  ;;  %v5571_v49 = vpop.f32.mrb[19].mxu0 }
 0x36d   :  { %v724_v26 = vpop.f32.mrb[16].mxu1 }
 0x36e   :  { %v1007_v27 = vpack.c.bf16 %v724_v26, %v724_v26  ;;  %v5576_v28 = vpop.f32.mrb[17].mxu1 }
 0x36f   :  { %v727_v23 = vpop.f32.mrb[18].mxu1 }
 0x370   :  { %1016 = vst.msk [vmem:[%s7323_s1 + $0x1] sm:$0x1] %vm1014_vm5, %v1007_v27  ;;  %v5577_v29 = vpop.f32.mrb[19].mxu1 }
 0x371   :  { %v770_v30 = vpop.f32.mrb[20].mxu0 }
 0x372   :  { %v1008_v32 = vpack.c.bf16 %v770_v30, %v770_v30  ;;  %v5582_v33 = vpop.f32.mrb[21].mxu0 }
 0x373   :  { %v773_v35 = vpop.f32.mrb[22].mxu0 }
 0x374   :  { %1017 = vst.msk [vmem:[%s7323_s1 + $0x2] sm:$0x1] %vm1014_vm5, %v1008_v32  ;;  %v5583_v57 = vpop.f32.mrb[23].mxu0 }
 0x375   :  { %v816_v36 = vpop.f32.mrb[20].mxu1 }
 0x376   :  { %v1009_v37 = vpack.c.bf16 %v816_v36, %v816_v36  ;;  %v5588_v38 = vpop.f32.mrb[21].mxu1 }
 0x377   :  { %v819_v39 = vpop.f32.mrb[22].mxu1 }
 0x378   :  { %1018 = vst.msk [vmem:[%s7323_s1 + $0x3] sm:$0x1] %vm1014_vm5, %v1009_v37  ;;  %v5589_v61 = vpop.f32.mrb[23].mxu1 }
 0x379   :  { %v862_v40 = vpop.f32.mrb[24].mxu0 }
 0x37a   :  { %v1010_v41 = vpack.c.bf16 %v862_v40, %v862_v40  ;;  %v5594_v0 = vpop.f32.mrb[25].mxu0 }
 0x37b   :  { %v865_v42 = vpop.f32.mrb[26].mxu0 }
 0x37c   :  { %1019 = vst.msk [vmem:[%s7323_s1 + $0x4] sm:$0x1] %vm1014_vm5, %v1010_v41  ;;  %v5595_v43 = vpop.f32.mrb[27].mxu0 }
 0x37d   :  { %v908_v45 = vpop.f32.mrb[24].mxu1  ;;  %v5336_v43 = vld.sshfl [vmem:[%s7322_s0 + $0xb] sm:$0x1 pattern:$0x75316420] }
 0x37e   :  { %v1011_v47 = vpack.c.bf16 %v908_v45, %v908_v45  ;;  %v5600_v48 = vpop.f32.mrb[25].mxu1  ;;  %v5334_v45 = vld.sshfl [vmem:[%s7322_s0 + $0x9] sm:$0x1 pattern:$0x75316420]  ;;  %v6498_v46 = vrot.slane %v5336_v43, %v6078_v10 }
 0x37f   :  { %v911_v7 = vpop.f32.mrb[26].mxu1  ;;  %v6507_v48 = vpop.permute.xlu1 %1924  ;;  %v2451_v43 = vld [vmem:[%s7322_s0 + $0x6] sm:$0x1] }
 0x380   :  { %1020 = vst.msk [vmem:[%s7323_s1 + $0x5] sm:$0x1] %vm1014_vm5, %v1011_v47  ;;  %v5601_v51 = vpop.f32.mrb[27].mxu1  ;;  %v6501_v47 = vrot.slane %v5334_v45, %v6078_v10 }
 0x383   :  { %v6509_v50 = vpop.permute.xlu1 %1987 }
 0x385   :  { %v1000_v52 = vpop.f32.mrb[28].mxu1 }
 0x386   :  { %v1013_v53 = vpack.c.bf16 %v1000_v52, %v1000_v52  ;;  %v5612_v55 = vpop.f32.mrb[29].mxu1 }
 0x387   :  { %v1003_v56 = vpop.f32.mrb[30].mxu1 }
 0x388   :  { %1022 = vst.msk [vmem:[%s7323_s1 + $0x7] sm:$0x1] %vm1014_vm5, %v1013_v53  ;;  %v5613_v58 = vpop.f32.mrb[31].mxu1 }
 0x3a7   :  { %v6464_v59 = vpop.f32.mrb[32].mxu1 }
 0x3a8   :  { %v1690_v60 = vsel %vm539_vm2, %v6464_v59, -inf  ;;  %v5624_v34 = vpop.f32.mrb[33].mxu1 }
 0x3a9   :  { %1691 = vmax.xlane.f32.xlu1 %v1690_v60  ;;  %v1204_v62 = vpop.f32.mrb[34].mxu1 }
 0x3aa   :  { %v5625_v63 = vpop.f32.mrb[35].mxu1 }
 0x3ae   :  { %v954_v1 = vpop.f32.mrb[28].mxu0 }
 0x3af   :  { %v1012_v2 = vpack.c.bf16 %v954_v1, %v954_v1  ;;  %v5606_v4 = vpop.f32.mrb[29].mxu0 }
 0x3b0   :  { %v957_v5 = vpop.f32.mrb[30].mxu0 }
 0x3b1   :  { %1021 = vst.msk [vmem:[%s7323_s1 + $0x6] sm:$0x1] %vm1014_vm5, %v1012_v2  ;;  %v5607_v6 = vpop.f32.mrb[31].mxu0 }
 0x3b3   :  { %v6472_v8 = vpop.f32.mrb[36].mxu1 }
 0x3b4   :  { %v5636_v9 = vpop.f32.mrb[37].mxu1  ;;  %v1696_v29 = vsel %vm539_vm2, %v6472_v8, -inf }
 0x3b5   :  { %v1364_v11 = vpop.f32.mrb[38].mxu1 }
 0x3b6   :  { %v1121_v12 = vpop.f32.mrb[32].mxu0  ;;  %v5637_v13 = vpop.f32.mrb[39].mxu1 }
 0x3b7   :  { %v5618_v14 = vpop.f32.mrb[33].mxu0  ;;  %v1687_v16 = vsel %vm539_vm2, %v1121_v12, -inf }
 0x3b8   :  { %1688 = vmax.xlane.f32.xlu0 %v1687_v16  ;;  %v1124_v18 = vpop.f32.mrb[34].mxu0 }
 0x3b9   :  { %v5619_v20 = vpop.f32.mrb[35].mxu0 }
 0x3bb   :  { %v6475_v21 = vpop.f32.mrb[40].mxu1 }
 0x3bc   :  { %v5648_v22 = vpop.f32.mrb[41].mxu1  ;;  %v1702_v31 = vsel %vm539_vm2, %v6475_v21, -inf }
 0x3bd   :  { %v1524_v24 = vpop.f32.mrb[42].mxu1 }
 0x3be   :  { %v1281_v25 = vpop.f32.mrb[36].mxu0  ;;  %v5649_v49 = vpop.f32.mrb[43].mxu1 }
 0x3bf   :  { %v5630_v26 = vpop.f32.mrb[37].mxu0  ;;  %v1693_v27 = vsel %vm539_vm2, %v1281_v25, -inf  ;;  %v5340_v49 = vld.sshfl [vmem:[%s7322_s0 + $0xf] sm:$0x1 pattern:$0x75316420] }
 0x3c0   :  { %1694 = vmax.xlane.f32.xlu0 %v1693_v27  ;;  %v1284_v28 = vpop.f32.mrb[38].mxu0  ;;  %v6542_v26 = vrot.slane %v5340_v49, %v6078_v10  ;;  %v5338_v27 = vld.sshfl [vmem:[%s7322_s0 + $0xd] sm:$0x1 pattern:$0x75316420] }
 0x3c1   :  { %v5631_v23 = vpop.f32.mrb[39].mxu0  ;;  %v6550_v28 = vrot.slane %v5338_v27, %v6078_v10 }
 0x3c3   :  { %v6480_v54 = vpop.f32.mrb[44].mxu1 }
 0x3c4   :  { %1697 = vmax.xlane.f32.xlu0 %v1696_v29  ;;  %v5660_v30 = vpop.f32.mrb[45].mxu1  ;;  %v1708_v39 = vsel %vm539_vm2, %v6480_v54, -inf }
 0x3c5   :  { %v1684_v32 = vpop.f32.mrb[46].mxu1 }
 0x3c6   :  { %v1441_v33 = vpop.f32.mrb[40].mxu0  ;;  %v5661_v35 = vpop.f32.mrb[47].mxu1 }
 0x3c7   :  { %v5642_v57 = vpop.f32.mrb[41].mxu0  ;;  %v1699_v36 = vsel %vm539_vm2, %v1441_v33, -inf }
 0x3c8   :  { %1703 = vmax.xlane.f32.xlu0 %v1702_v31  ;;  %1700 = vmax.xlane.f32.xlu1 %v1699_v36  ;;  %v1444_v37 = vpop.f32.mrb[42].mxu0 }
 0x3c9   :  { %v5643_v38 = vpop.f32.mrb[43].mxu0 }
 0x3ca   :  { %v2448_v38 = vld [vmem:[%s7322_s0] sm:$0x1] }
 0x3cc   :  { %1709 = vmax.xlane.f32.xlu0 %v1708_v39 }
 0x3ce   :  { %v6487_v61 = vpop.f32.mrb[44].mxu0 }
 0x3cf   :  { %v1705_v40 = vsel %vm539_vm2, %v6487_v61, -inf  ;;  %v5654_v41 = vpop.f32.mrb[45].mxu0 }
 0x3d0   :  { %1706 = vmax.xlane.f32.xlu1 %v1705_v40  ;;  %v1604_v0 = vpop.f32.mrb[46].mxu0  ;;  %v2496_v40 = vrot.slane %v2448_v38, %v6078_v10 }
 0x3d1   :  { %v5655_v42 = vpop.f32.mrb[47].mxu0  ;;  %v2456_v0 = vmul.bf16 1048592000, %v2448_v38 }
 0x3d2   :  { %v2503_v45 = vrot.slane %v2496_v40, %v6078_v10 }
 0x3e1   :  { %2113 = vrot.lane.b32.xlu1 %v6498_v46, %s6045_s7 }
 0x3e2   :  { %2050 = vrot.lane.b32.xlu0 %v6501_v47, %s6045_s7 }
 0x436   :  { %v1692_v7 = vpop.xlane.xlu1 %1691 }
 0x437   :  { %v1712_v51 = vsub.f32 %v6464_v59, %v1692_v7  ;;  %v2479_v7 = vrot.slane %v2456_v0, %v6078_v10 }
 0x439   :  { %v1721_v52 = vmul.f32 1.442695, %v1712_v51 }
 0x43b   :  { %5944 = vpow2.f32 %v1721_v52  ;;  %v2450_v52 = vld [vmem:[%s7322_s0 + $0x4] sm:$0x1] }
 0x445   :  { %v6512_v53 = vpop.eup %5944  ;;  %v1689_v55 = vpop.xlane.xlu0 %1688 }
 0x446   :  { %v1711_v56 = vsub.f32 %v1121_v12, %v1689_v55  ;;  %v1738_v58 = vsel %vm539_vm2, %v6512_v53, 0.0  ;;  %v2736_v55 = vrot.slane %v2451_v43, %v6078_v10 }
 0x447   :  { %1739 = vadd.xlane.f32.xlu0 %v1738_v58  ;;  %v2656_v58 = vrot.slane %v2450_v52, %v6078_v10 }
 0x448   :  { %v1719_v60 = vmul.f32 1.442695, %v1711_v56  ;;  %v2459_v56 = vmul.bf16 1048592000, %v2451_v43 }
 0x44a   :  { %5946 = vpow2.f32 %v1719_v60  ;;  %v2486_v60 = vrot.slane %v2479_v7, %v6078_v10 }
 0x44d   :  { %v1695_v34 = vpop.xlane.xlu0 %1694 }
 0x44e   :  { %v1713_v62 = vsub.f32 %v1281_v25, %v1695_v34  ;;  %v2743_v34 = vrot.slane %v2736_v55, %v6078_v10 }
 0x450   :  { %v1723_v63 = vmul.f32 1.442695, %v1713_v62  ;;  %v2458_v62 = vmul.bf16 1048592000, %v2450_v52 }
 0x451   :  { %v1698_v1 = vpop.xlane.xlu0 %1697 }
 0x452   :  { %5948 = vpow2.f32 %v1723_v63  ;;  %v1714_v2 = vsub.f32 %v6472_v8, %v1698_v1  ;;  %v2719_v63 = vrot.slane %v2459_v56, %v6078_v10  ;;  %v2453_v1 = vld [vmem:[%s7322_s0 + $0xa] sm:$0x1] }
 0x454   :  { %v6517_v59 = vpop.eup %5946  ;;  %v1725_v4 = vmul.f32 1.442695, %v1714_v2  ;;  %v2663_v2 = vrot.slane %v2656_v58, %v6078_v10 }
 0x455   :  { %v1704_v5 = vpop.xlane.xlu0 %1703  ;;  %v1701_v6 = vpop.xlane.xlu1 %1700  ;;  %v1735_v9 = vsel %vm539_vm2, %v6517_v59, 0.0 }
 0x456   :  { %5950 = vpow2.f32 %v1725_v4  ;;  %v1716_v11 = vsub.f32 %v6475_v21, %v1704_v5  ;;  %v1715_v12 = vsub.f32 %v1441_v33, %v1701_v6  ;;  %1736 = vadd.xlane.f32.xlu1 %v1735_v9  ;;  %v2639_v4 = vrot.slane %v2458_v62, %v6078_v10  ;;  %v2452_v6 = vld [vmem:[%s7322_s0 + $0x8] sm:$0x1] }
 0x457   :  { %v2726_v5 = vrot.slane %v2719_v63, %v6078_v10  ;;  %v2896_v9 = vrot.slane %v2453_v1, %v6078_v10 }
 0x458   :  { %v1729_v13 = vmul.f32 1.442695, %v1716_v11  ;;  %v1727_v14 = vmul.f32 1.442695, %v1715_v12  ;;  %v2461_v11 = vmul.bf16 1048592000, %v2453_v1  ;;  %v2816_v12 = vrot.slane %v2452_v6, %v6078_v10 }
 0x459   :  { %v1710_v23 = vpop.xlane.xlu0 %1709 }
 0x45a   :  { %5952 = vpow2.f32 %v1729_v13  ;;  %v1718_v30 = vsub.f32 %v6480_v54, %v1710_v23  ;;  %v2449_v54 = vld [vmem:[%s7322_s0 + $0x2] sm:$0x1]  ;;  %v2646_v13 = vrot.slane %v2639_v4, %v6078_v10  ;;  %v2454_v23 = vld [vmem:[%s7322_s0 + $0xc] sm:$0x1] }
 0x45b   :  { %5954 = vpow2.f32 %v1727_v14  ;;  %v2576_v39 = vrot.slane %v2449_v54, %v6078_v10  ;;  %v2903_v14 = vrot.slane %v2896_v9, %v6078_v10 }
 0x45c   :  { %v6522_v16 = vpop.eup %5948  ;;  %v1733_v32 = vmul.f32 1.442695, %v1718_v30 }
 0x45d   :  { %v1741_v8 = vsel %vm539_vm2, %v6522_v16, 0.0  ;;  %v1707_v29 = vpop.xlane.xlu1 %1706  ;;  %v2583_v41 = vrot.slane %v2576_v39, %v6078_v10  ;;  %v2051_v40 = vpop.permute.xlu0 %2050 }
 0x45e   :  { %1742 = vadd.xlane.f32.xlu1 %v1741_v8  ;;  %v1717_v31 = vsub.f32 %v6487_v61, %v1707_v29  ;;  %5956 = vpow2.f32 %v1733_v32  ;;  %v2457_v61 = vmul.bf16 1048592000, %v2449_v54  ;;  %v2460_v8 = vmul.bf16 1048592000, %v2452_v6 }
 0x460   :  { %v6526_v18 = vpop.eup %5950  ;;  %v1731_v33 = vmul.f32 1.442695, %v1717_v31  ;;  %v2559_v42 = vrot.slane %v2457_v61, %v6078_v10  ;;  %v2799_v49 = vrot.slane %v2460_v8, %v6078_v10  ;;  %v2976_v31 = vrot.slane %v2454_v23, %v6078_v10 }
 0x461   :  { %v1744_v20 = vsel %vm539_vm2, %v6526_v18, 0.0 }
 0x462   :  { %1745 = vadd.xlane.f32.xlu0 %v1744_v20  ;;  %5958 = vpow2.f32 %v1731_v33  ;;  %v2566_v51 = vrot.slane %v2559_v42, %v6078_v10  ;;  %v2879_v20 = vrot.slane %v2461_v11, %v6078_v10  ;;  %v2806_v32 = vrot.slane %v2799_v49, %v6078_v10  ;;  %v2114_v42 = vpop.permute.xlu1 %2113 }
 0x463   :  { %v2983_v54 = vrot.slane %v2976_v31, %v6078_v10 }
 0x464   :  { %v6530_v22 = vpop.eup %5952  ;;  %v2886_v27 = vrot.slane %v2879_v20, %v6078_v10 }
 0x465   :  { %v6532_v21 = vpop.eup %5954  ;;  %v1750_v24 = vsel %vm539_vm2, %v6530_v22, 0.0 }
 0x466   :  { %1751 = vadd.xlane.f32.xlu0 %v1750_v24  ;;  %v1747_v25 = vsel %vm539_vm2, %v6532_v21, 0.0  ;;  %v2455_v24 = vld [vmem:[%s7322_s0 + $0xe] sm:$0x1] }
 0x467   :  { %1748 = vadd.xlane.f32.xlu1 %v1747_v25  ;;  %v2823_v25 = vrot.slane %v2816_v12, %v6078_v10  ;;  %v3056_v29 = vrot.slane %v2455_v24, %v6078_v10  ;;  %v2463_v30 = vmul.bf16 1048592000, %v2455_v24 }
 0x468   :  { %v6556_v35 = vpop.eup %5956 }
 0x469   :  { %v1756_v36 = vsel %vm539_vm2, %v6556_v35, 0.0  ;;  %v3063_v33 = vrot.slane %v3056_v29, %v6078_v10 }
 0x46c   :  { %v6558_v57 = vpop.eup %5958 }
 0x46d   :  { %v1753_v37 = vsel %vm539_vm2, %v6558_v57, 0.0 }
 0x478   :  { %2239 = vrot.lane.b32.xlu1 %v6542_v26, %s6045_s7 }
 0x47c   :  { %2176 = vrot.lane.b32.xlu0 %v6550_v28, %s6045_s7 }
 0x49b   :  { %1757 = vadd.xlane.f32.xlu0 %v1756_v36  ;;  %v2462_v36 = vmul.bf16 1048592000, %v2454_v23 }
 0x49c   :  { %1754 = vadd.xlane.f32.xlu1 %v1753_v37  ;;  %v3039_v37 = vrot.slane %v2463_v30, %v6078_v10 }
 0x49d   :  { %v2959_v38 = vrot.slane %v2462_v36, %v6078_v10 }
 0x49e   :  { %v3046_v39 = vrot.slane %v3039_v37, %v6078_v10 }
 0x49f   :  { %v2966_v61 = vrot.slane %v2959_v38, %v6078_v10 }
 0x4ad   :  { %2584 = vrot.lane.b32.xlu1 %v2583_v41, %s6046_s11 }
 0x4b1   :  { %2504 = vrot.lane.b32.xlu0 %v2503_v45, %s6046_s11  ;;  %2567 = vrot.lane.b32.xlu1 %v2566_v51, %s6047_s14 }
 0x4b5   :  { %2487 = vrot.lane.b32.xlu0 %v2486_v60, %s6047_s14  ;;  %2744 = vrot.lane.b32.xlu1 %v2743_v34, %s6046_s11  ;;  %v2056_v34 = vsel %vm640_vm3, %v2051_v40, 0 }
 0x4b9   :  { %2664 = vrot.lane.b32.xlu0 %v2663_v2, %s6046_s11  ;;  %2727 = vrot.lane.b32.xlu1 %v2726_v5, %s6047_s14  ;;  %v2119_v2 = vsel %vm640_vm3, %v2114_v42, 0 }
 0x4bd   :  { %2647 = vrot.lane.b32.xlu0 %v2646_v13, %s6047_s14  ;;  %2904 = vrot.lane.b32.xlu1 %v2903_v14, %s6046_s11 }
 0x4c1   :  { %2824 = vrot.lane.b32.xlu0 %v2823_v25, %s6046_s11  ;;  %2887 = vrot.lane.b32.xlu1 %v2886_v27, %s6047_s14 }
 0x4c5   :  { %2807 = vrot.lane.b32.xlu0 %v2806_v32, %s6047_s14  ;;  %3064 = vrot.lane.b32.xlu1 %v3063_v33, %s6046_s11 }
 0x4c9   :  { %2984 = vrot.lane.b32.xlu0 %v2983_v54, %s6046_s11  ;;  %3047 = vrot.lane.b32.xlu1 %v3046_v39, %s6047_s14 }
 0x4cd   :  { %2967 = vrot.lane.b32.xlu0 %v2966_v61, %s6047_s14  ;;  %3223 = vrot.lane.b32.xlu1 %v6402_v15, %s6047_s14  ;;  %v1993_v15 = vsel %vm640_vm3, %v6509_v50, 0  ;;  %v1930_v50 = vsel %vm640_vm3, %v6507_v48, 0 }
 0x4d1   :  { %3349 = vrot.lane.b32.xlu1 %v6412_v17, %s6047_s14  ;;  %3286 = vrot.lane.b32.xlu0 %v6428_v44, %s6047_s14 }
 0x4d4   :  { %v1740_v41 = vpop.xlane.xlu0 %1739 }
 0x4d5   :  { %5960 = vrcp.f32 %v1740_v41  ;;  %3412 = vrot.lane.b32.xlu1 %v6420_v19, %s6047_s14 }
 0x4df   :  { %v5961_v0 = vpop.eup %5960 }
 0x4e0   :  { %v1768_v43 = vmul.f32 %v5961_v0, %v6512_v53 }
 0x4e2   :  { %v1776_v45 = vpack.c.bf16 %v1768_v43, %v1768_v43 }
 0x4e3   :  { %v1737_v7 = vpop.xlane.xlu1 %1736 }
 0x4e4   :  { %5962 = vrcp.f32 %v1737_v7  ;;  %5671 = vmatmul.mubr.msk.bf16.vlgmr.msra.gmra.mrb[48].mxu1 %vm636_vm4, %v1776_v45 }
 0x4e5   :  { %5681 = vmatpush3.bf16.msra.mxu1 %v1993_v15  ;;  %5682 = vmatprep.mubr.msk.bf16.mxu1 %vm6042_vm0, %v6041_v3 }
 0x4e6   :  { %5692 = vmatprep.subr.bf16.mxu1 %v6041_v3 }
 0x4eb   :  { %v1743_v17 = vpop.xlane.xlu1 %1742 }
 0x4ec   :  { %5964 = vrcp.f32 %v1743_v17 }
 0x4ee   :  { %v5963_v19 = vpop.eup %5962 }
 0x4ef   :  { %v1746_v44 = vpop.xlane.xlu0 %1745  ;;  %v1767_v53 = vmul.f32 %v5963_v19, %v6517_v59 }
 0x4f0   :  { %5966 = vrcp.f32 %v1746_v44 }
 0x4f1   :  { %v1775_v51 = vpack.c.bf16 %v1767_v53, %v1767_v53 }
 0x4f3   :  { %v1752_v52 = vpop.xlane.xlu0 %1751  ;;  %5665 = vmatmul.mubr.msk.bf16.vlgmr.msra.gmra.mrb[48].mxu0 %vm636_vm4, %v1775_v51 }
 0x4f4   :  { %5968 = vrcp.f32 %v1752_v52  ;;  %5675 = vmatpush3.bf16.msra.mxu0 %v1930_v50  ;;  %v1749_v55 = vpop.xlane.xlu1 %1748  ;;  %5676 = vmatprep.mubr.msk.bf16.mxu0 %vm6042_vm0, %v6041_v3 }
 0x4f5   :  { %5970 = vrcp.f32 %v1749_v55  ;;  %5686 = vmatprep.subr.bf16.mxu0 %v6041_v3 }
 0x4f6   :  { %v5965_v56 = vpop.eup %5964 }
 0x4f7   :  { %v1769_v59 = vmul.f32 %v5965_v56, %v6522_v16 }
 0x4f8   :  { %v2240_v9 = vpop.permute.xlu1 %2239 }
 0x4f9   :  { %v1777_v58 = vpack.c.bf16 %v1769_v59, %v1769_v59 }
 0x4fa   :  { %v5967_v60 = vpop.eup %5966 }
 0x4fb   :  { %5677 = vmatmul.mubr.msk.bf16.vlgmr.msra.gmra.mrb[52].mxu0 %vm636_vm4, %v1777_v58  ;;  %v1770_v48 = vmul.f32 %v5967_v60, %v6526_v18  ;;  %v2177_v18 = vpop.permute.xlu0 %2176 }
 0x4fc   :  { %5687 = vmatpush3.bf16.msra.mxu0 %v2056_v34  ;;  %5688 = vmatprep.mubr.msk.bf16.mxu0 %vm6042_vm0, %v6041_v3  ;;  %v2182_v6 = vsel %vm640_vm3, %v2177_v18, 0 }
 0x4fd   :  { %v1778_v62 = vpack.c.bf16 %v1770_v48, %v1770_v48  ;;  %5698 = vmatprep.subr.bf16.mxu0 %v6041_v3 }
 0x4fe   :  { %v5969_v63 = vpop.eup %5968 }
 0x4ff   :  { %v5971_v1 = vpop.eup %5970  ;;  %5683 = vmatmul.mubr.msk.bf16.vlgmr.msra.gmra.mrb[52].mxu1 %vm636_vm4, %v1778_v62  ;;  %v1772_v4 = vmul.f32 %v5969_v63, %v6530_v22 }
 0x500   :  { %5693 = vmatpush3.bf16.msra.mxu1 %v2119_v2  ;;  %v1771_v16 = vmul.f32 %v5971_v1, %v6532_v21  ;;  %5694 = vmatprep.mubr.msk.bf16.mxu1 %vm6042_vm0, %v6041_v3  ;;  %v2245_v21 = vsel %vm640_vm3, %v2240_v9, 0 }
 0x501   :  { %5704 = vmatprep.subr.bf16.mxu1 %v6041_v3  ;;  %v1780_v11 = vpack.c.bf16 %v1772_v4, %v1772_v4 }
 0x502   :  { %v1779_v5 = vpack.c.bf16 %v1771_v16, %v1771_v16 }
 0x504   :  { %5689 = vmatmul.mubr.msk.bf16.vlgmr.msra.gmra.mrb[56].mxu0 %vm636_vm4, %v1779_v5 }
 0x505   :  { %5699 = vmatpush3.bf16.msra.mxu0 %v2182_v6  ;;  %5700 = vmatprep.mubr.msk.bf16.mxu0 %vm6042_vm0, %v6041_v3 }
 0x506   :  { %5710 = vmatprep.subr.bf16.mxu0 %v6041_v3 }
 0x507   :  { %5695 = vmatmul.mubr.msk.bf16.vlgmr.msra.gmra.mrb[56].mxu1 %vm636_vm4, %v1780_v11 }
 0x508   :  { %5705 = vmatpush3.bf16.msra.mxu1 %v2245_v21  ;;  %5706 = vmatprep.mubr.msk.bf16.mxu1 %vm6042_vm0, %v6041_v3 }
 0x509   :  { %5716 = vmatprep.subr.bf16.mxu1 %v6041_v3 }
 0x528   :  { %v1758_v22 = vpop.xlane.xlu0 %1757 }
 0x529   :  { %5972 = vrcp.f32 %v1758_v22  ;;  %v1755_v12 = vpop.xlane.xlu1 %1754 }
 0x52a   :  { %5974 = vrcp.f32 %v1755_v12 }
 0x52c   :  { %v2505_v13 = vpop.permute.xlu0 %2504 }
 0x52d   :  { %v2585_v14 = vpop.permute.xlu1 %2584  ;;  %v2510_v32 = vsel %vm51_vm1, %v2505_v13, 0 }
 0x52e   :  { %v2590_v30 = vsel %vm51_vm1, %v2585_v14, 0 }
 0x530   :  { %v2488_v8 = vpop.permute.xlu0 %2487 }
 0x531   :  { %v2568_v20 = vpop.permute.xlu1 %2567 }
 0x533   :  { %v5973_v24 = vpop.eup %5972 }
 0x534   :  { %v5975_v25 = vpop.eup %5974  ;;  %v1774_v49 = vmul.f32 %v5973_v24, %v6556_v35  ;;  %v2665_v27 = vpop.permute.xlu0 %2664 }
 0x535   :  { %v1773_v23 = vmul.f32 %v5975_v25, %v6558_v57  ;;  %v2745_v29 = vpop.permute.xlu1 %2744  ;;  %v2670_v37 = vsel %vm51_vm1, %v2665_v27, 0 }
 0x536   :  { %v1782_v31 = vpack.c.bf16 %v1774_v49, %v1774_v49  ;;  %v2750_v57 = vsel %vm51_vm1, %v2745_v29, 0 }
 0x537   :  { %v1781_v33 = vpack.c.bf16 %v1773_v23, %v1773_v23 }
 0x538   :  { %5707 = vmatmul.mubr.msk.bf16.vlgmr.msra.gmra.mrb[60].mxu1 %vm636_vm4, %v1782_v31  ;;  %v2648_v35 = vpop.permute.xlu0 %2647 }
 0x539   :  { %5701 = vmatmul.mubr.msk.bf16.vlgmr.msra.gmra.mrb[60].mxu0 %vm636_vm4, %v1781_v33  ;;  %5717 = vmatpush3.bf16.xpose.msra.mxu1 %v2590_v30  ;;  %v2728_v36 = vpop.permute.xlu1 %2727 }
 0x53a   :  { %5711 = vmatpush3.bf16.xpose.msra.mxu0 %v2510_v32  ;;  %5712 = vmatprep.mubr.msk.bf16.mxu0 %vm6042_vm0, %v6041_v3 }
 0x53b   :  { %5718 = vmatprep.mubr.msk.bf16.mxu1 %vm6042_vm0, %v6041_v3  ;;  %5722 = vmatprep.subr.bf16.mxu0 %v6041_v3 }
 0x53c   :  { %5728 = vmatprep.subr.bf16.mxu1 %v6041_v3  ;;  %v2825_v38 = vpop.permute.xlu0 %2824 }
 0x53d   :  { %v2905_v54 = vpop.permute.xlu1 %2904  ;;  %v2830_v41 = vsel %vm51_vm1, %v2825_v38, 0 }
 0x53e   :  { %v2910_v61 = vsel %vm51_vm1, %v2905_v54, 0 }
 0x540   :  { %5719 = vmatmul.mubr.msk.bf16.vlgmr.msra.gmra.mrb[64].mxu1 %vm51_vm1, %v2568_v20  ;;  %v2808_v40 = vpop.permute.xlu0 %2807 }
 0x541   :  { %5713 = vmatmul.mubr.msk.bf16.vlgmr.msra.gmra.mrb[64].mxu0 %vm51_vm1, %v2488_v8  ;;  %5729 = vmatpush3.bf16.xpose.msra.mxu1 %v2750_v57  ;;  %v2888_v39 = vpop.permute.xlu1 %2887 }
 0x542   :  { %5723 = vmatpush3.bf16.xpose.msra.mxu0 %v2670_v37  ;;  %5724 = vmatprep.mubr.msk.bf16.mxu0 %vm6042_vm0, %v6041_v3 }
 0x543   :  { %5730 = vmatprep.mubr.msk.bf16.mxu1 %vm6042_vm0, %v6041_v3  ;;  %5734 = vmatprep.subr.bf16.mxu0 %v6041_v3 }
 0x544   :  { %5740 = vmatprep.subr.bf16.mxu1 %v6041_v3  ;;  %v2985_v42 = vpop.permute.xlu0 %2984 }
 0x545   :  { %v3065_v0 = vpop.permute.xlu1 %3064  ;;  %v2990_v45 = vsel %vm51_vm1, %v2985_v42, 0 }
 0x546   :  { %v3070_v43 = vsel %vm51_vm1, %v3065_v0, 0 }
 0x548   :  { %5731 = vmatmul.mubr.msk.bf16.vlgmr.msra.gmra.mrb[68].mxu1 %vm51_vm1, %v2728_v36  ;;  %v2968_v15 = vpop.permute.xlu0 %2967 }
 0x549   :  { %5725 = vmatmul.mubr.msk.bf16.vlgmr.msra.gmra.mrb[68].mxu0 %vm51_vm1, %v2648_v35  ;;  %5741 = vmatpush3.bf16.xpose.msra.mxu1 %v2910_v61  ;;  %v3048_v7 = vpop.permute.xlu1 %3047 }
 0x54a   :  { %5735 = vmatpush3.bf16.xpose.msra.mxu0 %v2830_v41  ;;  %5736 = vmatprep.mubr.msk.bf16.mxu0 %vm6042_vm0, %v6041_v3 }
 0x54b   :  { %5742 = vmatprep.mubr.msk.bf16.mxu1 %vm6042_vm0, %v6041_v3  ;;  %5746 = vmatprep.subr.bf16.mxu0 %v6041_v3 }
 0x54c   :  { %5752 = vmatprep.subr.bf16.mxu1 %v6041_v3  ;;  %v3287_v19 = vpop.permute.xlu0 %3286 }
 0x54d   :  { %v3224_v17 = vpop.permute.xlu1 %3223  ;;  %v3292_v53 = vsel %vm640_vm3, %v3287_v19, 0 }
 0x54e   :  { %v3229_v44 = vsel %vm640_vm3, %v3224_v17, 0 }
 0x550   :  { %5743 = vmatmul.mubr.msk.bf16.vlgmr.msra.gmra.mrb[72].mxu1 %vm51_vm1, %v2888_v39 }
 0x551   :  { %5737 = vmatmul.mubr.msk.bf16.vlgmr.msra.gmra.mrb[72].mxu0 %vm51_vm1, %v2808_v40  ;;  %5753 = vmatpush3.bf16.xpose.msra.mxu1 %v3070_v43 }
 0x552   :  { %5747 = vmatpush3.bf16.xpose.msra.mxu0 %v2990_v45  ;;  %5748 = vmatprep.mubr.msk.bf16.mxu0 %vm6042_vm0, %v6041_v3 }
 0x553   :  { %5754 = vmatprep.mubr.msk.bf16.mxu1 %vm6042_vm0, %v6041_v3  ;;  %5758 = vmatprep.subr.bf16.mxu0 %v6041_v3 }
 0x554   :  { %5764 = vmatprep.subr.bf16.mxu1 %v6041_v3 }
 0x558   :  { %5755 = vmatmul.mubr.msk.bf16.vlgmr.msra.gmra.mrb[76].mxu1 %vm51_vm1, %v3048_v7 }
 0x559   :  { %5749 = vmatmul.mubr.msk.bf16.vlgmr.msra.gmra.mrb[76].mxu0 %vm51_vm1, %v2968_v15  ;;  %5766 = vmatprep.mubr.msk.bf16.mxu1 %vm6042_vm0, %v6041_v3 }
 0x55a   :  { %5760 = vmatprep.mubr.msk.bf16.mxu0 %vm6042_vm0, %v6041_v3  ;;  %5759 = vmatpush3.bf16.msra.mxu0 %v3229_v44 }
 0x55b   :  { %5765 = vmatpush3.bf16.msra.mxu1 %v3292_v53  ;;  %5770 = vmatprep.subr.bf16.mxu0 %v6041_v3 }
 0x55c   :  { %5776 = vmatprep.subr.bf16.mxu1 %v6041_v3 }
 0x5b7   :  { %v6734_v51 = vpop.f32.mrb[48].mxu1 }
 0x5b8   :  { %v5672_v50 = vpop.f32.mrb[49].mxu1 }
 0x5b9   :  { %v1906_v52 = vpop.f32.mrb[50].mxu1 }
 0x5ba   :  { %v5673_v55 = vpop.f32.mrb[51].mxu1 }
 0x5c6   :  { %v6736_v56 = vpop.f32.mrb[48].mxu0 }
 0x5c7   :  { %v5666_v59 = vpop.f32.mrb[49].mxu0 }
 0x5c8   :  { %v1843_v58 = vpop.f32.mrb[50].mxu0 }
 0x5c9   :  { %v5667_v60 = vpop.f32.mrb[51].mxu0 }
 0x5ce   :  { %v6738_v34 = vpop.f32.mrb[52].mxu0 }
 0x5cf   :  { %v5678_v48 = vpop.f32.mrb[53].mxu0 }
 0x5d0   :  { %v1969_v62 = vpop.f32.mrb[54].mxu0 }
 0x5d1   :  { %v5679_v63 = vpop.f32.mrb[55].mxu0 }
 0x5d2   :  { %v6740_v1 = vpop.f32.mrb[52].mxu1 }
 0x5d3   :  { %v5684_v2 = vpop.f32.mrb[53].mxu1 }
 0x5d4   :  { %v2032_v16 = vpop.f32.mrb[54].mxu1 }
 0x5d5   :  { %v5685_v18 = vpop.f32.mrb[55].mxu1 }
 0x5d7   :  { %v6742_v4 = vpop.f32.mrb[56].mxu0 }
 0x5d8   :  { %v5690_v5 = vpop.f32.mrb[57].mxu0 }
 0x5d9   :  { %v2095_v6 = vpop.f32.mrb[58].mxu0 }
 0x5da   :  { %v5691_v9 = vpop.f32.mrb[59].mxu0  ;;  %v6744_v11 = vpop.f32.mrb[56].mxu1 }
 0x5db   :  { %v5696_v21 = vpop.f32.mrb[57].mxu1  ;;  %v6768_v9 = vpop.permute.xlu1 %3349 }
 0x5dc   :  { %v2158_v22 = vpop.f32.mrb[58].mxu1 }
 0x5dd   :  { %v5697_v12 = vpop.f32.mrb[59].mxu1 }
 0x5df   :  { %v6770_v21 = vpop.permute.xlu1 %3412 }
 0x60b   :  { %v6746_v13 = vpop.f32.mrb[60].mxu1 }
 0x60c   :  { %v6748_v14 = vpop.f32.mrb[60].mxu0  ;;  %v5708_v8 = vpop.f32.mrb[61].mxu1 }
 0x60d   :  { %v5702_v20 = vpop.f32.mrb[61].mxu0  ;;  %v2284_v24 = vpop.f32.mrb[62].mxu1 }
 0x60e   :  { %v2221_v25 = vpop.f32.mrb[62].mxu0  ;;  %v5709_v49 = vpop.f32.mrb[63].mxu1 }
 0x60f   :  { %v5703_v27 = vpop.f32.mrb[63].mxu0 }
 0x613   :  { %v2626_v23 = vpop.f32.mrb[64].mxu1 }
 0x614   :  { %v2546_v29 = vpop.f32.mrb[64].mxu0  ;;  %v5720_v30 = vpop.f32.mrb[65].mxu1  ;;  %v3115_v31 = vsel %vm539_vm2, %v2626_v23, -inf }
 0x615   :  { %v5714_v32 = vpop.f32.mrb[65].mxu0  ;;  %3116 = vmax.xlane.f32.xlu1 %v3115_v31  ;;  %v2629_v33 = vpop.f32.mrb[66].mxu1  ;;  %v3112_v36 = vsel %vm539_vm2, %v2546_v29, -inf }
 0x616   :  { %3113 = vmax.xlane.f32.xlu0 %v3112_v36  ;;  %v2549_v35 = vpop.f32.mrb[66].mxu0  ;;  %v5721_v57 = vpop.f32.mrb[67].mxu1 }
 0x617   :  { %v5715_v37 = vpop.f32.mrb[67].mxu0 }
 0x61b   :  { %v2786_v54 = vpop.f32.mrb[68].mxu1 }
 0x61c   :  { %v2706_v38 = vpop.f32.mrb[68].mxu0  ;;  %v5732_v39 = vpop.f32.mrb[69].mxu1  ;;  %v3121_v45 = vsel %vm539_vm2, %v2786_v54, -inf }
 0x61d   :  { %v5726_v61 = vpop.f32.mrb[69].mxu0  ;;  %v2789_v40 = vpop.f32.mrb[70].mxu1  ;;  %v3118_v41 = vsel %vm539_vm2, %v2706_v38, -inf }
 0x61e   :  { %3119 = vmax.xlane.f32.xlu0 %v3118_v41  ;;  %v2709_v0 = vpop.f32.mrb[70].mxu0  ;;  %v5733_v42 = vpop.f32.mrb[71].mxu1 }
 0x61f   :  { %v5727_v43 = vpop.f32.mrb[71].mxu0 }
 0x622   :  { %3122 = vmax.xlane.f32.xlu0 %v3121_v45 }
 0x623   :  { %v2946_v7 = vpop.f32.mrb[72].mxu1 }
 0x624   :  { %v2866_v15 = vpop.f32.mrb[72].mxu0  ;;  %v3127_v17 = vsel %vm539_vm2, %v2946_v7, -inf  ;;  %v5744_v19 = vpop.f32.mrb[73].mxu1 }
 0x625   :  { %v5738_v44 = vpop.f32.mrb[73].mxu0  ;;  %v3124_v53 = vsel %vm539_vm2, %v2866_v15, -inf  ;;  %v2949_v50 = vpop.f32.mrb[74].mxu1 }
 0x626   :  { %3128 = vmax.xlane.f32.xlu0 %v3127_v17  ;;  %3125 = vmax.xlane.f32.xlu1 %v3124_v53  ;;  %v2869_v52 = vpop.f32.mrb[74].mxu0  ;;  %v5745_v55 = vpop.f32.mrb[75].mxu1 }
 0x627   :  { %v5739_v59 = vpop.f32.mrb[75].mxu0  ;;  %v3874_v55 = vld [vmem:[%s7322_s0 + $0x2] sm:$0x1] }
 0x628   :  { %v4001_v59 = vrot.slane %v3874_v55, %v6078_v10 }
 0x62b   :  { %v6756_v58 = vpop.f32.mrb[76].mxu1 }
 0x62c   :  { %v6758_v60 = vpop.f32.mrb[76].mxu0  ;;  %v3133_v48 = vsel %vm539_vm2, %v6756_v58, -inf  ;;  %v5756_v62 = vpop.f32.mrb[77].mxu1 }
 0x62d   :  { %3134 = vmax.xlane.f32.xlu0 %v3133_v48  ;;  %v3130_v63 = vsel %vm539_vm2, %v6758_v60, -inf  ;;  %v5750_v2 = vpop.f32.mrb[77].mxu0  ;;  %v3109_v16 = vpop.f32.mrb[78].mxu1 }
 0x62e   :  { %3131 = vmax.xlane.f32.xlu1 %v3130_v63  ;;  %v3029_v18 = vpop.f32.mrb[78].mxu0  ;;  %v5757_v5 = vpop.f32.mrb[79].mxu1  ;;  %v4008_v63 = vrot.slane %v4001_v59, %v6078_v10  ;;  %v3876_v16 = vld [vmem:[%s7322_s0 + $0x6] sm:$0x1] }
 0x62f   :  { %v5751_v6 = vpop.f32.mrb[79].mxu0 }
 0x63f   :  { %3538 = vrot.lane.b32.xlu1 %v6498_v46, %s6047_s14 }
 0x643   :  { %3475 = vrot.lane.b32.xlu0 %v6501_v47, %s6047_s14 }
 0x6a2   :  { %v3117_v22 = vpop.xlane.xlu1 %3116 }
 0x6a3   :  { %v3137_v12 = vsub.f32 %v2626_v23, %v3117_v22  ;;  %v3114_v8 = vpop.xlane.xlu0 %3113  ;;  %v4161_v22 = vrot.slane %v3876_v16, %v6078_v10 }
 0x6a4   :  { %v3136_v20 = vsub.f32 %v2546_v29, %v3114_v8  ;;  %v3875_v8 = vld [vmem:[%s7322_s0 + $0x4] sm:$0x1] }
 0x6a5   :  { %v3146_v24 = vmul.f32 1.442695, %v3137_v12  ;;  %v3884_v12 = vmul.bf16 1048592000, %v3876_v16 }
 0x6a6   :  { %v3144_v25 = vmul.f32 1.442695, %v3136_v20 }
 0x6a7   :  { %5976 = vpow2.f32 %v3146_v24  ;;  %v3883_v24 = vmul.bf16 1048592000, %v3875_v8 }
 0x6a8   :  { %5978 = vpow2.f32 %v3144_v25  ;;  %v4081_v25 = vrot.slane %v3875_v8, %v6078_v10 }
 0x6ab   :  { %v3120_v49 = vpop.xlane.xlu0 %3119 }
 0x6ac   :  { %v3138_v27 = vsub.f32 %v2706_v38, %v3120_v49  ;;  %v4168_v49 = vrot.slane %v4161_v22, %v6078_v10 }
 0x6ae   :  { %v3148_v30 = vmul.f32 1.442695, %v3138_v27  ;;  %v4144_v27 = vrot.slane %v3884_v12, %v6078_v10 }
 0x6af   :  { %v3123_v31 = vpop.xlane.xlu0 %3122 }
 0x6b0   :  { %5980 = vpow2.f32 %v3148_v30  ;;  %v3139_v46 = vsub.f32 %v2786_v54, %v3123_v31  ;;  %v3878_v30 = vld [vmem:[%s7322_s0 + $0xa] sm:$0x1]  ;;  %v4064_v31 = vrot.slane %v3883_v24, %v6078_v10  ;;  %v3418_v24 = vsel %vm640_vm3, %v6770_v21, 0 }
 0x6b1   :  { %v6772_v32 = vpop.eup %5976 }
 0x6b2   :  { %v6774_v47 = vpop.eup %5978  ;;  %v3150_v33 = vmul.f32 1.442695, %v3139_v46  ;;  %v3163_v23 = vsel %vm539_vm2, %v6772_v32, 0.0  ;;  %v4088_v46 = vrot.slane %v4081_v25, %v6078_v10  ;;  %v3355_v25 = vsel %vm640_vm3, %v6768_v9, 0 }
 0x6b3   :  { %v3129_v36 = vpop.xlane.xlu0 %3128  ;;  %v3126_v29 = vpop.xlane.xlu1 %3125  ;;  %3164 = vadd.xlane.f32.xlu0 %v3163_v23  ;;  %v3160_v35 = vsel %vm539_vm2, %v6774_v47, 0.0  ;;  %v4321_v23 = vrot.slane %v3878_v30, %v6078_v10 }
 0x6b4   :  { %5982 = vpow2.f32 %v3150_v33  ;;  %v3141_v57 = vsub.f32 %v2946_v7, %v3129_v36  ;;  %v3140_v37 = vsub.f32 %v2866_v15, %v3126_v29  ;;  %3161 = vadd.xlane.f32.xlu1 %v3160_v35  ;;  %v4151_v33 = vrot.slane %v4144_v27, %v6078_v10  ;;  %v3877_v29 = vld [vmem:[%s7322_s0 + $0x8] sm:$0x1] }
 0x6b5   :  { %v3886_v36 = vmul.bf16 1048592000, %v3878_v30  ;;  %v4071_v35 = vrot.slane %v4064_v31, %v6078_v10 }
 0x6b6   :  { %v3154_v38 = vmul.f32 1.442695, %v3141_v57  ;;  %v3152_v54 = vmul.f32 1.442695, %v3140_v37  ;;  %v3885_v57 = vmul.bf16 1048592000, %v3877_v29  ;;  %v4241_v37 = vrot.slane %v3877_v29, %v6078_v10 }
 0x6b8   :  { %5984 = vpow2.f32 %v3154_v38  ;;  %v4328_v38 = vrot.slane %v4321_v23, %v6078_v10 }
 0x6b9   :  { %5986 = vpow2.f32 %v3152_v54  ;;  %v4304_v54 = vrot.slane %v3886_v36, %v6078_v10 }
 0x6ba   :  { %v6780_v39 = vpop.eup %5980  ;;  %v3135_v7 = vpop.xlane.xlu0 %3134 }
 0x6bb   :  { %v3166_v61 = vsel %vm539_vm2, %v6780_v39, 0.0  ;;  %v3132_v15 = vpop.xlane.xlu1 %3131  ;;  %v3143_v17 = vsub.f32 %v6756_v58, %v3135_v7  ;;  %v3882_v58 = vmul.bf16 1048592000, %v3874_v55 }
 0x6bc   :  { %3167 = vadd.xlane.f32.xlu1 %v3166_v61  ;;  %v3142_v19 = vsub.f32 %v6758_v60, %v3132_v15  ;;  %v3873_v60 = vld [vmem:[%s7322_s0] sm:$0x1]  ;;  %v3880_v61 = vld [vmem:[%s7322_s0 + $0xe] sm:$0x1] }
 0x6bd   :  { %v3158_v44 = vmul.f32 1.442695, %v3143_v17  ;;  %v3881_v48 = vmul.bf16 1048592000, %v3873_v60  ;;  %v3921_v62 = vrot.slane %v3873_v60, %v6078_v10  ;;  %v3984_v2 = vrot.slane %v3882_v58, %v6078_v10  ;;  %v3879_v17 = vld [vmem:[%s7322_s0 + $0xc] sm:$0x1] }
 0x6be   :  { %v6784_v40 = vpop.eup %5982  ;;  %v3156_v53 = vmul.f32 1.442695, %v3142_v19  ;;  %v4481_v7 = vrot.slane %v3880_v61, %v6078_v10  ;;  %v3888_v15 = vmul.bf16 1048592000, %v3880_v61 }
 0x6bf   :  { %v3169_v41 = vsel %vm539_vm2, %v6784_v40, 0.0  ;;  %5988 = vpow2.f32 %v3158_v44  ;;  %v3904_v18 = vrot.slane %v3881_v48, %v6078_v10  ;;  %v3928_v5 = vrot.slane %v3921_v62, %v6078_v10  ;;  %v3476_v48 = vpop.permute.xlu0 %3475  ;;  %v3539_v62 = vpop.permute.xlu1 %3538 }
 0x6c0   :  { %3170 = vadd.xlane.f32.xlu0 %v3169_v41  ;;  %5990 = vpow2.f32 %v3156_v53  ;;  %v3991_v6 = vrot.slane %v3984_v2, %v6078_v10  ;;  %v4224_v41 = vrot.slane %v3885_v57, %v6078_v10  ;;  %v4401_v44 = vrot.slane %v3879_v17, %v6078_v10 }
 0x6c1   :  { %v3911_v20 = vrot.slane %v3904_v18, %v6078_v10  ;;  %v4488_v53 = vrot.slane %v4481_v7, %v6078_v10  ;;  %v3481_v30 = vsel %vm640_vm3, %v3476_v48, 0  ;;  %v3544_v36 = vsel %vm640_vm3, %v3539_v62, 0 }
 0x6c2   :  { %v6788_v0 = vpop.eup %5984  ;;  %v4231_v19 = vrot.slane %v4224_v41, %v6078_v10  ;;  %v4408_v55 = vrot.slane %v4401_v44, %v6078_v10 }
 0x6c3   :  { %v6790_v42 = vpop.eup %5986  ;;  %v3175_v43 = vsel %vm539_vm2, %v6788_v0, 0.0 }
 0x6c4   :  { %3176 = vadd.xlane.f32.xlu0 %v3175_v43  ;;  %v3172_v45 = vsel %vm539_vm2, %v6790_v42, 0.0  ;;  %v4248_v43 = vrot.slane %v4241_v37, %v6078_v10 }
 0x6c5   :  { %3173 = vadd.xlane.f32.xlu1 %v3172_v45  ;;  %v4311_v45 = vrot.slane %v4304_v54, %v6078_v10 }
 0x6c9   :  { %v6802_v50 = vpop.eup %5988 }
 0x6ca   :  { %v6804_v52 = vpop.eup %5990 }
 0x6d6   :  { %3664 = vrot.lane.b32.xlu1 %v6542_v26, %s6047_s14  ;;  %v3181_v26 = vsel %vm539_vm2, %v6802_v50, 0.0 }
 0x6da   :  { %3601 = vrot.lane.b32.xlu0 %v6550_v28, %s6047_s14  ;;  %v3178_v28 = vsel %vm539_vm2, %v6804_v52, 0.0 }
 0x6f9   :  { %3182 = vadd.xlane.f32.xlu0 %v3181_v26  ;;  %v3887_v26 = vmul.bf16 1048592000, %v3879_v17 }
 0x6fa   :  { %3179 = vadd.xlane.f32.xlu1 %v3178_v28  ;;  %v4464_v28 = vrot.slane %v3888_v15, %v6078_v10 }
 0x6fb   :  { %v4384_v59 = vrot.slane %v3887_v26, %v6078_v10 }
 0x6fc   :  { %v4471_v58 = vrot.slane %v4464_v28, %v6078_v10 }
 0x6fd   :  { %v4391_v60 = vrot.slane %v4384_v59, %v6078_v10 }
 0x70b   :  { %4009 = vrot.lane.b32.xlu1 %v4008_v63, %s6048_s30 }
 0x70f   :  { %3929 = vrot.lane.b32.xlu0 %v3928_v5, %s6048_s30  ;;  %3992 = vrot.lane.b32.xlu1 %v3991_v6, %s6049_s4 }
 0x713   :  { %3912 = vrot.lane.b32.xlu0 %v3911_v20, %s6049_s4  ;;  %4169 = vrot.lane.b32.xlu1 %v4168_v49, %s6048_s30 }
 0x717   :  { %4089 = vrot.lane.b32.xlu0 %v4088_v46, %s6048_s30  ;;  %4152 = vrot.lane.b32.xlu1 %v4151_v33, %s6049_s4 }
 0x71b   :  { %4072 = vrot.lane.b32.xlu0 %v4071_v35, %s6049_s4  ;;  %4329 = vrot.lane.b32.xlu1 %v4328_v38, %s6048_s30 }
 0x71f   :  { %4249 = vrot.lane.b32.xlu0 %v4248_v43, %s6048_s30  ;;  %4312 = vrot.lane.b32.xlu1 %v4311_v45, %s6049_s4 }
 0x723   :  { %4232 = vrot.lane.b32.xlu0 %v4231_v19, %s6049_s4  ;;  %4489 = vrot.lane.b32.xlu1 %v4488_v53, %s6048_s30 }
 0x727   :  { %4409 = vrot.lane.b32.xlu0 %v4408_v55, %s6048_s30  ;;  %4472 = vrot.lane.b32.xlu1 %v4471_v58, %s6049_s4 }
 0x72b   :  { %4392 = vrot.lane.b32.xlu0 %v4391_v60, %s6049_s4 }
 0x740   :  { %v3165_v63 = vpop.xlane.xlu0 %3164 }
 0x741   :  { %5992 = vrcp.f32 %v3165_v63  ;;  %v3162_v2 = vpop.xlane.xlu1 %3161 }
 0x742   :  { %5994 = vrcp.f32 %v3162_v2 }
 0x749   :  { %v3168_v16 = vpop.xlane.xlu1 %3167 }
 0x74a   :  { %5996 = vrcp.f32 %v3168_v16 }
 0x74b   :  { %v5993_v18 = vpop.eup %5992 }
 0x74c   :  { %v5995_v5 = vpop.eup %5994  ;;  %v3193_v6 = vmul.f32 %v5993_v18, %v6772_v32 }
 0x74d   :  { %v3192_v22 = vmul.f32 %v5995_v5, %v6774_v47  ;;  %v3171_v12 = vpop.xlane.xlu0 %3170 }
 0x74e   :  { %5998 = vrcp.f32 %v3171_v12  ;;  %v3201_v8 = vpack.c.bf16 %v3193_v6, %v3193_v6 }
 0x74f   :  { %v3200_v20 = vpack.c.bf16 %v3192_v22, %v3192_v22 }
 0x750   :  { %5767 = vmatmul.mubr.msk.bf16.vlgmr.msra.gmra.mrb[80].mxu1 %vm636_vm4, %v3201_v8 }
 0x751   :  { %5777 = vmatpush3.bf16.msra.mxu1 %v3418_v24  ;;  %v3177_v49 = vpop.xlane.xlu0 %3176  ;;  %5761 = vmatmul.mubr.msk.bf16.vlgmr.msra.gmra.mrb[80].mxu0 %vm636_vm4, %v3200_v20  ;;  %v5374_v24 = vld.sshfl [vmem:[%s7322_s0 + $0x1] sm:$0x1 pattern:$0x75316420] }
 0x752   :  { %6000 = vrcp.f32 %v3177_v49  ;;  %5771 = vmatpush3.bf16.msra.mxu0 %v3355_v25  ;;  %v3174_v32 = vpop.xlane.xlu1 %3173  ;;  %5772 = vmatprep.mubr.msk.bf16.mxu0 %vm6042_vm0, %v6041_v3  ;;  %v4647_v25 = vrot.slane %v5374_v24, %v6078_v10 }
 0x753   :  { %6002 = vrcp.f32 %v3174_v32  ;;  %5782 = vmatprep.subr.bf16.mxu0 %v6041_v3  ;;  %5778 = vmatprep.mubr.msk.bf16.mxu1 %vm6042_vm0, %v6041_v3 }
 0x754   :  { %v5997_v21 = vpop.eup %5996  ;;  %5788 = vmatprep.subr.bf16.mxu1 %v6041_v3  ;;  %4648 = vrot.lane.b32.xlu1 %v4647_v25, %s6049_s4 }
 0x755   :  { %v3194_v9 = vmul.f32 %v5997_v21, %v6780_v39  ;;  %v3602_v29 = vpop.permute.xlu0 %3601 }
 0x756   :  { %v3607_v57 = vsel %vm640_vm3, %v3602_v29, 0  ;;  %v3665_v37 = vpop.permute.xlu1 %3664 }
 0x757   :  { %v3202_v47 = vpack.c.bf16 %v3194_v9, %v3194_v9 }
 0x758   :  { %v5999_v27 = vpop.eup %5998 }
 0x759   :  { %v3195_v31 = vmul.f32 %v5999_v27, %v6784_v40  ;;  %5773 = vmatmul.mubr.msk.bf16.vlgmr.msra.gmra.mrb[84].mxu0 %vm636_vm4, %v3202_v47 }
 0x75a   :  { %5783 = vmatpush3.bf16.msra.mxu0 %v3481_v30  ;;  %5784 = vmatprep.mubr.msk.bf16.mxu0 %vm6042_vm0, %v6041_v3 }
 0x75b   :  { %v3203_v46 = vpack.c.bf16 %v3195_v31, %v3195_v31  ;;  %5794 = vmatprep.subr.bf16.mxu0 %v6041_v3 }
 0x75c   :  { %v6001_v33 = vpop.eup %6000 }
 0x75d   :  { %v6003_v23 = vpop.eup %6002  ;;  %5779 = vmatmul.mubr.msk.bf16.vlgmr.msra.gmra.mrb[84].mxu1 %vm636_vm4, %v3203_v46  ;;  %v3197_v40 = vmul.f32 %v6001_v33, %v6788_v0 }
 0x75e   :  { %v3196_v39 = vmul.f32 %v6003_v23, %v6790_v42  ;;  %5789 = vmatpush3.bf16.msra.mxu1 %v3544_v36  ;;  %5790 = vmatprep.mubr.msk.bf16.mxu1 %vm6042_vm0, %v6041_v3  ;;  %v3670_v42 = vsel %vm640_vm3, %v3665_v37, 0 }
 0x75f   :  { %5800 = vmatprep.subr.bf16.mxu1 %v6041_v3  ;;  %v3205_v38 = vpack.c.bf16 %v3197_v40, %v3197_v40 }
 0x760   :  { %v3204_v35 = vpack.c.bf16 %v3196_v39, %v3196_v39 }
 0x762   :  { %5785 = vmatmul.mubr.msk.bf16.vlgmr.msra.gmra.mrb[88].mxu0 %vm636_vm4, %v3204_v35 }
 0x763   :  { %5795 = vmatpush3.bf16.msra.mxu0 %v3607_v57  ;;  %5796 = vmatprep.mubr.msk.bf16.mxu0 %vm6042_vm0, %v6041_v3 }
 0x764   :  { %5806 = vmatprep.subr.bf16.mxu0 %v6041_v3 }
 0x765   :  { %5791 = vmatmul.mubr.msk.bf16.vlgmr.msra.gmra.mrb[88].mxu1 %vm636_vm4, %v3205_v38 }
 0x766   :  { %5801 = vmatpush3.bf16.msra.mxu1 %v3670_v42  ;;  %5802 = vmatprep.mubr.msk.bf16.mxu1 %vm6042_vm0, %v6041_v3 }
 0x767   :  { %5812 = vmatprep.subr.bf16.mxu1 %v6041_v3 }
 0x786   :  { %v3183_v0 = vpop.xlane.xlu0 %3182 }
 0x787   :  { %6004 = vrcp.f32 %v3183_v0  ;;  %v3180_v54 = vpop.xlane.xlu1 %3179 }
 0x788   :  { %6006 = vrcp.f32 %v3180_v54 }
 0x78a   :  { %v3930_v61 = vpop.permute.xlu0 %3929 }
 0x78b   :  { %v4010_v41 = vpop.permute.xlu1 %4009  ;;  %v3935_v55 = vsel %vm51_vm1, %v3930_v61, 0 }
 0x78c   :  { %v4015_v26 = vsel %vm51_vm1, %v4010_v41, 0 }
 0x78e   :  { %v3913_v43 = vpop.permute.xlu0 %3912 }
 0x78f   :  { %v3993_v45 = vpop.permute.xlu1 %3992 }
 0x791   :  { %v6005_v7 = vpop.eup %6004 }
 0x792   :  { %v6007_v15 = vpop.eup %6006  ;;  %v3199_v17 = vmul.f32 %v6005_v7, %v6802_v50  ;;  %v4090_v19 = vpop.permute.xlu0 %4089 }
 0x793   :  { %v3198_v44 = vmul.f32 %v6007_v15, %v6804_v52  ;;  %v4170_v53 = vpop.permute.xlu1 %4169  ;;  %v4095_v60 = vsel %vm51_vm1, %v4090_v19, 0 }
 0x794   :  { %v3207_v28 = vpack.c.bf16 %v3199_v17, %v3199_v17  ;;  %v4175_v52 = vsel %vm51_vm1, %v4170_v53, 0 }
 0x795   :  { %v3206_v59 = vpack.c.bf16 %v3198_v44, %v3198_v44 }
 0x796   :  { %5803 = vmatmul.mubr.msk.bf16.vlgmr.msra.gmra.mrb[92].mxu1 %vm636_vm4, %v3207_v28  ;;  %v4073_v50 = vpop.permute.xlu0 %4072 }
 0x797   :  { %5797 = vmatmul.mubr.msk.bf16.vlgmr.msra.gmra.mrb[92].mxu0 %vm636_vm4, %v3206_v59  ;;  %5813 = vmatpush3.bf16.xpose.msra.mxu1 %v4015_v26  ;;  %v4153_v58 = vpop.permute.xlu1 %4152 }
 0x798   :  { %5807 = vmatpush3.bf16.xpose.msra.mxu0 %v3935_v55  ;;  %5808 = vmatprep.mubr.msk.bf16.mxu0 %vm6042_vm0, %v6041_v3 }
 0x799   :  { %5814 = vmatprep.mubr.msk.bf16.mxu1 %vm6042_vm0, %v6041_v3  ;;  %5818 = vmatprep.subr.bf16.mxu0 %v6041_v3 }
 0x79a   :  { %5824 = vmatprep.subr.bf16.mxu1 %v6041_v3  ;;  %v4250_v62 = vpop.permute.xlu0 %4249 }
 0x79b   :  { %v4330_v48 = vpop.permute.xlu1 %4329  ;;  %v4255_v18 = vsel %vm51_vm1, %v4250_v62, 0 }
 0x79c   :  { %v4335_v2 = vsel %vm51_vm1, %v4330_v48, 0 }
 0x79e   :  { %5815 = vmatmul.mubr.msk.bf16.vlgmr.msra.gmra.mrb[96].mxu1 %vm51_vm1, %v3993_v45  ;;  %v4233_v16 = vpop.permute.xlu0 %4232 }
 0x79f   :  { %5809 = vmatmul.mubr.msk.bf16.vlgmr.msra.gmra.mrb[96].mxu0 %vm51_vm1, %v3913_v43  ;;  %5825 = vmatpush3.bf16.xpose.msra.mxu1 %v4175_v52  ;;  %v4313_v63 = vpop.permute.xlu1 %4312 }
 0x7a0   :  { %5819 = vmatpush3.bf16.xpose.msra.mxu0 %v4095_v60  ;;  %5820 = vmatprep.mubr.msk.bf16.mxu0 %vm6042_vm0, %v6041_v3 }
 0x7a1   :  { %5826 = vmatprep.mubr.msk.bf16.mxu1 %vm6042_vm0, %v6041_v3  ;;  %5830 = vmatprep.subr.bf16.mxu0 %v6041_v3 }
 0x7a2   :  { %5836 = vmatprep.subr.bf16.mxu1 %v6041_v3  ;;  %v4410_v6 = vpop.permute.xlu0 %4409 }
 0x7a3   :  { %v4490_v5 = vpop.permute.xlu1 %4489  ;;  %v4415_v12 = vsel %vm51_vm1, %v4410_v6, 0 }
 0x7a4   :  { %v4495_v22 = vsel %vm51_vm1, %v4490_v5, 0 }
 0x7a6   :  { %5827 = vmatmul.mubr.msk.bf16.vlgmr.msra.gmra.mrb[100].mxu1 %vm51_vm1, %v4153_v58  ;;  %v4393_v20 = vpop.permute.xlu0 %4392 }
 0x7a7   :  { %5821 = vmatmul.mubr.msk.bf16.vlgmr.msra.gmra.mrb[100].mxu0 %vm51_vm1, %v4073_v50  ;;  %5837 = vmatpush3.bf16.xpose.msra.mxu1 %v4335_v2  ;;  %v4473_v8 = vpop.permute.xlu1 %4472 }
 0x7a8   :  { %5831 = vmatpush3.bf16.xpose.msra.mxu0 %v4255_v18  ;;  %5832 = vmatprep.mubr.msk.bf16.mxu0 %vm6042_vm0, %v6041_v3 }
 0x7a9   :  { %5838 = vmatprep.mubr.msk.bf16.mxu1 %vm6042_vm0, %v6041_v3  ;;  %5842 = vmatprep.subr.bf16.mxu0 %v6041_v3 }
 0x7aa   :  { %5848 = vmatprep.subr.bf16.mxu1 %v6041_v3 }
 0x7ae   :  { %5839 = vmatmul.mubr.msk.bf16.vlgmr.msra.gmra.mrb[104].mxu1 %vm51_vm1, %v4313_v63 }
 0x7af   :  { %5833 = vmatmul.mubr.msk.bf16.vlgmr.msra.gmra.mrb[104].mxu0 %vm51_vm1, %v4233_v16  ;;  %5849 = vmatpush3.bf16.xpose.msra.mxu1 %v4495_v22 }
 0x7b0   :  { %5843 = vmatpush3.bf16.xpose.msra.mxu0 %v4415_v12  ;;  %5844 = vmatprep.mubr.msk.bf16.mxu0 %vm6042_vm0, %v6041_v3 }
 0x7b1   :  { %5850 = vmatprep.mubr.msk.bf16.mxu1 %vm6042_vm0, %v6041_v3  ;;  %5854 = vmatprep.subr.bf16.mxu0 %v6041_v3 }
 0x7b2   :  { %5860 = vmatprep.subr.bf16.mxu1 %v6041_v3 }
 0x7b6   :  { %5851 = vmatmul.mubr.msk.bf16.vlgmr.msra.gmra.mrb[108].mxu1 %vm51_vm1, %v4473_v8 }
 0x7b7   :  { %5845 = vmatmul.mubr.msk.bf16.vlgmr.msra.gmra.mrb[108].mxu0 %vm51_vm1, %v4393_v20  ;;  %5862 = vmatprep.mubr.msk.bf16.mxu1 %vm6042_vm0, %v6041_v3 }
 0x7b8   :  { %5856 = vmatprep.mubr.msk.bf16.mxu0 %vm6042_vm0, %v6041_v3 }
 0x7c6   :  { %v4649_v35 = vpop.permute.xlu1 %4648 }
 0x7c7   :  { %v4654_v37 = vsel %vm640_vm3, %v4649_v35, 0 }
 0x7c8   :  { %5855 = vmatpush3.bf16.msra.mxu0 %v4654_v37 }
 0x7c9   :  { %5866 = vmatprep.subr.bf16.mxu0 %v6041_v3 }
 0x823   :  { %v6973_v49 = vpop.f32.mrb[80].mxu1 }
 0x824   :  { %v6975_v32 = vpop.f32.mrb[80].mxu0  ;;  %v5768_v21 = vpop.f32.mrb[81].mxu1 }
 0x825   :  { %v5762_v9 = vpop.f32.mrb[81].mxu0  ;;  %v3331_v47 = vpop.f32.mrb[82].mxu1 }
 0x826   :  { %v3268_v27 = vpop.f32.mrb[82].mxu0  ;;  %v5769_v30 = vpop.f32.mrb[83].mxu1 }
 0x827   :  { %v5763_v31 = vpop.f32.mrb[83].mxu0 }
 0x82c   :  { %v6977_v46 = vpop.f32.mrb[84].mxu0 }
 0x82d   :  { %v5774_v33 = vpop.f32.mrb[85].mxu0 }
 0x82e   :  { %v3394_v23 = vpop.f32.mrb[86].mxu0 }
 0x82f   :  { %v5775_v36 = vpop.f32.mrb[87].mxu0 }
 0x830   :  { %v6979_v39 = vpop.f32.mrb[84].mxu1 }
 0x831   :  { %v5780_v40 = vpop.f32.mrb[85].mxu1 }
 0x832   :  { %v3457_v29 = vpop.f32.mrb[86].mxu1 }
 0x833   :  { %v5781_v57 = vpop.f32.mrb[87].mxu1 }
 0x835   :  { %v6982_v38 = vpop.f32.mrb[88].mxu0 }
 0x836   :  { %v5786_v42 = vpop.f32.mrb[89].mxu0 }
 0x837   :  { %v3520_v0 = vpop.f32.mrb[90].mxu0 }
 0x838   :  { %v5787_v54 = vpop.f32.mrb[91].mxu0  ;;  %v6985_v61 = vpop.f32.mrb[88].mxu1 }
 0x839   :  { %v5792_v41 = vpop.f32.mrb[89].mxu1 }
 0x83a   :  { %v3583_v43 = vpop.f32.mrb[90].mxu1 }
 0x83b   :  { %v5793_v45 = vpop.f32.mrb[91].mxu1 }
 0x869   :  { %v6987_v7 = vpop.f32.mrb[92].mxu1 }
 0x86a   :  { %v6989_v15 = vpop.f32.mrb[92].mxu0  ;;  %v5804_v17 = vpop.f32.mrb[93].mxu1 }
 0x86b   :  { %v5798_v19 = vpop.f32.mrb[93].mxu0  ;;  %v3709_v44 = vpop.f32.mrb[94].mxu1  ;;  %v5378_v17 = vld.sshfl [vmem:[%s7322_s0 + $0x5] sm:$0x1 pattern:$0x75316420] }
 0x86c   :  { %v3646_v53 = vpop.f32.mrb[94].mxu0  ;;  %v5805_v26 = vpop.f32.mrb[95].mxu1  ;;  %v4773_v19 = vrot.slane %v5378_v17, %v6078_v10  ;;  %v5380_v44 = vld.sshfl [vmem:[%s7322_s0 + $0x7] sm:$0x1 pattern:$0x75316420] }
 0x86d   :  { %v5799_v28 = vpop.f32.mrb[95].mxu0  ;;  %v5376_v53 = vld.sshfl [vmem:[%s7322_s0 + $0x3] sm:$0x1 pattern:$0x75316420]  ;;  %v4836_v26 = vrot.slane %v5380_v44, %v6078_v10 }
 0x86e   :  { %v4710_v28 = vrot.slane %v5376_v53, %v6078_v10 }
 0x871   :  { %v4051_v55 = vpop.f32.mrb[96].mxu1 }
 0x872   :  { %v3971_v59 = vpop.f32.mrb[96].mxu0  ;;  %v5816_v58 = vpop.f32.mrb[97].mxu1  ;;  %v4540_v50 = vsel %vm539_vm2, %v4051_v55, -inf }
 0x873   :  { %v5810_v52 = vpop.f32.mrb[97].mxu0  ;;  %4541 = vmax.xlane.f32.xlu1 %v4540_v50  ;;  %v4054_v60 = vpop.f32.mrb[98].mxu1  ;;  %v4537_v48 = vsel %vm539_vm2, %v3971_v59, -inf }
 0x874   :  { %4538 = vmax.xlane.f32.xlu0 %v4537_v48  ;;  %v3974_v62 = vpop.f32.mrb[98].mxu0  ;;  %v5817_v63 = vpop.f32.mrb[99].mxu1 }
 0x875   :  { %v5811_v2 = vpop.f32.mrb[99].mxu0 }
 0x879   :  { %v4211_v16 = vpop.f32.mrb[100].mxu1 }
 0x87a   :  { %v4131_v18 = vpop.f32.mrb[100].mxu0  ;;  %v5828_v5 = vpop.f32.mrb[101].mxu1  ;;  %v4546_v25 = vsel %vm539_vm2, %v4211_v16, -inf }
 0x87b   :  { %v5822_v6 = vpop.f32.mrb[101].mxu0  ;;  %v4543_v22 = vsel %vm539_vm2, %v4131_v18, -inf  ;;  %v4214_v12 = vpop.f32.mrb[102].mxu1 }
 0x87c   :  { %4544 = vmax.xlane.f32.xlu0 %v4543_v22  ;;  %v4134_v8 = vpop.f32.mrb[102].mxu0  ;;  %v5829_v20 = vpop.f32.mrb[103].mxu1 }
 0x87d   :  { %v5823_v24 = vpop.f32.mrb[103].mxu0 }
 0x880   :  { %4547 = vmax.xlane.f32.xlu0 %v4546_v25 }
 0x881   :  { %v6995_v21 = vpop.f32.mrb[104].mxu1 }
 0x882   :  { %v6997_v9 = vpop.f32.mrb[104].mxu0  ;;  %v4552_v47 = vsel %vm539_vm2, %v6995_v21, -inf  ;;  %v5840_v27 = vpop.f32.mrb[105].mxu1 }
 0x883   :  { %v4549_v30 = vsel %vm539_vm2, %v6997_v9, -inf  ;;  %v5834_v31 = vpop.f32.mrb[105].mxu0  ;;  %v4374_v33 = vpop.f32.mrb[106].mxu1 }
 0x884   :  { %4553 = vmax.xlane.f32.xlu0 %v4552_v47  ;;  %4550 = vmax.xlane.f32.xlu1 %v4549_v30  ;;  %v4294_v23 = vpop.f32.mrb[106].mxu0  ;;  %v5841_v36 = vpop.f32.mrb[107].mxu1  ;;  %v5384_v33 = vld.sshfl [vmem:[%s7322_s0 + $0xb] sm:$0x1 pattern:$0x75316420] }
 0x885   :  { %v5835_v40 = vpop.f32.mrb[107].mxu0  ;;  %v4962_v23 = vrot.slane %v5384_v33, %v6078_v10  ;;  %v5382_v36 = vld.sshfl [vmem:[%s7322_s0 + $0x9] sm:$0x1 pattern:$0x75316420]  ;;  %v2293_v33 = vpack.c.bf16 %v6748_v14, %v6748_v14 }
 0x886   :  { %v4899_v40 = vrot.slane %v5382_v36, %v6078_v10  ;;  %v3717_v36 = vpack.c.bf16 %v6985_v61, %v6985_v61 }
 0x889   :  { %v7003_v29 = vpop.f32.mrb[108].mxu1 }
 0x88a   :  { %v7005_v35 = vpop.f32.mrb[108].mxu0  ;;  %v4558_v57 = vsel %vm539_vm2, %v7003_v29, -inf  ;;  %v5852_v37 = vpop.f32.mrb[109].mxu1 }
 0x88b   :  { %4559 = vmax.xlane.f32.xlu0 %v4558_v57  ;;  %v4555_v42 = vsel %vm539_vm2, %v7005_v35, -inf  ;;  %v5846_v0 = vpop.f32.mrb[109].mxu0  ;;  %v4534_v54 = vpop.f32.mrb[110].mxu1 }
 0x88c   :  { %4556 = vmax.xlane.f32.xlu1 %v4555_v42  ;;  %v4454_v41 = vpop.f32.mrb[110].mxu0  ;;  %v5853_v43 = vpop.f32.mrb[111].mxu1 }
 0x88d   :  { %v5847_v45 = vpop.f32.mrb[111].mxu0 }
 0x89d   :  { %4774 = vrot.lane.b32.xlu1 %v4773_v19, %s6049_s4 }
 0x8a1   :  { %4837 = vrot.lane.b32.xlu1 %v4836_v26, %s6049_s4  ;;  %4711 = vrot.lane.b32.xlu0 %v4710_v28, %s6049_s4 }
 0x900   :  { %v4542_v58 = vpop.xlane.xlu1 %4541 }
 0x901   :  { %v4562_v50 = vsub.f32 %v4051_v55, %v4542_v58  ;;  %v4539_v52 = vpop.xlane.xlu0 %4538  ;;  %v5388_v58 = vld.sshfl [vmem:[%s7322_s0 + $0xf] sm:$0x1 pattern:$0x75316420] }
 0x902   :  { %v4561_v60 = vsub.f32 %v3971_v59, %v4539_v52  ;;  %v5088_v52 = vrot.slane %v5388_v58, %v6078_v10 }
 0x903   :  { %v4571_v48 = vmul.f32 1.442695, %v4562_v50  ;;  %v2288_v50 = vpack.c.bf16 %v6734_v51, %v6734_v51  ;;  %v5386_v51 = vld.sshfl [vmem:[%s7322_s0 + $0xd] sm:$0x1 pattern:$0x75316420] }
 0x904   :  { %v4569_v62 = vmul.f32 1.442695, %v4561_v60 }
 0x905   :  { %6008 = vpow2.f32 %v4571_v48  ;;  %v2323_v60 = vrot.slane %v2288_v50, %v6078_v10  ;;  %v2290_v48 = vpack.c.bf16 %v6740_v1, %v6740_v1  ;;  %v5025_v1 = vrot.slane %v5386_v51, %v6078_v10 }
 0x906   :  { %6010 = vpow2.f32 %v4569_v62 }
 0x907   :  { %v2330_v62 = vrot.slane %v2323_v60, %v6078_v10 }
 0x909   :  { %v4545_v63 = vpop.xlane.xlu0 %4544 }
 0x90a   :  { %v4563_v2 = vsub.f32 %v4131_v18, %v4545_v63  ;;  %v2351_v63 = vrot.slane %v2290_v48, %v6078_v10 }
 0x90c   :  { %v4573_v5 = vmul.f32 1.442695, %v4563_v2  ;;  %v2292_v2 = vpack.c.bf16 %v6744_v11, %v6744_v11 }
 0x90d   :  { %v4548_v6 = vpop.xlane.xlu0 %4547 }
 0x90e   :  { %6012 = vpow2.f32 %v4573_v5  ;;  %v4564_v22 = vsub.f32 %v4211_v16, %v4548_v6  ;;  %v2287_v5 = vpack.c.bf16 %v6736_v56, %v6736_v56  ;;  %v2358_v6 = vrot.slane %v2351_v63, %v6078_v10 }
 0x90f   :  { %v7026_v12 = vpop.eup %6008 }
 0x910   :  { %v7028_v8 = vpop.eup %6010  ;;  %v4575_v20 = vmul.f32 1.442695, %v4564_v22  ;;  %v4588_v55 = vsel %vm539_vm2, %v7026_v12, 0.0  ;;  %v2379_v22 = vrot.slane %v2292_v2, %v6078_v10  ;;  %v2309_v11 = vrot.slane %v2287_v5, %v6078_v10 }
 0x911   :  { %4589 = vadd.xlane.f32.xlu0 %v4588_v55  ;;  %v4585_v59 = vsel %vm539_vm2, %v7028_v8, 0.0  ;;  %v4554_v24 = vpop.xlane.xlu0 %4553  ;;  %v4551_v57 = vpop.xlane.xlu1 %4550  ;;  %v2289_v55 = vpack.c.bf16 %v6738_v34, %v6738_v34 }
 0x912   :  { %6014 = vpow2.f32 %v4575_v20  ;;  %4586 = vadd.xlane.f32.xlu1 %v4585_v59  ;;  %v4565_v37 = vsub.f32 %v6997_v9, %v4551_v57  ;;  %v4566_v0 = vsub.f32 %v6995_v21, %v4554_v24  ;;  %v2294_v20 = vpack.c.bf16 %v6746_v13, %v6746_v13 }
 0x913   :  { %v2386_v56 = vrot.slane %v2379_v22, %v6078_v10  ;;  %v3713_v24 = vpack.c.bf16 %v6973_v49, %v6973_v49  ;;  %v2337_v13 = vrot.slane %v2289_v55, %v6078_v10  ;;  %v3712_v57 = vpack.c.bf16 %v6975_v32, %v6975_v32 }
 0x914   :  { %v4577_v54 = vmul.f32 1.442695, %v4565_v37  ;;  %v4579_v43 = vmul.f32 1.442695, %v4566_v0  ;;  %v2407_v59 = vrot.slane %v2294_v20, %v6078_v10  ;;  %v3804_v37 = vrot.slane %v3717_v36, %v6078_v10 }
 0x915   :  { %v2344_v49 = vrot.slane %v2337_v13, %v6078_v10  ;;  %v3734_v0 = vrot.slane %v3712_v57, %v6078_v10 }
 0x916   :  { %6016 = vpow2.f32 %v4577_v54  ;;  %v2414_v34 = vrot.slane %v2407_v59, %v6078_v10  ;;  %v3714_v54 = vpack.c.bf16 %v6977_v46, %v6977_v46  ;;  %v3811_v32 = vrot.slane %v3804_v37, %v6078_v10 }
 0x917   :  { %6018 = vpow2.f32 %v4579_v43  ;;  %v3741_v43 = vrot.slane %v3734_v0, %v6078_v10 }
 0x918   :  { %v7034_v18 = vpop.eup %6012  ;;  %v4560_v25 = vpop.xlane.xlu0 %4559 }
 0x919   :  { %v4591_v16 = vsel %vm539_vm2, %v7034_v18, 0.0  ;;  %v4557_v42 = vpop.xlane.xlu1 %4556  ;;  %v4568_v45 = vsub.f32 %v7003_v29, %v4560_v25  ;;  %v2316_v25 = vrot.slane %v2309_v11, %v6078_v10 }
 0x91a   :  { %4592 = vadd.xlane.f32.xlu1 %v4591_v16  ;;  %v4567_v41 = vsub.f32 %v7005_v35, %v4557_v42  ;;  %v2291_v16 = vpack.c.bf16 %v6742_v4, %v6742_v4  ;;  %v3719_v42 = vpack.c.bf16 %v6987_v7, %v6987_v7  ;;  %v3716_v7 = vpack.c.bf16 %v6982_v38, %v6982_v38 }
 0x91b   :  { %v4583_v19 = vmul.f32 1.442695, %v4568_v45  ;;  %v3762_v45 = vrot.slane %v3714_v54, %v6078_v10 }
 0x91c   :  { %v7038_v47 = vpop.eup %6014  ;;  %v4712_v27 = vpop.permute.xlu0 %4711  ;;  %v4581_v17 = vmul.f32 1.442695, %v4567_v41  ;;  %v3832_v41 = vrot.slane %v3719_v42, %v6078_v10 }
 0x91d   :  { %v4594_v30 = vsel %vm539_vm2, %v7038_v47, 0.0  ;;  %v4717_v31 = vsel %vm640_vm3, %v4712_v27, 0  ;;  %v3748_v27 = vrot.slane %v3713_v24, %v6078_v10 }
 0x91e   :  { %4595 = vadd.xlane.f32.xlu0 %v4594_v30  ;;  %5861 = vmatpush3.bf16.msra.mxu1 %v4717_v31  ;;  %6020 = vpow2.f32 %v4581_v17  ;;  %v3715_v30 = vpack.c.bf16 %v6979_v39, %v6979_v39  ;;  %v2365_v31 = vrot.slane %v2291_v16, %v6078_v10  ;;  %v3839_v46 = vrot.slane %v3832_v41, %v6078_v10 }
 0x91f   :  { %5872 = vmatprep.subr.bf16.mxu1 %v6041_v3  ;;  %6022 = vpow2.f32 %v4583_v19  ;;  %v3755_v4 = vrot.slane %v3748_v27, %v6078_v10  ;;  %v3769_v17 = vrot.slane %v3762_v45, %v6078_v10  ;;  %v3790_v19 = vrot.slane %v3716_v7, %v6078_v10 }
 0x920   :  { %v7058_v44 = vpop.eup %6016  ;;  %v2372_v39 = vrot.slane %v2365_v31, %v6078_v10 }
 0x921   :  { %v7060_v53 = vpop.eup %6018  ;;  %v4597_v9 = vsel %vm539_vm2, %v7058_v44, 0.0 }
 0x922   :  { %v4600_v35 = vsel %vm539_vm2, %v7060_v53, 0.0 }
 0x928   :  { %v7064_v21 = vpop.eup %6020 }
 0x929   :  { %v4603_v29 = vsel %vm539_vm2, %v7064_v21, 0.0  ;;  %v7070_v26 = vpop.eup %6022 }
 0x92a   :  { %v4606_v28 = vsel %vm539_vm2, %v7070_v26, 0.0 }
 0x92b   :  { %4963 = vrot.lane.b32.xlu1 %v4962_v23, %s6049_s4  ;;  %v3776_v23 = vrot.slane %v3715_v30, %v6078_v10 }
 0x92d   :  { %v3783_v14 = vrot.slane %v3776_v23, %v6078_v10 }
 0x934   :  { %4900 = vrot.lane.b32.xlu0 %v4899_v40, %s6049_s4  ;;  %v2393_v40 = vrot.slane %v2293_v33, %v6078_v10 }
 0x936   :  { %v2400_v61 = vrot.slane %v2393_v40, %v6078_v10 }
 0x94f   :  { %4598 = vadd.xlane.f32.xlu1 %v4597_v9  ;;  %v3718_v9 = vpack.c.bf16 %v6989_v15, %v6989_v15 }
 0x951   :  { %v3818_v38 = vrot.slane %v3718_v9, %v6078_v10 }
 0x953   :  { %4601 = vadd.xlane.f32.xlu0 %v4600_v35  ;;  %4604 = vadd.xlane.f32.xlu1 %v4603_v29  ;;  %v3797_v35 = vrot.slane %v3790_v19, %v6078_v10  ;;  %v3825_v29 = vrot.slane %v3818_v38, %v6078_v10 }
 0x957   :  { %4607 = vadd.xlane.f32.xlu0 %v4606_v28  ;;  %v4775_v28 = vpop.permute.xlu1 %4774 }
 0x95b   :  { %v4838_v58 = vpop.permute.xlu1 %4837 }
 0x964   :  { %5089 = vrot.lane.b32.xlu1 %v5088_v52, %s6049_s4 }
 0x968   :  { %2417 = vrot.lane.b32.xlu1 %v2330_v62, %s6048_s30 }
 0x96c   :  { %2421 = vrot.lane.b32.xlu1 %v2358_v6, %s6048_s30  ;;  %v4780_v6 = vsel %vm640_vm3, %v4775_v28, 0 }
 0x96d   :  { %5026 = vrot.lane.b32.xlu0 %v5025_v1, %s6049_s4  ;;  %v4843_v1 = vsel %vm640_vm3, %v4838_v58, 0 }
 0x970   :  { %2425 = vrot.lane.b32.xlu1 %v2386_v56, %s6048_s30 }
 0x971   :  { %2415 = vrot.lane.b32.xlu0 %v2316_v25, %s6048_s30 }
 0x974   :  { %2429 = vrot.lane.b32.xlu1 %v2414_v34, %s6048_s30 }
 0x975   :  { %2419 = vrot.lane.b32.xlu0 %v2344_v49, %s6048_s30 }
 0x978   :  { %3842 = vrot.lane.b32.xlu1 %v3755_v4, %s6046_s11 }
 0x979   :  { %2423 = vrot.lane.b32.xlu0 %v2372_v39, %s6048_s30 }
 0x97c   :  { %3846 = vrot.lane.b32.xlu1 %v3783_v14, %s6046_s11 }
 0x97d   :  { %2427 = vrot.lane.b32.xlu0 %v2400_v61, %s6048_s30 }
 0x980   :  { %3850 = vrot.lane.b32.xlu1 %v3811_v32, %s6046_s11 }
 0x981   :  { %3840 = vrot.lane.b32.xlu0 %v3741_v43, %s6046_s11 }
 0x984   :  { %3854 = vrot.lane.b32.xlu1 %v3839_v46, %s6046_s11 }
 0x985   :  { %3844 = vrot.lane.b32.xlu0 %v3769_v17, %s6046_s11 }
 0x989   :  { %3848 = vrot.lane.b32.xlu0 %v3797_v35, %s6046_s11 }
 0x98d   :  { %3852 = vrot.lane.b32.xlu0 %v3825_v29, %s6046_s11 }
 0x99e   :  { %v4590_v50 = vpop.xlane.xlu0 %4589 }
 0x99f   :  { %6024 = vrcp.f32 %v4590_v50  ;;  %v4587_v52 = vpop.xlane.xlu1 %4586 }
 0x9a0   :  { %6026 = vrcp.f32 %v4587_v52 }
 0x9a7   :  { %v4593_v15 = vpop.xlane.xlu1 %4592 }
 0x9a8   :  { %6028 = vrcp.f32 %v4593_v15 }
 0x9a9   :  { %v6025_v60 = vpop.eup %6024 }
 0x9aa   :  { %v6027_v48 = vpop.eup %6026  ;;  %v4618_v62 = vmul.f32 %v6025_v60, %v7026_v12 }
 0x9ab   :  { %v4617_v63 = vmul.f32 %v6027_v48, %v7028_v8  ;;  %v4596_v2 = vpop.xlane.xlu0 %4595  ;;  %v4964_v59 = vpop.permute.xlu1 %4963 }
 0x9ac   :  { %6030 = vrcp.f32 %v4596_v2  ;;  %v4626_v51 = vpack.c.bf16 %v4618_v62, %v4618_v62  ;;  %v4969_v25 = vsel %vm640_vm3, %v4964_v59, 0 }
 0x9ad   :  { %v4625_v5 = vpack.c.bf16 %v4617_v63, %v4617_v63 }
 0x9ae   :  { %5863 = vmatmul.mubr.msk.bf16.vlgmr.msra.gmra.mrb[112].mxu1 %vm636_vm4, %v4626_v51 }
 0x9af   :  { %5857 = vmatmul.mubr.msk.bf16.vlgmr.msra.gmra.mrb[112].mxu0 %vm636_vm4, %v4625_v5  ;;  %5873 = vmatpush3.bf16.msra.mxu1 %v4843_v1  ;;  %v4901_v22 = vpop.permute.xlu0 %4900 }
 0x9b0   :  { %5867 = vmatpush3.bf16.msra.mxu0 %v4780_v6  ;;  %5868 = vmatprep.mubr.msk.bf16.mxu0 %vm6042_vm0, %v6041_v3  ;;  %v4906_v56 = vsel %vm640_vm3, %v4901_v22, 0 }
 0x9b1   :  { %5878 = vmatprep.subr.bf16.mxu0 %v6041_v3  ;;  %5874 = vmatprep.mubr.msk.bf16.mxu1 %vm6042_vm0, %v6041_v3 }
 0x9b2   :  { %v6029_v12 = vpop.eup %6028  ;;  %5884 = vmatprep.subr.bf16.mxu1 %v6041_v3 }
 0x9b3   :  { %v4619_v8 = vmul.f32 %v6029_v12, %v7034_v18 }
 0x9b5   :  { %v4627_v20 = vpack.c.bf16 %v4619_v8, %v4619_v8 }
 0x9b6   :  { %v6031_v11 = vpop.eup %6030 }
 0x9b7   :  { %v4620_v55 = vmul.f32 %v6031_v11, %v7038_v47  ;;  %5869 = vmatmul.mubr.msk.bf16.vlgmr.msra.gmra.mrb[116].mxu0 %vm636_vm4, %v4627_v20 }
 0x9b8   :  { %5879 = vmatpush3.bf16.msra.mxu0 %v4906_v56  ;;  %5880 = vmatprep.mubr.msk.bf16.mxu0 %vm6042_vm0, %v6041_v3 }
 0x9b9   :  { %v4628_v24 = vpack.c.bf16 %v4620_v55, %v4620_v55  ;;  %5890 = vmatprep.subr.bf16.mxu0 %v6041_v3 }
 0x9bb   :  { %5875 = vmatmul.mubr.msk.bf16.vlgmr.msra.gmra.mrb[116].mxu1 %vm636_vm4, %v4628_v24 }
 0x9bc   :  { %5885 = vmatpush3.bf16.msra.mxu1 %v4969_v25  ;;  %5886 = vmatprep.mubr.msk.bf16.mxu1 %vm6042_vm0, %v6041_v3 }
 0x9bd   :  { %5896 = vmatprep.subr.bf16.mxu1 %v6041_v3 }
 0x9dc   :  { %v4599_v18 = vpop.xlane.xlu1 %4598 }
 0x9dd   :  { %6032 = vrcp.f32 %v4599_v18 }
 0x9e0   :  { %v4602_v47 = vpop.xlane.xlu0 %4601  ;;  %v4605_v13 = vpop.xlane.xlu1 %4604 }
 0x9e1   :  { %6034 = vrcp.f32 %v4602_v47 }
 0x9e2   :  { %6036 = vrcp.f32 %v4605_v13 }
 0x9e4   :  { %v4608_v16 = vpop.xlane.xlu0 %4607  ;;  %v5090_v34 = vpop.permute.xlu1 %5089 }
 0x9e5   :  { %6038 = vrcp.f32 %v4608_v16 }
 0x9e7   :  { %v6033_v27 = vpop.eup %6032 }
 0x9e8   :  { %v4621_v30 = vmul.f32 %v6033_v27, %v7058_v44  ;;  %v5027_v49 = vpop.permute.xlu0 %5026  ;;  %v2418_v31 = vpop.permute.xlu1 %2417 }
 0x9e9   :  { %2441 = vst.msk [vmem:[%s7323_s1 + $0x1] sm:$0x1] %vm2439_vm6, %v2418_v31  ;;  %v5032_v33 = vsel %vm640_vm3, %v5027_v49, 0 }
 0x9ea   :  { %v4629_v4 = vpack.c.bf16 %v4621_v30, %v4621_v30 }
 0x9eb   :  { %v6035_v23 = vpop.eup %6034 }
 0x9ec   :  { %v6037_v36 = vpop.eup %6036  ;;  %v4622_v39 = vmul.f32 %v6035_v23, %v7060_v53  ;;  %v2416_v40 = vpop.permute.xlu0 %2415  ;;  %5881 = vmatmul.mubr.msk.bf16.vlgmr.msra.gmra.mrb[120].mxu0 %vm636_vm4, %v4629_v4  ;;  %v5095_v53 = vsel %vm640_vm3, %v5090_v34, 0 }
 0x9ed   :  { %v2422_v57 = vpop.permute.xlu1 %2421  ;;  %2440 = vst.msk [vmem:[%s7323_s1] sm:$0x1] %vm2439_vm6, %v2416_v40  ;;  %5891 = vmatpush3.bf16.msra.mxu0 %v5032_v33  ;;  %5892 = vmatprep.mubr.msk.bf16.mxu0 %vm6042_vm0, %v6041_v3  ;;  %v4623_v44 = vmul.f32 %v6037_v36, %v7064_v21 }
 0x9ee   :  { %2443 = vst.msk [vmem:[%s7323_s1 + $0x3] sm:$0x1] %vm2439_vm6, %v2422_v57  ;;  %v4630_v14 = vpack.c.bf16 %v4622_v39, %v4622_v39 }
 0x9ef   :  { %v6039_v37 = vpop.eup %6038  ;;  %v4631_v0 = vpack.c.bf16 %v4623_v44, %v4623_v44 }
 0x9f0   :  { %v2420_v42 = vpop.permute.xlu0 %2419  ;;  %5887 = vmatmul.mubr.msk.bf16.vlgmr.msra.gmra.mrb[120].mxu1 %vm636_vm4, %v4630_v14  ;;  %v4624_v21 = vmul.f32 %v6039_v37, %v7070_v26 }
 0x9f1   :  { %v2426_v61 = vpop.permute.xlu1 %2425  ;;  %2442 = vst.msk [vmem:[%s7323_s1 + $0x2] sm:$0x1] %vm2439_vm6, %v2420_v42  ;;  %5897 = vmatpush3.bf16.msra.mxu1 %v5095_v53  ;;  %5898 = vmatprep.mubr.msk.bf16.mxu1 %vm6042_vm0, %v6041_v3 }
 0x9f2   :  { %2445 = vst.msk [vmem:[%s7323_s1 + $0x5] sm:$0x1] %vm2439_vm6, %v2426_v61  ;;  %v4632_v41 = vpack.c.bf16 %v4624_v21, %v4624_v21 }
 0x9f4   :  { %v2424_v54 = vpop.permute.xlu0 %2423  ;;  %5893 = vmatmul.mubr.msk.bf16.vlgmr.msra.gmra.mrb[124].mxu0 %vm636_vm4, %v4631_v0 }
 0x9f5   :  { %v2430_v32 = vpop.permute.xlu1 %2429  ;;  %2444 = vst.msk [vmem:[%s7323_s1 + $0x4] sm:$0x1] %vm2439_vm6, %v2424_v54 }
 0x9f6   :  { %2447 = vst.msk [vmem:[%s7323_s1 + $0x7] sm:$0x1] %vm2439_vm6, %v2430_v32 }
 0x9f8   :  { %v2428_v3 = vpop.permute.xlu0 %2427  ;;  %5899 = vmatmul.mubr.msk.bf16.vlgmr.msra.gmra.mrb[124].mxu1 %vm636_vm4, %v4632_v41 }
 0x9f9   :  { %v3843_v26 = vpop.permute.xlu1 %3842  ;;  %2446 = vst.msk [vmem:[%s7323_s1 + $0x6] sm:$0x1] %vm2439_vm6, %v2428_v3 }
 0x9fa   :  { %3866 = vst.msk [vmem:[%s7323_s1 + $0x1] sm:$0x1] %vm3864_vm7, %v3843_v26 }
 0x9fc   :  { %v3841_v43 = vpop.permute.xlu0 %3840 }
 0x9fd   :  { %v3847_v45 = vpop.permute.xlu1 %3846  ;;  %3865 = vst.msk [vmem:[%s7323_s1] sm:$0x1] %vm3864_vm7, %v3841_v43 }
 0x9fe   :  { %3868 = vst.msk [vmem:[%s7323_s1 + $0x3] sm:$0x1] %vm3864_vm7, %v3847_v45 }
 0xa00   :  { %v3845_v7 = vpop.permute.xlu0 %3844 }
 0xa01   :  { %v3851_v46 = vpop.permute.xlu1 %3850  ;;  %3867 = vst.msk [vmem:[%s7323_s1 + $0x2] sm:$0x1] %vm3864_vm7, %v3845_v7 }
 0xa02   :  { %3870 = vst.msk [vmem:[%s7323_s1 + $0x5] sm:$0x1] %vm3864_vm7, %v3851_v46 }
 0xa04   :  { %v3849_v17 = vpop.permute.xlu0 %3848 }
 0xa05   :  { %v3855_v19 = vpop.permute.xlu1 %3854  ;;  %3869 = vst.msk [vmem:[%s7323_s1 + $0x4] sm:$0x1] %vm3864_vm7, %v3849_v17 }
 0xa06   :  { %3872 = vst.msk [vmem:[%s7323_s1 + $0x7] sm:$0x1] %vm3864_vm7, %v3855_v19 }
 0xa08   :  { %v3853_v9 = vpop.permute.xlu0 %3852 }
 0xa09   :  { %3871 = vst.msk [vmem:[%s7323_s1 + $0x6] sm:$0x1] %vm3864_vm7, %v3853_v9 }
 0xa81   :  { %v4753_v35 = vpop.f32.mrb[112].mxu1 }
 0xa82   :  { %v4690_v38 = vpop.f32.mrb[112].mxu0  ;;  %v5138_v29 = vpack.c.bf16 %v4753_v35, %v4753_v35  ;;  %v5864_v28 = vpop.f32.mrb[113].mxu1 }
 0xa83   :  { %v5137_v58 = vpack.c.bf16 %v4690_v38, %v4690_v38  ;;  %v5858_v50 = vpop.f32.mrb[113].mxu0  ;;  %v4756_v52 = vpop.f32.mrb[114].mxu1 }
 0xa84   :  { %v5173_v15 = vrot.slane %v5138_v29, %v6078_v10  ;;  %v4693_v60 = vpop.f32.mrb[114].mxu0  ;;  %v5865_v48 = vpop.f32.mrb[115].mxu1 }
 0xa85   :  { %v5159_v62 = vrot.slane %v5137_v58, %v6078_v10  ;;  %v5859_v63 = vpop.f32.mrb[115].mxu0 }
 0xa86   :  { %v5180_v2 = vrot.slane %v5173_v15, %v6078_v10 }
 0xa87   :  { %v5166_v51 = vrot.slane %v5159_v62, %v6078_v10 }
 0xa88   :  { %5267 = vrot.lane.b32.xlu1 %v5180_v2, %s6044_s29 }
 0xa89   :  { %5265 = vrot.lane.b32.xlu0 %v5166_v51, %s6044_s29 }
 0xa8a   :  { %v4816_v5 = vpop.f32.mrb[116].mxu0 }
 0xa8b   :  { %v5139_v1 = vpack.c.bf16 %v4816_v5, %v4816_v5  ;;  %v5870_v6 = vpop.f32.mrb[117].mxu0 }
 0xa8c   :  { %v4819_v12 = vpop.f32.mrb[118].mxu0 }
 0xa8d   :  { %v5187_v8 = vrot.slane %v5139_v1, %v6078_v10  ;;  %v5871_v22 = vpop.f32.mrb[119].mxu0 }
 0xa8e   :  { %v4879_v20 = vpop.f32.mrb[116].mxu1 }
 0xa8f   :  { %v5194_v11 = vrot.slane %v5187_v8, %v6078_v10  ;;  %v5140_v55 = vpack.c.bf16 %v4879_v20, %v4879_v20  ;;  %v5876_v56 = vpop.f32.mrb[117].mxu1 }
 0xa90   :  { %v4882_v59 = vpop.f32.mrb[118].mxu1 }
 0xa91   :  { %v5201_v24 = vrot.slane %v5140_v55, %v6078_v10  ;;  %v5877_v25 = vpop.f32.mrb[119].mxu1  ;;  %5269 = vrot.lane.b32.xlu0 %v5194_v11, %s6044_s29 }
 0xa93   :  { %v5208_v18 = vrot.slane %v5201_v24, %v6078_v10 }
 0xa95   :  { %5271 = vrot.lane.b32.xlu1 %v5208_v18, %s6044_s29 }
 0xabf   :  { %v4942_v47 = vpop.f32.mrb[120].mxu0 }
 0xac0   :  { %v5141_v13 = vpack.c.bf16 %v4942_v47, %v4942_v47  ;;  %v5882_v16 = vpop.f32.mrb[121].mxu0 }
 0xac1   :  { %v4945_v34 = vpop.f32.mrb[122].mxu0 }
 0xac2   :  { %v5215_v27 = vrot.slane %v5141_v13, %v6078_v10  ;;  %v5883_v30 = vpop.f32.mrb[123].mxu0 }
 0xac3   :  { %v5005_v49 = vpop.f32.mrb[120].mxu1 }
 0xac4   :  { %v5222_v31 = vrot.slane %v5215_v27, %v6078_v10  ;;  %v5142_v33 = vpack.c.bf16 %v5005_v49, %v5005_v49  ;;  %v5888_v4 = vpop.f32.mrb[121].mxu1 }
 0xac5   :  { %v5008_v23 = vpop.f32.mrb[122].mxu1 }
 0xac6   :  { %v5229_v36 = vrot.slane %v5142_v33, %v6078_v10  ;;  %v5889_v39 = vpop.f32.mrb[123].mxu1  ;;  %5273 = vrot.lane.b32.xlu0 %v5222_v31, %s6044_s29 }
 0xac7   :  { %v5068_v40 = vpop.f32.mrb[124].mxu0 }
 0xac8   :  { %v5236_v57 = vrot.slane %v5229_v36, %v6078_v10  ;;  %v5143_v44 = vpack.c.bf16 %v5068_v40, %v5068_v40  ;;  %v5894_v53 = vpop.f32.mrb[125].mxu0 }
 0xac9   :  { %v5071_v14 = vpop.f32.mrb[126].mxu0 }
 0xaca   :  { %v5243_v37 = vrot.slane %v5143_v44, %v6078_v10  ;;  %5275 = vrot.lane.b32.xlu1 %v5236_v57, %s6044_s29  ;;  %v5895_v42 = vpop.f32.mrb[127].mxu0 }
 0xacb   :  { %v5131_v61 = vpop.f32.mrb[124].mxu1 }
 0xacc   :  { %v5250_v21 = vrot.slane %v5243_v37, %v6078_v10  ;;  %v5144_v0 = vpack.c.bf16 %v5131_v61, %v5131_v61  ;;  %v5900_v54 = vpop.f32.mrb[125].mxu1 }
 0xacd   :  { %v5134_v32 = vpop.f32.mrb[126].mxu1 }
 0xace   :  { %v5257_v41 = vrot.slane %v5144_v0, %v6078_v10  ;;  %v5901_v3 = vpop.f32.mrb[127].mxu1  ;;  %5277 = vrot.lane.b32.xlu0 %v5250_v21, %s6044_s29 }
 0xad0   :  { %v5264_v26 = vrot.slane %v5257_v41, %v6078_v10 }
 0xad2   :  { %5279 = vrot.lane.b32.xlu1 %v5264_v26, %s6044_s29 }
 0xafa   :  { %v5268_v43 = vpop.permute.xlu1 %5267 }
 0xafb   :  { %5291 = vst.msk [vmem:[%s7323_s1 + $0x1] sm:$0x1] %vm5289_vm8, %v5268_v43  ;;  %v5266_v45 = vpop.permute.xlu0 %5265 }
 0xafc   :  { %5290 = vst.msk [vmem:[%s7323_s1] sm:$0x1] %vm5289_vm8, %v5266_v45 }
 0xb03   :  { %v5270_v7 = vpop.permute.xlu0 %5269 }
 0xb04   :  { %5292 = vst.msk [vmem:[%s7323_s1 + $0x2] sm:$0x1] %vm5289_vm8, %v5270_v7 }
 0xb07   :  { %v5272_v10 = vpop.permute.xlu1 %5271 }
 0xb08   :  { %5293 = vst.msk [vmem:[%s7323_s1 + $0x3] sm:$0x1] %vm5289_vm8, %v5272_v10 }
 0xb38   :  { %v5274_v46 = vpop.permute.xlu0 %5273 }
 0xb39   :  { %5294 = vst.msk [vmem:[%s7323_s1 + $0x4] sm:$0x1] %vm5289_vm8, %v5274_v46 }
 0xb3c   :  { %v5276_v17 = vpop.permute.xlu1 %5275 }
 0xb3d   :  { %5295 = vst.msk [vmem:[%s7323_s1 + $0x5] sm:$0x1] %vm5289_vm8, %v5276_v17 }
 0xb40   :  { %v5278_v19 = vpop.permute.xlu0 %5277 }
 0xb41   :  { %5296 = vst.msk [vmem:[%s7323_s1 + $0x6] sm:$0x1] %vm5289_vm8, %v5278_v19 }
 0xb44   :  { %v5280_v9 = vpop.permute.xlu1 %5279 }
 0xb45   :  { %5297 = vst.msk [vmem:[%s7323_s1 + $0x7] sm:$0x1] %vm5289_vm8, %v5280_v9 }

// kernel: model_forward.39
= control target key start
LH: loop header
LB: loop body
LE: loop exit
PB: predicated region body
PF: predicated region fallthrough
CT: control target
= control target key end

     0   :  { %vm243_vm0 = vcmask 519168   ;;  %vm246_vm1 = vcmask 516096   ;;  %s448_s1 = inlined_call_operand.vmem [shape: bf16[256,64], index: 1, kind: input, shape index: {}]   ;;  %s449_s0 = inlined_call_operand.vmem [shape: bf16[18,256], index: 0, kind: input, shape index: {}]   ;;  %s450_s3 = inlined_call_operand.vmem [shape: bf16[18,64], index: 3, kind: input, shape index: {}]   ;;  %s451_s2 = inlined_call_operand.vmem [shape: f32[1,64], index: 2, kind: input, shape index: {}]   ;;  %s452_s4 = inlined_call_operand.vmem [shape: bf16[18,64], index: 4, kind: output, shape index: {}]  }
   0x1   :  { %v327_v0 = vld [vmem:[%s448_s1 + $0x40] sm:$0xff]   ;;  %v329_v2 = vld [vmem:[%s448_s1 + $0x48] sm:$0xff]   ;;  %v331_v4 = vld [vmem:[%s448_s1 + $0x50] sm:$0xff]  }
   0x2   :  { %v328_v1 = vld [vmem:[%s448_s1] sm:$0xff]   ;;  %283 = vmatprep.subr.bf16.mxu0 %v327_v0  ;;  %311 = vmatprep.subr.bf16.mxu1 %v327_v0  ;;  %v330_v3 = vld [vmem:[%s448_s1 + $0x8] sm:$0xff]   ;;  %v332_v5 = vld [vmem:[%s448_s1 + $0x10] sm:$0xff]  }
   0x3   :  { %284 = vmatpush3.bf16.msra.mxu0 %v328_v1  ;;  %319 = vmatpush3.bf16.msra.mxu1 %v328_v1  ;;  %v333_v6 = vld [vmem:[%s448_s1 + $0x58] sm:$0xff]   ;;  %v335_v8 = vld [vmem:[%s448_s1 + $0x60] sm:$0xff]   ;;  %v337_v10 = vld [vmem:[%s448_s1 + $0x68] sm:$0xff]  }
   0x4   :  { %285 = vmatprep.subr.bf16.mxu0 %v329_v2  ;;  %312 = vmatprep.subr.bf16.mxu1 %v329_v2  ;;  %v334_v7 = vld [vmem:[%s448_s1 + $0x18] sm:$0xff]   ;;  %v336_v9 = vld [vmem:[%s448_s1 + $0x20] sm:$0xff]   ;;  %v20_v12 = vld [vmem:[%s449_s0 + $0x10] sm:$0x11] }
   0x5   :  { %v345_v11 = vld [vmem:[%s449_s0 + $0x4] ss:$8 sps:$4 sm:$0xff]   ;;  %v256_v13 = vcombine.high %v20_v12, %v20_v12  ;;  %v339_v15 = vld [vmem:[%s448_s1 + $0x70] sm:$0xff]   ;;  %v341_v17 = vld [vmem:[%s448_s1 + $0x78] sm:$0xff]   ;;  %v255_v20 = vcombine.low %v20_v12, %v20_v12 }
   0x6   :  { %v338_v14 = vld [vmem:[%s448_s1 + $0x28] sm:$0xff]   ;;  %205 = vmatprep.mubr.bf16.mxu0 %v345_v11  ;;  %v340_v16 = vld [vmem:[%s448_s1 + $0x30] sm:$0xff]   ;;  %v342_v18 = vld [vmem:[%s448_s1 + $0x38] sm:$0xff]  }
   0x7   :  { %286 = vmatpush3.bf16.msra.mxu0 %v330_v3  ;;  %320 = vmatpush3.bf16.msra.mxu1 %v330_v3  ;;  %v343_v19 = vld [vmem:[%s449_s0] ss:$8 sps:$4 sm:$0xff]  }
   0x8   :  { %287 = vmatprep.subr.bf16.mxu0 %v331_v4  ;;  %313 = vmatprep.subr.bf16.mxu1 %v331_v4  ;;  %v280_v21 = vld [vmem:[%s450_s3] sm:$0xff]   ;;  %v223_v22 = vld [vmem:[%s450_s3 + $0x8] sm:$0x1] }
   0x9   :  { %213 = vmatprep.mubr.bf16.mxu1 %v256_v13  ;;  %v252_v25 = vld [vmem:[%s451_s2] ss:$0 sm:$0xff]  ;;  %v281_v29 = vunpack.c.l.bf16 %v280_v21  ;;  %v226_v31 = vunpack.c.l.bf16 %v223_v22  ;;  %v282_v39 = vunpack.c.h.bf16 %v280_v21 }
   0xb   :  { %288 = vmatpush3.bf16.msra.mxu0 %v332_v5  ;;  %321 = vmatpush3.bf16.msra.mxu1 %v332_v5 }
   0xc   :  { %289 = vmatprep.subr.bf16.mxu0 %v333_v6  ;;  %314 = vmatprep.subr.bf16.mxu1 %v333_v6 }
   0xf   :  { %290 = vmatpush3.bf16.msra.mxu0 %v334_v7  ;;  %322 = vmatpush3.bf16.msra.mxu1 %v334_v7 }
  0x10   :  { %291 = vmatprep.subr.bf16.mxu0 %v335_v8  ;;  %315 = vmatprep.subr.bf16.mxu1 %v335_v8 }
  0x13   :  { %292 = vmatpush3.bf16.msra.mxu0 %v336_v9  ;;  %323 = vmatpush3.bf16.msra.mxu1 %v336_v9 }
  0x14   :  { %293 = vmatprep.subr.bf16.mxu0 %v337_v10  ;;  %316 = vmatprep.subr.bf16.mxu1 %v337_v10 }
  0x17   :  { %294 = vmatpush3.bf16.msra.mxu0 %v338_v14  ;;  %324 = vmatpush3.bf16.msra.mxu1 %v338_v14 }
  0x18   :  { %295 = vmatprep.subr.bf16.mxu0 %v339_v15  ;;  %317 = vmatprep.subr.bf16.mxu1 %v339_v15 }
  0x1b   :  { %296 = vmatpush3.bf16.msra.mxu0 %v340_v16  ;;  %325 = vmatpush3.bf16.msra.mxu1 %v340_v16 }
  0x1c   :  { %297 = vmatprep.subr.bf16.mxu0 %v341_v17  ;;  %318 = vmatprep.subr.bf16.mxu1 %v341_v17 }
  0x1f   :  { %298 = vmatpush3.bf16.msra.mxu0 %v342_v18  ;;  %326 = vmatpush3.bf16.msra.mxu1 %v342_v18 }
  0x22   :  { %206 = vmatmul.mubr.bf16.vlgmr.msra.gmra.mrb[0].mxu0 %v343_v19  ;;  %214 = vmatmul.mubr.bf16.vlgmr.msra.gmra.mrb[0].mxu1 %v255_v20 }
  0xf5   :  { %v299_v23 = vpop.f32.mrb[0].mxu0  ;;  %v305_v24 = vpop.f32.mrb[0].mxu1 }
  0xf6   :  { %v300_v26 = vpop.f32.mrb[1].mxu0  ;;  %v306_v27 = vpop.f32.mrb[1].mxu1 }
  0xf7   :  { %v301_v28 = vadd.f32 %v300_v26, %v299_v23  ;;  %v307_v30 = vadd.f32 %v306_v27, %v305_v24  ;;  %v302_v32 = vpop.f32.mrb[2].mxu0  ;;  %v308_v33 = vpop.f32.mrb[2].mxu1 }
  0xf8   :  { %v303_v34 = vpop.f32.mrb[3].mxu0  ;;  %v309_v35 = vpop.f32.mrb[3].mxu1 }
  0xf9   :  { %v208_v36 = vadd.f32 %v301_v28, %v252_v25  ;;  %v216_v37 = vadd.f32 %v307_v30, %v252_v25  ;;  %v304_v38 = vadd.f32 %v303_v34, %v302_v32 }
  0xfb   :  { %v227_v40 = vadd.f32 %v281_v29, %v208_v36  ;;  %v229_v41 = vadd.f32 %v226_v31, %v216_v37  ;;  %v211_v42 = vadd.f32 %v304_v38, %v252_v25 }
  0xfd   :  { %v276_v43 = vpack.c.bf16 %v227_v40, %v227_v40  ;;  %v278_v44 = vpack.c.bf16 %v229_v41, %v229_v41  ;;  %v228_v45 = vadd.f32 %v282_v39, %v211_v42 }
  0xff   :  { %244 = vst.msk [vmem:[%s452_s4] sm:$0xf] %vm243_vm0, %v276_v43  ;;  %v277_v46 = vpack.c.bf16 %v228_v45, %v228_v45 }
 0x100   :  { %247 = vst.msk [vmem:[%s452_s4 + $0x8] sm:$0x1] %vm246_vm1, %v278_v44 }
 0x101   :  { %245 = vst.msk [vmem:[%s452_s4 + $0x4] sm:$0xf] %vm243_vm0, %v277_v46 }

// kernel: model_forward.53
= control target key start
LH: loop header
LB: loop body
LE: loop exit
PB: predicated region body
PF: predicated region fallthrough
CT: control target
= control target key end

     0   :  { %v170_v1 = vmov 0.0   ;;  %vm171_vm0 = vmmov 0   ;;  %s223_s0 = inlined_call_operand.vmem [shape: bf16[2,64], index: 0, kind: input, shape index: {}]   ;;  %s224_s1 = inlined_call_operand.vmem [shape: bf16[64,10], index: 1, kind: input, shape index: {}]   ;;  %s225_s2 = inlined_call_operand.vmem [shape: f32[1,10], index: 2, kind: input, shape index: {}]   ;;  %s226_s3 = inlined_call_operand.hbm [shape: f32[2,10], index: 3, kind: output, shape index: {}]  }
   0x1   :  { %v142_v0 = vld [vmem:[%s224_s1] sm:$0xff]   ;;  %127 = vmatprep.subr.bf16.mxu0 %v170_v1  ;;  %v143_v2 = vld [vmem:[%s224_s1 + $0x8] sm:$0xff]   ;;  %135 = vmatprep.mubr.msk.bf16.mxu0 %vm171_vm0, %v170_v1 }
   0x2   :  { %128 = vmatpush3.bf16.msra.mxu0 %v142_v0 }
   0x3   :  { %129 = vmatprep.subr.bf16.mxu0 %v170_v1 }
   0x4   :  { %8 = vsyncpa [#allocation3], 0  ;;  %v144_v3 = vld [vmem:[%s224_s1 + $0x10] sm:$0xff]   ;;  %v145_v4 = vld [vmem:[%s224_s1 + $0x18] sm:$0xff]   ;;  %vm56_vm1 = vcmask 523264   ;;  %s172_s24 = smov [#allocation2]  }
   0x5   :  { %v16_v5 = vld [vmem:[%s223_s0] sm:$0x1]  ;;  %s108_s25 = sshll.u32 %s172_s24, 4  ;;  %vm100_vm2 = vcmask 74752   ;;  %s109_s25 = int_to_ptr.vmem [resolvable:$true] %s108_s25 }
   0x6   :  { %130 = vmatpush3.bf16.msra.mxu0 %v143_v2  ;;  %v116_v6 = vld [vmem:[%s225_s2] ss:$0 sm:$0xff]  ;;  %s146_s1 = scalar_lea.vmem %s109_s25, 32  ;;  %p151_p1 = scmp.lt.s32.totalorder %s109_s25, %s109_s25 }
   0x7   :  { %131 = vmatprep.subr.bf16.mxu0 %v170_v1  ;;  %p147_p0 = scmp.ne.s32.totalorder %s109_s25, %s146_s1  ;;  %p152_p2 = scmp.lt.s32.totalorder %s146_s1, %s146_s1 }
   0x9   :  { %p153_p3 = por %p152_p2, %p151_p1 }
   0xa   :  { %132 = vmatpush3.bf16.msra.mxu0 %v144_v3 }
   0xb   :  { %133 = vmatprep.subr.bf16.mxu0 %v170_v1  ;;  %p154_p4 = pnand %p153_p3, %p147_p0 }
   0xe   :  { %134 = vmatpush3.bf16.msra.mxu0 %v145_v4 }
  0x11   :  { %136 = vmatmul.mubr.msk.bf16.vlgmr.msra.gmra.mrb[0].mxu0 %vm56_vm1, %v16_v5 }
  0xe4   :  { %v94_v7 = vpop.f32.mrb[0].mxu0 }
  0xe5   :  { %v95_v8 = vadd.f32 %v116_v6, %v94_v7  ;;  %v137_v9 = vpop.f32.mrb[1].mxu0 }
  0xe6   :  { %v97_v10 = vpop.f32.mrb[2].mxu0 }
  0xe7   :  { %v138_v11 = vpop.f32.mrb[3].mxu0  ;;  %101 = vst.msk [vmem:[#allocation2] sm:$0x3] %vm100_vm2, %v95_v8 }
  0xe8   :  { %157 = shalt.err (!%p154_p4)
}
  0xe9   :  { %s158_s2 = scalar_lea.hbm %s226_s3, 32 }
  0xea   :  { %p159_p5 = scmp.ne.s32.totalorder %s226_s3, %s158_s2  ;;  %p162_p6 = scmp.lt.u32.totalorder %s158_s2, %s226_s3 }
  0xec   :  { %p164_p7 = pnand %p162_p6, %p159_p5 }
  0xee   :  { %167 = shalt.err (!%p164_p7)
}
  0xef   :  { %111 = dma.vmem_to_hbm [thread:$0]  %s109_s25, 32, %s226_s3, [#allocation3]  }
  0xf0   :  { %168 = dma.done.wait [#allocation3], 32  }
  0xf1   :  { %169 = vsyncadd [#allocation3], 4294967264 }
  0xf2   :  { %115 = vsyncpa [#allocation3], 1 }

</bundles_post_ra>
